<compile_context>
chip_gen: v7x
topology: tpu7x:2x2x1
jax: 0.10.0
libtpu: 0.0.40
codegen_flags: <defaults>
</compile_context>

<pallas_src>
import functools

import jax
import jax.numpy as jnp
from jax.experimental import pallas as pl
from jax.experimental.pallas import tpu as pltpu

# ----------------------------------------------------------------------------
# DenseNet-121 configuration (torchvision defaults)
# ----------------------------------------------------------------------------
GROWTH = 32
BN_SIZE = 4
BLOCK_CONFIG = (6, 12, 24, 16)
NUM_INIT_FEATURES = 64
EPS = 1e-5

DTYPE = jnp.bfloat16            # activation / weight storage dtype
VMEM_LIMIT = 32 * 1024 * 1024   # safe on v5e/v6e (128 MiB) and v7x (64 MiB)
_NEG = -3.0e38                  # ~bf16 min, used as max-pool padding value


def _ceil_to(v, m):
    return ((v + m - 1) // m) * m


# ----------------------------------------------------------------------------
# Pallas kernels
# ----------------------------------------------------------------------------
def _fused_mm_kernel(a_ref, b_ref, ks_ref, kb_ref, ns_ref, nb_ref,
                     o_ref, acc_ref, *, use_pre, pre_relu, use_post, post_relu):
    """Tiled matmul with optional fused per-K (prologue) / per-N (epilogue)
    affine(+ReLU), i.e. BatchNorm folded into the conv matmul."""
    k = pl.program_id(1)

    @pl.when(k == 0)
    def _():
        acc_ref[...] = jnp.zeros_like(acc_ref)

    a = a_ref[...]
    if use_pre:                                   # pre-activation BN (+ReLU)
        a32 = a.astype(jnp.float32) * ks_ref[...] + kb_ref[...]
        if pre_relu:
            a32 = jnp.maximum(a32, 0.0)
        a = a32.astype(jnp.bfloat16)

    acc_ref[...] += jnp.dot(a, b_ref[...], preferred_element_type=jnp.float32)

    @pl.when(k == pl.num_programs(1) - 1)
    def _():
        out = acc_ref[...]
        if use_post:                              # post-conv BN (+ReLU)
            out = out * ns_ref[...] + nb_ref[...]
            if post_relu:
                out = jnp.maximum(out, 0.0)
        o_ref[...] = out.astype(o_ref.dtype)


def _pool_kernel(*refs, kind, n_taps):
    """Reduce n_taps shifted views (max or mean) on a (tm, C) tile."""
    in_refs, o_ref = refs[:n_taps], refs[n_taps]
    acc = in_refs[0][...].astype(jnp.float32)
    for r in in_refs[1:]:
        v = r[...].astype(jnp.float32)
        acc = jnp.maximum(acc, v) if kind == "max" else acc + v
    if kind == "avg":
        acc = acc * (1.0 / n_taps)
    o_ref[...] = acc.astype(o_ref.dtype)


def _bn_kernel(x_ref, s_ref, b_ref, o_ref):
    """Standalone inference BatchNorm (scale/shift precomputed), no ReLU."""
    o_ref[...] = (x_ref[...].astype(jnp.float32) * s_ref[...]
                  + b_ref[...]).astype(o_ref.dtype)


# ----------------------------------------------------------------------------
# Pallas-backed ops
# ----------------------------------------------------------------------------
def fused_matmul(a, b, *, pre=None, pre_relu=True, post=None, post_relu=True,
                 out_dtype=DTYPE):
    """a:(M,K), b:(K,N) -> (M,N). bf16 MXU matmul, f32 accumulation, with
    optional fused per-K / per-N affine(+ReLU)."""
    m, k = a.shape
    _, n = b.shape

    # -- M tiling --
    mp = _ceil_to(m, 8)
    tm = mp if mp <= 256 else 256
    mp = _ceil_to(m, tm)
    # -- K tiling (tk <= 512, multiple of 128) --
    u = _ceil_to(k, 128) // 128
    kt = -(-u // 4)
    u_per = -(-u // kt)
    tk = 128 * u_per
    kp = tk * kt

    a = jnp.pad(a.astype(DTYPE), ((0, mp - m), (0, kp - k)))
    b = jnp.pad(b.astype(DTYPE), ((0, kp - k), (0, 0)))

    def _affine(p, size):
        if p is None:
            z = jnp.zeros((1, size), jnp.float32)
            return z, z
        s, sh = p
        padw = ((0, 0), (0, size - s.shape[0]))
        return (jnp.pad(s.reshape(1, -1).astype(jnp.float32), padw),
                jnp.pad(sh.reshape(1, -1).astype(jnp.float32), padw))

    ks, kb = _affine(pre, kp)
    ns, nb = _affine(post, n)

    kern = functools.partial(_fused_mm_kernel,
                             use_pre=pre is not None, pre_relu=pre_relu,
                             use_post=post is not None, post_relu=post_relu)
    cost = pl.CostEstimate(flops=2 * mp * kp * n, transcendentals=0,
                           bytes_accessed=mp * kp * 2 + kp * n * 2 + mp * n * 2)

    out = pl.pallas_call(
        kern,
        out_shape=jax.ShapeDtypeStruct((mp, n), out_dtype),
        grid_spec=pltpu.PrefetchScalarGridSpec(
            num_scalar_prefetch=0,
            grid=(mp // tm, kt),
            in_specs=[
                pl.BlockSpec((tm, tk), lambda i, s: (i, s)),   # A tile
                pl.BlockSpec((tk, n), lambda i, s: (s, 0)),    # B tile
                pl.BlockSpec((1, tk), lambda i, s: (0, s)),    # pre scale
                pl.BlockSpec((1, tk), lambda i, s: (0, s)),    # pre shift
                pl.BlockSpec((1, n), lambda i, s: (0, 0)),     # post scale
                pl.BlockSpec((1, n), lambda i, s: (0, 0)),     # post shift
            ],
            out_specs=pl.BlockSpec((tm, n), lambda i, s: (i, 0)),
            scratch_shapes=[pltpu.VMEM((tm, n), jnp.float32)],
        ),
        compiler_params=pltpu.CompilerParams(
            dimension_semantics=("parallel", "arbitrary"),
            vmem_limit_bytes=VMEM_LIMIT),
        cost_estimate=cost,
    )(a, b, ks, kb, ns, nb)
    return out[:m, :n]


def _im2col(x, kh, kw, stride, pad):
    """x: (N,H,W,C) -> (N*Ho*Wo, kh*kw*C) patches (glue, bf16)."""
    n, h, w, c = x.shape
    if pad > 0:
        x = jnp.pad(x, ((0, 0), (pad, pad), (pad, pad), (0, 0)))
    hp, wp = h + 2 * pad, w + 2 * pad
    ho = (hp - kh) // stride + 1
    wo = (wp - kw) // stride + 1
    cols = []
    for i in range(kh):
        for j in range(kw):
            cols.append(x[:, i:i + (ho - 1) * stride + 1:stride,
                          j:j + (wo - 1) * stride + 1:stride, :])
    patches = jnp.concatenate(cols, axis=-1)
    return patches.reshape(n * ho * wo, kh * kw * c), ho, wo


def conv2d(x, w_mat, *, kh, kw, stride=1, pad=0,
           pre=None, pre_relu=True, post=None, post_relu=True):
    """x:(N,H,W,C) NHWC bf16, w_mat:(kh*kw*Cin, Cout) bf16, no bias.
    `pre`  = (scale, shift) per input channel  -> fused BN(+ReLU) prologue.
    `post` = (scale, shift) per output channel -> fused BN(+ReLU) epilogue."""
    n, h, w, cin = x.shape
    cout = w_mat.shape[1]
    if kh == 1 and kw == 1 and stride == 1 and pad == 0:
        patches, ho, wo = x.reshape(n * h * w, cin), h, w
        pre_full = pre
    else:
        patches, ho, wo = _im2col(x, kh, kw, stride, pad)
        pre_full = None
        if pre is not None:      # only valid with pad == 0 (not used with pad>0)
            pre_full = tuple(jnp.tile(p, kh * kw) for p in pre)
    out = fused_matmul(patches, w_mat, pre=pre_full, pre_relu=pre_relu,
                       post=post, post_relu=post_relu)
    return out.reshape(n, ho, wo, cout)


def _pool(x, ksize, stride, pad, kind):
    """Max/avg pooling: shifted views passed as separate tiled inputs, the
    reduction happens on (tm, C) tiles inside the Pallas kernel."""
    n, h, w, c = x.shape
    if pad > 0:
        pad_val = _NEG if kind == "max" else 0.0
        x = jnp.pad(x, ((0, 0), (pad, pad), (pad, pad), (0, 0)),
                    constant_values=pad_val)
    hp, wp = h + 2 * pad, w + 2 * pad
    ho = (hp - ksize) // stride + 1
    wo = (wp - ksize) // stride + 1
    m = n * ho * wo

    views = []
    for i in range(ksize):
        for j in range(ksize):
            v = x[:, i:i + (ho - 1) * stride + 1:stride,
                  j:j + (wo - 1) * stride + 1:stride, :]
            views.append(v.reshape(m, c))

    mp = _ceil_to(m, 8)
    tm = mp if mp <= 512 else 512
    mp = _ceil_to(m, tm)
    views = [jnp.pad(v, ((0, mp - m), (0, 0))) for v in views]
    n_taps = len(views)

    spec = pl.BlockSpec((tm, c), lambda i: (i, 0))
    out = pl.pallas_call(
        functools.partial(_pool_kernel, kind=kind, n_taps=n_taps),
        out_shape=jax.ShapeDtypeStruct((mp, c), x.dtype),
        grid=(mp // tm,),
        in_specs=[spec] * n_taps,
        out_specs=spec,
        compiler_params=pltpu.CompilerParams(
            dimension_semantics=("parallel",),
            vmem_limit_bytes=VMEM_LIMIT),
    )(*views)
    return out[:m, :c].reshape(n, ho, wo, c)


def batchnorm(x, scale, shift, out_dtype=jnp.float32):
    """Standalone inference BatchNorm2d (no ReLU) over NHWC (used for norm5)."""
    n, h, w, c = x.shape
    m = n * h * w
    mp = _ceil_to(m, 8)
    tm = mp if mp <= 512 else 512
    mp = _ceil_to(m, tm)
    x2 = jnp.pad(x.reshape(m, c), ((0, mp - m), (0, 0)))
    out = pl.pallas_call(
        _bn_kernel,
        out_shape=jax.ShapeDtypeStruct((mp, c), out_dtype),
        grid=(mp // tm,),
        in_specs=[pl.BlockSpec((tm, c), lambda i: (i, 0)),
                  pl.BlockSpec((1, c), lambda i: (0, 0)),
                  pl.BlockSpec((1, c), lambda i: (0, 0))],
        out_specs=pl.BlockSpec((tm, c), lambda i: (i, 0)),
        compiler_params=pltpu.CompilerParams(
            dimension_semantics=("parallel",),
            vmem_limit_bytes=VMEM_LIMIT),
    )(x2, scale.reshape(1, c).astype(jnp.float32),
      shift.reshape(1, c).astype(jnp.float32))
    return out[:m, :c].reshape(n, h, w, c)


# ----------------------------------------------------------------------------
# Parameter initialization (deterministic, synthetic)
# ----------------------------------------------------------------------------
def _conv_init(key, kh, kw, cin, cout):
    fan_in = kh * kw * cin
    std = (2.0 / fan_in) ** 0.5  # kaiming-normal, as in torchvision densenet
    w = jax.random.normal(key, (kh, kw, cin, cout)) * std
    return w.reshape(kh * kw * cin, cout).astype(DTYPE)   # pre-packed (K, N)


def _bn_init(key, c):
    k1, k2, k3, k4 = jax.random.split(key, 4)
    gamma = 1.0 + 0.1 * jax.random.normal(k1, (c,))
    beta = 0.1 * jax.random.normal(k2, (c,))
    mean = 0.1 * jax.random.normal(k3, (c,))
    var = 1.0 + 0.1 * jax.random.uniform(k4, (c,))
    scale = (gamma * jax.lax.rsqrt(var + EPS)).astype(jnp.float32)
    shift = (beta - mean * scale).astype(jnp.float32)
    return scale, shift                       # precomputed fused BN affine


def init_params(key):
    keys = iter(jax.random.split(key, 512))
    nk = lambda: next(keys)
    params = {
        "conv0": _conv_init(nk(), 7, 7, 3, NUM_INIT_FEATURES),
        "norm0": _bn_init(nk(), NUM_INIT_FEATURES),
    }
    num_features = NUM_INIT_FEATURES
    blocks, transitions = [], []
    for bi, n_layers in enumerate(BLOCK_CONFIG):
        layers = []
        for li in range(n_layers):
            cin = num_features + li * GROWTH
            layers.append(dict(
                norm1=_bn_init(nk(), cin),
                conv1=_conv_init(nk(), 1, 1, cin, BN_SIZE * GROWTH),
                norm2=_bn_init(nk(), BN_SIZE * GROWTH),
                conv2=_conv_init(nk(), 3, 3, BN_SIZE * GROWTH, GROWTH),
            ))
        blocks.append(layers)
        num_features += n_layers * GROWTH
        if bi != len(BLOCK_CONFIG) - 1:
            transitions.append(dict(
                norm=_bn_init(nk(), num_features),
                conv=_conv_init(nk(), 1, 1, num_features, num_features // 2),
            ))
            num_features //= 2
    params["blocks"] = blocks
    params["transitions"] = transitions
    params["norm5"] = _bn_init(nk(), num_features)  # num_features == 1024
    return params


# ----------------------------------------------------------------------------
# Forward pass (== densenet121().features)
# ----------------------------------------------------------------------------
def _dense_layer(x, p):
    # norm1+relu fused as matmul prologue, norm2+relu fused as epilogue.
    y = conv2d(x, p["conv1"], kh=1, kw=1,
               pre=p["norm1"], pre_relu=True,
               post=p["norm2"], post_relu=True)
    y = conv2d(y, p["conv2"], kh=3, kw=3, stride=1, pad=1)   # plain 3x3 conv
    return jnp.concatenate([x, y], axis=-1)


def densenet121_features(params, x_nchw):
    x = jnp.transpose(x_nchw, (0, 2, 3, 1)).astype(DTYPE)    # NCHW -> NHWC
    # stem: conv0 (+fused norm0/relu0) / pool0
    x = conv2d(x, params["conv0"], kh=7, kw=7, stride=2, pad=3,
               post=params["norm0"], post_relu=True)
    x = _pool(x, ksize=3, stride=2, pad=1, kind="max")
    # dense blocks + transitions
    for bi in range(len(BLOCK_CONFIG)):
        for layer in params["blocks"][bi]:
            x = _dense_layer(x, layer)
        if bi != len(BLOCK_CONFIG) - 1:
            t = params["transitions"][bi]
            x = conv2d(x, t["conv"], kh=1, kw=1,
                       pre=t["norm"], pre_relu=True)          # norm+relu fused
            x = _pool(x, ksize=2, stride=2, pad=0, kind="avg")
    # final norm5 (no ReLU inside .features)
    x = batchnorm(x, *params["norm5"], out_dtype=jnp.float32)
    return jnp.transpose(x, (0, 3, 1, 2))                     # NHWC -> NCHW


# ----------------------------------------------------------------------------
if __name__ == "__main__":
    key = jax.random.PRNGKey(0)
    pkey, xkey = jax.random.split(key)
    params = init_params(pkey)
    x = jax.random.normal(xkey, (2, 3, 32, 32), jnp.float32)  # NCHW like PyTorch

    fwd = jax.jit(densenet121_features)
    out = jax.block_until_ready(fwd(params, x))

    assert out.shape == (2, 1024, 1, 1), out.shape
    assert bool(jnp.all(jnp.isfinite(out)))
    print("KERNEL_OK")
</pallas_src>

<mosaic_0001>
module attributes {stable_mosaic.version = 11 : i64} {
  func.func @_fused_mm_kernel(%arg0: i32, %arg1: i32, %arg2: memref<256x256xbf16, #tpu.memory_space<vmem>>, %arg3: memref<256x64xbf16, #tpu.memory_space<vmem>>, %arg4: memref<1x256xf32, #tpu.memory_space<vmem>>, %arg5: memref<1x256xf32, #tpu.memory_space<vmem>>, %arg6: memref<1x64xf32, #tpu.memory_space<vmem>>, %arg7: memref<1x64xf32, #tpu.memory_space<vmem>>, %arg8: memref<256x64xbf16, #tpu.memory_space<vmem>>, %arg9: memref<256x64xf32, #tpu.memory_space<vmem>>) attributes {dimension_semantics = [#tpu.dimension_semantics<parallel>, #tpu.dimension_semantics<arbitrary>], iteration_bounds = array<i64: 2, 1>, scalar_prefetch = 0 : i64, scratch_operands = 1 : i64, tpu.core_type = #tpu.core_type<tc>, window_params = [{transform_indices = @transform_0, window_bounds = array<i64: 256, 256>}, {transform_indices = @transform_1, window_bounds = array<i64: 256, 64>}, {transform_indices = @transform_2, window_bounds = array<i64: 1, 256>}, {transform_indices = @transform_3, window_bounds = array<i64: 1, 256>}, {pipeline_mode = #tpu.pipeline_mode<synchronous>, transform_indices = @transform_4, window_bounds = array<i64: 1, 64>}, {pipeline_mode = #tpu.pipeline_mode<synchronous>, transform_indices = @transform_5, window_bounds = array<i64: 1, 64>}, {transform_indices = @transform_6, window_bounds = array<i64: 256, 64>}]} {
    %c0_i32 = arith.constant 0 : i32
    %0 = arith.cmpi eq, %arg1, %c0_i32 : i32
    %1 = arith.extui %0 : i1 to i32
    %c0_i32_0 = arith.constant 0 : i32
    %2 = arith.cmpi ne, %1, %c0_i32_0 : i32
    scf.if %2 {
      %cst_10 = arith.constant 0.000000e+00 : f32
      %12 = vector.broadcast %cst_10 : f32 to vector<256x64xf32>
      %c0_11 = arith.constant 0 : index
      %c0_12 = arith.constant 0 : index
      %13 = vector.load %arg9[%c0_11, %c0_12] : memref<256x64xf32, #tpu.memory_space<vmem>>, vector<256x64xf32>
      tpu.vector_store %arg9[%c0_11, %c0_12], %12 {strides = array<i32>} : memref<256x64xf32, #tpu.memory_space<vmem>>, vector<256x64xf32>,
    } else {
    }
    %c0 = arith.constant 0 : index
    %c0_1 = arith.constant 0 : index
    %3 = vector.load %arg2[%c0, %c0_1] : memref<256x256xbf16, #tpu.memory_space<vmem>>, vector<256x256xbf16>
    %c0_2 = arith.constant 0 : index
    %c0_3 = arith.constant 0 : index
    %4 = vector.load %arg9[%c0_2, %c0_3] : memref<256x64xf32, #tpu.memory_space<vmem>>, vector<256x64xf32>
    %c0_4 = arith.constant 0 : index
    %c0_5 = arith.constant 0 : index
    %5 = vector.load %arg3[%c0_4, %c0_5] : memref<256x64xbf16, #tpu.memory_space<vmem>>, vector<256x64xbf16>
    %cst = arith.constant dense<0.000000e+00> : vector<256x64xf32>
    %6 = tpu.matmul %3, %5, %cst {dimension_numbers = #tpu.dot_dimension_numbers<[1], [0], [0], [1], [0, 0, 1, 1], [], []>} : vector<256x256xbf16>, vector<256x64xbf16>, vector<256x64xf32> -> vector<256x64xf32>
    %7 = arith.addf %4, %6 : vector<256x64xf32>
    %c0_6 = arith.constant 0 : index
    %c0_7 = arith.constant 0 : index
    %8 = vector.load %arg9[%c0_6, %c0_7] : memref<256x64xf32, #tpu.memory_space<vmem>>, vector<256x64xf32>
    tpu.vector_store %arg9[%c0_6, %c0_7], %7 {strides = array<i32>} : memref<256x64xf32, #tpu.memory_space<vmem>>, vector<256x64xf32>,
    %c0_i32_8 = arith.constant 0 : i32
    %9 = arith.cmpi eq, %arg1, %c0_i32_8 : i32
    %10 = arith.extui %9 : i1 to i32
    %c0_i32_9 = arith.constant 0 : i32
    %11 = arith.cmpi ne, %10, %c0_i32_9 : i32
    scf.if %11 {
      %c0_10 = arith.constant 0 : index
      %c0_11 = arith.constant 0 : index
      %12 = vector.load %arg9[%c0_10, %c0_11] : memref<256x64xf32, #tpu.memory_space<vmem>>, vector<256x64xf32>
      %c0_12 = arith.constant 0 : index
      %c0_13 = arith.constant 0 : index
      %13 = vector.load %arg6[%c0_12, %c0_13] : memref<1x64xf32, #tpu.memory_space<vmem>>, vector<1x64xf32>
      %14 = vector.broadcast %13 : vector<1x64xf32> to vector<256x64xf32>
      %15 = arith.mulf %12, %14 : vector<256x64xf32>
      %c0_14 = arith.constant 0 : index
      %c0_15 = arith.constant 0 : index
      %16 = vector.load %arg7[%c0_14, %c0_15] : memref<1x64xf32, #tpu.memory_space<vmem>>, vector<1x64xf32>
      %17 = vector.broadcast %16 : vector<1x64xf32> to vector<256x64xf32>
      %18 = arith.addf %15, %17 : vector<256x64xf32>
      %cst_16 = arith.constant 0.000000e+00 : f32
      %19 = vector.broadcast %cst_16 : f32 to vector<256x64xf32>
      %20 = arith.maximumf %18, %19 : vector<256x64xf32>
      %21 = arith.truncf %20 : vector<256x64xf32> to vector<256x64xbf16>
      %c0_17 = arith.constant 0 : index
      %c0_18 = arith.constant 0 : index
      %22 = vector.load %arg8[%c0_17, %c0_18] : memref<256x64xbf16, #tpu.memory_space<vmem>>, vector<256x64xbf16>
      tpu.vector_store %arg8[%c0_17, %c0_18], %21 {strides = array<i32>} : memref<256x64xbf16, #tpu.memory_space<vmem>>, vector<256x64xbf16>,
    } else {
    }
    return
  }
  func.func @transform_0(%arg0: i32, %arg1: i32) -> (i32, i32) {
    %c0_i32 = arith.constant 0 : i32
    return %arg0, %arg1 : i32, i32
  }
  func.func @transform_1(%arg0: i32, %arg1: i32) -> (i32, i32) {
    %c0_i32 = arith.constant 0 : i32
    %c0_i32_0 = arith.constant 0 : i32
    return %arg1, %c0_i32 : i32, i32
  }
  func.func @transform_2(%arg0: i32, %arg1: i32) -> (i32, i32) {
    %c0_i32 = arith.constant 0 : i32
    %c0_i32_0 = arith.constant 0 : i32
    return %c0_i32, %arg1 : i32, i32
  }
  func.func @transform_3(%arg0: i32, %arg1: i32) -> (i32, i32) {
    %c0_i32 = arith.constant 0 : i32
    %c0_i32_0 = arith.constant 0 : i32
    return %c0_i32, %arg1 : i32, i32
  }
  func.func @transform_4(%arg0: i32, %arg1: i32) -> (i32, i32) {
    %c0_i32 = arith.constant 0 : i32
    %c0_i32_0 = arith.constant 0 : i32
    %c0_i32_1 = arith.constant 0 : i32
    return %c0_i32, %c0_i32_0 : i32, i32
  }
  func.func @transform_5(%arg0: i32, %arg1: i32) -> (i32, i32) {
    %c0_i32 = arith.constant 0 : i32
    %c0_i32_0 = arith.constant 0 : i32
    %c0_i32_1 = arith.constant 0 : i32
    return %c0_i32, %c0_i32_0 : i32, i32
  }
  func.func @transform_6(%arg0: i32, %arg1: i32) -> (i32, i32) {
    %c0_i32 = arith.constant 0 : i32
    %c0_i32_0 = arith.constant 0 : i32
    return %arg0, %c0_i32 : i32, i32
  }
}

module attributes {stable_mosaic.version = 11 : i64} {
  func.func @_pool_kernel(%arg0: i32, %arg1: memref<128x64xbf16, #tpu.memory_space<vmem>>, %arg2: memref<128x64xbf16, #tpu.memory_space<vmem>>, %arg3: memref<128x64xbf16, #tpu.memory_space<vmem>>, %arg4: memref<128x64xbf16, #tpu.memory_space<vmem>>, %arg5: memref<128x64xbf16, #tpu.memory_space<vmem>>, %arg6: memref<128x64xbf16, #tpu.memory_space<vmem>>, %arg7: memref<128x64xbf16, #tpu.memory_space<vmem>>, %arg8: memref<128x64xbf16, #tpu.memory_space<vmem>>, %arg9: memref<128x64xbf16, #tpu.memory_space<vmem>>, %arg10: memref<128x64xbf16, #tpu.memory_space<vmem>>) attributes {dimension_semantics = [#tpu.dimension_semantics<parallel>], iteration_bounds = array<i64: 1>, scalar_prefetch = 0 : i64, scratch_operands = 0 : i64, tpu.core_type = #tpu.core_type<tc>, window_params = [{transform_indices = @transform_0, window_bounds = array<i64: 128, 64>}, {transform_indices = @transform_1, window_bounds = array<i64: 128, 64>}, {transform_indices = @transform_2, window_bounds = array<i64: 128, 64>}, {transform_indices = @transform_3, window_bounds = array<i64: 128, 64>}, {transform_indices = @transform_4, window_bounds = array<i64: 128, 64>}, {transform_indices = @transform_5, window_bounds = array<i64: 128, 64>}, {transform_indices = @transform_6, window_bounds = array<i64: 128, 64>}, {transform_indices = @transform_7, window_bounds = array<i64: 128, 64>}, {transform_indices = @transform_8, window_bounds = array<i64: 128, 64>}, {transform_indices = @transform_9, window_bounds = array<i64: 128, 64>}]} {
    %c0 = arith.constant 0 : index
    %c0_0 = arith.constant 0 : index
    %0 = vector.load %arg1[%c0, %c0_0] : memref<128x64xbf16, #tpu.memory_space<vmem>>, vector<128x64xbf16>
    %1 = arith.extf %0 : vector<128x64xbf16> to vector<128x64xf32>
    %c0_1 = arith.constant 0 : index
    %c0_2 = arith.constant 0 : index
    %2 = vector.load %arg2[%c0_1, %c0_2] : memref<128x64xbf16, #tpu.memory_space<vmem>>, vector<128x64xbf16>
    %3 = arith.extf %2 : vector<128x64xbf16> to vector<128x64xf32>
    %4 = arith.maximumf %1, %3 : vector<128x64xf32>
    %c0_3 = arith.constant 0 : index
    %c0_4 = arith.constant 0 : index
    %5 = vector.load %arg3[%c0_3, %c0_4] : memref<128x64xbf16, #tpu.memory_space<vmem>>, vector<128x64xbf16>
    %6 = arith.extf %5 : vector<128x64xbf16> to vector<128x64xf32>
    %7 = arith.maximumf %4, %6 : vector<128x64xf32>
    %c0_5 = arith.constant 0 : index
    %c0_6 = arith.constant 0 : index
    %8 = vector.load %arg4[%c0_5, %c0_6] : memref<128x64xbf16, #tpu.memory_space<vmem>>, vector<128x64xbf16>
    %9 = arith.extf %8 : vector<128x64xbf16> to vector<128x64xf32>
    %10 = arith.maximumf %7, %9 : vector<128x64xf32>
    %c0_7 = arith.constant 0 : index
    %c0_8 = arith.constant 0 : index
    %11 = vector.load %arg5[%c0_7, %c0_8] : memref<128x64xbf16, #tpu.memory_space<vmem>>, vector<128x64xbf16>
    %12 = arith.extf %11 : vector<128x64xbf16> to vector<128x64xf32>
    %13 = arith.maximumf %10, %12 : vector<128x64xf32>
    %c0_9 = arith.constant 0 : index
    %c0_10 = arith.constant 0 : index
    %14 = vector.load %arg6[%c0_9, %c0_10] : memref<128x64xbf16, #tpu.memory_space<vmem>>, vector<128x64xbf16>
    %15 = arith.extf %14 : vector<128x64xbf16> to vector<128x64xf32>
    %16 = arith.maximumf %13, %15 : vector<128x64xf32>
    %c0_11 = arith.constant 0 : index
    %c0_12 = arith.constant 0 : index
    %17 = vector.load %arg7[%c0_11, %c0_12] : memref<128x64xbf16, #tpu.memory_space<vmem>>, vector<128x64xbf16>
    %18 = arith.extf %17 : vector<128x64xbf16> to vector<128x64xf32>
    %19 = arith.maximumf %16, %18 : vector<128x64xf32>
    %c0_13 = arith.constant 0 : index
    %c0_14 = arith.constant 0 : index
    %20 = vector.load %arg8[%c0_13, %c0_14] : memref<128x64xbf16, #tpu.memory_space<vmem>>, vector<128x64xbf16>
    %21 = arith.extf %20 : vector<128x64xbf16> to vector<128x64xf32>
    %22 = arith.maximumf %19, %21 : vector<128x64xf32>
    %c0_15 = arith.constant 0 : index
    %c0_16 = arith.constant 0 : index
    %23 = vector.load %arg9[%c0_15, %c0_16] : memref<128x64xbf16, #tpu.memory_space<vmem>>, vector<128x64xbf16>
    %24 = arith.extf %23 : vector<128x64xbf16> to vector<128x64xf32>
    %25 = arith.maximumf %22, %24 : vector<128x64xf32>
    %26 = arith.truncf %25 : vector<128x64xf32> to vector<128x64xbf16>
    %c0_17 = arith.constant 0 : index
    %c0_18 = arith.constant 0 : index
    %27 = vector.load %arg10[%c0_17, %c0_18] : memref<128x64xbf16, #tpu.memory_space<vmem>>, vector<128x64xbf16>
    tpu.vector_store %arg10[%c0_17, %c0_18], %26 {strides = array<i32>} : memref<128x64xbf16, #tpu.memory_space<vmem>>, vector<128x64xbf16>,
    return
  }
  func.func @transform_0(%arg0: i32) -> (i32, i32) {
    %c0_i32 = arith.constant 0 : i32
    %c0_i32_0 = arith.constant 0 : i32
    return %arg0, %c0_i32 : i32, i32
  }
  func.func @transform_1(%arg0: i32) -> (i32, i32) {
    %c0_i32 = arith.constant 0 : i32
    %c0_i32_0 = arith.constant 0 : i32
    return %arg0, %c0_i32 : i32, i32
  }
  func.func @transform_2(%arg0: i32) -> (i32, i32) {
    %c0_i32 = arith.constant 0 : i32
    %c0_i32_0 = arith.constant 0 : i32
    return %arg0, %c0_i32 : i32, i32
  }
  func.func @transform_3(%arg0: i32) -> (i32, i32) {
    %c0_i32 = arith.constant 0 : i32
    %c0_i32_0 = arith.constant 0 : i32
    return %arg0, %c0_i32 : i32, i32
  }
  func.func @transform_4(%arg0: i32) -> (i32, i32) {
    %c0_i32 = arith.constant 0 : i32
    %c0_i32_0 = arith.constant 0 : i32
    return %arg0, %c0_i32 : i32, i32
  }
  func.func @transform_5(%arg0: i32) -> (i32, i32) {
    %c0_i32 = arith.constant 0 : i32
    %c0_i32_0 = arith.constant 0 : i32
    return %arg0, %c0_i32 : i32, i32
  }
  func.func @transform_6(%arg0: i32) -> (i32, i32) {
    %c0_i32 = arith.constant 0 : i32
    %c0_i32_0 = arith.constant 0 : i32
    return %arg0, %c0_i32 : i32, i32
  }
  func.func @transform_7(%arg0: i32) -> (i32, i32) {
    %c0_i32 = arith.constant 0 : i32
    %c0_i32_0 = arith.constant 0 : i32
    return %arg0, %c0_i32 : i32, i32
  }
  func.func @transform_8(%arg0: i32) -> (i32, i32) {
    %c0_i32 = arith.constant 0 : i32
    %c0_i32_0 = arith.constant 0 : i32
    return %arg0, %c0_i32 : i32, i32
  }
  func.func @transform_9(%arg0: i32) -> (i32, i32) {
    %c0_i32 = arith.constant 0 : i32
    %c0_i32_0 = arith.constant 0 : i32
    return %arg0, %c0_i32 : i32, i32
  }
}

module attributes {stable_mosaic.version = 11 : i64} {
  func.func @_fused_mm_kernel(%arg0: i32, %arg1: i32, %arg2: memref<128x128xbf16, #tpu.memory_space<vmem>>, %arg3: memref<128x128xbf16, #tpu.memory_space<vmem>>, %arg4: memref<1x128xf32, #tpu.memory_space<vmem>>, %arg5: memref<1x128xf32, #tpu.memory_space<vmem>>, %arg6: memref<1x128xf32, #tpu.memory_space<vmem>>, %arg7: memref<1x128xf32, #tpu.memory_space<vmem>>, %arg8: memref<128x128xbf16, #tpu.memory_space<vmem>>, %arg9: memref<128x128xf32, #tpu.memory_space<vmem>>) attributes {dimension_semantics = [#tpu.dimension_semantics<parallel>, #tpu.dimension_semantics<arbitrary>], iteration_bounds = array<i64: 1, 1>, scalar_prefetch = 0 : i64, scratch_operands = 1 : i64, tpu.core_type = #tpu.core_type<tc>, window_params = [{transform_indices = @transform_0, window_bounds = array<i64: 128, 128>}, {transform_indices = @transform_1, window_bounds = array<i64: 128, 128>}, {transform_indices = @transform_2, window_bounds = array<i64: 1, 128>}, {transform_indices = @transform_3, window_bounds = array<i64: 1, 128>}, {pipeline_mode = #tpu.pipeline_mode<synchronous>, transform_indices = @transform_4, window_bounds = array<i64: 1, 128>}, {pipeline_mode = #tpu.pipeline_mode<synchronous>, transform_indices = @transform_5, window_bounds = array<i64: 1, 128>}, {transform_indices = @transform_6, window_bounds = array<i64: 128, 128>}]} {
    %c0_i32 = arith.constant 0 : i32
    %0 = arith.cmpi eq, %arg1, %c0_i32 : i32
    %1 = arith.extui %0 : i1 to i32
    %c0_i32_0 = arith.constant 0 : i32
    %2 = arith.cmpi ne, %1, %c0_i32_0 : i32
    scf.if %2 {
      %cst_15 = arith.constant 0.000000e+00 : f32
      %22 = vector.broadcast %cst_15 : f32 to vector<128x128xf32>
      %c0_16 = arith.constant 0 : index
      %c0_17 = arith.constant 0 : index
      %23 = vector.load %arg9[%c0_16, %c0_17] : memref<128x128xf32, #tpu.memory_space<vmem>>, vector<128x128xf32>
      tpu.vector_store %arg9[%c0_16, %c0_17], %22 {strides = array<i32>} : memref<128x128xf32, #tpu.memory_space<vmem>>, vector<128x128xf32>,
    } else {
    }
    %c0 = arith.constant 0 : index
    %c0_1 = arith.constant 0 : index
    %3 = vector.load %arg2[%c0, %c0_1] : memref<128x128xbf16, #tpu.memory_space<vmem>>, vector<128x128xbf16>
    %4 = arith.extf %3 : vector<128x128xbf16> to vector<128x128xf32>
    %c0_2 = arith.constant 0 : index
    %c0_3 = arith.constant 0 : index
    %5 = vector.load %arg4[%c0_2, %c0_3] : memref<1x128xf32, #tpu.memory_space<vmem>>, vector<1x128xf32>
    %6 = vector.broadcast %5 : vector<1x128xf32> to vector<128x128xf32>
    %7 = arith.mulf %4, %6 : vector<128x128xf32>
    %c0_4 = arith.constant 0 : index
    %c0_5 = arith.constant 0 : index
    %8 = vector.load %arg5[%c0_4, %c0_5] : memref<1x128xf32, #tpu.memory_space<vmem>>, vector<1x128xf32>
    %9 = vector.broadcast %8 : vector<1x128xf32> to vector<128x128xf32>
    %10 = arith.addf %7, %9 : vector<128x128xf32>
    %cst = arith.constant 0.000000e+00 : f32
    %11 = vector.broadcast %cst : f32 to vector<128x128xf32>
    %12 = arith.maximumf %10, %11 : vector<128x128xf32>
    %13 = arith.truncf %12 : vector<128x128xf32> to vector<128x128xbf16>
    %c0_6 = arith.constant 0 : index
    %c0_7 = arith.constant 0 : index
    %14 = vector.load %arg9[%c0_6, %c0_7] : memref<128x128xf32, #tpu.memory_space<vmem>>, vector<128x128xf32>
    %c0_8 = arith.constant 0 : index
    %c0_9 = arith.constant 0 : index
    %15 = vector.load %arg3[%c0_8, %c0_9] : memref<128x128xbf16, #tpu.memory_space<vmem>>, vector<128x128xbf16>
    %cst_10 = arith.constant dense<0.000000e+00> : vector<128x128xf32>
    %16 = tpu.matmul %13, %15, %cst_10 {dimension_numbers = #tpu.dot_dimension_numbers<[1], [0], [0], [1], [0, 0, 1, 1], [], []>} : vector<128x128xbf16>, vector<128x128xbf16>, vector<128x128xf32> -> vector<128x128xf32>
    %17 = arith.addf %14, %16 : vector<128x128xf32>
    %c0_11 = arith.constant 0 : index
    %c0_12 = arith.constant 0 : index
    %18 = vector.load %arg9[%c0_11, %c0_12] : memref<128x128xf32, #tpu.memory_space<vmem>>, vector<128x128xf32>
    tpu.vector_store %arg9[%c0_11, %c0_12], %17 {strides = array<i32>} : memref<128x128xf32, #tpu.memory_space<vmem>>, vector<128x128xf32>,
    %c0_i32_13 = arith.constant 0 : i32
    %19 = arith.cmpi eq, %arg1, %c0_i32_13 : i32
    %20 = arith.extui %19 : i1 to i32
    %c0_i32_14 = arith.constant 0 : i32
    %21 = arith.cmpi ne, %20, %c0_i32_14 : i32
    scf.if %21 {
      %c0_15 = arith.constant 0 : index
      %c0_16 = arith.constant 0 : index
      %22 = vector.load %arg9[%c0_15, %c0_16] : memref<128x128xf32, #tpu.memory_space<vmem>>, vector<128x128xf32>
      %c0_17 = arith.constant 0 : index
      %c0_18 = arith.constant 0 : index
      %23 = vector.load %arg6[%c0_17, %c0_18] : memref<1x128xf32, #tpu.memory_space<vmem>>, vector<1x128xf32>
      %24 = vector.broadcast %23 : vector<1x128xf32> to vector<128x128xf32>
      %25 = arith.mulf %22, %24 : vector<128x128xf32>
      %c0_19 = arith.constant 0 : index
      %c0_20 = arith.constant 0 : index
      %26 = vector.load %arg7[%c0_19, %c0_20] : memref<1x128xf32, #tpu.memory_space<vmem>>, vector<1x128xf32>
      %27 = vector.broadcast %26 : vector<1x128xf32> to vector<128x128xf32>
      %28 = arith.addf %25, %27 : vector<128x128xf32>
      %cst_21 = arith.constant 0.000000e+00 : f32
      %29 = vector.broadcast %cst_21 : f32 to vector<128x128xf32>
      %30 = arith.maximumf %28, %29 : vector<128x128xf32>
      %31 = arith.truncf %30 : vector<128x128xf32> to vector<128x128xbf16>
      %c0_22 = arith.constant 0 : index
      %c0_23 = arith.constant 0 : index
      %32 = vector.load %arg8[%c0_22, %c0_23] : memref<128x128xbf16, #tpu.memory_space<vmem>>, vector<128x128xbf16>
      tpu.vector_store %arg8[%c0_22, %c0_23], %31 {strides = array<i32>} : memref<128x128xbf16, #tpu.memory_space<vmem>>, vector<128x128xbf16>,
    } else {
    }
    return
  }
  func.func @transform_0(%arg0: i32, %arg1: i32) -> (i32, i32) {
    %c0_i32 = arith.constant 0 : i32
    return %arg0, %arg1 : i32, i32
  }
  func.func @transform_1(%arg0: i32, %arg1: i32) -> (i32, i32) {
    %c0_i32 = arith.constant 0 : i32
    %c0_i32_0 = arith.constant 0 : i32
    return %arg1, %c0_i32 : i32, i32
  }
  func.func @transform_2(%arg0: i32, %arg1: i32) -> (i32, i32) {
    %c0_i32 = arith.constant 0 : i32
    %c0_i32_0 = arith.constant 0 : i32
    return %c0_i32, %arg1 : i32, i32
  }
  func.func @transform_3(%arg0: i32, %arg1: i32) -> (i32, i32) {
    %c0_i32 = arith.constant 0 : i32
    %c0_i32_0 = arith.constant 0 : i32
    return %c0_i32, %arg1 : i32, i32
  }
  func.func @transform_4(%arg0: i32, %arg1: i32) -> (i32, i32) {
    %c0_i32 = arith.constant 0 : i32
    %c0_i32_0 = arith.constant 0 : i32
    %c0_i32_1 = arith.constant 0 : i32
    return %c0_i32, %c0_i32_0 : i32, i32
  }
  func.func @transform_5(%arg0: i32, %arg1: i32) -> (i32, i32) {
    %c0_i32 = arith.constant 0 : i32
    %c0_i32_0 = arith.constant 0 : i32
    %c0_i32_1 = arith.constant 0 : i32
    return %c0_i32, %c0_i32_0 : i32, i32
  }
  func.func @transform_6(%arg0: i32, %arg1: i32) -> (i32, i32) {
    %c0_i32 = arith.constant 0 : i32
    %c0_i32_0 = arith.constant 0 : i32
    return %arg0, %c0_i32 : i32, i32
  }
}

module attributes {stable_mosaic.version = 11 : i64} {
  func.func @_fused_mm_kernel(%arg0: i32, %arg1: i32, %arg2: memref<128x256xbf16, #tpu.memory_space<vmem>>, %arg3: memref<256x128xbf16, #tpu.memory_space<vmem>>, %arg4: memref<1x256xf32, #tpu.memory_space<vmem>>, %arg5: memref<1x256xf32, #tpu.memory_space<vmem>>, %arg6: memref<1x128xf32, #tpu.memory_space<vmem>>, %arg7: memref<1x128xf32, #tpu.memory_space<vmem>>, %arg8: memref<128x128xbf16, #tpu.memory_space<vmem>>, %arg9: memref<128x128xf32, #tpu.memory_space<vmem>>) attributes {dimension_semantics = [#tpu.dimension_semantics<parallel>, #tpu.dimension_semantics<arbitrary>], iteration_bounds = array<i64: 1, 1>, scalar_prefetch = 0 : i64, scratch_operands = 1 : i64, tpu.core_type = #tpu.core_type<tc>, window_params = [{transform_indices = @transform_0, window_bounds = array<i64: 128, 256>}, {transform_indices = @transform_1, window_bounds = array<i64: 256, 128>}, {transform_indices = @transform_2, window_bounds = array<i64: 1, 256>}, {transform_indices = @transform_3, window_bounds = array<i64: 1, 256>}, {pipeline_mode = #tpu.pipeline_mode<synchronous>, transform_indices = @transform_4, window_bounds = array<i64: 1, 128>}, {pipeline_mode = #tpu.pipeline_mode<synchronous>, transform_indices = @transform_5, window_bounds = array<i64: 1, 128>}, {transform_indices = @transform_6, window_bounds = array<i64: 128, 128>}]} {
    %c0_i32 = arith.constant 0 : i32
    %0 = arith.cmpi eq, %arg1, %c0_i32 : i32
    %1 = arith.extui %0 : i1 to i32
    %c0_i32_0 = arith.constant 0 : i32
    %2 = arith.cmpi ne, %1, %c0_i32_0 : i32
    scf.if %2 {
      %cst_15 = arith.constant 0.000000e+00 : f32
      %22 = vector.broadcast %cst_15 : f32 to vector<128x128xf32>
      %c0_16 = arith.constant 0 : index
      %c0_17 = arith.constant 0 : index
      %23 = vector.load %arg9[%c0_16, %c0_17] : memref<128x128xf32, #tpu.memory_space<vmem>>, vector<128x128xf32>
      tpu.vector_store %arg9[%c0_16, %c0_17], %22 {strides = array<i32>} : memref<128x128xf32, #tpu.memory_space<vmem>>, vector<128x128xf32>,
    } else {
    }
    %c0 = arith.constant 0 : index
    %c0_1 = arith.constant 0 : index
    %3 = vector.load %arg2[%c0, %c0_1] : memref<128x256xbf16, #tpu.memory_space<vmem>>, vector<128x256xbf16>
    %4 = arith.extf %3 : vector<128x256xbf16> to vector<128x256xf32>
    %c0_2 = arith.constant 0 : index
    %c0_3 = arith.constant 0 : index
    %5 = vector.load %arg4[%c0_2, %c0_3] : memref<1x256xf32, #tpu.memory_space<vmem>>, vector<1x256xf32>
    %6 = vector.broadcast %5 : vector<1x256xf32> to vector<128x256xf32>
    %7 = arith.mulf %4, %6 : vector<128x256xf32>
    %c0_4 = arith.constant 0 : index
    %c0_5 = arith.constant 0 : index
    %8 = vector.load %arg5[%c0_4, %c0_5] : memref<1x256xf32, #tpu.memory_space<vmem>>, vector<1x256xf32>
    %9 = vector.broadcast %8 : vector<1x256xf32> to vector<128x256xf32>
    %10 = arith.addf %7, %9 : vector<128x256xf32>
    %cst = arith.constant 0.000000e+00 : f32
    %11 = vector.broadcast %cst : f32 to vector<128x256xf32>
    %12 = arith.maximumf %10, %11 : vector<128x256xf32>
    %13 = arith.truncf %12 : vector<128x256xf32> to vector<128x256xbf16>
    %c0_6 = arith.constant 0 : index
    %c0_7 = arith.constant 0 : index
    %14 = vector.load %arg9[%c0_6, %c0_7] : memref<128x128xf32, #tpu.memory_space<vmem>>, vector<128x128xf32>
    %c0_8 = arith.constant 0 : index
    %c0_9 = arith.constant 0 : index
    %15 = vector.load %arg3[%c0_8, %c0_9] : memref<256x128xbf16, #tpu.memory_space<vmem>>, vector<256x128xbf16>
    %cst_10 = arith.constant dense<0.000000e+00> : vector<128x128xf32>
    %16 = tpu.matmul %13, %15, %cst_10 {dimension_numbers = #tpu.dot_dimension_numbers<[1], [0], [0], [1], [0, 0, 1, 1], [], []>} : vector<128x256xbf16>, vector<256x128xbf16>, vector<128x128xf32> -> vector<128x128xf32>
    %17 = arith.addf %14, %16 : vector<128x128xf32>
    %c0_11 = arith.constant 0 : index
    %c0_12 = arith.constant 0 : index
    %18 = vector.load %arg9[%c0_11, %c0_12] : memref<128x128xf32, #tpu.memory_space<vmem>>, vector<128x128xf32>
    tpu.vector_store %arg9[%c0_11, %c0_12], %17 {strides = array<i32>} : memref<128x128xf32, #tpu.memory_space<vmem>>, vector<128x128xf32>,
    %c0_i32_13 = arith.constant 0 : i32
    %19 = arith.cmpi eq, %arg1, %c0_i32_13 : i32
    %20 = arith.extui %19 : i1 to i32
    %c0_i32_14 = arith.constant 0 : i32
    %21 = arith.cmpi ne, %20, %c0_i32_14 : i32
    scf.if %21 {
      %c0_15 = arith.constant 0 : index
      %c0_16 = arith.constant 0 : index
      %22 = vector.load %arg9[%c0_15, %c0_16] : memref<128x128xf32, #tpu.memory_space<vmem>>, vector<128x128xf32>
      %c0_17 = arith.constant 0 : index
      %c0_18 = arith.constant 0 : index
      %23 = vector.load %arg6[%c0_17, %c0_18] : memref<1x128xf32, #tpu.memory_space<vmem>>, vector<1x128xf32>
      %24 = vector.broadcast %23 : vector<1x128xf32> to vector<128x128xf32>
      %25 = arith.mulf %22, %24 : vector<128x128xf32>
      %c0_19 = arith.constant 0 : index
      %c0_20 = arith.constant 0 : index
      %26 = vector.load %arg7[%c0_19, %c0_20] : memref<1x128xf32, #tpu.memory_space<vmem>>, vector<1x128xf32>
      %27 = vector.broadcast %26 : vector<1x128xf32> to vector<128x128xf32>
      %28 = arith.addf %25, %27 : vector<128x128xf32>
      %cst_21 = arith.constant 0.000000e+00 : f32
      %29 = vector.broadcast %cst_21 : f32 to vector<128x128xf32>
      %30 = arith.maximumf %28, %29 : vector<128x128xf32>
      %31 = arith.truncf %30 : vector<128x128xf32> to vector<128x128xbf16>
      %c0_22 = arith.constant 0 : index
      %c0_23 = arith.constant 0 : index
      %32 = vector.load %arg8[%c0_22, %c0_23] : memref<128x128xbf16, #tpu.memory_space<vmem>>, vector<128x128xbf16>
      tpu.vector_store %arg8[%c0_22, %c0_23], %31 {strides = array<i32>} : memref<128x128xbf16, #tpu.memory_space<vmem>>, vector<128x128xbf16>,
    } else {
    }
    return
  }
  func.func @transform_0(%arg0: i32, %arg1: i32) -> (i32, i32) {
    %c0_i32 = arith.constant 0 : i32
    return %arg0, %arg1 : i32, i32
  }
  func.func @transform_1(%arg0: i32, %arg1: i32) -> (i32, i32) {
    %c0_i32 = arith.constant 0 : i32
    %c0_i32_0 = arith.constant 0 : i32
    return %arg1, %c0_i32 : i32, i32
  }
  func.func @transform_2(%arg0: i32, %arg1: i32) -> (i32, i32) {
    %c0_i32 = arith.constant 0 : i32
    %c0_i32_0 = arith.constant 0 : i32
    return %c0_i32, %arg1 : i32, i32
  }
  func.func @transform_3(%arg0: i32, %arg1: i32) -> (i32, i32) {
    %c0_i32 = arith.constant 0 : i32
    %c0_i32_0 = arith.constant 0 : i32
    return %c0_i32, %arg1 : i32, i32
  }
  func.func @transform_4(%arg0: i32, %arg1: i32) -> (i32, i32) {
    %c0_i32 = arith.constant 0 : i32
    %c0_i32_0 = arith.constant 0 : i32
    %c0_i32_1 = arith.constant 0 : i32
    return %c0_i32, %c0_i32_0 : i32, i32
  }
  func.func @transform_5(%arg0: i32, %arg1: i32) -> (i32, i32) {
    %c0_i32 = arith.constant 0 : i32
    %c0_i32_0 = arith.constant 0 : i32
    %c0_i32_1 = arith.constant 0 : i32
    return %c0_i32, %c0_i32_0 : i32, i32
  }
  func.func @transform_6(%arg0: i32, %arg1: i32) -> (i32, i32) {
    %c0_i32 = arith.constant 0 : i32
    %c0_i32_0 = arith.constant 0 : i32
    return %arg0, %c0_i32 : i32, i32
  }
}

module attributes {stable_mosaic.version = 11 : i64} {
  func.func @_fused_mm_kernel(%arg0: i32, %arg1: i32, %arg2: memref<128x384xbf16, #tpu.memory_space<vmem>>, %arg3: memref<384x32xbf16, #tpu.memory_space<vmem>>, %arg4: memref<1x384xf32, #tpu.memory_space<vmem>>, %arg5: memref<1x384xf32, #tpu.memory_space<vmem>>, %arg6: memref<1x32xf32, #tpu.memory_space<vmem>>, %arg7: memref<1x32xf32, #tpu.memory_space<vmem>>, %arg8: memref<128x32xbf16, #tpu.memory_space<vmem>>, %arg9: memref<128x32xf32, #tpu.memory_space<vmem>>) attributes {dimension_semantics = [#tpu.dimension_semantics<parallel>, #tpu.dimension_semantics<arbitrary>], iteration_bounds = array<i64: 1, 3>, scalar_prefetch = 0 : i64, scratch_operands = 1 : i64, tpu.core_type = #tpu.core_type<tc>, window_params = [{transform_indices = @transform_0, window_bounds = array<i64: 128, 384>}, {transform_indices = @transform_1, window_bounds = array<i64: 384, 32>}, {transform_indices = @transform_2, window_bounds = array<i64: 1, 384>}, {transform_indices = @transform_3, window_bounds = array<i64: 1, 384>}, {pipeline_mode = #tpu.pipeline_mode<synchronous>, transform_indices = @transform_4, window_bounds = array<i64: 1, 32>}, {pipeline_mode = #tpu.pipeline_mode<synchronous>, transform_indices = @transform_5, window_bounds = array<i64: 1, 32>}, {transform_indices = @transform_6, window_bounds = array<i64: 128, 32>}]} {
    %c0_i32 = arith.constant 0 : i32
    %0 = arith.cmpi eq, %arg1, %c0_i32 : i32
    %1 = arith.extui %0 : i1 to i32
    %c0_i32_0 = arith.constant 0 : i32
    %2 = arith.cmpi ne, %1, %c0_i32_0 : i32
    scf.if %2 {
      %cst_9 = arith.constant 0.000000e+00 : f32
      %12 = vector.broadcast %cst_9 : f32 to vector<128x32xf32>
      %c0_10 = arith.constant 0 : index
      %c0_11 = arith.constant 0 : index
      %13 = vector.load %arg9[%c0_10, %c0_11] : memref<128x32xf32, #tpu.memory_space<vmem>>, vector<128x32xf32>
      tpu.vector_store %arg9[%c0_10, %c0_11], %12 {strides = array<i32>} : memref<128x32xf32, #tpu.memory_space<vmem>>, vector<128x32xf32>,
    } else {
    }
    %c0 = arith.constant 0 : index
    %c0_1 = arith.constant 0 : index
    %3 = vector.load %arg2[%c0, %c0_1] : memref<128x384xbf16, #tpu.memory_space<vmem>>, vector<128x384xbf16>
    %c0_2 = arith.constant 0 : index
    %c0_3 = arith.constant 0 : index
    %4 = vector.load %arg9[%c0_2, %c0_3] : memref<128x32xf32, #tpu.memory_space<vmem>>, vector<128x32xf32>
    %c0_4 = arith.constant 0 : index
    %c0_5 = arith.constant 0 : index
    %5 = vector.load %arg3[%c0_4, %c0_5] : memref<384x32xbf16, #tpu.memory_space<vmem>>, vector<384x32xbf16>
    %cst = arith.constant dense<0.000000e+00> : vector<128x32xf32>
    %6 = tpu.matmul %3, %5, %cst {dimension_numbers = #tpu.dot_dimension_numbers<[1], [0], [0], [1], [0, 0, 1, 1], [], []>} : vector<128x384xbf16>, vector<384x32xbf16>, vector<128x32xf32> -> vector<128x32xf32>
    %7 = arith.addf %4, %6 : vector<128x32xf32>
    %c0_6 = arith.constant 0 : index
    %c0_7 = arith.constant 0 : index
    %8 = vector.load %arg9[%c0_6, %c0_7] : memref<128x32xf32, #tpu.memory_space<vmem>>, vector<128x32xf32>
    tpu.vector_store %arg9[%c0_6, %c0_7], %7 {strides = array<i32>} : memref<128x32xf32, #tpu.memory_space<vmem>>, vector<128x32xf32>,
    %c2_i32 = arith.constant 2 : i32
    %9 = arith.cmpi eq, %arg1, %c2_i32 : i32
    %10 = arith.extui %9 : i1 to i32
    %c0_i32_8 = arith.constant 0 : i32
    %11 = arith.cmpi ne, %10, %c0_i32_8 : i32
    scf.if %11 {
      %c0_9 = arith.constant 0 : index
      %c0_10 = arith.constant 0 : index
      %12 = vector.load %arg9[%c0_9, %c0_10] : memref<128x32xf32, #tpu.memory_space<vmem>>, vector<128x32xf32>
      %13 = arith.truncf %12 : vector<128x32xf32> to vector<128x32xbf16>
      %c0_11 = arith.constant 0 : index
      %c0_12 = arith.constant 0 : index
      %14 = vector.load %arg8[%c0_11, %c0_12] : memref<128x32xbf16, #tpu.memory_space<vmem>>, vector<128x32xbf16>
      tpu.vector_store %arg8[%c0_11, %c0_12], %13 {strides = array<i32>} : memref<128x32xbf16, #tpu.memory_space<vmem>>, vector<128x32xbf16>,
    } else {
    }
    return
  }
  func.func @transform_0(%arg0: i32, %arg1: i32) -> (i32, i32) {
    %c0_i32 = arith.constant 0 : i32
    return %arg0, %arg1 : i32, i32
  }
  func.func @transform_1(%arg0: i32, %arg1: i32) -> (i32, i32) {
    %c0_i32 = arith.constant 0 : i32
    %c0_i32_0 = arith.constant 0 : i32
    return %arg1, %c0_i32 : i32, i32
  }
  func.func @transform_2(%arg0: i32, %arg1: i32) -> (i32, i32) {
    %c0_i32 = arith.constant 0 : i32
    %c0_i32_0 = arith.constant 0 : i32
    return %c0_i32, %arg1 : i32, i32
  }
  func.func @transform_3(%arg0: i32, %arg1: i32) -> (i32, i32) {
    %c0_i32 = arith.constant 0 : i32
    %c0_i32_0 = arith.constant 0 : i32
    return %c0_i32, %arg1 : i32, i32
  }
  func.func @transform_4(%arg0: i32, %arg1: i32) -> (i32, i32) {
    %c0_i32 = arith.constant 0 : i32
    %c0_i32_0 = arith.constant 0 : i32
    %c0_i32_1 = arith.constant 0 : i32
    return %c0_i32, %c0_i32_0 : i32, i32
  }
  func.func @transform_5(%arg0: i32, %arg1: i32) -> (i32, i32) {
    %c0_i32 = arith.constant 0 : i32
    %c0_i32_0 = arith.constant 0 : i32
    %c0_i32_1 = arith.constant 0 : i32
    return %c0_i32, %c0_i32_0 : i32, i32
  }
  func.func @transform_6(%arg0: i32, %arg1: i32) -> (i32, i32) {
    %c0_i32 = arith.constant 0 : i32
    %c0_i32_0 = arith.constant 0 : i32
    return %arg0, %c0_i32 : i32, i32
  }
}

module attributes {stable_mosaic.version = 11 : i64} {
  func.func @_fused_mm_kernel(%arg0: i32, %arg1: i32, %arg2: memref<128x256xbf16, #tpu.memory_space<vmem>>, %arg3: memref<256x128xbf16, #tpu.memory_space<vmem>>, %arg4: memref<1x256xf32, #tpu.memory_space<vmem>>, %arg5: memref<1x256xf32, #tpu.memory_space<vmem>>, %arg6: memref<1x128xf32, #tpu.memory_space<vmem>>, %arg7: memref<1x128xf32, #tpu.memory_space<vmem>>, %arg8: memref<128x128xbf16, #tpu.memory_space<vmem>>, %arg9: memref<128x128xf32, #tpu.memory_space<vmem>>) attributes {dimension_semantics = [#tpu.dimension_semantics<parallel>, #tpu.dimension_semantics<arbitrary>], iteration_bounds = array<i64: 1, 1>, scalar_prefetch = 0 : i64, scratch_operands = 1 : i64, tpu.core_type = #tpu.core_type<tc>, window_params = [{transform_indices = @transform_0, window_bounds = array<i64: 128, 256>}, {transform_indices = @transform_1, window_bounds = array<i64: 256, 128>}, {transform_indices = @transform_2, window_bounds = array<i64: 1, 256>}, {transform_indices = @transform_3, window_bounds = array<i64: 1, 256>}, {pipeline_mode = #tpu.pipeline_mode<synchronous>, transform_indices = @transform_4, window_bounds = array<i64: 1, 128>}, {pipeline_mode = #tpu.pipeline_mode<synchronous>, transform_indices = @transform_5, window_bounds = array<i64: 1, 128>}, {transform_indices = @transform_6, window_bounds = array<i64: 128, 128>}]} {
    %c0_i32 = arith.constant 0 : i32
    %0 = arith.cmpi eq, %arg1, %c0_i32 : i32
    %1 = arith.extui %0 : i1 to i32
    %c0_i32_0 = arith.constant 0 : i32
    %2 = arith.cmpi ne, %1, %c0_i32_0 : i32
    scf.if %2 {
      %cst_15 = arith.constant 0.000000e+00 : f32
      %22 = vector.broadcast %cst_15 : f32 to vector<128x128xf32>
      %c0_16 = arith.constant 0 : index
      %c0_17 = arith.constant 0 : index
      %23 = vector.load %arg9[%c0_16, %c0_17] : memref<128x128xf32, #tpu.memory_space<vmem>>, vector<128x128xf32>
      tpu.vector_store %arg9[%c0_16, %c0_17], %22 {strides = array<i32>} : memref<128x128xf32, #tpu.memory_space<vmem>>, vector<128x128xf32>,
    } else {
    }
    %c0 = arith.constant 0 : index
    %c0_1 = arith.constant 0 : index
    %3 = vector.load %arg2[%c0, %c0_1] : memref<128x256xbf16, #tpu.memory_space<vmem>>, vector<128x256xbf16>
    %4 = arith.extf %3 : vector<128x256xbf16> to vector<128x256xf32>
    %c0_2 = arith.constant 0 : index
    %c0_3 = arith.constant 0 : index
    %5 = vector.load %arg4[%c0_2, %c0_3] : memref<1x256xf32, #tpu.memory_space<vmem>>, vector<1x256xf32>
    %6 = vector.broadcast %5 : vector<1x256xf32> to vector<128x256xf32>
    %7 = arith.mulf %4, %6 : vector<128x256xf32>
    %c0_4 = arith.constant 0 : index
    %c0_5 = arith.constant 0 : index
    %8 = vector.load %arg5[%c0_4, %c0_5] : memref<1x256xf32, #tpu.memory_space<vmem>>, vector<1x256xf32>
    %9 = vector.broadcast %8 : vector<1x256xf32> to vector<128x256xf32>
    %10 = arith.addf %7, %9 : vector<128x256xf32>
    %cst = arith.constant 0.000000e+00 : f32
    %11 = vector.broadcast %cst : f32 to vector<128x256xf32>
    %12 = arith.maximumf %10, %11 : vector<128x256xf32>
    %13 = arith.truncf %12 : vector<128x256xf32> to vector<128x256xbf16>
    %c0_6 = arith.constant 0 : index
    %c0_7 = arith.constant 0 : index
    %14 = vector.load %arg9[%c0_6, %c0_7] : memref<128x128xf32, #tpu.memory_space<vmem>>, vector<128x128xf32>
    %c0_8 = arith.constant 0 : index
    %c0_9 = arith.constant 0 : index
    %15 = vector.load %arg3[%c0_8, %c0_9] : memref<256x128xbf16, #tpu.memory_space<vmem>>, vector<256x128xbf16>
    %cst_10 = arith.constant dense<0.000000e+00> : vector<128x128xf32>
    %16 = tpu.matmul %13, %15, %cst_10 {dimension_numbers = #tpu.dot_dimension_numbers<[1], [0], [0], [1], [0, 0, 1, 1], [], []>} : vector<128x256xbf16>, vector<256x128xbf16>, vector<128x128xf32> -> vector<128x128xf32>
    %17 = arith.addf %14, %16 : vector<128x128xf32>
    %c0_11 = arith.constant 0 : index
    %c0_12 = arith.constant 0 : index
    %18 = vector.load %arg9[%c0_11, %c0_12] : memref<128x128xf32, #tpu.memory_space<vmem>>, vector<128x128xf32>
    tpu.vector_store %arg9[%c0_11, %c0_12], %17 {strides = array<i32>} : memref<128x128xf32, #tpu.memory_space<vmem>>, vector<128x128xf32>,
    %c0_i32_13 = arith.constant 0 : i32
    %19 = arith.cmpi eq, %arg1, %c0_i32_13 : i32
    %20 = arith.extui %19 : i1 to i32
    %c0_i32_14 = arith.constant 0 : i32
    %21 = arith.cmpi ne, %20, %c0_i32_14 : i32
    scf.if %21 {
      %c0_15 = arith.constant 0 : index
      %c0_16 = arith.constant 0 : index
      %22 = vector.load %arg9[%c0_15, %c0_16] : memref<128x128xf32, #tpu.memory_space<vmem>>, vector<128x128xf32>
      %23 = arith.truncf %22 : vector<128x128xf32> to vector<128x128xbf16>
      %c0_17 = arith.constant 0 : index
      %c0_18 = arith.constant 0 : index
      %24 = vector.load %arg8[%c0_17, %c0_18] : memref<128x128xbf16, #tpu.memory_space<vmem>>, vector<128x128xbf16>
      tpu.vector_store %arg8[%c0_17, %c0_18], %23 {strides = array<i32>} : memref<128x128xbf16, #tpu.memory_space<vmem>>, vector<128x128xbf16>,
    } else {
    }
    return
  }
  func.func @transform_0(%arg0: i32, %arg1: i32) -> (i32, i32) {
    %c0_i32 = arith.constant 0 : i32
    return %arg0, %arg1 : i32, i32
  }
  func.func @transform_1(%arg0: i32, %arg1: i32) -> (i32, i32) {
    %c0_i32 = arith.constant 0 : i32
    %c0_i32_0 = arith.constant 0 : i32
    return %arg1, %c0_i32 : i32, i32
  }
  func.func @transform_2(%arg0: i32, %arg1: i32) -> (i32, i32) {
    %c0_i32 = arith.constant 0 : i32
    %c0_i32_0 = arith.constant 0 : i32
    return %c0_i32, %arg1 : i32, i32
  }
  func.func @transform_3(%arg0: i32, %arg1: i32) -> (i32, i32) {
    %c0_i32 = arith.constant 0 : i32
    %c0_i32_0 = arith.constant 0 : i32
    return %c0_i32, %arg1 : i32, i32
  }
  func.func @transform_4(%arg0: i32, %arg1: i32) -> (i32, i32) {
    %c0_i32 = arith.constant 0 : i32
    %c0_i32_0 = arith.constant 0 : i32
    %c0_i32_1 = arith.constant 0 : i32
    return %c0_i32, %c0_i32_0 : i32, i32
  }
  func.func @transform_5(%arg0: i32, %arg1: i32) -> (i32, i32) {
    %c0_i32 = arith.constant 0 : i32
    %c0_i32_0 = arith.constant 0 : i32
    %c0_i32_1 = arith.constant 0 : i32
    return %c0_i32, %c0_i32_0 : i32, i32
  }
  func.func @transform_6(%arg0: i32, %arg1: i32) -> (i32, i32) {
    %c0_i32 = arith.constant 0 : i32
    %c0_i32_0 = arith.constant 0 : i32
    return %arg0, %c0_i32 : i32, i32
  }
}

module attributes {stable_mosaic.version = 11 : i64} {
  func.func @_fused_mm_kernel(%arg0: i32, %arg1: i32, %arg2: memref<32x128xbf16, #tpu.memory_space<vmem>>, %arg3: memref<128x128xbf16, #tpu.memory_space<vmem>>, %arg4: memref<1x128xf32, #tpu.memory_space<vmem>>, %arg5: memref<1x128xf32, #tpu.memory_space<vmem>>, %arg6: memref<1x128xf32, #tpu.memory_space<vmem>>, %arg7: memref<1x128xf32, #tpu.memory_space<vmem>>, %arg8: memref<32x128xbf16, #tpu.memory_space<vmem>>, %arg9: memref<32x128xf32, #tpu.memory_space<vmem>>) attributes {dimension_semantics = [#tpu.dimension_semantics<parallel>, #tpu.dimension_semantics<arbitrary>], iteration_bounds = array<i64: 1, 1>, scalar_prefetch = 0 : i64, scratch_operands = 1 : i64, tpu.core_type = #tpu.core_type<tc>, window_params = [{transform_indices = @transform_0, window_bounds = array<i64: 32, 128>}, {transform_indices = @transform_1, window_bounds = array<i64: 128, 128>}, {transform_indices = @transform_2, window_bounds = array<i64: 1, 128>}, {transform_indices = @transform_3, window_bounds = array<i64: 1, 128>}, {pipeline_mode = #tpu.pipeline_mode<synchronous>, transform_indices = @transform_4, window_bounds = array<i64: 1, 128>}, {pipeline_mode = #tpu.pipeline_mode<synchronous>, transform_indices = @transform_5, window_bounds = array<i64: 1, 128>}, {transform_indices = @transform_6, window_bounds = array<i64: 32, 128>}]} {
    %c0_i32 = arith.constant 0 : i32
    %0 = arith.cmpi eq, %arg1, %c0_i32 : i32
    %1 = arith.extui %0 : i1 to i32
    %c0_i32_0 = arith.constant 0 : i32
    %2 = arith.cmpi ne, %1, %c0_i32_0 : i32
    scf.if %2 {
      %cst_15 = arith.constant 0.000000e+00 : f32
      %22 = vector.broadcast %cst_15 : f32 to vector<32x128xf32>
      %c0_16 = arith.constant 0 : index
      %c0_17 = arith.constant 0 : index
      %23 = vector.load %arg9[%c0_16, %c0_17] : memref<32x128xf32, #tpu.memory_space<vmem>>, vector<32x128xf32>
      tpu.vector_store %arg9[%c0_16, %c0_17], %22 {strides = array<i32>} : memref<32x128xf32, #tpu.memory_space<vmem>>, vector<32x128xf32>,
    } else {
    }
    %c0 = arith.constant 0 : index
    %c0_1 = arith.constant 0 : index
    %3 = vector.load %arg2[%c0, %c0_1] : memref<32x128xbf16, #tpu.memory_space<vmem>>, vector<32x128xbf16>
    %4 = arith.extf %3 : vector<32x128xbf16> to vector<32x128xf32>
    %c0_2 = arith.constant 0 : index
    %c0_3 = arith.constant 0 : index
    %5 = vector.load %arg4[%c0_2, %c0_3] : memref<1x128xf32, #tpu.memory_space<vmem>>, vector<1x128xf32>
    %6 = vector.broadcast %5 : vector<1x128xf32> to vector<32x128xf32>
    %7 = arith.mulf %4, %6 : vector<32x128xf32>
    %c0_4 = arith.constant 0 : index
    %c0_5 = arith.constant 0 : index
    %8 = vector.load %arg5[%c0_4, %c0_5] : memref<1x128xf32, #tpu.memory_space<vmem>>, vector<1x128xf32>
    %9 = vector.broadcast %8 : vector<1x128xf32> to vector<32x128xf32>
    %10 = arith.addf %7, %9 : vector<32x128xf32>
    %cst = arith.constant 0.000000e+00 : f32
    %11 = vector.broadcast %cst : f32 to vector<32x128xf32>
    %12 = arith.maximumf %10, %11 : vector<32x128xf32>
    %13 = arith.truncf %12 : vector<32x128xf32> to vector<32x128xbf16>
    %c0_6 = arith.constant 0 : index
    %c0_7 = arith.constant 0 : index
    %14 = vector.load %arg9[%c0_6, %c0_7] : memref<32x128xf32, #tpu.memory_space<vmem>>, vector<32x128xf32>
    %c0_8 = arith.constant 0 : index
    %c0_9 = arith.constant 0 : index
    %15 = vector.load %arg3[%c0_8, %c0_9] : memref<128x128xbf16, #tpu.memory_space<vmem>>, vector<128x128xbf16>
    %cst_10 = arith.constant dense<0.000000e+00> : vector<32x128xf32>
    %16 = tpu.matmul %13, %15, %cst_10 {dimension_numbers = #tpu.dot_dimension_numbers<[1], [0], [0], [1], [0, 0, 1, 1], [], []>} : vector<32x128xbf16>, vector<128x128xbf16>, vector<32x128xf32> -> vector<32x128xf32>
    %17 = arith.addf %14, %16 : vector<32x128xf32>
    %c0_11 = arith.constant 0 : index
    %c0_12 = arith.constant 0 : index
    %18 = vector.load %arg9[%c0_11, %c0_12] : memref<32x128xf32, #tpu.memory_space<vmem>>, vector<32x128xf32>
    tpu.vector_store %arg9[%c0_11, %c0_12], %17 {strides = array<i32>} : memref<32x128xf32, #tpu.memory_space<vmem>>, vector<32x128xf32>,
    %c0_i32_13 = arith.constant 0 : i32
    %19 = arith.cmpi eq, %arg1, %c0_i32_13 : i32
    %20 = arith.extui %19 : i1 to i32
    %c0_i32_14 = arith.constant 0 : i32
    %21 = arith.cmpi ne, %20, %c0_i32_14 : i32
    scf.if %21 {
      %c0_15 = arith.constant 0 : index
      %c0_16 = arith.constant 0 : index
      %22 = vector.load %arg9[%c0_15, %c0_16] : memref<32x128xf32, #tpu.memory_space<vmem>>, vector<32x128xf32>
      %c0_17 = arith.constant 0 : index
      %c0_18 = arith.constant 0 : index
      %23 = vector.load %arg6[%c0_17, %c0_18] : memref<1x128xf32, #tpu.memory_space<vmem>>, vector<1x128xf32>
      %24 = vector.broadcast %23 : vector<1x128xf32> to vector<32x128xf32>
      %25 = arith.mulf %22, %24 : vector<32x128xf32>
      %c0_19 = arith.constant 0 : index
      %c0_20 = arith.constant 0 : index
      %26 = vector.load %arg7[%c0_19, %c0_20] : memref<1x128xf32, #tpu.memory_space<vmem>>, vector<1x128xf32>
      %27 = vector.broadcast %26 : vector<1x128xf32> to vector<32x128xf32>
      %28 = arith.addf %25, %27 : vector<32x128xf32>
      %cst_21 = arith.constant 0.000000e+00 : f32
      %29 = vector.broadcast %cst_21 : f32 to vector<32x128xf32>
      %30 = arith.maximumf %28, %29 : vector<32x128xf32>
      %31 = arith.truncf %30 : vector<32x128xf32> to vector<32x128xbf16>
      %c0_22 = arith.constant 0 : index
      %c0_23 = arith.constant 0 : index
      %32 = vector.load %arg8[%c0_22, %c0_23] : memref<32x128xbf16, #tpu.memory_space<vmem>>, vector<32x128xbf16>
      tpu.vector_store %arg8[%c0_22, %c0_23], %31 {strides = array<i32>} : memref<32x128xbf16, #tpu.memory_space<vmem>>, vector<32x128xbf16>,
    } else {
    }
    return
  }
  func.func @transform_0(%arg0: i32, %arg1: i32) -> (i32, i32) {
    %c0_i32 = arith.constant 0 : i32
    return %arg0, %arg1 : i32, i32
  }
  func.func @transform_1(%arg0: i32, %arg1: i32) -> (i32, i32) {
    %c0_i32 = arith.constant 0 : i32
    %c0_i32_0 = arith.constant 0 : i32
    return %arg1, %c0_i32 : i32, i32
  }
  func.func @transform_2(%arg0: i32, %arg1: i32) -> (i32, i32) {
    %c0_i32 = arith.constant 0 : i32
    %c0_i32_0 = arith.constant 0 : i32
    return %c0_i32, %arg1 : i32, i32
  }
  func.func @transform_3(%arg0: i32, %arg1: i32) -> (i32, i32) {
    %c0_i32 = arith.constant 0 : i32
    %c0_i32_0 = arith.constant 0 : i32
    return %c0_i32, %arg1 : i32, i32
  }
  func.func @transform_4(%arg0: i32, %arg1: i32) -> (i32, i32) {
    %c0_i32 = arith.constant 0 : i32
    %c0_i32_0 = arith.constant 0 : i32
    %c0_i32_1 = arith.constant 0 : i32
    return %c0_i32, %c0_i32_0 : i32, i32
  }
  func.func @transform_5(%arg0: i32, %arg1: i32) -> (i32, i32) {
    %c0_i32 = arith.constant 0 : i32
    %c0_i32_0 = arith.constant 0 : i32
    %c0_i32_1 = arith.constant 0 : i32
    return %c0_i32, %c0_i32_0 : i32, i32
  }
  func.func @transform_6(%arg0: i32, %arg1: i32) -> (i32, i32) {
    %c0_i32 = arith.constant 0 : i32
    %c0_i32_0 = arith.constant 0 : i32
    return %arg0, %c0_i32 : i32, i32
  }
}

module attributes {stable_mosaic.version = 11 : i64} {
  func.func @_pool_kernel(%arg0: i32, %arg1: memref<32x128xbf16, #tpu.memory_space<vmem>>, %arg2: memref<32x128xbf16, #tpu.memory_space<vmem>>, %arg3: memref<32x128xbf16, #tpu.memory_space<vmem>>, %arg4: memref<32x128xbf16, #tpu.memory_space<vmem>>, %arg5: memref<32x128xbf16, #tpu.memory_space<vmem>>) attributes {dimension_semantics = [#tpu.dimension_semantics<parallel>], iteration_bounds = array<i64: 1>, scalar_prefetch = 0 : i64, scratch_operands = 0 : i64, tpu.core_type = #tpu.core_type<tc>, window_params = [{transform_indices = @transform_0, window_bounds = array<i64: 32, 128>}, {transform_indices = @transform_1, window_bounds = array<i64: 32, 128>}, {transform_indices = @transform_2, window_bounds = array<i64: 32, 128>}, {transform_indices = @transform_3, window_bounds = array<i64: 32, 128>}, {transform_indices = @transform_4, window_bounds = array<i64: 32, 128>}]} {
    %c0 = arith.constant 0 : index
    %c0_0 = arith.constant 0 : index
    %0 = vector.load %arg1[%c0, %c0_0] : memref<32x128xbf16, #tpu.memory_space<vmem>>, vector<32x128xbf16>
    %1 = arith.extf %0 : vector<32x128xbf16> to vector<32x128xf32>
    %c0_1 = arith.constant 0 : index
    %c0_2 = arith.constant 0 : index
    %2 = vector.load %arg2[%c0_1, %c0_2] : memref<32x128xbf16, #tpu.memory_space<vmem>>, vector<32x128xbf16>
    %3 = arith.extf %2 : vector<32x128xbf16> to vector<32x128xf32>
    %4 = arith.addf %1, %3 : vector<32x128xf32>
    %c0_3 = arith.constant 0 : index
    %c0_4 = arith.constant 0 : index
    %5 = vector.load %arg3[%c0_3, %c0_4] : memref<32x128xbf16, #tpu.memory_space<vmem>>, vector<32x128xbf16>
    %6 = arith.extf %5 : vector<32x128xbf16> to vector<32x128xf32>
    %7 = arith.addf %4, %6 : vector<32x128xf32>
    %c0_5 = arith.constant 0 : index
    %c0_6 = arith.constant 0 : index
    %8 = vector.load %arg4[%c0_5, %c0_6] : memref<32x128xbf16, #tpu.memory_space<vmem>>, vector<32x128xbf16>
    %9 = arith.extf %8 : vector<32x128xbf16> to vector<32x128xf32>
    %10 = arith.addf %7, %9 : vector<32x128xf32>
    %cst = arith.constant 2.500000e-01 : f32
    %11 = vector.broadcast %cst : f32 to vector<32x128xf32>
    %12 = arith.mulf %10, %11 : vector<32x128xf32>
    %13 = arith.truncf %12 : vector<32x128xf32> to vector<32x128xbf16>
    %c0_7 = arith.constant 0 : index
    %c0_8 = arith.constant 0 : index
    %14 = vector.load %arg5[%c0_7, %c0_8] : memref<32x128xbf16, #tpu.memory_space<vmem>>, vector<32x128xbf16>
    tpu.vector_store %arg5[%c0_7, %c0_8], %13 {strides = array<i32>} : memref<32x128xbf16, #tpu.memory_space<vmem>>, vector<32x128xbf16>,
    return
  }
  func.func @transform_0(%arg0: i32) -> (i32, i32) {
    %c0_i32 = arith.constant 0 : i32
    %c0_i32_0 = arith.constant 0 : i32
    return %arg0, %c0_i32 : i32, i32
  }
  func.func @transform_1(%arg0: i32) -> (i32, i32) {
    %c0_i32 = arith.constant 0 : i32
    %c0_i32_0 = arith.constant 0 : i32
    return %arg0, %c0_i32 : i32, i32
  }
  func.func @transform_2(%arg0: i32) -> (i32, i32) {
    %c0_i32 = arith.constant 0 : i32
    %c0_i32_0 = arith.constant 0 : i32
    return %arg0, %c0_i32 : i32, i32
  }
  func.func @transform_3(%arg0: i32) -> (i32, i32) {
    %c0_i32 = arith.constant 0 : i32
    %c0_i32_0 = arith.constant 0 : i32
    return %arg0, %c0_i32 : i32, i32
  }
  func.func @transform_4(%arg0: i32) -> (i32, i32) {
    %c0_i32 = arith.constant 0 : i32
    %c0_i32_0 = arith.constant 0 : i32
    return %arg0, %c0_i32 : i32, i32
  }
}

module attributes {stable_mosaic.version = 11 : i64} {
  func.func @_fused_mm_kernel(%arg0: i32, %arg1: i32, %arg2: memref<32x256xbf16, #tpu.memory_space<vmem>>, %arg3: memref<256x128xbf16, #tpu.memory_space<vmem>>, %arg4: memref<1x256xf32, #tpu.memory_space<vmem>>, %arg5: memref<1x256xf32, #tpu.memory_space<vmem>>, %arg6: memref<1x128xf32, #tpu.memory_space<vmem>>, %arg7: memref<1x128xf32, #tpu.memory_space<vmem>>, %arg8: memref<32x128xbf16, #tpu.memory_space<vmem>>, %arg9: memref<32x128xf32, #tpu.memory_space<vmem>>) attributes {dimension_semantics = [#tpu.dimension_semantics<parallel>, #tpu.dimension_semantics<arbitrary>], iteration_bounds = array<i64: 1, 1>, scalar_prefetch = 0 : i64, scratch_operands = 1 : i64, tpu.core_type = #tpu.core_type<tc>, window_params = [{transform_indices = @transform_0, window_bounds = array<i64: 32, 256>}, {transform_indices = @transform_1, window_bounds = array<i64: 256, 128>}, {transform_indices = @transform_2, window_bounds = array<i64: 1, 256>}, {transform_indices = @transform_3, window_bounds = array<i64: 1, 256>}, {pipeline_mode = #tpu.pipeline_mode<synchronous>, transform_indices = @transform_4, window_bounds = array<i64: 1, 128>}, {pipeline_mode = #tpu.pipeline_mode<synchronous>, transform_indices = @transform_5, window_bounds = array<i64: 1, 128>}, {transform_indices = @transform_6, window_bounds = array<i64: 32, 128>}]} {
    %c0_i32 = arith.constant 0 : i32
    %0 = arith.cmpi eq, %arg1, %c0_i32 : i32
    %1 = arith.extui %0 : i1 to i32
    %c0_i32_0 = arith.constant 0 : i32
    %2 = arith.cmpi ne, %1, %c0_i32_0 : i32
    scf.if %2 {
      %cst_15 = arith.constant 0.000000e+00 : f32
      %22 = vector.broadcast %cst_15 : f32 to vector<32x128xf32>
      %c0_16 = arith.constant 0 : index
      %c0_17 = arith.constant 0 : index
      %23 = vector.load %arg9[%c0_16, %c0_17] : memref<32x128xf32, #tpu.memory_space<vmem>>, vector<32x128xf32>
      tpu.vector_store %arg9[%c0_16, %c0_17], %22 {strides = array<i32>} : memref<32x128xf32, #tpu.memory_space<vmem>>, vector<32x128xf32>,
    } else {
    }
    %c0 = arith.constant 0 : index
    %c0_1 = arith.constant 0 : index
    %3 = vector.load %arg2[%c0, %c0_1] : memref<32x256xbf16, #tpu.memory_space<vmem>>, vector<32x256xbf16>
    %4 = arith.extf %3 : vector<32x256xbf16> to vector<32x256xf32>
    %c0_2 = arith.constant 0 : index
    %c0_3 = arith.constant 0 : index
    %5 = vector.load %arg4[%c0_2, %c0_3] : memref<1x256xf32, #tpu.memory_space<vmem>>, vector<1x256xf32>
    %6 = vector.broadcast %5 : vector<1x256xf32> to vector<32x256xf32>
    %7 = arith.mulf %4, %6 : vector<32x256xf32>
    %c0_4 = arith.constant 0 : index
    %c0_5 = arith.constant 0 : index
    %8 = vector.load %arg5[%c0_4, %c0_5] : memref<1x256xf32, #tpu.memory_space<vmem>>, vector<1x256xf32>
    %9 = vector.broadcast %8 : vector<1x256xf32> to vector<32x256xf32>
    %10 = arith.addf %7, %9 : vector<32x256xf32>
    %cst = arith.constant 0.000000e+00 : f32
    %11 = vector.broadcast %cst : f32 to vector<32x256xf32>
    %12 = arith.maximumf %10, %11 : vector<32x256xf32>
    %13 = arith.truncf %12 : vector<32x256xf32> to vector<32x256xbf16>
    %c0_6 = arith.constant 0 : index
    %c0_7 = arith.constant 0 : index
    %14 = vector.load %arg9[%c0_6, %c0_7] : memref<32x128xf32, #tpu.memory_space<vmem>>, vector<32x128xf32>
    %c0_8 = arith.constant 0 : index
    %c0_9 = arith.constant 0 : index
    %15 = vector.load %arg3[%c0_8, %c0_9] : memref<256x128xbf16, #tpu.memory_space<vmem>>, vector<256x128xbf16>
    %cst_10 = arith.constant dense<0.000000e+00> : vector<32x128xf32>
    %16 = tpu.matmul %13, %15, %cst_10 {dimension_numbers = #tpu.dot_dimension_numbers<[1], [0], [0], [1], [0, 0, 1, 1], [], []>} : vector<32x256xbf16>, vector<256x128xbf16>, vector<32x128xf32> -> vector<32x128xf32>
    %17 = arith.addf %14, %16 : vector<32x128xf32>
    %c0_11 = arith.constant 0 : index
    %c0_12 = arith.constant 0 : index
    %18 = vector.load %arg9[%c0_11, %c0_12] : memref<32x128xf32, #tpu.memory_space<vmem>>, vector<32x128xf32>
    tpu.vector_store %arg9[%c0_11, %c0_12], %17 {strides = array<i32>} : memref<32x128xf32, #tpu.memory_space<vmem>>, vector<32x128xf32>,
    %c0_i32_13 = arith.constant 0 : i32
    %19 = arith.cmpi eq, %arg1, %c0_i32_13 : i32
    %20 = arith.extui %19 : i1 to i32
    %c0_i32_14 = arith.constant 0 : i32
    %21 = arith.cmpi ne, %20, %c0_i32_14 : i32
    scf.if %21 {
      %c0_15 = arith.constant 0 : index
      %c0_16 = arith.constant 0 : index
      %22 = vector.load %arg9[%c0_15, %c0_16] : memref<32x128xf32, #tpu.memory_space<vmem>>, vector<32x128xf32>
      %c0_17 = arith.constant 0 : index
      %c0_18 = arith.constant 0 : index
      %23 = vector.load %arg6[%c0_17, %c0_18] : memref<1x128xf32, #tpu.memory_space<vmem>>, vector<1x128xf32>
      %24 = vector.broadcast %23 : vector<1x128xf32> to vector<32x128xf32>
      %25 = arith.mulf %22, %24 : vector<32x128xf32>
      %c0_19 = arith.constant 0 : index
      %c0_20 = arith.constant 0 : index
      %26 = vector.load %arg7[%c0_19, %c0_20] : memref<1x128xf32, #tpu.memory_space<vmem>>, vector<1x128xf32>
      %27 = vector.broadcast %26 : vector<1x128xf32> to vector<32x128xf32>
      %28 = arith.addf %25, %27 : vector<32x128xf32>
      %cst_21 = arith.constant 0.000000e+00 : f32
      %29 = vector.broadcast %cst_21 : f32 to vector<32x128xf32>
      %30 = arith.maximumf %28, %29 : vector<32x128xf32>
      %31 = arith.truncf %30 : vector<32x128xf32> to vector<32x128xbf16>
      %c0_22 = arith.constant 0 : index
      %c0_23 = arith.constant 0 : index
      %32 = vector.load %arg8[%c0_22, %c0_23] : memref<32x128xbf16, #tpu.memory_space<vmem>>, vector<32x128xbf16>
      tpu.vector_store %arg8[%c0_22, %c0_23], %31 {strides = array<i32>} : memref<32x128xbf16, #tpu.memory_space<vmem>>, vector<32x128xbf16>,
    } else {
    }
    return
  }
  func.func @transform_0(%arg0: i32, %arg1: i32) -> (i32, i32) {
    %c0_i32 = arith.constant 0 : i32
    return %arg0, %arg1 : i32, i32
  }
  func.func @transform_1(%arg0: i32, %arg1: i32) -> (i32, i32) {
    %c0_i32 = arith.constant 0 : i32
    %c0_i32_0 = arith.constant 0 : i32
    return %arg1, %c0_i32 : i32, i32
  }
  func.func @transform_2(%arg0: i32, %arg1: i32) -> (i32, i32) {
    %c0_i32 = arith.constant 0 : i32
    %c0_i32_0 = arith.constant 0 : i32
    return %c0_i32, %arg1 : i32, i32
  }
  func.func @transform_3(%arg0: i32, %arg1: i32) -> (i32, i32) {
    %c0_i32 = arith.constant 0 : i32
    %c0_i32_0 = arith.constant 0 : i32
    return %c0_i32, %arg1 : i32, i32
  }
  func.func @transform_4(%arg0: i32, %arg1: i32) -> (i32, i32) {
    %c0_i32 = arith.constant 0 : i32
    %c0_i32_0 = arith.constant 0 : i32
    %c0_i32_1 = arith.constant 0 : i32
    return %c0_i32, %c0_i32_0 : i32, i32
  }
  func.func @transform_5(%arg0: i32, %arg1: i32) -> (i32, i32) {
    %c0_i32 = arith.constant 0 : i32
    %c0_i32_0 = arith.constant 0 : i32
    %c0_i32_1 = arith.constant 0 : i32
    return %c0_i32, %c0_i32_0 : i32, i32
  }
  func.func @transform_6(%arg0: i32, %arg1: i32) -> (i32, i32) {
    %c0_i32 = arith.constant 0 : i32
    %c0_i32_0 = arith.constant 0 : i32
    return %arg0, %c0_i32 : i32, i32
  }
}

module attributes {stable_mosaic.version = 11 : i64} {
  func.func @_fused_mm_kernel(%arg0: i32, %arg1: i32, %arg2: memref<32x384xbf16, #tpu.memory_space<vmem>>, %arg3: memref<384x32xbf16, #tpu.memory_space<vmem>>, %arg4: memref<1x384xf32, #tpu.memory_space<vmem>>, %arg5: memref<1x384xf32, #tpu.memory_space<vmem>>, %arg6: memref<1x32xf32, #tpu.memory_space<vmem>>, %arg7: memref<1x32xf32, #tpu.memory_space<vmem>>, %arg8: memref<32x32xbf16, #tpu.memory_space<vmem>>, %arg9: memref<32x32xf32, #tpu.memory_space<vmem>>) attributes {dimension_semantics = [#tpu.dimension_semantics<parallel>, #tpu.dimension_semantics<arbitrary>], iteration_bounds = array<i64: 1, 3>, scalar_prefetch = 0 : i64, scratch_operands = 1 : i64, tpu.core_type = #tpu.core_type<tc>, window_params = [{transform_indices = @transform_0, window_bounds = array<i64: 32, 384>}, {transform_indices = @transform_1, window_bounds = array<i64: 384, 32>}, {transform_indices = @transform_2, window_bounds = array<i64: 1, 384>}, {transform_indices = @transform_3, window_bounds = array<i64: 1, 384>}, {pipeline_mode = #tpu.pipeline_mode<synchronous>, transform_indices = @transform_4, window_bounds = array<i64: 1, 32>}, {pipeline_mode = #tpu.pipeline_mode<synchronous>, transform_indices = @transform_5, window_bounds = array<i64: 1, 32>}, {transform_indices = @transform_6, window_bounds = array<i64: 32, 32>}]} {
    %c0_i32 = arith.constant 0 : i32
    %0 = arith.cmpi eq, %arg1, %c0_i32 : i32
    %1 = arith.extui %0 : i1 to i32
    %c0_i32_0 = arith.constant 0 : i32
    %2 = arith.cmpi ne, %1, %c0_i32_0 : i32
    scf.if %2 {
      %cst_9 = arith.constant 0.000000e+00 : f32
      %12 = vector.broadcast %cst_9 : f32 to vector<32x32xf32>
      %c0_10 = arith.constant 0 : index
      %c0_11 = arith.constant 0 : index
      %13 = vector.load %arg9[%c0_10, %c0_11] : memref<32x32xf32, #tpu.memory_space<vmem>>, vector<32x32xf32>
      tpu.vector_store %arg9[%c0_10, %c0_11], %12 {strides = array<i32>} : memref<32x32xf32, #tpu.memory_space<vmem>>, vector<32x32xf32>,
    } else {
    }
    %c0 = arith.constant 0 : index
    %c0_1 = arith.constant 0 : index
    %3 = vector.load %arg2[%c0, %c0_1] : memref<32x384xbf16, #tpu.memory_space<vmem>>, vector<32x384xbf16>
    %c0_2 = arith.constant 0 : index
    %c0_3 = arith.constant 0 : index
    %4 = vector.load %arg9[%c0_2, %c0_3] : memref<32x32xf32, #tpu.memory_space<vmem>>, vector<32x32xf32>
    %c0_4 = arith.constant 0 : index
    %c0_5 = arith.constant 0 : index
    %5 = vector.load %arg3[%c0_4, %c0_5] : memref<384x32xbf16, #tpu.memory_space<vmem>>, vector<384x32xbf16>
    %cst = arith.constant dense<0.000000e+00> : vector<32x32xf32>
    %6 = tpu.matmul %3, %5, %cst {dimension_numbers = #tpu.dot_dimension_numbers<[1], [0], [0], [1], [0, 0, 1, 1], [], []>} : vector<32x384xbf16>, vector<384x32xbf16>, vector<32x32xf32> -> vector<32x32xf32>
    %7 = arith.addf %4, %6 : vector<32x32xf32>
    %c0_6 = arith.constant 0 : index
    %c0_7 = arith.constant 0 : index
    %8 = vector.load %arg9[%c0_6, %c0_7] : memref<32x32xf32, #tpu.memory_space<vmem>>, vector<32x32xf32>
    tpu.vector_store %arg9[%c0_6, %c0_7], %7 {strides = array<i32>} : memref<32x32xf32, #tpu.memory_space<vmem>>, vector<32x32xf32>,
    %c2_i32 = arith.constant 2 : i32
    %9 = arith.cmpi eq, %arg1, %c2_i32 : i32
    %10 = arith.extui %9 : i1 to i32
    %c0_i32_8 = arith.constant 0 : i32
    %11 = arith.cmpi ne, %10, %c0_i32_8 : i32
    scf.if %11 {
      %c0_9 = arith.constant 0 : index
      %c0_10 = arith.constant 0 : index
      %12 = vector.load %arg9[%c0_9, %c0_10] : memref<32x32xf32, #tpu.memory_space<vmem>>, vector<32x32xf32>
      %13 = arith.truncf %12 : vector<32x32xf32> to vector<32x32xbf16>
      %c0_11 = arith.constant 0 : index
      %c0_12 = arith.constant 0 : index
      %14 = vector.load %arg8[%c0_11, %c0_12] : memref<32x32xbf16, #tpu.memory_space<vmem>>, vector<32x32xbf16>
      tpu.vector_store %arg8[%c0_11, %c0_12], %13 {strides = array<i32>} : memref<32x32xbf16, #tpu.memory_space<vmem>>, vector<32x32xbf16>,
    } else {
    }
    return
  }
  func.func @transform_0(%arg0: i32, %arg1: i32) -> (i32, i32) {
    %c0_i32 = arith.constant 0 : i32
    return %arg0, %arg1 : i32, i32
  }
  func.func @transform_1(%arg0: i32, %arg1: i32) -> (i32, i32) {
    %c0_i32 = arith.constant 0 : i32
    %c0_i32_0 = arith.constant 0 : i32
    return %arg1, %c0_i32 : i32, i32
  }
  func.func @transform_2(%arg0: i32, %arg1: i32) -> (i32, i32) {
    %c0_i32 = arith.constant 0 : i32
    %c0_i32_0 = arith.constant 0 : i32
    return %c0_i32, %arg1 : i32, i32
  }
  func.func @transform_3(%arg0: i32, %arg1: i32) -> (i32, i32) {
    %c0_i32 = arith.constant 0 : i32
    %c0_i32_0 = arith.constant 0 : i32
    return %c0_i32, %arg1 : i32, i32
  }
  func.func @transform_4(%arg0: i32, %arg1: i32) -> (i32, i32) {
    %c0_i32 = arith.constant 0 : i32
    %c0_i32_0 = arith.constant 0 : i32
    %c0_i32_1 = arith.constant 0 : i32
    return %c0_i32, %c0_i32_0 : i32, i32
  }
  func.func @transform_5(%arg0: i32, %arg1: i32) -> (i32, i32) {
    %c0_i32 = arith.constant 0 : i32
    %c0_i32_0 = arith.constant 0 : i32
    %c0_i32_1 = arith.constant 0 : i32
    return %c0_i32, %c0_i32_0 : i32, i32
  }
  func.func @transform_6(%arg0: i32, %arg1: i32) -> (i32, i32) {
    %c0_i32 = arith.constant 0 : i32
    %c0_i32_0 = arith.constant 0 : i32
    return %arg0, %c0_i32 : i32, i32
  }
}

module attributes {stable_mosaic.version = 11 : i64} {
  func.func @_fused_mm_kernel(%arg0: i32, %arg1: i32, %arg2: memref<32x384xbf16, #tpu.memory_space<vmem>>, %arg3: memref<384x128xbf16, #tpu.memory_space<vmem>>, %arg4: memref<1x384xf32, #tpu.memory_space<vmem>>, %arg5: memref<1x384xf32, #tpu.memory_space<vmem>>, %arg6: memref<1x128xf32, #tpu.memory_space<vmem>>, %arg7: memref<1x128xf32, #tpu.memory_space<vmem>>, %arg8: memref<32x128xbf16, #tpu.memory_space<vmem>>, %arg9: memref<32x128xf32, #tpu.memory_space<vmem>>) attributes {dimension_semantics = [#tpu.dimension_semantics<parallel>, #tpu.dimension_semantics<arbitrary>], iteration_bounds = array<i64: 1, 1>, scalar_prefetch = 0 : i64, scratch_operands = 1 : i64, tpu.core_type = #tpu.core_type<tc>, window_params = [{transform_indices = @transform_0, window_bounds = array<i64: 32, 384>}, {transform_indices = @transform_1, window_bounds = array<i64: 384, 128>}, {transform_indices = @transform_2, window_bounds = array<i64: 1, 384>}, {transform_indices = @transform_3, window_bounds = array<i64: 1, 384>}, {pipeline_mode = #tpu.pipeline_mode<synchronous>, transform_indices = @transform_4, window_bounds = array<i64: 1, 128>}, {pipeline_mode = #tpu.pipeline_mode<synchronous>, transform_indices = @transform_5, window_bounds = array<i64: 1, 128>}, {transform_indices = @transform_6, window_bounds = array<i64: 32, 128>}]} {
    %c0_i32 = arith.constant 0 : i32
    %0 = arith.cmpi eq, %arg1, %c0_i32 : i32
    %1 = arith.extui %0 : i1 to i32
    %c0_i32_0 = arith.constant 0 : i32
    %2 = arith.cmpi ne, %1, %c0_i32_0 : i32
    scf.if %2 {
      %cst_15 = arith.constant 0.000000e+00 : f32
      %22 = vector.broadcast %cst_15 : f32 to vector<32x128xf32>
      %c0_16 = arith.constant 0 : index
      %c0_17 = arith.constant 0 : index
      %23 = vector.load %arg9[%c0_16, %c0_17] : memref<32x128xf32, #tpu.memory_space<vmem>>, vector<32x128xf32>
      tpu.vector_store %arg9[%c0_16, %c0_17], %22 {strides = array<i32>} : memref<32x128xf32, #tpu.memory_space<vmem>>, vector<32x128xf32>,
    } else {
    }
    %c0 = arith.constant 0 : index
    %c0_1 = arith.constant 0 : index
    %3 = vector.load %arg2[%c0, %c0_1] : memref<32x384xbf16, #tpu.memory_space<vmem>>, vector<32x384xbf16>
    %4 = arith.extf %3 : vector<32x384xbf16> to vector<32x384xf32>
    %c0_2 = arith.constant 0 : index
    %c0_3 = arith.constant 0 : index
    %5 = vector.load %arg4[%c0_2, %c0_3] : memref<1x384xf32, #tpu.memory_space<vmem>>, vector<1x384xf32>
    %6 = vector.broadcast %5 : vector<1x384xf32> to vector<32x384xf32>
    %7 = arith.mulf %4, %6 : vector<32x384xf32>
    %c0_4 = arith.constant 0 : index
    %c0_5 = arith.constant 0 : index
    %8 = vector.load %arg5[%c0_4, %c0_5] : memref<1x384xf32, #tpu.memory_space<vmem>>, vector<1x384xf32>
    %9 = vector.broadcast %8 : vector<1x384xf32> to vector<32x384xf32>
    %10 = arith.addf %7, %9 : vector<32x384xf32>
    %cst = arith.constant 0.000000e+00 : f32
    %11 = vector.broadcast %cst : f32 to vector<32x384xf32>
    %12 = arith.maximumf %10, %11 : vector<32x384xf32>
    %13 = arith.truncf %12 : vector<32x384xf32> to vector<32x384xbf16>
    %c0_6 = arith.constant 0 : index
    %c0_7 = arith.constant 0 : index
    %14 = vector.load %arg9[%c0_6, %c0_7] : memref<32x128xf32, #tpu.memory_space<vmem>>, vector<32x128xf32>
    %c0_8 = arith.constant 0 : index
    %c0_9 = arith.constant 0 : index
    %15 = vector.load %arg3[%c0_8, %c0_9] : memref<384x128xbf16, #tpu.memory_space<vmem>>, vector<384x128xbf16>
    %cst_10 = arith.constant dense<0.000000e+00> : vector<32x128xf32>
    %16 = tpu.matmul %13, %15, %cst_10 {dimension_numbers = #tpu.dot_dimension_numbers<[1], [0], [0], [1], [0, 0, 1, 1], [], []>} : vector<32x384xbf16>, vector<384x128xbf16>, vector<32x128xf32> -> vector<32x128xf32>
    %17 = arith.addf %14, %16 : vector<32x128xf32>
    %c0_11 = arith.constant 0 : index
    %c0_12 = arith.constant 0 : index
    %18 = vector.load %arg9[%c0_11, %c0_12] : memref<32x128xf32, #tpu.memory_space<vmem>>, vector<32x128xf32>
    tpu.vector_store %arg9[%c0_11, %c0_12], %17 {strides = array<i32>} : memref<32x128xf32, #tpu.memory_space<vmem>>, vector<32x128xf32>,
    %c0_i32_13 = arith.constant 0 : i32
    %19 = arith.cmpi eq, %arg1, %c0_i32_13 : i32
    %20 = arith.extui %19 : i1 to i32
    %c0_i32_14 = arith.constant 0 : i32
    %21 = arith.cmpi ne, %20, %c0_i32_14 : i32
    scf.if %21 {
      %c0_15 = arith.constant 0 : index
      %c0_16 = arith.constant 0 : index
      %22 = vector.load %arg9[%c0_15, %c0_16] : memref<32x128xf32, #tpu.memory_space<vmem>>, vector<32x128xf32>
      %c0_17 = arith.constant 0 : index
      %c0_18 = arith.constant 0 : index
      %23 = vector.load %arg6[%c0_17, %c0_18] : memref<1x128xf32, #tpu.memory_space<vmem>>, vector<1x128xf32>
      %24 = vector.broadcast %23 : vector<1x128xf32> to vector<32x128xf32>
      %25 = arith.mulf %22, %24 : vector<32x128xf32>
      %c0_19 = arith.constant 0 : index
      %c0_20 = arith.constant 0 : index
      %26 = vector.load %arg7[%c0_19, %c0_20] : memref<1x128xf32, #tpu.memory_space<vmem>>, vector<1x128xf32>
      %27 = vector.broadcast %26 : vector<1x128xf32> to vector<32x128xf32>
      %28 = arith.addf %25, %27 : vector<32x128xf32>
      %cst_21 = arith.constant 0.000000e+00 : f32
      %29 = vector.broadcast %cst_21 : f32 to vector<32x128xf32>
      %30 = arith.maximumf %28, %29 : vector<32x128xf32>
      %31 = arith.truncf %30 : vector<32x128xf32> to vector<32x128xbf16>
      %c0_22 = arith.constant 0 : index
      %c0_23 = arith.constant 0 : index
      %32 = vector.load %arg8[%c0_22, %c0_23] : memref<32x128xbf16, #tpu.memory_space<vmem>>, vector<32x128xbf16>
      tpu.vector_store %arg8[%c0_22, %c0_23], %31 {strides = array<i32>} : memref<32x128xbf16, #tpu.memory_space<vmem>>, vector<32x128xbf16>,
    } else {
    }
    return
  }
  func.func @transform_0(%arg0: i32, %arg1: i32) -> (i32, i32) {
    %c0_i32 = arith.constant 0 : i32
    return %arg0, %arg1 : i32, i32
  }
  func.func @transform_1(%arg0: i32, %arg1: i32) -> (i32, i32) {
    %c0_i32 = arith.constant 0 : i32
    %c0_i32_0 = arith.constant 0 : i32
    return %arg1, %c0_i32 : i32, i32
  }
  func.func @transform_2(%arg0: i32, %arg1: i32) -> (i32, i32) {
    %c0_i32 = arith.constant 0 : i32
    %c0_i32_0 = arith.constant 0 : i32
    return %c0_i32, %arg1 : i32, i32
  }
  func.func @transform_3(%arg0: i32, %arg1: i32) -> (i32, i32) {
    %c0_i32 = arith.constant 0 : i32
    %c0_i32_0 = arith.constant 0 : i32
    return %c0_i32, %arg1 : i32, i32
  }
  func.func @transform_4(%arg0: i32, %arg1: i32) -> (i32, i32) {
    %c0_i32 = arith.constant 0 : i32
    %c0_i32_0 = arith.constant 0 : i32
    %c0_i32_1 = arith.constant 0 : i32
    return %c0_i32, %c0_i32_0 : i32, i32
  }
  func.func @transform_5(%arg0: i32, %arg1: i32) -> (i32, i32) {
    %c0_i32 = arith.constant 0 : i32
    %c0_i32_0 = arith.constant 0 : i32
    %c0_i32_1 = arith.constant 0 : i32
    return %c0_i32, %c0_i32_0 : i32, i32
  }
  func.func @transform_6(%arg0: i32, %arg1: i32) -> (i32, i32) {
    %c0_i32 = arith.constant 0 : i32
    %c0_i32_0 = arith.constant 0 : i32
    return %arg0, %c0_i32 : i32, i32
  }
}

module attributes {stable_mosaic.version = 11 : i64} {
  func.func @_fused_mm_kernel(%arg0: i32, %arg1: i32, %arg2: memref<32x512xbf16, #tpu.memory_space<vmem>>, %arg3: memref<512x128xbf16, #tpu.memory_space<vmem>>, %arg4: memref<1x512xf32, #tpu.memory_space<vmem>>, %arg5: memref<1x512xf32, #tpu.memory_space<vmem>>, %arg6: memref<1x128xf32, #tpu.memory_space<vmem>>, %arg7: memref<1x128xf32, #tpu.memory_space<vmem>>, %arg8: memref<32x128xbf16, #tpu.memory_space<vmem>>, %arg9: memref<32x128xf32, #tpu.memory_space<vmem>>) attributes {dimension_semantics = [#tpu.dimension_semantics<parallel>, #tpu.dimension_semantics<arbitrary>], iteration_bounds = array<i64: 1, 1>, scalar_prefetch = 0 : i64, scratch_operands = 1 : i64, tpu.core_type = #tpu.core_type<tc>, window_params = [{transform_indices = @transform_0, window_bounds = array<i64: 32, 512>}, {transform_indices = @transform_1, window_bounds = array<i64: 512, 128>}, {transform_indices = @transform_2, window_bounds = array<i64: 1, 512>}, {transform_indices = @transform_3, window_bounds = array<i64: 1, 512>}, {pipeline_mode = #tpu.pipeline_mode<synchronous>, transform_indices = @transform_4, window_bounds = array<i64: 1, 128>}, {pipeline_mode = #tpu.pipeline_mode<synchronous>, transform_indices = @transform_5, window_bounds = array<i64: 1, 128>}, {transform_indices = @transform_6, window_bounds = array<i64: 32, 128>}]} {
    %c0_i32 = arith.constant 0 : i32
    %0 = arith.cmpi eq, %arg1, %c0_i32 : i32
    %1 = arith.extui %0 : i1 to i32
    %c0_i32_0 = arith.constant 0 : i32
    %2 = arith.cmpi ne, %1, %c0_i32_0 : i32
    scf.if %2 {
      %cst_15 = arith.constant 0.000000e+00 : f32
      %22 = vector.broadcast %cst_15 : f32 to vector<32x128xf32>
      %c0_16 = arith.constant 0 : index
      %c0_17 = arith.constant 0 : index
      %23 = vector.load %arg9[%c0_16, %c0_17] : memref<32x128xf32, #tpu.memory_space<vmem>>, vector<32x128xf32>
      tpu.vector_store %arg9[%c0_16, %c0_17], %22 {strides = array<i32>} : memref<32x128xf32, #tpu.memory_space<vmem>>, vector<32x128xf32>,
    } else {
    }
    %c0 = arith.constant 0 : index
    %c0_1 = arith.constant 0 : index
    %3 = vector.load %arg2[%c0, %c0_1] : memref<32x512xbf16, #tpu.memory_space<vmem>>, vector<32x512xbf16>
    %4 = arith.extf %3 : vector<32x512xbf16> to vector<32x512xf32>
    %c0_2 = arith.constant 0 : index
    %c0_3 = arith.constant 0 : index
    %5 = vector.load %arg4[%c0_2, %c0_3] : memref<1x512xf32, #tpu.memory_space<vmem>>, vector<1x512xf32>
    %6 = vector.broadcast %5 : vector<1x512xf32> to vector<32x512xf32>
    %7 = arith.mulf %4, %6 : vector<32x512xf32>
    %c0_4 = arith.constant 0 : index
    %c0_5 = arith.constant 0 : index
    %8 = vector.load %arg5[%c0_4, %c0_5] : memref<1x512xf32, #tpu.memory_space<vmem>>, vector<1x512xf32>
    %9 = vector.broadcast %8 : vector<1x512xf32> to vector<32x512xf32>
    %10 = arith.addf %7, %9 : vector<32x512xf32>
    %cst = arith.constant 0.000000e+00 : f32
    %11 = vector.broadcast %cst : f32 to vector<32x512xf32>
    %12 = arith.maximumf %10, %11 : vector<32x512xf32>
    %13 = arith.truncf %12 : vector<32x512xf32> to vector<32x512xbf16>
    %c0_6 = arith.constant 0 : index
    %c0_7 = arith.constant 0 : index
    %14 = vector.load %arg9[%c0_6, %c0_7] : memref<32x128xf32, #tpu.memory_space<vmem>>, vector<32x128xf32>
    %c0_8 = arith.constant 0 : index
    %c0_9 = arith.constant 0 : index
    %15 = vector.load %arg3[%c0_8, %c0_9] : memref<512x128xbf16, #tpu.memory_space<vmem>>, vector<512x128xbf16>
    %cst_10 = arith.constant dense<0.000000e+00> : vector<32x128xf32>
    %16 = tpu.matmul %13, %15, %cst_10 {dimension_numbers = #tpu.dot_dimension_numbers<[1], [0], [0], [1], [0, 0, 1, 1], [], []>} : vector<32x512xbf16>, vector<512x128xbf16>, vector<32x128xf32> -> vector<32x128xf32>
    %17 = arith.addf %14, %16 : vector<32x128xf32>
    %c0_11 = arith.constant 0 : index
    %c0_12 = arith.constant 0 : index
    %18 = vector.load %arg9[%c0_11, %c0_12] : memref<32x128xf32, #tpu.memory_space<vmem>>, vector<32x128xf32>
    tpu.vector_store %arg9[%c0_11, %c0_12], %17 {strides = array<i32>} : memref<32x128xf32, #tpu.memory_space<vmem>>, vector<32x128xf32>,
    %c0_i32_13 = arith.constant 0 : i32
    %19 = arith.cmpi eq, %arg1, %c0_i32_13 : i32
    %20 = arith.extui %19 : i1 to i32
    %c0_i32_14 = arith.constant 0 : i32
    %21 = arith.cmpi ne, %20, %c0_i32_14 : i32
    scf.if %21 {
      %c0_15 = arith.constant 0 : index
      %c0_16 = arith.constant 0 : index
      %22 = vector.load %arg9[%c0_15, %c0_16] : memref<32x128xf32, #tpu.memory_space<vmem>>, vector<32x128xf32>
      %c0_17 = arith.constant 0 : index
      %c0_18 = arith.constant 0 : index
      %23 = vector.load %arg6[%c0_17, %c0_18] : memref<1x128xf32, #tpu.memory_space<vmem>>, vector<1x128xf32>
      %24 = vector.broadcast %23 : vector<1x128xf32> to vector<32x128xf32>
      %25 = arith.mulf %22, %24 : vector<32x128xf32>
      %c0_19 = arith.constant 0 : index
      %c0_20 = arith.constant 0 : index
      %26 = vector.load %arg7[%c0_19, %c0_20] : memref<1x128xf32, #tpu.memory_space<vmem>>, vector<1x128xf32>
      %27 = vector.broadcast %26 : vector<1x128xf32> to vector<32x128xf32>
      %28 = arith.addf %25, %27 : vector<32x128xf32>
      %cst_21 = arith.constant 0.000000e+00 : f32
      %29 = vector.broadcast %cst_21 : f32 to vector<32x128xf32>
      %30 = arith.maximumf %28, %29 : vector<32x128xf32>
      %31 = arith.truncf %30 : vector<32x128xf32> to vector<32x128xbf16>
      %c0_22 = arith.constant 0 : index
      %c0_23 = arith.constant 0 : index
      %32 = vector.load %arg8[%c0_22, %c0_23] : memref<32x128xbf16, #tpu.memory_space<vmem>>, vector<32x128xbf16>
      tpu.vector_store %arg8[%c0_22, %c0_23], %31 {strides = array<i32>} : memref<32x128xbf16, #tpu.memory_space<vmem>>, vector<32x128xbf16>,
    } else {
    }
    return
  }
  func.func @transform_0(%arg0: i32, %arg1: i32) -> (i32, i32) {
    %c0_i32 = arith.constant 0 : i32
    return %arg0, %arg1 : i32, i32
  }
  func.func @transform_1(%arg0: i32, %arg1: i32) -> (i32, i32) {
    %c0_i32 = arith.constant 0 : i32
    %c0_i32_0 = arith.constant 0 : i32
    return %arg1, %c0_i32 : i32, i32
  }
  func.func @transform_2(%arg0: i32, %arg1: i32) -> (i32, i32) {
    %c0_i32 = arith.constant 0 : i32
    %c0_i32_0 = arith.constant 0 : i32
    return %c0_i32, %arg1 : i32, i32
  }
  func.func @transform_3(%arg0: i32, %arg1: i32) -> (i32, i32) {
    %c0_i32 = arith.constant 0 : i32
    %c0_i32_0 = arith.constant 0 : i32
    return %c0_i32, %arg1 : i32, i32
  }
  func.func @transform_4(%arg0: i32, %arg1: i32) -> (i32, i32) {
    %c0_i32 = arith.constant 0 : i32
    %c0_i32_0 = arith.constant 0 : i32
    %c0_i32_1 = arith.constant 0 : i32
    return %c0_i32, %c0_i32_0 : i32, i32
  }
  func.func @transform_5(%arg0: i32, %arg1: i32) -> (i32, i32) {
    %c0_i32 = arith.constant 0 : i32
    %c0_i32_0 = arith.constant 0 : i32
    %c0_i32_1 = arith.constant 0 : i32
    return %c0_i32, %c0_i32_0 : i32, i32
  }
  func.func @transform_6(%arg0: i32, %arg1: i32) -> (i32, i32) {
    %c0_i32 = arith.constant 0 : i32
    %c0_i32_0 = arith.constant 0 : i32
    return %arg0, %c0_i32 : i32, i32
  }
}

module attributes {stable_mosaic.version = 11 : i64} {
  func.func @_fused_mm_kernel(%arg0: i32, %arg1: i32, %arg2: memref<32x512xbf16, #tpu.memory_space<vmem>>, %arg3: memref<512x256xbf16, #tpu.memory_space<vmem>>, %arg4: memref<1x512xf32, #tpu.memory_space<vmem>>, %arg5: memref<1x512xf32, #tpu.memory_space<vmem>>, %arg6: memref<1x256xf32, #tpu.memory_space<vmem>>, %arg7: memref<1x256xf32, #tpu.memory_space<vmem>>, %arg8: memref<32x256xbf16, #tpu.memory_space<vmem>>, %arg9: memref<32x256xf32, #tpu.memory_space<vmem>>) attributes {dimension_semantics = [#tpu.dimension_semantics<parallel>, #tpu.dimension_semantics<arbitrary>], iteration_bounds = array<i64: 1, 1>, scalar_prefetch = 0 : i64, scratch_operands = 1 : i64, tpu.core_type = #tpu.core_type<tc>, window_params = [{transform_indices = @transform_0, window_bounds = array<i64: 32, 512>}, {transform_indices = @transform_1, window_bounds = array<i64: 512, 256>}, {transform_indices = @transform_2, window_bounds = array<i64: 1, 512>}, {transform_indices = @transform_3, window_bounds = array<i64: 1, 512>}, {pipeline_mode = #tpu.pipeline_mode<synchronous>, transform_indices = @transform_4, window_bounds = array<i64: 1, 256>}, {pipeline_mode = #tpu.pipeline_mode<synchronous>, transform_indices = @transform_5, window_bounds = array<i64: 1, 256>}, {transform_indices = @transform_6, window_bounds = array<i64: 32, 256>}]} {
    %c0_i32 = arith.constant 0 : i32
    %0 = arith.cmpi eq, %arg1, %c0_i32 : i32
    %1 = arith.extui %0 : i1 to i32
    %c0_i32_0 = arith.constant 0 : i32
    %2 = arith.cmpi ne, %1, %c0_i32_0 : i32
    scf.if %2 {
      %cst_15 = arith.constant 0.000000e+00 : f32
      %22 = vector.broadcast %cst_15 : f32 to vector<32x256xf32>
      %c0_16 = arith.constant 0 : index
      %c0_17 = arith.constant 0 : index
      %23 = vector.load %arg9[%c0_16, %c0_17] : memref<32x256xf32, #tpu.memory_space<vmem>>, vector<32x256xf32>
      tpu.vector_store %arg9[%c0_16, %c0_17], %22 {strides = array<i32>} : memref<32x256xf32, #tpu.memory_space<vmem>>, vector<32x256xf32>,
    } else {
    }
    %c0 = arith.constant 0 : index
    %c0_1 = arith.constant 0 : index
    %3 = vector.load %arg2[%c0, %c0_1] : memref<32x512xbf16, #tpu.memory_space<vmem>>, vector<32x512xbf16>
    %4 = arith.extf %3 : vector<32x512xbf16> to vector<32x512xf32>
    %c0_2 = arith.constant 0 : index
    %c0_3 = arith.constant 0 : index
    %5 = vector.load %arg4[%c0_2, %c0_3] : memref<1x512xf32, #tpu.memory_space<vmem>>, vector<1x512xf32>
    %6 = vector.broadcast %5 : vector<1x512xf32> to vector<32x512xf32>
    %7 = arith.mulf %4, %6 : vector<32x512xf32>
    %c0_4 = arith.constant 0 : index
    %c0_5 = arith.constant 0 : index
    %8 = vector.load %arg5[%c0_4, %c0_5] : memref<1x512xf32, #tpu.memory_space<vmem>>, vector<1x512xf32>
    %9 = vector.broadcast %8 : vector<1x512xf32> to vector<32x512xf32>
    %10 = arith.addf %7, %9 : vector<32x512xf32>
    %cst = arith.constant 0.000000e+00 : f32
    %11 = vector.broadcast %cst : f32 to vector<32x512xf32>
    %12 = arith.maximumf %10, %11 : vector<32x512xf32>
    %13 = arith.truncf %12 : vector<32x512xf32> to vector<32x512xbf16>
    %c0_6 = arith.constant 0 : index
    %c0_7 = arith.constant 0 : index
    %14 = vector.load %arg9[%c0_6, %c0_7] : memref<32x256xf32, #tpu.memory_space<vmem>>, vector<32x256xf32>
    %c0_8 = arith.constant 0 : index
    %c0_9 = arith.constant 0 : index
    %15 = vector.load %arg3[%c0_8, %c0_9] : memref<512x256xbf16, #tpu.memory_space<vmem>>, vector<512x256xbf16>
    %cst_10 = arith.constant dense<0.000000e+00> : vector<32x256xf32>
    %16 = tpu.matmul %13, %15, %cst_10 {dimension_numbers = #tpu.dot_dimension_numbers<[1], [0], [0], [1], [0, 0, 1, 1], [], []>} : vector<32x512xbf16>, vector<512x256xbf16>, vector<32x256xf32> -> vector<32x256xf32>
    %17 = arith.addf %14, %16 : vector<32x256xf32>
    %c0_11 = arith.constant 0 : index
    %c0_12 = arith.constant 0 : index
    %18 = vector.load %arg9[%c0_11, %c0_12] : memref<32x256xf32, #tpu.memory_space<vmem>>, vector<32x256xf32>
    tpu.vector_store %arg9[%c0_11, %c0_12], %17 {strides = array<i32>} : memref<32x256xf32, #tpu.memory_space<vmem>>, vector<32x256xf32>,
    %c0_i32_13 = arith.constant 0 : i32
    %19 = arith.cmpi eq, %arg1, %c0_i32_13 : i32
    %20 = arith.extui %19 : i1 to i32
    %c0_i32_14 = arith.constant 0 : i32
    %21 = arith.cmpi ne, %20, %c0_i32_14 : i32
    scf.if %21 {
      %c0_15 = arith.constant 0 : index
      %c0_16 = arith.constant 0 : index
      %22 = vector.load %arg9[%c0_15, %c0_16] : memref<32x256xf32, #tpu.memory_space<vmem>>, vector<32x256xf32>
      %23 = arith.truncf %22 : vector<32x256xf32> to vector<32x256xbf16>
      %c0_17 = arith.constant 0 : index
      %c0_18 = arith.constant 0 : index
      %24 = vector.load %arg8[%c0_17, %c0_18] : memref<32x256xbf16, #tpu.memory_space<vmem>>, vector<32x256xbf16>
      tpu.vector_store %arg8[%c0_17, %c0_18], %23 {strides = array<i32>} : memref<32x256xbf16, #tpu.memory_space<vmem>>, vector<32x256xbf16>,
    } else {
    }
    return
  }
  func.func @transform_0(%arg0: i32, %arg1: i32) -> (i32, i32) {
    %c0_i32 = arith.constant 0 : i32
    return %arg0, %arg1 : i32, i32
  }
  func.func @transform_1(%arg0: i32, %arg1: i32) -> (i32, i32) {
    %c0_i32 = arith.constant 0 : i32
    %c0_i32_0 = arith.constant 0 : i32
    return %arg1, %c0_i32 : i32, i32
  }
  func.func @transform_2(%arg0: i32, %arg1: i32) -> (i32, i32) {
    %c0_i32 = arith.constant 0 : i32
    %c0_i32_0 = arith.constant 0 : i32
    return %c0_i32, %arg1 : i32, i32
  }
  func.func @transform_3(%arg0: i32, %arg1: i32) -> (i32, i32) {
    %c0_i32 = arith.constant 0 : i32
    %c0_i32_0 = arith.constant 0 : i32
    return %c0_i32, %arg1 : i32, i32
  }
  func.func @transform_4(%arg0: i32, %arg1: i32) -> (i32, i32) {
    %c0_i32 = arith.constant 0 : i32
    %c0_i32_0 = arith.constant 0 : i32
    %c0_i32_1 = arith.constant 0 : i32
    return %c0_i32, %c0_i32_0 : i32, i32
  }
  func.func @transform_5(%arg0: i32, %arg1: i32) -> (i32, i32) {
    %c0_i32 = arith.constant 0 : i32
    %c0_i32_0 = arith.constant 0 : i32
    %c0_i32_1 = arith.constant 0 : i32
    return %c0_i32, %c0_i32_0 : i32, i32
  }
  func.func @transform_6(%arg0: i32, %arg1: i32) -> (i32, i32) {
    %c0_i32 = arith.constant 0 : i32
    %c0_i32_0 = arith.constant 0 : i32
    return %arg0, %c0_i32 : i32, i32
  }
}

module attributes {stable_mosaic.version = 11 : i64} {
  func.func @_pool_kernel(%arg0: i32, %arg1: memref<8x256xbf16, #tpu.memory_space<vmem>>, %arg2: memref<8x256xbf16, #tpu.memory_space<vmem>>, %arg3: memref<8x256xbf16, #tpu.memory_space<vmem>>, %arg4: memref<8x256xbf16, #tpu.memory_space<vmem>>, %arg5: memref<8x256xbf16, #tpu.memory_space<vmem>>) attributes {dimension_semantics = [#tpu.dimension_semantics<parallel>], iteration_bounds = array<i64: 1>, scalar_prefetch = 0 : i64, scratch_operands = 0 : i64, tpu.core_type = #tpu.core_type<tc>, window_params = [{transform_indices = @transform_0, window_bounds = array<i64: 8, 256>}, {transform_indices = @transform_1, window_bounds = array<i64: 8, 256>}, {transform_indices = @transform_2, window_bounds = array<i64: 8, 256>}, {transform_indices = @transform_3, window_bounds = array<i64: 8, 256>}, {transform_indices = @transform_4, window_bounds = array<i64: 8, 256>}]} {
    %c0 = arith.constant 0 : index
    %c0_0 = arith.constant 0 : index
    %0 = vector.load %arg1[%c0, %c0_0] : memref<8x256xbf16, #tpu.memory_space<vmem>>, vector<8x256xbf16>
    %1 = arith.extf %0 : vector<8x256xbf16> to vector<8x256xf32>
    %c0_1 = arith.constant 0 : index
    %c0_2 = arith.constant 0 : index
    %2 = vector.load %arg2[%c0_1, %c0_2] : memref<8x256xbf16, #tpu.memory_space<vmem>>, vector<8x256xbf16>
    %3 = arith.extf %2 : vector<8x256xbf16> to vector<8x256xf32>
    %4 = arith.addf %1, %3 : vector<8x256xf32>
    %c0_3 = arith.constant 0 : index
    %c0_4 = arith.constant 0 : index
    %5 = vector.load %arg3[%c0_3, %c0_4] : memref<8x256xbf16, #tpu.memory_space<vmem>>, vector<8x256xbf16>
    %6 = arith.extf %5 : vector<8x256xbf16> to vector<8x256xf32>
    %7 = arith.addf %4, %6 : vector<8x256xf32>
    %c0_5 = arith.constant 0 : index
    %c0_6 = arith.constant 0 : index
    %8 = vector.load %arg4[%c0_5, %c0_6] : memref<8x256xbf16, #tpu.memory_space<vmem>>, vector<8x256xbf16>
    %9 = arith.extf %8 : vector<8x256xbf16> to vector<8x256xf32>
    %10 = arith.addf %7, %9 : vector<8x256xf32>
    %cst = arith.constant 2.500000e-01 : f32
    %11 = vector.broadcast %cst : f32 to vector<8x256xf32>
    %12 = arith.mulf %10, %11 : vector<8x256xf32>
    %13 = arith.truncf %12 : vector<8x256xf32> to vector<8x256xbf16>
    %c0_7 = arith.constant 0 : index
    %c0_8 = arith.constant 0 : index
    %14 = vector.load %arg5[%c0_7, %c0_8] : memref<8x256xbf16, #tpu.memory_space<vmem>>, vector<8x256xbf16>
    tpu.vector_store %arg5[%c0_7, %c0_8], %13 {strides = array<i32>} : memref<8x256xbf16, #tpu.memory_space<vmem>>, vector<8x256xbf16>,
    return
  }
  func.func @transform_0(%arg0: i32) -> (i32, i32) {
    %c0_i32 = arith.constant 0 : i32
    %c0_i32_0 = arith.constant 0 : i32
    return %arg0, %c0_i32 : i32, i32
  }
  func.func @transform_1(%arg0: i32) -> (i32, i32) {
    %c0_i32 = arith.constant 0 : i32
    %c0_i32_0 = arith.constant 0 : i32
    return %arg0, %c0_i32 : i32, i32
  }
  func.func @transform_2(%arg0: i32) -> (i32, i32) {
    %c0_i32 = arith.constant 0 : i32
    %c0_i32_0 = arith.constant 0 : i32
    return %arg0, %c0_i32 : i32, i32
  }
  func.func @transform_3(%arg0: i32) -> (i32, i32) {
    %c0_i32 = arith.constant 0 : i32
    %c0_i32_0 = arith.constant 0 : i32
    return %arg0, %c0_i32 : i32, i32
  }
  func.func @transform_4(%arg0: i32) -> (i32, i32) {
    %c0_i32 = arith.constant 0 : i32
    %c0_i32_0 = arith.constant 0 : i32
    return %arg0, %c0_i32 : i32, i32
  }
}

module attributes {stable_mosaic.version = 11 : i64} {
  func.func @_fused_mm_kernel(%arg0: i32, %arg1: i32, %arg2: memref<8x256xbf16, #tpu.memory_space<vmem>>, %arg3: memref<256x128xbf16, #tpu.memory_space<vmem>>, %arg4: memref<1x256xf32, #tpu.memory_space<vmem>>, %arg5: memref<1x256xf32, #tpu.memory_space<vmem>>, %arg6: memref<1x128xf32, #tpu.memory_space<vmem>>, %arg7: memref<1x128xf32, #tpu.memory_space<vmem>>, %arg8: memref<8x128xbf16, #tpu.memory_space<vmem>>, %arg9: memref<8x128xf32, #tpu.memory_space<vmem>>) attributes {dimension_semantics = [#tpu.dimension_semantics<parallel>, #tpu.dimension_semantics<arbitrary>], iteration_bounds = array<i64: 1, 1>, scalar_prefetch = 0 : i64, scratch_operands = 1 : i64, tpu.core_type = #tpu.core_type<tc>, window_params = [{transform_indices = @transform_0, window_bounds = array<i64: 8, 256>}, {transform_indices = @transform_1, window_bounds = array<i64: 256, 128>}, {transform_indices = @transform_2, window_bounds = array<i64: 1, 256>}, {transform_indices = @transform_3, window_bounds = array<i64: 1, 256>}, {pipeline_mode = #tpu.pipeline_mode<synchronous>, transform_indices = @transform_4, window_bounds = array<i64: 1, 128>}, {pipeline_mode = #tpu.pipeline_mode<synchronous>, transform_indices = @transform_5, window_bounds = array<i64: 1, 128>}, {transform_indices = @transform_6, window_bounds = array<i64: 8, 128>}]} {
    %c0_i32 = arith.constant 0 : i32
    %0 = arith.cmpi eq, %arg1, %c0_i32 : i32
    %1 = arith.extui %0 : i1 to i32
    %c0_i32_0 = arith.constant 0 : i32
    %2 = arith.cmpi ne, %1, %c0_i32_0 : i32
    scf.if %2 {
      %cst_15 = arith.constant 0.000000e+00 : f32
      %22 = vector.broadcast %cst_15 : f32 to vector<8x128xf32>
      %c0_16 = arith.constant 0 : index
      %c0_17 = arith.constant 0 : index
      %23 = vector.load %arg9[%c0_16, %c0_17] : memref<8x128xf32, #tpu.memory_space<vmem>>, vector<8x128xf32>
      tpu.vector_store %arg9[%c0_16, %c0_17], %22 {strides = array<i32>} : memref<8x128xf32, #tpu.memory_space<vmem>>, vector<8x128xf32>,
    } else {
    }
    %c0 = arith.constant 0 : index
    %c0_1 = arith.constant 0 : index
    %3 = vector.load %arg2[%c0, %c0_1] : memref<8x256xbf16, #tpu.memory_space<vmem>>, vector<8x256xbf16>
    %4 = arith.extf %3 : vector<8x256xbf16> to vector<8x256xf32>
    %c0_2 = arith.constant 0 : index
    %c0_3 = arith.constant 0 : index
    %5 = vector.load %arg4[%c0_2, %c0_3] : memref<1x256xf32, #tpu.memory_space<vmem>>, vector<1x256xf32>
    %6 = vector.broadcast %5 : vector<1x256xf32> to vector<8x256xf32>
    %7 = arith.mulf %4, %6 : vector<8x256xf32>
    %c0_4 = arith.constant 0 : index
    %c0_5 = arith.constant 0 : index
    %8 = vector.load %arg5[%c0_4, %c0_5] : memref<1x256xf32, #tpu.memory_space<vmem>>, vector<1x256xf32>
    %9 = vector.broadcast %8 : vector<1x256xf32> to vector<8x256xf32>
    %10 = arith.addf %7, %9 : vector<8x256xf32>
    %cst = arith.constant 0.000000e+00 : f32
    %11 = vector.broadcast %cst : f32 to vector<8x256xf32>
    %12 = arith.maximumf %10, %11 : vector<8x256xf32>
    %13 = arith.truncf %12 : vector<8x256xf32> to vector<8x256xbf16>
    %c0_6 = arith.constant 0 : index
    %c0_7 = arith.constant 0 : index
    %14 = vector.load %arg9[%c0_6, %c0_7] : memref<8x128xf32, #tpu.memory_space<vmem>>, vector<8x128xf32>
    %c0_8 = arith.constant 0 : index
    %c0_9 = arith.constant 0 : index
    %15 = vector.load %arg3[%c0_8, %c0_9] : memref<256x128xbf16, #tpu.memory_space<vmem>>, vector<256x128xbf16>
    %cst_10 = arith.constant dense<0.000000e+00> : vector<8x128xf32>
    %16 = tpu.matmul %13, %15, %cst_10 {dimension_numbers = #tpu.dot_dimension_numbers<[1], [0], [0], [1], [0, 0, 1, 1], [], []>} : vector<8x256xbf16>, vector<256x128xbf16>, vector<8x128xf32> -> vector<8x128xf32>
    %17 = arith.addf %14, %16 : vector<8x128xf32>
    %c0_11 = arith.constant 0 : index
    %c0_12 = arith.constant 0 : index
    %18 = vector.load %arg9[%c0_11, %c0_12] : memref<8x128xf32, #tpu.memory_space<vmem>>, vector<8x128xf32>
    tpu.vector_store %arg9[%c0_11, %c0_12], %17 {strides = array<i32>} : memref<8x128xf32, #tpu.memory_space<vmem>>, vector<8x128xf32>,
    %c0_i32_13 = arith.constant 0 : i32
    %19 = arith.cmpi eq, %arg1, %c0_i32_13 : i32
    %20 = arith.extui %19 : i1 to i32
    %c0_i32_14 = arith.constant 0 : i32
    %21 = arith.cmpi ne, %20, %c0_i32_14 : i32
    scf.if %21 {
      %c0_15 = arith.constant 0 : index
      %c0_16 = arith.constant 0 : index
      %22 = vector.load %arg9[%c0_15, %c0_16] : memref<8x128xf32, #tpu.memory_space<vmem>>, vector<8x128xf32>
      %c0_17 = arith.constant 0 : index
      %c0_18 = arith.constant 0 : index
      %23 = vector.load %arg6[%c0_17, %c0_18] : memref<1x128xf32, #tpu.memory_space<vmem>>, vector<1x128xf32>
      %24 = vector.broadcast %23 : vector<1x128xf32> to vector<8x128xf32>
      %25 = arith.mulf %22, %24 : vector<8x128xf32>
      %c0_19 = arith.constant 0 : index
      %c0_20 = arith.constant 0 : index
      %26 = vector.load %arg7[%c0_19, %c0_20] : memref<1x128xf32, #tpu.memory_space<vmem>>, vector<1x128xf32>
      %27 = vector.broadcast %26 : vector<1x128xf32> to vector<8x128xf32>
      %28 = arith.addf %25, %27 : vector<8x128xf32>
      %cst_21 = arith.constant 0.000000e+00 : f32
      %29 = vector.broadcast %cst_21 : f32 to vector<8x128xf32>
      %30 = arith.maximumf %28, %29 : vector<8x128xf32>
      %31 = arith.truncf %30 : vector<8x128xf32> to vector<8x128xbf16>
      %c0_22 = arith.constant 0 : index
      %c0_23 = arith.constant 0 : index
      %32 = vector.load %arg8[%c0_22, %c0_23] : memref<8x128xbf16, #tpu.memory_space<vmem>>, vector<8x128xbf16>
      tpu.vector_store %arg8[%c0_22, %c0_23], %31 {strides = array<i32>} : memref<8x128xbf16, #tpu.memory_space<vmem>>, vector<8x128xbf16>,
    } else {
    }
    return
  }
  func.func @transform_0(%arg0: i32, %arg1: i32) -> (i32, i32) {
    %c0_i32 = arith.constant 0 : i32
    return %arg0, %arg1 : i32, i32
  }
  func.func @transform_1(%arg0: i32, %arg1: i32) -> (i32, i32) {
    %c0_i32 = arith.constant 0 : i32
    %c0_i32_0 = arith.constant 0 : i32
    return %arg1, %c0_i32 : i32, i32
  }
  func.func @transform_2(%arg0: i32, %arg1: i32) -> (i32, i32) {
    %c0_i32 = arith.constant 0 : i32
    %c0_i32_0 = arith.constant 0 : i32
    return %c0_i32, %arg1 : i32, i32
  }
  func.func @transform_3(%arg0: i32, %arg1: i32) -> (i32, i32) {
    %c0_i32 = arith.constant 0 : i32
    %c0_i32_0 = arith.constant 0 : i32
    return %c0_i32, %arg1 : i32, i32
  }
  func.func @transform_4(%arg0: i32, %arg1: i32) -> (i32, i32) {
    %c0_i32 = arith.constant 0 : i32
    %c0_i32_0 = arith.constant 0 : i32
    %c0_i32_1 = arith.constant 0 : i32
    return %c0_i32, %c0_i32_0 : i32, i32
  }
  func.func @transform_5(%arg0: i32, %arg1: i32) -> (i32, i32) {
    %c0_i32 = arith.constant 0 : i32
    %c0_i32_0 = arith.constant 0 : i32
    %c0_i32_1 = arith.constant 0 : i32
    return %c0_i32, %c0_i32_0 : i32, i32
  }
  func.func @transform_6(%arg0: i32, %arg1: i32) -> (i32, i32) {
    %c0_i32 = arith.constant 0 : i32
    %c0_i32_0 = arith.constant 0 : i32
    return %arg0, %c0_i32 : i32, i32
  }
}

module attributes {stable_mosaic.version = 11 : i64} {
  func.func @_fused_mm_kernel(%arg0: i32, %arg1: i32, %arg2: memref<8x384xbf16, #tpu.memory_space<vmem>>, %arg3: memref<384x128xbf16, #tpu.memory_space<vmem>>, %arg4: memref<1x384xf32, #tpu.memory_space<vmem>>, %arg5: memref<1x384xf32, #tpu.memory_space<vmem>>, %arg6: memref<1x128xf32, #tpu.memory_space<vmem>>, %arg7: memref<1x128xf32, #tpu.memory_space<vmem>>, %arg8: memref<8x128xbf16, #tpu.memory_space<vmem>>, %arg9: memref<8x128xf32, #tpu.memory_space<vmem>>) attributes {dimension_semantics = [#tpu.dimension_semantics<parallel>, #tpu.dimension_semantics<arbitrary>], iteration_bounds = array<i64: 1, 1>, scalar_prefetch = 0 : i64, scratch_operands = 1 : i64, tpu.core_type = #tpu.core_type<tc>, window_params = [{transform_indices = @transform_0, window_bounds = array<i64: 8, 384>}, {transform_indices = @transform_1, window_bounds = array<i64: 384, 128>}, {transform_indices = @transform_2, window_bounds = array<i64: 1, 384>}, {transform_indices = @transform_3, window_bounds = array<i64: 1, 384>}, {pipeline_mode = #tpu.pipeline_mode<synchronous>, transform_indices = @transform_4, window_bounds = array<i64: 1, 128>}, {pipeline_mode = #tpu.pipeline_mode<synchronous>, transform_indices = @transform_5, window_bounds = array<i64: 1, 128>}, {transform_indices = @transform_6, window_bounds = array<i64: 8, 128>}]} {
    %c0_i32 = arith.constant 0 : i32
    %0 = arith.cmpi eq, %arg1, %c0_i32 : i32
    %1 = arith.extui %0 : i1 to i32
    %c0_i32_0 = arith.constant 0 : i32
    %2 = arith.cmpi ne, %1, %c0_i32_0 : i32
    scf.if %2 {
      %cst_15 = arith.constant 0.000000e+00 : f32
      %22 = vector.broadcast %cst_15 : f32 to vector<8x128xf32>
      %c0_16 = arith.constant 0 : index
      %c0_17 = arith.constant 0 : index
      %23 = vector.load %arg9[%c0_16, %c0_17] : memref<8x128xf32, #tpu.memory_space<vmem>>, vector<8x128xf32>
      tpu.vector_store %arg9[%c0_16, %c0_17], %22 {strides = array<i32>} : memref<8x128xf32, #tpu.memory_space<vmem>>, vector<8x128xf32>,
    } else {
    }
    %c0 = arith.constant 0 : index
    %c0_1 = arith.constant 0 : index
    %3 = vector.load %arg2[%c0, %c0_1] : memref<8x384xbf16, #tpu.memory_space<vmem>>, vector<8x384xbf16>
    %4 = arith.extf %3 : vector<8x384xbf16> to vector<8x384xf32>
    %c0_2 = arith.constant 0 : index
    %c0_3 = arith.constant 0 : index
    %5 = vector.load %arg4[%c0_2, %c0_3] : memref<1x384xf32, #tpu.memory_space<vmem>>, vector<1x384xf32>
    %6 = vector.broadcast %5 : vector<1x384xf32> to vector<8x384xf32>
    %7 = arith.mulf %4, %6 : vector<8x384xf32>
    %c0_4 = arith.constant 0 : index
    %c0_5 = arith.constant 0 : index
    %8 = vector.load %arg5[%c0_4, %c0_5] : memref<1x384xf32, #tpu.memory_space<vmem>>, vector<1x384xf32>
    %9 = vector.broadcast %8 : vector<1x384xf32> to vector<8x384xf32>
    %10 = arith.addf %7, %9 : vector<8x384xf32>
    %cst = arith.constant 0.000000e+00 : f32
    %11 = vector.broadcast %cst : f32 to vector<8x384xf32>
    %12 = arith.maximumf %10, %11 : vector<8x384xf32>
    %13 = arith.truncf %12 : vector<8x384xf32> to vector<8x384xbf16>
    %c0_6 = arith.constant 0 : index
    %c0_7 = arith.constant 0 : index
    %14 = vector.load %arg9[%c0_6, %c0_7] : memref<8x128xf32, #tpu.memory_space<vmem>>, vector<8x128xf32>
    %c0_8 = arith.constant 0 : index
    %c0_9 = arith.constant 0 : index
    %15 = vector.load %arg3[%c0_8, %c0_9] : memref<384x128xbf16, #tpu.memory_space<vmem>>, vector<384x128xbf16>
    %cst_10 = arith.constant dense<0.000000e+00> : vector<8x128xf32>
    %16 = tpu.matmul %13, %15, %cst_10 {dimension_numbers = #tpu.dot_dimension_numbers<[1], [0], [0], [1], [0, 0, 1, 1], [], []>} : vector<8x384xbf16>, vector<384x128xbf16>, vector<8x128xf32> -> vector<8x128xf32>
    %17 = arith.addf %14, %16 : vector<8x128xf32>
    %c0_11 = arith.constant 0 : index
    %c0_12 = arith.constant 0 : index
    %18 = vector.load %arg9[%c0_11, %c0_12] : memref<8x128xf32, #tpu.memory_space<vmem>>, vector<8x128xf32>
    tpu.vector_store %arg9[%c0_11, %c0_12], %17 {strides = array<i32>} : memref<8x128xf32, #tpu.memory_space<vmem>>, vector<8x128xf32>,
    %c0_i32_13 = arith.constant 0 : i32
    %19 = arith.cmpi eq, %arg1, %c0_i32_13 : i32
    %20 = arith.extui %19 : i1 to i32
    %c0_i32_14 = arith.constant 0 : i32
    %21 = arith.cmpi ne, %20, %c0_i32_14 : i32
    scf.if %21 {
      %c0_15 = arith.constant 0 : index
      %c0_16 = arith.constant 0 : index
      %22 = vector.load %arg9[%c0_15, %c0_16] : memref<8x128xf32, #tpu.memory_space<vmem>>, vector<8x128xf32>
      %c0_17 = arith.constant 0 : index
      %c0_18 = arith.constant 0 : index
      %23 = vector.load %arg6[%c0_17, %c0_18] : memref<1x128xf32, #tpu.memory_space<vmem>>, vector<1x128xf32>
      %24 = vector.broadcast %23 : vector<1x128xf32> to vector<8x128xf32>
      %25 = arith.mulf %22, %24 : vector<8x128xf32>
      %c0_19 = arith.constant 0 : index
      %c0_20 = arith.constant 0 : index
      %26 = vector.load %arg7[%c0_19, %c0_20] : memref<1x128xf32, #tpu.memory_space<vmem>>, vector<1x128xf32>
      %27 = vector.broadcast %26 : vector<1x128xf32> to vector<8x128xf32>
      %28 = arith.addf %25, %27 : vector<8x128xf32>
      %cst_21 = arith.constant 0.000000e+00 : f32
      %29 = vector.broadcast %cst_21 : f32 to vector<8x128xf32>
      %30 = arith.maximumf %28, %29 : vector<8x128xf32>
      %31 = arith.truncf %30 : vector<8x128xf32> to vector<8x128xbf16>
      %c0_22 = arith.constant 0 : index
      %c0_23 = arith.constant 0 : index
      %32 = vector.load %arg8[%c0_22, %c0_23] : memref<8x128xbf16, #tpu.memory_space<vmem>>, vector<8x128xbf16>
      tpu.vector_store %arg8[%c0_22, %c0_23], %31 {strides = array<i32>} : memref<8x128xbf16, #tpu.memory_space<vmem>>, vector<8x128xbf16>,
    } else {
    }
    return
  }
  func.func @transform_0(%arg0: i32, %arg1: i32) -> (i32, i32) {
    %c0_i32 = arith.constant 0 : i32
    return %arg0, %arg1 : i32, i32
  }
  func.func @transform_1(%arg0: i32, %arg1: i32) -> (i32, i32) {
    %c0_i32 = arith.constant 0 : i32
    %c0_i32_0 = arith.constant 0 : i32
    return %arg1, %c0_i32 : i32, i32
  }
  func.func @transform_2(%arg0: i32, %arg1: i32) -> (i32, i32) {
    %c0_i32 = arith.constant 0 : i32
    %c0_i32_0 = arith.constant 0 : i32
    return %c0_i32, %arg1 : i32, i32
  }
  func.func @transform_3(%arg0: i32, %arg1: i32) -> (i32, i32) {
    %c0_i32 = arith.constant 0 : i32
    %c0_i32_0 = arith.constant 0 : i32
    return %c0_i32, %arg1 : i32, i32
  }
  func.func @transform_4(%arg0: i32, %arg1: i32) -> (i32, i32) {
    %c0_i32 = arith.constant 0 : i32
    %c0_i32_0 = arith.constant 0 : i32
    %c0_i32_1 = arith.constant 0 : i32
    return %c0_i32, %c0_i32_0 : i32, i32
  }
  func.func @transform_5(%arg0: i32, %arg1: i32) -> (i32, i32) {
    %c0_i32 = arith.constant 0 : i32
    %c0_i32_0 = arith.constant 0 : i32
    %c0_i32_1 = arith.constant 0 : i32
    return %c0_i32, %c0_i32_0 : i32, i32
  }
  func.func @transform_6(%arg0: i32, %arg1: i32) -> (i32, i32) {
    %c0_i32 = arith.constant 0 : i32
    %c0_i32_0 = arith.constant 0 : i32
    return %arg0, %c0_i32 : i32, i32
  }
}

module attributes {stable_mosaic.version = 11 : i64} {
  func.func @_fused_mm_kernel(%arg0: i32, %arg1: i32, %arg2: memref<8x384xbf16, #tpu.memory_space<vmem>>, %arg3: memref<384x32xbf16, #tpu.memory_space<vmem>>, %arg4: memref<1x384xf32, #tpu.memory_space<vmem>>, %arg5: memref<1x384xf32, #tpu.memory_space<vmem>>, %arg6: memref<1x32xf32, #tpu.memory_space<vmem>>, %arg7: memref<1x32xf32, #tpu.memory_space<vmem>>, %arg8: memref<8x32xbf16, #tpu.memory_space<vmem>>, %arg9: memref<8x32xf32, #tpu.memory_space<vmem>>) attributes {dimension_semantics = [#tpu.dimension_semantics<parallel>, #tpu.dimension_semantics<arbitrary>], iteration_bounds = array<i64: 1, 3>, scalar_prefetch = 0 : i64, scratch_operands = 1 : i64, tpu.core_type = #tpu.core_type<tc>, window_params = [{transform_indices = @transform_0, window_bounds = array<i64: 8, 384>}, {transform_indices = @transform_1, window_bounds = array<i64: 384, 32>}, {transform_indices = @transform_2, window_bounds = array<i64: 1, 384>}, {transform_indices = @transform_3, window_bounds = array<i64: 1, 384>}, {pipeline_mode = #tpu.pipeline_mode<synchronous>, transform_indices = @transform_4, window_bounds = array<i64: 1, 32>}, {pipeline_mode = #tpu.pipeline_mode<synchronous>, transform_indices = @transform_5, window_bounds = array<i64: 1, 32>}, {transform_indices = @transform_6, window_bounds = array<i64: 8, 32>}]} {
    %c0_i32 = arith.constant 0 : i32
    %0 = arith.cmpi eq, %arg1, %c0_i32 : i32
    %1 = arith.extui %0 : i1 to i32
    %c0_i32_0 = arith.constant 0 : i32
    %2 = arith.cmpi ne, %1, %c0_i32_0 : i32
    scf.if %2 {
      %cst_9 = arith.constant 0.000000e+00 : f32
      %12 = vector.broadcast %cst_9 : f32 to vector<8x32xf32>
      %c0_10 = arith.constant 0 : index
      %c0_11 = arith.constant 0 : index
      %13 = vector.load %arg9[%c0_10, %c0_11] : memref<8x32xf32, #tpu.memory_space<vmem>>, vector<8x32xf32>
      tpu.vector_store %arg9[%c0_10, %c0_11], %12 {strides = array<i32>} : memref<8x32xf32, #tpu.memory_space<vmem>>, vector<8x32xf32>,
    } else {
    }
    %c0 = arith.constant 0 : index
    %c0_1 = arith.constant 0 : index
    %3 = vector.load %arg2[%c0, %c0_1] : memref<8x384xbf16, #tpu.memory_space<vmem>>, vector<8x384xbf16>
    %c0_2 = arith.constant 0 : index
    %c0_3 = arith.constant 0 : index
    %4 = vector.load %arg9[%c0_2, %c0_3] : memref<8x32xf32, #tpu.memory_space<vmem>>, vector<8x32xf32>
    %c0_4 = arith.constant 0 : index
    %c0_5 = arith.constant 0 : index
    %5 = vector.load %arg3[%c0_4, %c0_5] : memref<384x32xbf16, #tpu.memory_space<vmem>>, vector<384x32xbf16>
    %cst = arith.constant dense<0.000000e+00> : vector<8x32xf32>
    %6 = tpu.matmul %3, %5, %cst {dimension_numbers = #tpu.dot_dimension_numbers<[1], [0], [0], [1], [0, 0, 1, 1], [], []>} : vector<8x384xbf16>, vector<384x32xbf16>, vector<8x32xf32> -> vector<8x32xf32>
    %7 = arith.addf %4, %6 : vector<8x32xf32>
    %c0_6 = arith.constant 0 : index
    %c0_7 = arith.constant 0 : index
    %8 = vector.load %arg9[%c0_6, %c0_7] : memref<8x32xf32, #tpu.memory_space<vmem>>, vector<8x32xf32>
    tpu.vector_store %arg9[%c0_6, %c0_7], %7 {strides = array<i32>} : memref<8x32xf32, #tpu.memory_space<vmem>>, vector<8x32xf32>,
    %c2_i32 = arith.constant 2 : i32
    %9 = arith.cmpi eq, %arg1, %c2_i32 : i32
    %10 = arith.extui %9 : i1 to i32
    %c0_i32_8 = arith.constant 0 : i32
    %11 = arith.cmpi ne, %10, %c0_i32_8 : i32
    scf.if %11 {
      %c0_9 = arith.constant 0 : index
      %c0_10 = arith.constant 0 : index
      %12 = vector.load %arg9[%c0_9, %c0_10] : memref<8x32xf32, #tpu.memory_space<vmem>>, vector<8x32xf32>
      %13 = arith.truncf %12 : vector<8x32xf32> to vector<8x32xbf16>
      %c0_11 = arith.constant 0 : index
      %c0_12 = arith.constant 0 : index
      %14 = vector.load %arg8[%c0_11, %c0_12] : memref<8x32xbf16, #tpu.memory_space<vmem>>, vector<8x32xbf16>
      tpu.vector_store %arg8[%c0_11, %c0_12], %13 {strides = array<i32>} : memref<8x32xbf16, #tpu.memory_space<vmem>>, vector<8x32xbf16>,
    } else {
    }
    return
  }
  func.func @transform_0(%arg0: i32, %arg1: i32) -> (i32, i32) {
    %c0_i32 = arith.constant 0 : i32
    return %arg0, %arg1 : i32, i32
  }
  func.func @transform_1(%arg0: i32, %arg1: i32) -> (i32, i32) {
    %c0_i32 = arith.constant 0 : i32
    %c0_i32_0 = arith.constant 0 : i32
    return %arg1, %c0_i32 : i32, i32
  }
  func.func @transform_2(%arg0: i32, %arg1: i32) -> (i32, i32) {
    %c0_i32 = arith.constant 0 : i32
    %c0_i32_0 = arith.constant 0 : i32
    return %c0_i32, %arg1 : i32, i32
  }
  func.func @transform_3(%arg0: i32, %arg1: i32) -> (i32, i32) {
    %c0_i32 = arith.constant 0 : i32
    %c0_i32_0 = arith.constant 0 : i32
    return %c0_i32, %arg1 : i32, i32
  }
  func.func @transform_4(%arg0: i32, %arg1: i32) -> (i32, i32) {
    %c0_i32 = arith.constant 0 : i32
    %c0_i32_0 = arith.constant 0 : i32
    %c0_i32_1 = arith.constant 0 : i32
    return %c0_i32, %c0_i32_0 : i32, i32
  }
  func.func @transform_5(%arg0: i32, %arg1: i32) -> (i32, i32) {
    %c0_i32 = arith.constant 0 : i32
    %c0_i32_0 = arith.constant 0 : i32
    %c0_i32_1 = arith.constant 0 : i32
    return %c0_i32, %c0_i32_0 : i32, i32
  }
  func.func @transform_6(%arg0: i32, %arg1: i32) -> (i32, i32) {
    %c0_i32 = arith.constant 0 : i32
    %c0_i32_0 = arith.constant 0 : i32
    return %arg0, %c0_i32 : i32, i32
  }
}

module attributes {stable_mosaic.version = 11 : i64} {
  func.func @_fused_mm_kernel(%arg0: i32, %arg1: i32, %arg2: memref<8x512xbf16, #tpu.memory_space<vmem>>, %arg3: memref<512x128xbf16, #tpu.memory_space<vmem>>, %arg4: memref<1x512xf32, #tpu.memory_space<vmem>>, %arg5: memref<1x512xf32, #tpu.memory_space<vmem>>, %arg6: memref<1x128xf32, #tpu.memory_space<vmem>>, %arg7: memref<1x128xf32, #tpu.memory_space<vmem>>, %arg8: memref<8x128xbf16, #tpu.memory_space<vmem>>, %arg9: memref<8x128xf32, #tpu.memory_space<vmem>>) attributes {dimension_semantics = [#tpu.dimension_semantics<parallel>, #tpu.dimension_semantics<arbitrary>], iteration_bounds = array<i64: 1, 1>, scalar_prefetch = 0 : i64, scratch_operands = 1 : i64, tpu.core_type = #tpu.core_type<tc>, window_params = [{transform_indices = @transform_0, window_bounds = array<i64: 8, 512>}, {transform_indices = @transform_1, window_bounds = array<i64: 512, 128>}, {transform_indices = @transform_2, window_bounds = array<i64: 1, 512>}, {transform_indices = @transform_3, window_bounds = array<i64: 1, 512>}, {pipeline_mode = #tpu.pipeline_mode<synchronous>, transform_indices = @transform_4, window_bounds = array<i64: 1, 128>}, {pipeline_mode = #tpu.pipeline_mode<synchronous>, transform_indices = @transform_5, window_bounds = array<i64: 1, 128>}, {transform_indices = @transform_6, window_bounds = array<i64: 8, 128>}]} {
    %c0_i32 = arith.constant 0 : i32
    %0 = arith.cmpi eq, %arg1, %c0_i32 : i32
    %1 = arith.extui %0 : i1 to i32
    %c0_i32_0 = arith.constant 0 : i32
    %2 = arith.cmpi ne, %1, %c0_i32_0 : i32
    scf.if %2 {
      %cst_15 = arith.constant 0.000000e+00 : f32
      %22 = vector.broadcast %cst_15 : f32 to vector<8x128xf32>
      %c0_16 = arith.constant 0 : index
      %c0_17 = arith.constant 0 : index
      %23 = vector.load %arg9[%c0_16, %c0_17] : memref<8x128xf32, #tpu.memory_space<vmem>>, vector<8x128xf32>
      tpu.vector_store %arg9[%c0_16, %c0_17], %22 {strides = array<i32>} : memref<8x128xf32, #tpu.memory_space<vmem>>, vector<8x128xf32>,
    } else {
    }
    %c0 = arith.constant 0 : index
    %c0_1 = arith.constant 0 : index
    %3 = vector.load %arg2[%c0, %c0_1] : memref<8x512xbf16, #tpu.memory_space<vmem>>, vector<8x512xbf16>
    %4 = arith.extf %3 : vector<8x512xbf16> to vector<8x512xf32>
    %c0_2 = arith.constant 0 : index
    %c0_3 = arith.constant 0 : index
    %5 = vector.load %arg4[%c0_2, %c0_3] : memref<1x512xf32, #tpu.memory_space<vmem>>, vector<1x512xf32>
    %6 = vector.broadcast %5 : vector<1x512xf32> to vector<8x512xf32>
    %7 = arith.mulf %4, %6 : vector<8x512xf32>
    %c0_4 = arith.constant 0 : index
    %c0_5 = arith.constant 0 : index
    %8 = vector.load %arg5[%c0_4, %c0_5] : memref<1x512xf32, #tpu.memory_space<vmem>>, vector<1x512xf32>
    %9 = vector.broadcast %8 : vector<1x512xf32> to vector<8x512xf32>
    %10 = arith.addf %7, %9 : vector<8x512xf32>
    %cst = arith.constant 0.000000e+00 : f32
    %11 = vector.broadcast %cst : f32 to vector<8x512xf32>
    %12 = arith.maximumf %10, %11 : vector<8x512xf32>
    %13 = arith.truncf %12 : vector<8x512xf32> to vector<8x512xbf16>
    %c0_6 = arith.constant 0 : index
    %c0_7 = arith.constant 0 : index
    %14 = vector.load %arg9[%c0_6, %c0_7] : memref<8x128xf32, #tpu.memory_space<vmem>>, vector<8x128xf32>
    %c0_8 = arith.constant 0 : index
    %c0_9 = arith.constant 0 : index
    %15 = vector.load %arg3[%c0_8, %c0_9] : memref<512x128xbf16, #tpu.memory_space<vmem>>, vector<512x128xbf16>
    %cst_10 = arith.constant dense<0.000000e+00> : vector<8x128xf32>
    %16 = tpu.matmul %13, %15, %cst_10 {dimension_numbers = #tpu.dot_dimension_numbers<[1], [0], [0], [1], [0, 0, 1, 1], [], []>} : vector<8x512xbf16>, vector<512x128xbf16>, vector<8x128xf32> -> vector<8x128xf32>
    %17 = arith.addf %14, %16 : vector<8x128xf32>
    %c0_11 = arith.constant 0 : index
    %c0_12 = arith.constant 0 : index
    %18 = vector.load %arg9[%c0_11, %c0_12] : memref<8x128xf32, #tpu.memory_space<vmem>>, vector<8x128xf32>
    tpu.vector_store %arg9[%c0_11, %c0_12], %17 {strides = array<i32>} : memref<8x128xf32, #tpu.memory_space<vmem>>, vector<8x128xf32>,
    %c0_i32_13 = arith.constant 0 : i32
    %19 = arith.cmpi eq, %arg1, %c0_i32_13 : i32
    %20 = arith.extui %19 : i1 to i32
    %c0_i32_14 = arith.constant 0 : i32
    %21 = arith.cmpi ne, %20, %c0_i32_14 : i32
    scf.if %21 {
      %c0_15 = arith.constant 0 : index
      %c0_16 = arith.constant 0 : index
      %22 = vector.load %arg9[%c0_15, %c0_16] : memref<8x128xf32, #tpu.memory_space<vmem>>, vector<8x128xf32>
      %c0_17 = arith.constant 0 : index
      %c0_18 = arith.constant 0 : index
      %23 = vector.load %arg6[%c0_17, %c0_18] : memref<1x128xf32, #tpu.memory_space<vmem>>, vector<1x128xf32>
      %24 = vector.broadcast %23 : vector<1x128xf32> to vector<8x128xf32>
      %25 = arith.mulf %22, %24 : vector<8x128xf32>
      %c0_19 = arith.constant 0 : index
      %c0_20 = arith.constant 0 : index
      %26 = vector.load %arg7[%c0_19, %c0_20] : memref<1x128xf32, #tpu.memory_space<vmem>>, vector<1x128xf32>
      %27 = vector.broadcast %26 : vector<1x128xf32> to vector<8x128xf32>
      %28 = arith.addf %25, %27 : vector<8x128xf32>
      %cst_21 = arith.constant 0.000000e+00 : f32
      %29 = vector.broadcast %cst_21 : f32 to vector<8x128xf32>
      %30 = arith.maximumf %28, %29 : vector<8x128xf32>
      %31 = arith.truncf %30 : vector<8x128xf32> to vector<8x128xbf16>
      %c0_22 = arith.constant 0 : index
      %c0_23 = arith.constant 0 : index
      %32 = vector.load %arg8[%c0_22, %c0_23] : memref<8x128xbf16, #tpu.memory_space<vmem>>, vector<8x128xbf16>
      tpu.vector_store %arg8[%c0_22, %c0_23], %31 {strides = array<i32>} : memref<8x128xbf16, #tpu.memory_space<vmem>>, vector<8x128xbf16>,
    } else {
    }
    return
  }
  func.func @transform_0(%arg0: i32, %arg1: i32) -> (i32, i32) {
    %c0_i32 = arith.constant 0 : i32
    return %arg0, %arg1 : i32, i32
  }
  func.func @transform_1(%arg0: i32, %arg1: i32) -> (i32, i32) {
    %c0_i32 = arith.constant 0 : i32
    %c0_i32_0 = arith.constant 0 : i32
    return %arg1, %c0_i32 : i32, i32
  }
  func.func @transform_2(%arg0: i32, %arg1: i32) -> (i32, i32) {
    %c0_i32 = arith.constant 0 : i32
    %c0_i32_0 = arith.constant 0 : i32
    return %c0_i32, %arg1 : i32, i32
  }
  func.func @transform_3(%arg0: i32, %arg1: i32) -> (i32, i32) {
    %c0_i32 = arith.constant 0 : i32
    %c0_i32_0 = arith.constant 0 : i32
    return %c0_i32, %arg1 : i32, i32
  }
  func.func @transform_4(%arg0: i32, %arg1: i32) -> (i32, i32) {
    %c0_i32 = arith.constant 0 : i32
    %c0_i32_0 = arith.constant 0 : i32
    %c0_i32_1 = arith.constant 0 : i32
    return %c0_i32, %c0_i32_0 : i32, i32
  }
  func.func @transform_5(%arg0: i32, %arg1: i32) -> (i32, i32) {
    %c0_i32 = arith.constant 0 : i32
    %c0_i32_0 = arith.constant 0 : i32
    %c0_i32_1 = arith.constant 0 : i32
    return %c0_i32, %c0_i32_0 : i32, i32
  }
  func.func @transform_6(%arg0: i32, %arg1: i32) -> (i32, i32) {
    %c0_i32 = arith.constant 0 : i32
    %c0_i32_0 = arith.constant 0 : i32
    return %arg0, %c0_i32 : i32, i32
  }
}

module attributes {stable_mosaic.version = 11 : i64} {
  func.func @_fused_mm_kernel(%arg0: i32, %arg1: i32, %arg2: memref<8x384xbf16, #tpu.memory_space<vmem>>, %arg3: memref<384x128xbf16, #tpu.memory_space<vmem>>, %arg4: memref<1x384xf32, #tpu.memory_space<vmem>>, %arg5: memref<1x384xf32, #tpu.memory_space<vmem>>, %arg6: memref<1x128xf32, #tpu.memory_space<vmem>>, %arg7: memref<1x128xf32, #tpu.memory_space<vmem>>, %arg8: memref<8x128xbf16, #tpu.memory_space<vmem>>, %arg9: memref<8x128xf32, #tpu.memory_space<vmem>>) attributes {dimension_semantics = [#tpu.dimension_semantics<parallel>, #tpu.dimension_semantics<arbitrary>], iteration_bounds = array<i64: 1, 2>, scalar_prefetch = 0 : i64, scratch_operands = 1 : i64, tpu.core_type = #tpu.core_type<tc>, window_params = [{transform_indices = @transform_0, window_bounds = array<i64: 8, 384>}, {transform_indices = @transform_1, window_bounds = array<i64: 384, 128>}, {transform_indices = @transform_2, window_bounds = array<i64: 1, 384>}, {transform_indices = @transform_3, window_bounds = array<i64: 1, 384>}, {pipeline_mode = #tpu.pipeline_mode<synchronous>, transform_indices = @transform_4, window_bounds = array<i64: 1, 128>}, {pipeline_mode = #tpu.pipeline_mode<synchronous>, transform_indices = @transform_5, window_bounds = array<i64: 1, 128>}, {transform_indices = @transform_6, window_bounds = array<i64: 8, 128>}]} {
    %c0_i32 = arith.constant 0 : i32
    %0 = arith.cmpi eq, %arg1, %c0_i32 : i32
    %1 = arith.extui %0 : i1 to i32
    %c0_i32_0 = arith.constant 0 : i32
    %2 = arith.cmpi ne, %1, %c0_i32_0 : i32
    scf.if %2 {
      %cst_14 = arith.constant 0.000000e+00 : f32
      %22 = vector.broadcast %cst_14 : f32 to vector<8x128xf32>
      %c0_15 = arith.constant 0 : index
      %c0_16 = arith.constant 0 : index
      %23 = vector.load %arg9[%c0_15, %c0_16] : memref<8x128xf32, #tpu.memory_space<vmem>>, vector<8x128xf32>
      tpu.vector_store %arg9[%c0_15, %c0_16], %22 {strides = array<i32>} : memref<8x128xf32, #tpu.memory_space<vmem>>, vector<8x128xf32>,
    } else {
    }
    %c0 = arith.constant 0 : index
    %c0_1 = arith.constant 0 : index
    %3 = vector.load %arg2[%c0, %c0_1] : memref<8x384xbf16, #tpu.memory_space<vmem>>, vector<8x384xbf16>
    %4 = arith.extf %3 : vector<8x384xbf16> to vector<8x384xf32>
    %c0_2 = arith.constant 0 : index
    %c0_3 = arith.constant 0 : index
    %5 = vector.load %arg4[%c0_2, %c0_3] : memref<1x384xf32, #tpu.memory_space<vmem>>, vector<1x384xf32>
    %6 = vector.broadcast %5 : vector<1x384xf32> to vector<8x384xf32>
    %7 = arith.mulf %4, %6 : vector<8x384xf32>
    %c0_4 = arith.constant 0 : index
    %c0_5 = arith.constant 0 : index
    %8 = vector.load %arg5[%c0_4, %c0_5] : memref<1x384xf32, #tpu.memory_space<vmem>>, vector<1x384xf32>
    %9 = vector.broadcast %8 : vector<1x384xf32> to vector<8x384xf32>
    %10 = arith.addf %7, %9 : vector<8x384xf32>
    %cst = arith.constant 0.000000e+00 : f32
    %11 = vector.broadcast %cst : f32 to vector<8x384xf32>
    %12 = arith.maximumf %10, %11 : vector<8x384xf32>
    %13 = arith.truncf %12 : vector<8x384xf32> to vector<8x384xbf16>
    %c0_6 = arith.constant 0 : index
    %c0_7 = arith.constant 0 : index
    %14 = vector.load %arg9[%c0_6, %c0_7] : memref<8x128xf32, #tpu.memory_space<vmem>>, vector<8x128xf32>
    %c0_8 = arith.constant 0 : index
    %c0_9 = arith.constant 0 : index
    %15 = vector.load %arg3[%c0_8, %c0_9] : memref<384x128xbf16, #tpu.memory_space<vmem>>, vector<384x128xbf16>
    %cst_10 = arith.constant dense<0.000000e+00> : vector<8x128xf32>
    %16 = tpu.matmul %13, %15, %cst_10 {dimension_numbers = #tpu.dot_dimension_numbers<[1], [0], [0], [1], [0, 0, 1, 1], [], []>} : vector<8x384xbf16>, vector<384x128xbf16>, vector<8x128xf32> -> vector<8x128xf32>
    %17 = arith.addf %14, %16 : vector<8x128xf32>
    %c0_11 = arith.constant 0 : index
    %c0_12 = arith.constant 0 : index
    %18 = vector.load %arg9[%c0_11, %c0_12] : memref<8x128xf32, #tpu.memory_space<vmem>>, vector<8x128xf32>
    tpu.vector_store %arg9[%c0_11, %c0_12], %17 {strides = array<i32>} : memref<8x128xf32, #tpu.memory_space<vmem>>, vector<8x128xf32>,
    %c1_i32 = arith.constant 1 : i32
    %19 = arith.cmpi eq, %arg1, %c1_i32 : i32
    %20 = arith.extui %19 : i1 to i32
    %c0_i32_13 = arith.constant 0 : i32
    %21 = arith.cmpi ne, %20, %c0_i32_13 : i32
    scf.if %21 {
      %c0_14 = arith.constant 0 : index
      %c0_15 = arith.constant 0 : index
      %22 = vector.load %arg9[%c0_14, %c0_15] : memref<8x128xf32, #tpu.memory_space<vmem>>, vector<8x128xf32>
      %c0_16 = arith.constant 0 : index
      %c0_17 = arith.constant 0 : index
      %23 = vector.load %arg6[%c0_16, %c0_17] : memref<1x128xf32, #tpu.memory_space<vmem>>, vector<1x128xf32>
      %24 = vector.broadcast %23 : vector<1x128xf32> to vector<8x128xf32>
      %25 = arith.mulf %22, %24 : vector<8x128xf32>
      %c0_18 = arith.constant 0 : index
      %c0_19 = arith.constant 0 : index
      %26 = vector.load %arg7[%c0_18, %c0_19] : memref<1x128xf32, #tpu.memory_space<vmem>>, vector<1x128xf32>
      %27 = vector.broadcast %26 : vector<1x128xf32> to vector<8x128xf32>
      %28 = arith.addf %25, %27 : vector<8x128xf32>
      %cst_20 = arith.constant 0.000000e+00 : f32
      %29 = vector.broadcast %cst_20 : f32 to vector<8x128xf32>
      %30 = arith.maximumf %28, %29 : vector<8x128xf32>
      %31 = arith.truncf %30 : vector<8x128xf32> to vector<8x128xbf16>
      %c0_21 = arith.constant 0 : index
      %c0_22 = arith.constant 0 : index
      %32 = vector.load %arg8[%c0_21, %c0_22] : memref<8x128xbf16, #tpu.memory_space<vmem>>, vector<8x128xbf16>
      tpu.vector_store %arg8[%c0_21, %c0_22], %31 {strides = array<i32>} : memref<8x128xbf16, #tpu.memory_space<vmem>>, vector<8x128xbf16>,
    } else {
    }
    return
  }
  func.func @transform_0(%arg0: i32, %arg1: i32) -> (i32, i32) {
    %c0_i32 = arith.constant 0 : i32
    return %arg0, %arg1 : i32, i32
  }
  func.func @transform_1(%arg0: i32, %arg1: i32) -> (i32, i32) {
    %c0_i32 = arith.constant 0 : i32
    %c0_i32_0 = arith.constant 0 : i32
    return %arg1, %c0_i32 : i32, i32
  }
  func.func @transform_2(%arg0: i32, %arg1: i32) -> (i32, i32) {
    %c0_i32 = arith.constant 0 : i32
    %c0_i32_0 = arith.constant 0 : i32
    return %c0_i32, %arg1 : i32, i32
  }
  func.func @transform_3(%arg0: i32, %arg1: i32) -> (i32, i32) {
    %c0_i32 = arith.constant 0 : i32
    %c0_i32_0 = arith.constant 0 : i32
    return %c0_i32, %arg1 : i32, i32
  }
  func.func @transform_4(%arg0: i32, %arg1: i32) -> (i32, i32) {
    %c0_i32 = arith.constant 0 : i32
    %c0_i32_0 = arith.constant 0 : i32
    %c0_i32_1 = arith.constant 0 : i32
    return %c0_i32, %c0_i32_0 : i32, i32
  }
  func.func @transform_5(%arg0: i32, %arg1: i32) -> (i32, i32) {
    %c0_i32 = arith.constant 0 : i32
    %c0_i32_0 = arith.constant 0 : i32
    %c0_i32_1 = arith.constant 0 : i32
    return %c0_i32, %c0_i32_0 : i32, i32
  }
  func.func @transform_6(%arg0: i32, %arg1: i32) -> (i32, i32) {
    %c0_i32 = arith.constant 0 : i32
    %c0_i32_0 = arith.constant 0 : i32
    return %arg0, %c0_i32 : i32, i32
  }
}

module attributes {stable_mosaic.version = 11 : i64} {
  func.func @_fused_mm_kernel(%arg0: i32, %arg1: i32, %arg2: memref<8x512xbf16, #tpu.memory_space<vmem>>, %arg3: memref<512x128xbf16, #tpu.memory_space<vmem>>, %arg4: memref<1x512xf32, #tpu.memory_space<vmem>>, %arg5: memref<1x512xf32, #tpu.memory_space<vmem>>, %arg6: memref<1x128xf32, #tpu.memory_space<vmem>>, %arg7: memref<1x128xf32, #tpu.memory_space<vmem>>, %arg8: memref<8x128xbf16, #tpu.memory_space<vmem>>, %arg9: memref<8x128xf32, #tpu.memory_space<vmem>>) attributes {dimension_semantics = [#tpu.dimension_semantics<parallel>, #tpu.dimension_semantics<arbitrary>], iteration_bounds = array<i64: 1, 2>, scalar_prefetch = 0 : i64, scratch_operands = 1 : i64, tpu.core_type = #tpu.core_type<tc>, window_params = [{transform_indices = @transform_0, window_bounds = array<i64: 8, 512>}, {transform_indices = @transform_1, window_bounds = array<i64: 512, 128>}, {transform_indices = @transform_2, window_bounds = array<i64: 1, 512>}, {transform_indices = @transform_3, window_bounds = array<i64: 1, 512>}, {pipeline_mode = #tpu.pipeline_mode<synchronous>, transform_indices = @transform_4, window_bounds = array<i64: 1, 128>}, {pipeline_mode = #tpu.pipeline_mode<synchronous>, transform_indices = @transform_5, window_bounds = array<i64: 1, 128>}, {transform_indices = @transform_6, window_bounds = array<i64: 8, 128>}]} {
    %c0_i32 = arith.constant 0 : i32
    %0 = arith.cmpi eq, %arg1, %c0_i32 : i32
    %1 = arith.extui %0 : i1 to i32
    %c0_i32_0 = arith.constant 0 : i32
    %2 = arith.cmpi ne, %1, %c0_i32_0 : i32
    scf.if %2 {
      %cst_14 = arith.constant 0.000000e+00 : f32
      %22 = vector.broadcast %cst_14 : f32 to vector<8x128xf32>
      %c0_15 = arith.constant 0 : index
      %c0_16 = arith.constant 0 : index
      %23 = vector.load %arg9[%c0_15, %c0_16] : memref<8x128xf32, #tpu.memory_space<vmem>>, vector<8x128xf32>
      tpu.vector_store %arg9[%c0_15, %c0_16], %22 {strides = array<i32>} : memref<8x128xf32, #tpu.memory_space<vmem>>, vector<8x128xf32>,
    } else {
    }
    %c0 = arith.constant 0 : index
    %c0_1 = arith.constant 0 : index
    %3 = vector.load %arg2[%c0, %c0_1] : memref<8x512xbf16, #tpu.memory_space<vmem>>, vector<8x512xbf16>
    %4 = arith.extf %3 : vector<8x512xbf16> to vector<8x512xf32>
    %c0_2 = arith.constant 0 : index
    %c0_3 = arith.constant 0 : index
    %5 = vector.load %arg4[%c0_2, %c0_3] : memref<1x512xf32, #tpu.memory_space<vmem>>, vector<1x512xf32>
    %6 = vector.broadcast %5 : vector<1x512xf32> to vector<8x512xf32>
    %7 = arith.mulf %4, %6 : vector<8x512xf32>
    %c0_4 = arith.constant 0 : index
    %c0_5 = arith.constant 0 : index
    %8 = vector.load %arg5[%c0_4, %c0_5] : memref<1x512xf32, #tpu.memory_space<vmem>>, vector<1x512xf32>
    %9 = vector.broadcast %8 : vector<1x512xf32> to vector<8x512xf32>
    %10 = arith.addf %7, %9 : vector<8x512xf32>
    %cst = arith.constant 0.000000e+00 : f32
    %11 = vector.broadcast %cst : f32 to vector<8x512xf32>
    %12 = arith.maximumf %10, %11 : vector<8x512xf32>
    %13 = arith.truncf %12 : vector<8x512xf32> to vector<8x512xbf16>
    %c0_6 = arith.constant 0 : index
    %c0_7 = arith.constant 0 : index
    %14 = vector.load %arg9[%c0_6, %c0_7] : memref<8x128xf32, #tpu.memory_space<vmem>>, vector<8x128xf32>
    %c0_8 = arith.constant 0 : index
    %c0_9 = arith.constant 0 : index
    %15 = vector.load %arg3[%c0_8, %c0_9] : memref<512x128xbf16, #tpu.memory_space<vmem>>, vector<512x128xbf16>
    %cst_10 = arith.constant dense<0.000000e+00> : vector<8x128xf32>
    %16 = tpu.matmul %13, %15, %cst_10 {dimension_numbers = #tpu.dot_dimension_numbers<[1], [0], [0], [1], [0, 0, 1, 1], [], []>} : vector<8x512xbf16>, vector<512x128xbf16>, vector<8x128xf32> -> vector<8x128xf32>
    %17 = arith.addf %14, %16 : vector<8x128xf32>
    %c0_11 = arith.constant 0 : index
    %c0_12 = arith.constant 0 : index
    %18 = vector.load %arg9[%c0_11, %c0_12] : memref<8x128xf32, #tpu.memory_space<vmem>>, vector<8x128xf32>
    tpu.vector_store %arg9[%c0_11, %c0_12], %17 {strides = array<i32>} : memref<8x128xf32, #tpu.memory_space<vmem>>, vector<8x128xf32>,
    %c1_i32 = arith.constant 1 : i32
    %19 = arith.cmpi eq, %arg1, %c1_i32 : i32
    %20 = arith.extui %19 : i1 to i32
    %c0_i32_13 = arith.constant 0 : i32
    %21 = arith.cmpi ne, %20, %c0_i32_13 : i32
    scf.if %21 {
      %c0_14 = arith.constant 0 : index
      %c0_15 = arith.constant 0 : index
      %22 = vector.load %arg9[%c0_14, %c0_15] : memref<8x128xf32, #tpu.memory_space<vmem>>, vector<8x128xf32>
      %c0_16 = arith.constant 0 : index
      %c0_17 = arith.constant 0 : index
      %23 = vector.load %arg6[%c0_16, %c0_17] : memref<1x128xf32, #tpu.memory_space<vmem>>, vector<1x128xf32>
      %24 = vector.broadcast %23 : vector<1x128xf32> to vector<8x128xf32>
      %25 = arith.mulf %22, %24 : vector<8x128xf32>
      %c0_18 = arith.constant 0 : index
      %c0_19 = arith.constant 0 : index
      %26 = vector.load %arg7[%c0_18, %c0_19] : memref<1x128xf32, #tpu.memory_space<vmem>>, vector<1x128xf32>
      %27 = vector.broadcast %26 : vector<1x128xf32> to vector<8x128xf32>
      %28 = arith.addf %25, %27 : vector<8x128xf32>
      %cst_20 = arith.constant 0.000000e+00 : f32
      %29 = vector.broadcast %cst_20 : f32 to vector<8x128xf32>
      %30 = arith.maximumf %28, %29 : vector<8x128xf32>
      %31 = arith.truncf %30 : vector<8x128xf32> to vector<8x128xbf16>
      %c0_21 = arith.constant 0 : index
      %c0_22 = arith.constant 0 : index
      %32 = vector.load %arg8[%c0_21, %c0_22] : memref<8x128xbf16, #tpu.memory_space<vmem>>, vector<8x128xbf16>
      tpu.vector_store %arg8[%c0_21, %c0_22], %31 {strides = array<i32>} : memref<8x128xbf16, #tpu.memory_space<vmem>>, vector<8x128xbf16>,
    } else {
    }
    return
  }
  func.func @transform_0(%arg0: i32, %arg1: i32) -> (i32, i32) {
    %c0_i32 = arith.constant 0 : i32
    return %arg0, %arg1 : i32, i32
  }
  func.func @transform_1(%arg0: i32, %arg1: i32) -> (i32, i32) {
    %c0_i32 = arith.constant 0 : i32
    %c0_i32_0 = arith.constant 0 : i32
    return %arg1, %c0_i32 : i32, i32
  }
  func.func @transform_2(%arg0: i32, %arg1: i32) -> (i32, i32) {
    %c0_i32 = arith.constant 0 : i32
    %c0_i32_0 = arith.constant 0 : i32
    return %c0_i32, %arg1 : i32, i32
  }
  func.func @transform_3(%arg0: i32, %arg1: i32) -> (i32, i32) {
    %c0_i32 = arith.constant 0 : i32
    %c0_i32_0 = arith.constant 0 : i32
    return %c0_i32, %arg1 : i32, i32
  }
  func.func @transform_4(%arg0: i32, %arg1: i32) -> (i32, i32) {
    %c0_i32 = arith.constant 0 : i32
    %c0_i32_0 = arith.constant 0 : i32
    %c0_i32_1 = arith.constant 0 : i32
    return %c0_i32, %c0_i32_0 : i32, i32
  }
  func.func @transform_5(%arg0: i32, %arg1: i32) -> (i32, i32) {
    %c0_i32 = arith.constant 0 : i32
    %c0_i32_0 = arith.constant 0 : i32
    %c0_i32_1 = arith.constant 0 : i32
    return %c0_i32, %c0_i32_0 : i32, i32
  }
  func.func @transform_6(%arg0: i32, %arg1: i32) -> (i32, i32) {
    %c0_i32 = arith.constant 0 : i32
    %c0_i32_0 = arith.constant 0 : i32
    return %arg0, %c0_i32 : i32, i32
  }
}

module attributes {stable_mosaic.version = 11 : i64} {
  func.func @_fused_mm_kernel(%arg0: i32, %arg1: i32, %arg2: memref<8x512xbf16, #tpu.memory_space<vmem>>, %arg3: memref<512x512xbf16, #tpu.memory_space<vmem>>, %arg4: memref<1x512xf32, #tpu.memory_space<vmem>>, %arg5: memref<1x512xf32, #tpu.memory_space<vmem>>, %arg6: memref<1x512xf32, #tpu.memory_space<vmem>>, %arg7: memref<1x512xf32, #tpu.memory_space<vmem>>, %arg8: memref<8x512xbf16, #tpu.memory_space<vmem>>, %arg9: memref<8x512xf32, #tpu.memory_space<vmem>>) attributes {dimension_semantics = [#tpu.dimension_semantics<parallel>, #tpu.dimension_semantics<arbitrary>], iteration_bounds = array<i64: 1, 2>, scalar_prefetch = 0 : i64, scratch_operands = 1 : i64, tpu.core_type = #tpu.core_type<tc>, window_params = [{transform_indices = @transform_0, window_bounds = array<i64: 8, 512>}, {transform_indices = @transform_1, window_bounds = array<i64: 512, 512>}, {transform_indices = @transform_2, window_bounds = array<i64: 1, 512>}, {transform_indices = @transform_3, window_bounds = array<i64: 1, 512>}, {pipeline_mode = #tpu.pipeline_mode<synchronous>, transform_indices = @transform_4, window_bounds = array<i64: 1, 512>}, {pipeline_mode = #tpu.pipeline_mode<synchronous>, transform_indices = @transform_5, window_bounds = array<i64: 1, 512>}, {transform_indices = @transform_6, window_bounds = array<i64: 8, 512>}]} {
    %c0_i32 = arith.constant 0 : i32
    %0 = arith.cmpi eq, %arg1, %c0_i32 : i32
    %1 = arith.extui %0 : i1 to i32
    %c0_i32_0 = arith.constant 0 : i32
    %2 = arith.cmpi ne, %1, %c0_i32_0 : i32
    scf.if %2 {
      %cst_14 = arith.constant 0.000000e+00 : f32
      %22 = vector.broadcast %cst_14 : f32 to vector<8x512xf32>
      %c0_15 = arith.constant 0 : index
      %c0_16 = arith.constant 0 : index
      %23 = vector.load %arg9[%c0_15, %c0_16] : memref<8x512xf32, #tpu.memory_space<vmem>>, vector<8x512xf32>
      tpu.vector_store %arg9[%c0_15, %c0_16], %22 {strides = array<i32>} : memref<8x512xf32, #tpu.memory_space<vmem>>, vector<8x512xf32>,
    } else {
    }
    %c0 = arith.constant 0 : index
    %c0_1 = arith.constant 0 : index
    %3 = vector.load %arg2[%c0, %c0_1] : memref<8x512xbf16, #tpu.memory_space<vmem>>, vector<8x512xbf16>
    %4 = arith.extf %3 : vector<8x512xbf16> to vector<8x512xf32>
    %c0_2 = arith.constant 0 : index
    %c0_3 = arith.constant 0 : index
    %5 = vector.load %arg4[%c0_2, %c0_3] : memref<1x512xf32, #tpu.memory_space<vmem>>, vector<1x512xf32>
    %6 = vector.broadcast %5 : vector<1x512xf32> to vector<8x512xf32>
    %7 = arith.mulf %4, %6 : vector<8x512xf32>
    %c0_4 = arith.constant 0 : index
    %c0_5 = arith.constant 0 : index
    %8 = vector.load %arg5[%c0_4, %c0_5] : memref<1x512xf32, #tpu.memory_space<vmem>>, vector<1x512xf32>
    %9 = vector.broadcast %8 : vector<1x512xf32> to vector<8x512xf32>
    %10 = arith.addf %7, %9 : vector<8x512xf32>
    %cst = arith.constant 0.000000e+00 : f32
    %11 = vector.broadcast %cst : f32 to vector<8x512xf32>
    %12 = arith.maximumf %10, %11 : vector<8x512xf32>
    %13 = arith.truncf %12 : vector<8x512xf32> to vector<8x512xbf16>
    %c0_6 = arith.constant 0 : index
    %c0_7 = arith.constant 0 : index
    %14 = vector.load %arg9[%c0_6, %c0_7] : memref<8x512xf32, #tpu.memory_space<vmem>>, vector<8x512xf32>
    %c0_8 = arith.constant 0 : index
    %c0_9 = arith.constant 0 : index
    %15 = vector.load %arg3[%c0_8, %c0_9] : memref<512x512xbf16, #tpu.memory_space<vmem>>, vector<512x512xbf16>
    %cst_10 = arith.constant dense<0.000000e+00> : vector<8x512xf32>
    %16 = tpu.matmul %13, %15, %cst_10 {dimension_numbers = #tpu.dot_dimension_numbers<[1], [0], [0], [1], [0, 0, 1, 1], [], []>} : vector<8x512xbf16>, vector<512x512xbf16>, vector<8x512xf32> -> vector<8x512xf32>
    %17 = arith.addf %14, %16 : vector<8x512xf32>
    %c0_11 = arith.constant 0 : index
    %c0_12 = arith.constant 0 : index
    %18 = vector.load %arg9[%c0_11, %c0_12] : memref<8x512xf32, #tpu.memory_space<vmem>>, vector<8x512xf32>
    tpu.vector_store %arg9[%c0_11, %c0_12], %17 {strides = array<i32>} : memref<8x512xf32, #tpu.memory_space<vmem>>, vector<8x512xf32>,
    %c1_i32 = arith.constant 1 : i32
    %19 = arith.cmpi eq, %arg1, %c1_i32 : i32
    %20 = arith.extui %19 : i1 to i32
    %c0_i32_13 = arith.constant 0 : i32
    %21 = arith.cmpi ne, %20, %c0_i32_13 : i32
    scf.if %21 {
      %c0_14 = arith.constant 0 : index
      %c0_15 = arith.constant 0 : index
      %22 = vector.load %arg9[%c0_14, %c0_15] : memref<8x512xf32, #tpu.memory_space<vmem>>, vector<8x512xf32>
      %23 = arith.truncf %22 : vector<8x512xf32> to vector<8x512xbf16>
      %c0_16 = arith.constant 0 : index
      %c0_17 = arith.constant 0 : index
      %24 = vector.load %arg8[%c0_16, %c0_17] : memref<8x512xbf16, #tpu.memory_space<vmem>>, vector<8x512xbf16>
      tpu.vector_store %arg8[%c0_16, %c0_17], %23 {strides = array<i32>} : memref<8x512xbf16, #tpu.memory_space<vmem>>, vector<8x512xbf16>,
    } else {
    }
    return
  }
  func.func @transform_0(%arg0: i32, %arg1: i32) -> (i32, i32) {
    %c0_i32 = arith.constant 0 : i32
    return %arg0, %arg1 : i32, i32
  }
  func.func @transform_1(%arg0: i32, %arg1: i32) -> (i32, i32) {
    %c0_i32 = arith.constant 0 : i32
    %c0_i32_0 = arith.constant 0 : i32
    return %arg1, %c0_i32 : i32, i32
  }
  func.func @transform_2(%arg0: i32, %arg1: i32) -> (i32, i32) {
    %c0_i32 = arith.constant 0 : i32
    %c0_i32_0 = arith.constant 0 : i32
    return %c0_i32, %arg1 : i32, i32
  }
  func.func @transform_3(%arg0: i32, %arg1: i32) -> (i32, i32) {
    %c0_i32 = arith.constant 0 : i32
    %c0_i32_0 = arith.constant 0 : i32
    return %c0_i32, %arg1 : i32, i32
  }
  func.func @transform_4(%arg0: i32, %arg1: i32) -> (i32, i32) {
    %c0_i32 = arith.constant 0 : i32
    %c0_i32_0 = arith.constant 0 : i32
    %c0_i32_1 = arith.constant 0 : i32
    return %c0_i32, %c0_i32_0 : i32, i32
  }
  func.func @transform_5(%arg0: i32, %arg1: i32) -> (i32, i32) {
    %c0_i32 = arith.constant 0 : i32
    %c0_i32_0 = arith.constant 0 : i32
    %c0_i32_1 = arith.constant 0 : i32
    return %c0_i32, %c0_i32_0 : i32, i32
  }
  func.func @transform_6(%arg0: i32, %arg1: i32) -> (i32, i32) {
    %c0_i32 = arith.constant 0 : i32
    %c0_i32_0 = arith.constant 0 : i32
    return %arg0, %c0_i32 : i32, i32
  }
}

module attributes {stable_mosaic.version = 11 : i64} {
  func.func @_pool_kernel(%arg0: i32, %arg1: memref<8x512xbf16, #tpu.memory_space<vmem>>, %arg2: memref<8x512xbf16, #tpu.memory_space<vmem>>, %arg3: memref<8x512xbf16, #tpu.memory_space<vmem>>, %arg4: memref<8x512xbf16, #tpu.memory_space<vmem>>, %arg5: memref<8x512xbf16, #tpu.memory_space<vmem>>) attributes {dimension_semantics = [#tpu.dimension_semantics<parallel>], iteration_bounds = array<i64: 1>, scalar_prefetch = 0 : i64, scratch_operands = 0 : i64, tpu.core_type = #tpu.core_type<tc>, window_params = [{transform_indices = @transform_0, window_bounds = array<i64: 8, 512>}, {transform_indices = @transform_1, window_bounds = array<i64: 8, 512>}, {transform_indices = @transform_2, window_bounds = array<i64: 8, 512>}, {transform_indices = @transform_3, window_bounds = array<i64: 8, 512>}, {transform_indices = @transform_4, window_bounds = array<i64: 8, 512>}]} {
    %c0 = arith.constant 0 : index
    %c0_0 = arith.constant 0 : index
    %0 = vector.load %arg1[%c0, %c0_0] : memref<8x512xbf16, #tpu.memory_space<vmem>>, vector<8x512xbf16>
    %1 = arith.extf %0 : vector<8x512xbf16> to vector<8x512xf32>
    %c0_1 = arith.constant 0 : index
    %c0_2 = arith.constant 0 : index
    %2 = vector.load %arg2[%c0_1, %c0_2] : memref<8x512xbf16, #tpu.memory_space<vmem>>, vector<8x512xbf16>
    %3 = arith.extf %2 : vector<8x512xbf16> to vector<8x512xf32>
    %4 = arith.addf %1, %3 : vector<8x512xf32>
    %c0_3 = arith.constant 0 : index
    %c0_4 = arith.constant 0 : index
    %5 = vector.load %arg3[%c0_3, %c0_4] : memref<8x512xbf16, #tpu.memory_space<vmem>>, vector<8x512xbf16>
    %6 = arith.extf %5 : vector<8x512xbf16> to vector<8x512xf32>
    %7 = arith.addf %4, %6 : vector<8x512xf32>
    %c0_5 = arith.constant 0 : index
    %c0_6 = arith.constant 0 : index
    %8 = vector.load %arg4[%c0_5, %c0_6] : memref<8x512xbf16, #tpu.memory_space<vmem>>, vector<8x512xbf16>
    %9 = arith.extf %8 : vector<8x512xbf16> to vector<8x512xf32>
    %10 = arith.addf %7, %9 : vector<8x512xf32>
    %cst = arith.constant 2.500000e-01 : f32
    %11 = vector.broadcast %cst : f32 to vector<8x512xf32>
    %12 = arith.mulf %10, %11 : vector<8x512xf32>
    %13 = arith.truncf %12 : vector<8x512xf32> to vector<8x512xbf16>
    %c0_7 = arith.constant 0 : index
    %c0_8 = arith.constant 0 : index
    %14 = vector.load %arg5[%c0_7, %c0_8] : memref<8x512xbf16, #tpu.memory_space<vmem>>, vector<8x512xbf16>
    tpu.vector_store %arg5[%c0_7, %c0_8], %13 {strides = array<i32>} : memref<8x512xbf16, #tpu.memory_space<vmem>>, vector<8x512xbf16>,
    return
  }
  func.func @transform_0(%arg0: i32) -> (i32, i32) {
    %c0_i32 = arith.constant 0 : i32
    %c0_i32_0 = arith.constant 0 : i32
    return %arg0, %c0_i32 : i32, i32
  }
  func.func @transform_1(%arg0: i32) -> (i32, i32) {
    %c0_i32 = arith.constant 0 : i32
    %c0_i32_0 = arith.constant 0 : i32
    return %arg0, %c0_i32 : i32, i32
  }
  func.func @transform_2(%arg0: i32) -> (i32, i32) {
    %c0_i32 = arith.constant 0 : i32
    %c0_i32_0 = arith.constant 0 : i32
    return %arg0, %c0_i32 : i32, i32
  }
  func.func @transform_3(%arg0: i32) -> (i32, i32) {
    %c0_i32 = arith.constant 0 : i32
    %c0_i32_0 = arith.constant 0 : i32
    return %arg0, %c0_i32 : i32, i32
  }
  func.func @transform_4(%arg0: i32) -> (i32, i32) {
    %c0_i32 = arith.constant 0 : i32
    %c0_i32_0 = arith.constant 0 : i32
    return %arg0, %c0_i32 : i32, i32
  }
}

module attributes {stable_mosaic.version = 11 : i64} {
  func.func @_bn_kernel(%arg0: i32, %arg1: memref<8x1024xbf16, #tpu.memory_space<vmem>>, %arg2: memref<1x1024xf32, #tpu.memory_space<vmem>>, %arg3: memref<1x1024xf32, #tpu.memory_space<vmem>>, %arg4: memref<8x1024xf32, #tpu.memory_space<vmem>>) attributes {dimension_semantics = [#tpu.dimension_semantics<parallel>], iteration_bounds = array<i64: 1>, scalar_prefetch = 0 : i64, scratch_operands = 0 : i64, tpu.core_type = #tpu.core_type<tc>, window_params = [{transform_indices = @transform_0, window_bounds = array<i64: 8, 1024>}, {pipeline_mode = #tpu.pipeline_mode<synchronous>, transform_indices = @transform_1, window_bounds = array<i64: 1, 1024>}, {pipeline_mode = #tpu.pipeline_mode<synchronous>, transform_indices = @transform_2, window_bounds = array<i64: 1, 1024>}, {transform_indices = @transform_3, window_bounds = array<i64: 8, 1024>}]} {
    %c0 = arith.constant 0 : index
    %c0_0 = arith.constant 0 : index
    %0 = vector.load %arg1[%c0, %c0_0] : memref<8x1024xbf16, #tpu.memory_space<vmem>>, vector<8x1024xbf16>
    %1 = arith.extf %0 : vector<8x1024xbf16> to vector<8x1024xf32>
    %c0_1 = arith.constant 0 : index
    %c0_2 = arith.constant 0 : index
    %2 = vector.load %arg2[%c0_1, %c0_2] : memref<1x1024xf32, #tpu.memory_space<vmem>>, vector<1x1024xf32>
    %3 = vector.broadcast %2 : vector<1x1024xf32> to vector<8x1024xf32>
    %4 = arith.mulf %1, %3 : vector<8x1024xf32>
    %c0_3 = arith.constant 0 : index
    %c0_4 = arith.constant 0 : index
    %5 = vector.load %arg3[%c0_3, %c0_4] : memref<1x1024xf32, #tpu.memory_space<vmem>>, vector<1x1024xf32>
    %6 = vector.broadcast %5 : vector<1x1024xf32> to vector<8x1024xf32>
    %7 = arith.addf %4, %6 : vector<8x1024xf32>
    %c0_5 = arith.constant 0 : index
    %c0_6 = arith.constant 0 : index
    %8 = vector.load %arg4[%c0_5, %c0_6] : memref<8x1024xf32, #tpu.memory_space<vmem>>, vector<8x1024xf32>
    tpu.vector_store %arg4[%c0_5, %c0_6], %7 {strides = array<i32>} : memref<8x1024xf32, #tpu.memory_space<vmem>>, vector<8x1024xf32>,
    return
  }
  func.func @transform_0(%arg0: i32) -> (i32, i32) {
    %c0_i32 = arith.constant 0 : i32
    %c0_i32_0 = arith.constant 0 : i32
    return %arg0, %c0_i32 : i32, i32
  }
  func.func @transform_1(%arg0: i32) -> (i32, i32) {
    %c0_i32 = arith.constant 0 : i32
    %c0_i32_0 = arith.constant 0 : i32
    %c0_i32_1 = arith.constant 0 : i32
    return %c0_i32, %c0_i32_0 : i32, i32
  }
  func.func @transform_2(%arg0: i32) -> (i32, i32) {
    %c0_i32 = arith.constant 0 : i32
    %c0_i32_0 = arith.constant 0 : i32
    %c0_i32_1 = arith.constant 0 : i32
    return %c0_i32, %c0_i32_0 : i32, i32
  }
  func.func @transform_3(%arg0: i32) -> (i32, i32) {
    %c0_i32 = arith.constant 0 : i32
    %c0_i32_0 = arith.constant 0 : i32
    return %arg0, %c0_i32 : i32, i32
  }
}

</mosaic_0001>

<bundles_post_ra>
// kernel: densenet121_features.126
= control target key start
LH: loop header
LB: loop body
LE: loop exit
PB: predicated region body
PF: predicated region fallthrough
CT: control target
= control target key end

     0   :  { %vm512_vm0 = vcmask 519168   ;;  %s1322_s0 = inlined_call_operand.vmem [shape: bf16[128,64], index: 0, kind: input, shape index: {}]   ;;  %s1323_s1 = inlined_call_operand.vmem [shape: bf16[128,64], index: 1, kind: input, shape index: {}]   ;;  %s1324_s2 = inlined_call_operand.vmem [shape: bf16[128,64], index: 2, kind: input, shape index: {}]   ;;  %s1325_s3 = inlined_call_operand.vmem [shape: bf16[128,64], index: 3, kind: input, shape index: {}]   ;;  %s1326_s4 = inlined_call_operand.vmem [shape: bf16[128,64], index: 4, kind: input, shape index: {}]   ;;  %s1327_s5 = inlined_call_operand.vmem [shape: bf16[128,64], index: 5, kind: input, shape index: {}]   ;;  %s1328_s6 = inlined_call_operand.vmem [shape: bf16[128,64], index: 6, kind: input, shape index: {}]   ;;  %s1329_s7 = inlined_call_operand.vmem [shape: bf16[128,64], index: 7, kind: input, shape index: {}]   ;;  %s1330_s8 = inlined_call_operand.vmem [shape: bf16[128,64], index: 8, kind: input, shape index: {}]   ;;  %s1331_s9 = inlined_call_operand.vmem [shape: bf16[128,64], index: 9, kind: output, shape index: {}]  }
   0x1   :  { %v566_v0 = vld [vmem:[%s1322_s0] sm:$0xff]   ;;  %v853_v17 = vld [vmem:[%s1322_s0 + $0x8] sm:$0xff]   ;;  %v854_v54 = vld [vmem:[%s1322_s0 + $0x10] sm:$0xff]  }
   0x2   :  { %v598_v1 = vld [vmem:[%s1323_s1] sm:$0xff]   ;;  %v567_v3 = vunpack.c.l.bf16 %v566_v0  ;;  %v568_v9 = vunpack.c.h.bf16 %v566_v0  ;;  %v860_v18 = vld [vmem:[%s1323_s1 + $0x8] sm:$0xff]   ;;  %v571_v31 = vunpack.c.l.bf16 %v853_v17  ;;  %v572_v48 = vunpack.c.h.bf16 %v853_v17  ;;  %v861_v59 = vld [vmem:[%s1323_s1 + $0x10] sm:$0xff]  }
   0x3   :  { %v630_v2 = vld [vmem:[%s1324_s2] sm:$0xff]   ;;  %v599_v4 = vunpack.c.l.bf16 %v598_v1  ;;  %v600_v13 = vunpack.c.h.bf16 %v598_v1  ;;  %v867_v23 = vld [vmem:[%s1324_s2 + $0x8] sm:$0xff]   ;;  %v603_v32 = vunpack.c.l.bf16 %v860_v18  ;;  %v604_v52 = vunpack.c.h.bf16 %v860_v18  ;;  %v868_v0 = vld [vmem:[%s1324_s2 + $0x10] sm:$0xff]  }
   0x4   :  { %v631_v5 = vunpack.c.l.bf16 %v630_v2  ;;  %v662_v6 = vld [vmem:[%s1325_s3] sm:$0xff]   ;;  %v632_v21 = vunpack.c.h.bf16 %v630_v2  ;;  %v874_v28 = vld [vmem:[%s1325_s3 + $0x8] sm:$0xff]   ;;  %v635_v37 = vunpack.c.l.bf16 %v867_v23  ;;  %v636_v53 = vunpack.c.h.bf16 %v867_v23  ;;  %v875_v1 = vld [vmem:[%s1325_s3 + $0x10] sm:$0xff]  }
   0x5   :  { %v694_v7 = vld [vmem:[%s1326_s4] sm:$0xff]   ;;  %v96_v14 = vmax.f32 %v567_v3, %v599_v4  ;;  %v663_v15 = vunpack.c.l.bf16 %v662_v6  ;;  %v97_v20 = vmax.f32 %v568_v9, %v600_v13  ;;  %v664_v22 = vunpack.c.h.bf16 %v662_v6  ;;  %v881_v33 = vld [vmem:[%s1326_s4 + $0x8] sm:$0xff]  }
   0x6   :  { %v726_v8 = vld [vmem:[%s1327_s5] sm:$0xff]   ;;  %v695_v16 = vunpack.c.l.bf16 %v694_v7  ;;  %v696_v30 = vunpack.c.h.bf16 %v694_v7  ;;  %v98_v40 = vmax.f32 %v571_v31, %v603_v32  ;;  %v667_v41 = vunpack.c.l.bf16 %v874_v28  ;;  %v888_v42 = vld [vmem:[%s1327_s5 + $0x8] sm:$0xff]   ;;  %v1063_v31 = vld [vmem:[%s1328_s6 + $0x10] sm:$0xff]  }
   0x7   :  { %v758_v10 = vld [vmem:[%s1328_s6] sm:$0xff]   ;;  %v727_v19 = vunpack.c.l.bf16 %v726_v8  ;;  %v144_v24 = vmax.f32 %v96_v14, %v631_v5  ;;  %v145_v29 = vmax.f32 %v97_v20, %v632_v21  ;;  %v728_v35 = vunpack.c.h.bf16 %v726_v8  ;;  %v1021_v43 = vld [vmem:[%s1328_s6 + $0x8] sm:$0xff]  }
   0x8   :  { %v990_v11 = vld [vmem:[%s1329_s7] sm:$0xff]   ;;  %v759_v25 = vunpack.c.l.bf16 %v758_v10  ;;  %v760_v36 = vunpack.c.h.bf16 %v758_v10  ;;  %v1026_v44 = vld [vmem:[%s1329_s7 + $0x8] sm:$0xff]   ;;  %v699_v47 = vunpack.c.l.bf16 %v881_v33  ;;  %v146_v50 = vmax.f32 %v98_v40, %v635_v37  ;;  %v882_v10 = vld [vmem:[%s1326_s4 + $0x10] sm:$0xff]  }
   0x9   :  { %v995_v12 = vld [vmem:[%s1330_s8] sm:$0xff]   ;;  %v791_v26 = vunpack.c.l.bf16 %v990_v11  ;;  %v192_v34 = vmax.f32 %v144_v24, %v663_v15  ;;  %v193_v38 = vmax.f32 %v145_v29, %v664_v22  ;;  %v792_v39 = vunpack.c.h.bf16 %v990_v11  ;;  %v1032_v51 = vld [vmem:[%s1330_s8 + $0x8] sm:$0xff]   ;;  %v1068_v37 = vld [vmem:[%s1329_s7 + $0x10] sm:$0xff]  }
   0xa   :  { %v823_v27 = vunpack.c.l.bf16 %v995_v12  ;;  %v824_v46 = vunpack.c.h.bf16 %v995_v12  ;;  %v731_v56 = vunpack.c.l.bf16 %v888_v42  ;;  %v763_v57 = vunpack.c.l.bf16 %v1021_v43 }
   0xb   :  { %v240_v45 = vmax.f32 %v192_v34, %v695_v16  ;;  %v241_v49 = vmax.f32 %v193_v38, %v696_v30  ;;  %v795_v58 = vunpack.c.l.bf16 %v1026_v44  ;;  %v194_v61 = vmax.f32 %v146_v50, %v667_v41  ;;  %v910_v50 = vld [vmem:[%s1330_s8 + $0x10] sm:$0xff]  }
   0xc   :  { %v99_v62 = vmax.f32 %v572_v48, %v604_v52  ;;  %v668_v63 = vunpack.c.h.bf16 %v874_v28  ;;  %v827_v3 = vunpack.c.l.bf16 %v1032_v51  ;;  %v700_v4 = vunpack.c.h.bf16 %v881_v33  ;;  %v869_v48 = vld [vmem:[%s1324_s2 + $0x18] sm:$0xff]  }
   0xd   :  { %v288_v55 = vmax.f32 %v240_v45, %v727_v19  ;;  %v289_v60 = vmax.f32 %v241_v49, %v728_v35  ;;  %v575_v5 = vunpack.c.l.bf16 %v854_v54  ;;  %v242_v7 = vmax.f32 %v194_v61, %v699_v47  ;;  %v1055_v19 = vld [vmem:[%s1327_s5 + $0x10] sm:$0xff]   ;;  %v862_v47 = vld [vmem:[%s1323_s1 + $0x18] sm:$0xff]  }
   0xe   :  { %v147_v8 = vmax.f32 %v99_v62, %v636_v53  ;;  %v607_v9 = vunpack.c.l.bf16 %v861_v59  ;;  %v732_v12 = vunpack.c.h.bf16 %v888_v42  ;;  %v639_v13 = vunpack.c.l.bf16 %v868_v0  ;;  %v855_v42 = vld [vmem:[%s1322_s0 + $0x18] sm:$0xff]  }
   0xf   :  { %v336_v2 = vmax.f32 %v288_v55, %v759_v25  ;;  %v337_v6 = vmax.f32 %v289_v60, %v760_v36  ;;  %v671_v14 = vunpack.c.l.bf16 %v875_v1  ;;  %v290_v16 = vmax.f32 %v242_v7, %v731_v56  ;;  %v883_v62 = vld [vmem:[%s1326_s4 + $0x18] sm:$0xff]  }
  0x10   :  { %v195_v17 = vmax.f32 %v147_v8, %v668_v63  ;;  %v100_v18 = vmax.f32 %v575_v5, %v607_v9  ;;  %v764_v21 = vunpack.c.h.bf16 %v1021_v43  ;;  %v796_v22 = vunpack.c.h.bf16 %v1026_v44  ;;  %v1109_v7 = vld [vmem:[%s1327_s5 + $0x18] sm:$0xff]  }
  0x11   :  { %v384_v11 = vmax.f32 %v336_v2, %v791_v26  ;;  %v385_v15 = vmax.f32 %v337_v6, %v792_v39  ;;  %v703_v23 = vunpack.c.l.bf16 %v882_v10  ;;  %v338_v25 = vmax.f32 %v290_v16, %v763_v57  ;;  %v876_v57 = vld [vmem:[%s1325_s3 + $0x18] sm:$0xff]  }
  0x12   :  { %v243_v26 = vmax.f32 %v195_v17, %v700_v4  ;;  %v148_v28 = vmax.f32 %v100_v18, %v639_v13  ;;  %v735_v30 = vunpack.c.l.bf16 %v1055_v19  ;;  %v576_v32 = vunpack.c.h.bf16 %v854_v54  ;;  %v1114_v8 = vld [vmem:[%s1328_s6 + $0x18] sm:$0xff]   ;;  %v856_v18 = vld [vmem:[%s1322_s0 + $0x20] sm:$0xff]  }
  0x13   :  { %v432_v20 = vmax.f32 %v384_v11, %v823_v27  ;;  %v433_v24 = vmax.f32 %v385_v15, %v824_v46  ;;  %v608_v33 = vunpack.c.h.bf16 %v861_v59  ;;  %v386_v34 = vmax.f32 %v338_v25, %v795_v58  ;;  %v1119_v15 = vld [vmem:[%s1329_s7 + $0x18] sm:$0xff]  }
  0x14   :  { %v291_v35 = vmax.f32 %v243_v26, %v732_v12  ;;  %v196_v36 = vmax.f32 %v148_v28, %v671_v14  ;;  %v828_v38 = vunpack.c.h.bf16 %v1032_v51  ;;  %v640_v40 = vunpack.c.h.bf16 %v868_v0  ;;  %v1136_v26 = vld [vmem:[%s1330_s8 + $0x18] sm:$0xff]  }
  0x15   :  { %v549_v29 = vpack.c.bf16 %v432_v20, %v432_v20  ;;  %v550_v27 = vpack.c.bf16 %v433_v24, %v433_v24  ;;  %v101_v39 = vmax.f32 %v576_v32, %v608_v33  ;;  %v672_v41 = vunpack.c.h.bf16 %v875_v1 }
  0x16   :  { %v434_v43 = vmax.f32 %v386_v34, %v827_v3  ;;  %v339_v44 = vmax.f32 %v291_v35, %v764_v21  ;;  %v244_v45 = vmax.f32 %v196_v36, %v703_v23  ;;  %v767_v46 = vunpack.c.l.bf16 %v1063_v31  ;;  %v863_v23 = vld [vmem:[%s1323_s1 + $0x20] sm:$0xff]  }
  0x17   :  { %513 = vst.msk [vmem:[%s1331_s9] sm:$0xf] %vm512_vm0, %v549_v29  ;;  %514 = vst.msk [vmem:[%s1331_s9 + $0x4] sm:$0xf] %vm512_vm0, %v550_v27  ;;  %v799_v49 = vunpack.c.l.bf16 %v1068_v37  ;;  %v149_v51 = vmax.f32 %v101_v39, %v640_v40  ;;  %v704_v52 = vunpack.c.h.bf16 %v882_v10  ;;  %v579_v56 = vunpack.c.l.bf16 %v855_v42  ;;  %v1148_v39 = vld [vmem:[%s1326_s4 + $0x20] sm:$0xff]  }
  0x18   :  { %v551_v53 = vpack.c.bf16 %v434_v43, %v434_v43  ;;  %v387_v54 = vmax.f32 %v339_v44, %v796_v22  ;;  %v292_v55 = vmax.f32 %v244_v45, %v735_v30  ;;  %v736_v59 = vunpack.c.h.bf16 %v1055_v19  ;;  %v870_v30 = vld [vmem:[%s1324_s2 + $0x20] sm:$0xff]  }
  0x19   :  { %v197_v58 = vmax.f32 %v149_v51, %v672_v41  ;;  %v611_v60 = vunpack.c.l.bf16 %v862_v47  ;;  %v643_v61 = vunpack.c.l.bf16 %v869_v48  ;;  %v831_v1 = vunpack.c.l.bf16 %v910_v50 }
  0x1a   :  { %515 = vst.msk [vmem:[%s1331_s9 + $0x8] sm:$0xf] %vm512_vm0, %v551_v53  ;;  %v435_v63 = vmax.f32 %v387_v54, %v828_v38  ;;  %v340_v0 = vmax.f32 %v292_v55, %v767_v46  ;;  %v768_v2 = vunpack.c.h.bf16 %v1063_v31  ;;  %v800_v4 = vunpack.c.h.bf16 %v1068_v37  ;;  %v877_v31 = vld [vmem:[%s1325_s3 + $0x20] sm:$0xff]  }
  0x1b   :  { %v245_v3 = vmax.f32 %v197_v58, %v704_v52  ;;  %v102_v5 = vmax.f32 %v579_v56, %v611_v60  ;;  %v675_v6 = vunpack.c.l.bf16 %v876_v57  ;;  %v707_v11 = vunpack.c.l.bf16 %v883_v62  ;;  %v1167_v52 = vld [vmem:[%s1328_s6 + $0x20] sm:$0xff]  }
  0x1c   :  { %v552_v9 = vpack.c.bf16 %v435_v63, %v435_v63  ;;  %v388_v10 = vmax.f32 %v340_v0, %v799_v49  ;;  %v580_v12 = vunpack.c.h.bf16 %v855_v42  ;;  %v612_v16 = vunpack.c.h.bf16 %v862_v47  ;;  %v1172_v58 = vld [vmem:[%s1329_s7 + $0x20] sm:$0xff]   ;;  %v857_v0 = vld [vmem:[%s1322_s0 + $0x28] sm:$0xff]  }
  0x1d   :  { %v293_v13 = vmax.f32 %v245_v3, %v736_v59  ;;  %v150_v14 = vmax.f32 %v102_v5, %v643_v61  ;;  %v644_v17 = vunpack.c.h.bf16 %v869_v48  ;;  %v832_v20 = vunpack.c.h.bf16 %v910_v50  ;;  %v1159_v48 = vld [vmem:[%s1327_s5 + $0x20] sm:$0xff]   ;;  %v864_v5 = vld [vmem:[%s1323_s1 + $0x28] sm:$0xff]  }
  0x1e   :  { %516 = vst.msk [vmem:[%s1331_s9 + $0xc] sm:$0xf] %vm512_vm0, %v552_v9  ;;  %v436_v19 = vmax.f32 %v388_v10, %v831_v1  ;;  %v739_v21 = vunpack.c.l.bf16 %v1109_v7  ;;  %v771_v22 = vunpack.c.l.bf16 %v1114_v8  ;;  %v103_v28 = vmax.f32 %v580_v12, %v612_v16  ;;  %v1177_v59 = vld [vmem:[%s1330_s8 + $0x20] sm:$0xff]  }
  0x1f   :  { %v341_v24 = vmax.f32 %v293_v13, %v768_v2  ;;  %v198_v25 = vmax.f32 %v150_v14, %v675_v6  ;;  %v676_v29 = vunpack.c.h.bf16 %v876_v57  ;;  %v803_v33 = vunpack.c.l.bf16 %v1119_v15  ;;  %v871_v6 = vld [vmem:[%s1324_s2 + $0x28] sm:$0xff]  }
  0x20   :  { %v553_v32 = vpack.c.bf16 %v436_v19, %v436_v19  ;;  %v708_v27 = vunpack.c.h.bf16 %v883_v62  ;;  %v583_v34 = vunpack.c.l.bf16 %v856_v18  ;;  %v151_v37 = vmax.f32 %v103_v28, %v644_v17 }
  0x21   :  { %v389_v35 = vmax.f32 %v341_v24, %v800_v4  ;;  %v246_v36 = vmax.f32 %v198_v25, %v707_v11  ;;  %v615_v38 = vunpack.c.l.bf16 %v863_v23  ;;  %v835_v40 = vunpack.c.l.bf16 %v1136_v26 }
  0x22   :  { %517 = vst.msk [vmem:[%s1331_s9 + $0x10] sm:$0xf] %vm512_vm0, %v553_v32  ;;  %v740_v41 = vunpack.c.h.bf16 %v1109_v7  ;;  %v647_v42 = vunpack.c.l.bf16 %v870_v30  ;;  %v679_v43 = vunpack.c.l.bf16 %v877_v31  ;;  %v199_v46 = vmax.f32 %v151_v37, %v676_v29  ;;  %v1222_v37 = vld [vmem:[%s1329_s7 + $0x28] sm:$0xff]  }
  0x23   :  { %v437_v44 = vmax.f32 %v389_v35, %v832_v20  ;;  %v294_v45 = vmax.f32 %v246_v36, %v739_v21  ;;  %v104_v47 = vmax.f32 %v583_v34, %v615_v38  ;;  %v772_v49 = vunpack.c.h.bf16 %v1114_v8  ;;  %v885_v20 = vld [vmem:[%s1326_s4 + $0x28] sm:$0xff]  }
  0x24   :  { %v804_v50 = vunpack.c.h.bf16 %v1119_v15  ;;  %v711_v51 = vunpack.c.l.bf16 %v1148_v39  ;;  %v584_v53 = vunpack.c.h.bf16 %v856_v18  ;;  %v247_v56 = vmax.f32 %v199_v46, %v708_v27  ;;  %v878_v15 = vld [vmem:[%s1325_s3 + $0x28] sm:$0xff]  }
  0x25   :  { %v554_v54 = vpack.c.bf16 %v437_v44, %v437_v44  ;;  %v342_v55 = vmax.f32 %v294_v45, %v771_v22  ;;  %v152_v57 = vmax.f32 %v104_v47, %v647_v42  ;;  %v836_v60 = vunpack.c.h.bf16 %v1136_v26  ;;  %v1217_v36 = vld [vmem:[%s1328_s6 + $0x28] sm:$0xff]  }
  0x26   :  { %v743_v61 = vunpack.c.l.bf16 %v1159_v48  ;;  %v616_v62 = vunpack.c.h.bf16 %v863_v23  ;;  %v648_v63 = vunpack.c.h.bf16 %v870_v30  ;;  %v295_v2 = vmax.f32 %v247_v56, %v740_v41  ;;  %v892_v30 = vld [vmem:[%s1327_s5 + $0x28] sm:$0xff]  }
  0x27   :  { %518 = vst.msk [vmem:[%s1331_s9 + $0x14] sm:$0xf] %vm512_vm0, %v554_v54  ;;  %v390_v1 = vmax.f32 %v342_v55, %v803_v33  ;;  %v200_v3 = vmax.f32 %v152_v57, %v679_v43  ;;  %v775_v4 = vunpack.c.l.bf16 %v1167_v52  ;;  %v807_v7 = vunpack.c.l.bf16 %v1172_v58  ;;  %v913_v57 = vld [vmem:[%s1330_s8 + $0x28] sm:$0xff]  }
  0x28   :  { %v839_v8 = vunpack.c.l.bf16 %v1177_v59  ;;  %v105_v9 = vmax.f32 %v584_v53, %v616_v62  ;;  %v680_v10 = vunpack.c.h.bf16 %v877_v31  ;;  %v343_v12 = vmax.f32 %v295_v2, %v772_v49  ;;  %v865_v49 = vld [vmem:[%s1323_s1 + $0x30] sm:$0xff]  }
  0x29   :  { %v438_v11 = vmax.f32 %v390_v1, %v835_v40  ;;  %v248_v13 = vmax.f32 %v200_v3, %v711_v51  ;;  %v587_v14 = vunpack.c.l.bf16 %v857_v0  ;;  %v712_v17 = vunpack.c.h.bf16 %v1148_v39 }
  0x2a   :  { %v153_v16 = vmax.f32 %v105_v9, %v648_v63  ;;  %v619_v18 = vunpack.c.l.bf16 %v864_v5  ;;  %v651_v19 = vunpack.c.l.bf16 %v871_v6  ;;  %v391_v22 = vmax.f32 %v343_v12, %v804_v50  ;;  %v872_v50 = vld [vmem:[%s1324_s2 + $0x30] sm:$0xff]  }
  0x2b   :  { %v555_v21 = vpack.c.bf16 %v438_v11, %v438_v11  ;;  %v296_v23 = vmax.f32 %v248_v13, %v743_v61  ;;  %v744_v24 = vunpack.c.h.bf16 %v1159_v48  ;;  %v776_v26 = vunpack.c.h.bf16 %v1167_v52  ;;  %v858_v48 = vld [vmem:[%s1322_s0 + $0x30] sm:$0xff]  }
  0x2c   :  { %v201_v25 = vmax.f32 %v153_v16, %v680_v10  ;;  %v106_v28 = vmax.f32 %v587_v14, %v619_v18  ;;  %v683_v29 = vunpack.c.l.bf16 %v878_v15  ;;  %v439_v31 = vmax.f32 %v391_v22, %v836_v60  ;;  %v879_v61 = vld [vmem:[%s1325_s3 + $0x30] sm:$0xff]  }
  0x2d   :  { %519 = vst.msk [vmem:[%s1331_s9 + $0x18] sm:$0xf] %vm512_vm0, %v555_v21  ;;  %v344_v32 = vmax.f32 %v296_v23, %v775_v4  ;;  %v808_v33 = vunpack.c.h.bf16 %v1172_v58  ;;  %v715_v27 = vunpack.c.l.bf16 %v885_v20  ;;  %v588_v38 = vunpack.c.h.bf16 %v857_v0  ;;  %v893_v14 = vld [vmem:[%s1327_s5 + $0x30] sm:$0xff]  }
  0x2e   :  { %v249_v34 = vmax.f32 %v201_v25, %v712_v17  ;;  %v154_v35 = vmax.f32 %v106_v28, %v651_v19  ;;  %v620_v39 = vunpack.c.h.bf16 %v864_v5  ;;  %v556_v40 = vpack.c.bf16 %v439_v31, %v439_v31  ;;  %v886_v5 = vld [vmem:[%s1326_s4 + $0x30] sm:$0xff]   ;;  %v866_v31 = vld [vmem:[%s1323_s1 + $0x38] sm:$0xff]  }
  0x2f   :  { %v392_v41 = vmax.f32 %v344_v32, %v807_v7  ;;  %v747_v42 = vunpack.c.l.bf16 %v892_v30  ;;  %v652_v43 = vunpack.c.h.bf16 %v871_v6  ;;  %v684_v47 = vunpack.c.h.bf16 %v878_v15  ;;  %v900_v17 = vld [vmem:[%s1328_s6 + $0x30] sm:$0xff]  }
  0x30   :  { %v297_v44 = vmax.f32 %v249_v34, %v744_v24  ;;  %v202_v45 = vmax.f32 %v154_v35, %v683_v29  ;;  %v107_v46 = vmax.f32 %v588_v38, %v620_v39  ;;  %520 = vst.msk [vmem:[%s1331_s9 + $0x1c] sm:$0xf] %vm512_vm0, %v556_v40  ;;  %v840_v52 = vunpack.c.h.bf16 %v1177_v59  ;;  %v907_v23 = vld [vmem:[%s1329_s7 + $0x30] sm:$0xff]   ;;  %v873_v35 = vld [vmem:[%s1324_s2 + $0x38] sm:$0xff]  }
  0x31   :  { %v440_v51 = vmax.f32 %v392_v41, %v839_v8  ;;  %v779_v53 = vunpack.c.l.bf16 %v1217_v36  ;;  %v811_v54 = vunpack.c.l.bf16 %v1222_v37  ;;  %v716_v60 = vunpack.c.h.bf16 %v885_v20  ;;  %v914_v38 = vld [vmem:[%s1330_s8 + $0x30] sm:$0xff]   ;;  %v880_v41 = vld [vmem:[%s1325_s3 + $0x38] sm:$0xff]  }
  0x32   :  { %v345_v55 = vmax.f32 %v297_v44, %v776_v26  ;;  %v250_v56 = vmax.f32 %v202_v45, %v715_v27  ;;  %v155_v58 = vmax.f32 %v107_v46, %v652_v43  ;;  %v591_v63 = vunpack.c.l.bf16 %v858_v48 }
  0x33   :  { %v557_v62 = vpack.c.bf16 %v440_v51, %v440_v51  ;;  %v623_v0 = vunpack.c.l.bf16 %v865_v49  ;;  %v655_v59 = vunpack.c.l.bf16 %v872_v50  ;;  %v748_v4 = vunpack.c.h.bf16 %v892_v30  ;;  %v859_v30 = vld [vmem:[%s1322_s0 + $0x38] sm:$0xff]  }
  0x34   :  { %v393_v1 = vmax.f32 %v345_v55, %v808_v33  ;;  %v298_v2 = vmax.f32 %v250_v56, %v747_v42  ;;  %v203_v3 = vmax.f32 %v155_v58, %v684_v47  ;;  %v843_v6 = vunpack.c.l.bf16 %v913_v57 }
  0x35   :  { %521 = vst.msk [vmem:[%s1331_s9 + $0x20] sm:$0xf] %vm512_vm0, %v557_v62  ;;  %v780_v7 = vunpack.c.h.bf16 %v1217_v36  ;;  %v108_v8 = vmax.f32 %v591_v63, %v623_v0  ;;  %v687_v9 = vunpack.c.l.bf16 %v879_v61  ;;  %v812_v13 = vunpack.c.h.bf16 %v1222_v37 }
  0x36   :  { %v441_v10 = vmax.f32 %v393_v1, %v840_v52  ;;  %v346_v11 = vmax.f32 %v298_v2, %v779_v53  ;;  %v251_v12 = vmax.f32 %v203_v3, %v716_v60  ;;  %v719_v16 = vunpack.c.l.bf16 %v886_v5  ;;  %v894_v60 = vld [vmem:[%s1327_s5 + $0x38] sm:$0xff]  }
  0x37   :  { %v156_v15 = vmax.f32 %v108_v8, %v655_v59  ;;  %v592_v18 = vunpack.c.h.bf16 %v858_v48  ;;  %v624_v19 = vunpack.c.h.bf16 %v865_v49  ;;  %v656_v24 = vunpack.c.h.bf16 %v872_v50  ;;  %v887_v50 = vld [vmem:[%s1326_s4 + $0x38] sm:$0xff]  }
  0x38   :  { %v558_v20 = vpack.c.bf16 %v441_v10, %v441_v10  ;;  %v394_v21 = vmax.f32 %v346_v11, %v811_v54  ;;  %v299_v22 = vmax.f32 %v251_v12, %v748_v4  ;;  %v751_v26 = vunpack.c.l.bf16 %v893_v14  ;;  %v901_v2 = vld [vmem:[%s1328_s6 + $0x38] sm:$0xff]  }
  0x39   :  { %v204_v25 = vmax.f32 %v156_v15, %v687_v9  ;;  %v109_v28 = vmax.f32 %v592_v18, %v624_v19  ;;  %v688_v29 = vunpack.c.h.bf16 %v879_v61  ;;  %v844_v27 = vunpack.c.h.bf16 %v913_v57  ;;  %v908_v10 = vld [vmem:[%s1329_s7 + $0x38] sm:$0xff]  }
  0x3a   :  { %522 = vst.msk [vmem:[%s1331_s9 + $0x24] sm:$0xf] %vm512_vm0, %v558_v20  ;;  %v442_v32 = vmax.f32 %v394_v21, %v843_v6  ;;  %v347_v33 = vmax.f32 %v299_v22, %v780_v7  ;;  %v783_v34 = vunpack.c.l.bf16 %v900_v17  ;;  %v815_v37 = vunpack.c.l.bf16 %v907_v23 }
  0x3b   :  { %v252_v36 = vmax.f32 %v204_v25, %v719_v16  ;;  %v157_v39 = vmax.f32 %v109_v28, %v656_v24  ;;  %v720_v40 = vunpack.c.h.bf16 %v886_v5  ;;  %v595_v44 = vunpack.c.l.bf16 %v859_v30 }
  0x3c   :  { %v559_v42 = vpack.c.bf16 %v442_v32, %v442_v32  ;;  %v395_v43 = vmax.f32 %v347_v33, %v812_v13  ;;  %v627_v45 = vunpack.c.l.bf16 %v866_v31  ;;  %v752_v48 = vunpack.c.h.bf16 %v893_v14 }
  0x3d   :  { %v300_v46 = vmax.f32 %v252_v36, %v751_v26  ;;  %v205_v47 = vmax.f32 %v157_v39, %v688_v29  ;;  %v659_v49 = vunpack.c.l.bf16 %v873_v35  ;;  %v847_v52 = vunpack.c.l.bf16 %v914_v38 }
  0x3e   :  { %523 = vst.msk [vmem:[%s1331_s9 + $0x28] sm:$0xf] %vm512_vm0, %v559_v42  ;;  %v443_v51 = vmax.f32 %v395_v43, %v844_v27  ;;  %v110_v53 = vmax.f32 %v595_v44, %v627_v45  ;;  %v691_v54 = vunpack.c.l.bf16 %v880_v41  ;;  %v784_v57 = vunpack.c.h.bf16 %v900_v17  ;;  %v915_v17 = vld [vmem:[%s1330_s8 + $0x38] sm:$0xff]  }
  0x3f   :  { %v348_v55 = vmax.f32 %v300_v46, %v783_v34  ;;  %v253_v56 = vmax.f32 %v205_v47, %v720_v40  ;;  %v816_v58 = vunpack.c.h.bf16 %v907_v23  ;;  %v723_v63 = vunpack.c.l.bf16 %v887_v50 }
  0x40   :  { %v560_v61 = vpack.c.bf16 %v443_v51, %v443_v51  ;;  %v158_v62 = vmax.f32 %v110_v53, %v659_v49  ;;  %v596_v0 = vunpack.c.h.bf16 %v859_v30  ;;  %v628_v3 = vunpack.c.h.bf16 %v866_v31 }
  0x41   :  { %v396_v59 = vmax.f32 %v348_v55, %v815_v37  ;;  %v301_v1 = vmax.f32 %v253_v56, %v752_v48  ;;  %v660_v4 = vunpack.c.h.bf16 %v873_v35  ;;  %v848_v5 = vunpack.c.h.bf16 %v914_v38 }
  0x42   :  { %524 = vst.msk [vmem:[%s1331_s9 + $0x2c] sm:$0xf] %vm512_vm0, %v560_v61  ;;  %v206_v6 = vmax.f32 %v158_v62, %v691_v54  ;;  %v755_v7 = vunpack.c.l.bf16 %v894_v60  ;;  %v111_v11 = vmax.f32 %v596_v0, %v628_v3  ;;  %v692_v12 = vunpack.c.h.bf16 %v880_v41 }
  0x43   :  { %v444_v8 = vmax.f32 %v396_v59, %v847_v52  ;;  %v349_v9 = vmax.f32 %v301_v1, %v784_v57  ;;  %v787_v14 = vunpack.c.l.bf16 %v901_v2  ;;  %v724_v19 = vunpack.c.h.bf16 %v887_v50 }
  0x44   :  { %v254_v13 = vmax.f32 %v206_v6, %v723_v63  ;;  %v159_v18 = vmax.f32 %v111_v11, %v660_v4  ;;  %v819_v21 = vunpack.c.l.bf16 %v908_v10  ;;  %v756_v24 = vunpack.c.h.bf16 %v894_v60 }
  0x45   :  { %v561_v15 = vpack.c.bf16 %v444_v8, %v444_v8  ;;  %v397_v16 = vmax.f32 %v349_v9, %v816_v58  ;;  %v851_v26 = vunpack.c.l.bf16 %v915_v17  ;;  %v788_v30 = vunpack.c.h.bf16 %v901_v2 }
  0x46   :  { %v302_v20 = vmax.f32 %v254_v13, %v755_v7  ;;  %v207_v23 = vmax.f32 %v159_v18, %v692_v12  ;;  %v820_v33 = vunpack.c.h.bf16 %v908_v10  ;;  %v852_v35 = vunpack.c.h.bf16 %v915_v17 }
  0x47   :  { %525 = vst.msk [vmem:[%s1331_s9 + $0x30] sm:$0xf] %vm512_vm0, %v561_v15  ;;  %v445_v22 = vmax.f32 %v397_v16, %v848_v5 }
  0x48   :  { %v350_v25 = vmax.f32 %v302_v20, %v787_v14  ;;  %v255_v29 = vmax.f32 %v207_v23, %v724_v19 }
  0x49   :  { %v562_v28 = vpack.c.bf16 %v445_v22, %v445_v22 }
  0x4a   :  { %v398_v31 = vmax.f32 %v350_v25, %v819_v21  ;;  %v303_v32 = vmax.f32 %v255_v29, %v756_v24 }
  0x4b   :  { %526 = vst.msk [vmem:[%s1331_s9 + $0x34] sm:$0xf] %vm512_vm0, %v562_v28 }
  0x4c   :  { %v446_v27 = vmax.f32 %v398_v31, %v851_v26  ;;  %v351_v34 = vmax.f32 %v303_v32, %v788_v30 }
  0x4e   :  { %v563_v36 = vpack.c.bf16 %v446_v27, %v446_v27  ;;  %v399_v37 = vmax.f32 %v351_v34, %v820_v33 }
  0x50   :  { %527 = vst.msk [vmem:[%s1331_s9 + $0x38] sm:$0xf] %vm512_vm0, %v563_v36  ;;  %v447_v38 = vmax.f32 %v399_v37, %v852_v35 }
  0x52   :  { %v564_v39 = vpack.c.bf16 %v447_v38, %v447_v38 }
  0x54   :  { %528 = vst.msk [vmem:[%s1331_s9 + $0x3c] sm:$0xf] %vm512_vm0, %v564_v39 }

// kernel: densenet121_features.125
= control target key start
LH: loop header
LB: loop body
LE: loop exit
PB: predicated region body
PF: predicated region fallthrough
CT: control target
= control target key end

     0   :  { %s1785_s21 = smov 0   ;;  %s1787_s22 = smov 0   ;;  %s2108_s0 = inlined_call_operand.vmem [shape: bf16[512,256], index: 0, kind: input, shape index: {}]   ;;  %s2109_s1 = inlined_call_operand.vmem [shape: bf16[256,64], index: 1, kind: input, shape index: {}]   ;;  %s2110_s2 = inlined_call_operand.vmem [shape: f32[1,256], index: 2, kind: input, shape index: {}, may-alias: {2,3}]   ;;  %s2111_s3 = inlined_call_operand.vmem [shape: f32[1,256], index: 3, kind: input, shape index: {}, may-alias: {2,3}]   ;;  %s2112_s4 = inlined_call_operand.vmem [shape: f32[1,64], index: 4, kind: input, shape index: {}]   ;;  %s2113_s5 = inlined_call_operand.vmem [shape: f32[1,64], index: 5, kind: input, shape index: {}]   ;;  %s2114_s6 = inlined_call_operand.vmem [shape: bf16[512,64], index: 6, kind: output, shape index: {}]  }
   0x1   :  { %s1789_s23 = smov 0  }
   0x2 LB: > { %s28_s2 = sadd.s32 1, %s1743_s22  ;;  %p1385_p0 = scmp.ge.s32.totalorder %s1747_s23, 1  ;;  %s1747_s23 = sphi %s1789_s23, %s16_s23   ;;  %s1743_s22 = sphi %s1787_s22, %s2116_s22   ;;  %s1739_s21 = sphi %s1785_s21, %s2115_s21  }
   0x3   : > { %p30_p1 = scmp.ge.s32.totalorder %s28_s2, 2  ;;  %p264_p2 = scmp.lt.s32.totalorder %s1747_s23, 3 }
   0x5   : > { %s2118_s2 = smov (%p30_p1, %s28_s2), 0  ;;  %p265_p3 = pnand %p1385_p0, %p264_p2 }
   0x6   : > { %v1661_v0 = vld [vmem:[%s2109_s1 + $0x40] sm:$0xff] (!%p265_p3)   ;;  %s1386_s25 = sshll.u32 (!%p265_p3), %s1739_s21, 5  ;;  %v1663_v2 = vld [vmem:[%s2109_s1 + $0x48] sm:$0xff] (!%p265_p3)   ;;  %v1665_v4 = vld [vmem:[%s2109_s1 + $0x50] sm:$0xff] (!%p265_p3)   ;;  %vm351_vm0 = vcmask (!%p265_p3), 523264   ;;  %v1749_v48 = vmov (!%p265_p3), 0.0  }
   0x7   : > { %268 = sbr.rel (%p265_p3) target bundleno = 333 (0x14d), region = 44  ;;  %v1662_v1 = vld [vmem:[%s2109_s1] sm:$0xff] (!%p265_p3)   ;;  %1508 = vmatprep.subr.bf16.mxu0 (!%p265_p3), %v1661_v0  ;;  %1620 = vmatprep.subr.bf16.mxu1 (!%p265_p3), %v1661_v0  ;;  %v1664_v3 = vld [vmem:[%s2109_s1 + $0x8] sm:$0xff] (!%p265_p3)   ;;  %p314_p4 = scmp.lt.s32.totalorder (!%p265_p3), %s1386_s25, 63  ;;  %v1666_v5 = vld [vmem:[%s2109_s1 + $0x10] sm:$0xff] (!%p265_p3)   ;;  %352 = vst.msk [vmem:[#allocation2] sm:$0xff] (!%p265_p3), %vm351_vm0, %v1749_v48 }
   0x8   : > { %1509 = vmatpush3.bf16.msra.mxu0 (!%p265_p3), %v1662_v1  ;;  %1628 = vmatpush3.bf16.msra.mxu1 (!%p265_p3), %v1662_v1  ;;  %v1667_v6 = vld [vmem:[%s2109_s1 + $0x58] sm:$0xff] (!%p265_p3)   ;;  %v1669_v8 = vld [vmem:[%s2109_s1 + $0x60] sm:$0xff] (!%p265_p3)   ;;  %v1671_v10 = vld [vmem:[%s2109_s1 + $0x68] sm:$0xff] (!%p265_p3)   ;;  %353 = vst.msk [vmem:[#allocation2 + $0x8] sm:$0xff] (!%p265_p3), %vm351_vm0, %v1749_v48  ;;  %vm1235_vm1 = vcmask (!%p265_p3), 519168  }
   0x9   : > { %1510 = vmatprep.subr.bf16.mxu0 (!%p265_p3), %v1663_v2  ;;  %1621 = vmatprep.subr.bf16.mxu1 (!%p265_p3), %v1663_v2  ;;  %v1668_v7 = vld [vmem:[%s2109_s1 + $0x18] sm:$0xff] (!%p265_p3)   ;;  %v1670_v9 = vld [vmem:[%s2109_s1 + $0x20] sm:$0xff] (!%p265_p3)   ;;  %v1672_v13 = vld [vmem:[%s2109_s1 + $0x28] sm:$0xff] (!%p265_p3)   ;;  %354 = vst.msk [vmem:[#allocation2 + $0x10] sm:$0xff] (!%p265_p3), %vm351_vm0, %v1749_v48 }
   0xa   : > { %v1673_v14 = vld [vmem:[%s2109_s1 + $0x70] sm:$0xff] (!%p265_p3)   ;;  %v1675_v16 = vld [vmem:[%s2109_s1 + $0x78] sm:$0xff] (!%p265_p3)   ;;  %355 = vst.msk [vmem:[#allocation2 + $0x18] sm:$0xff] (!%p265_p3), %vm351_vm0, %v1749_v48  ;;  %356 = vst.msk [vmem:[#allocation2 + $0x20] sm:$0xff] (!%p265_p3), %vm351_vm0, %v1749_v48 }
   0xb   : > { %v1674_v15 = vld [vmem:[%s2109_s1 + $0x30] sm:$0xff] (!%p265_p3)   ;;  %v1676_v17 = vld [vmem:[%s2109_s1 + $0x38] sm:$0xff] (!%p265_p3)   ;;  %357 = vst.msk [vmem:[#allocation2 + $0x28] sm:$0xff] (!%p265_p3), %vm351_vm0, %v1749_v48  ;;  %358 = vst.msk [vmem:[#allocation2 + $0x30] sm:$0xff] (!%p265_p3), %vm351_vm0, %v1749_v48 }
   0xc   : > { %1511 = vmatpush3.bf16.msra.mxu0 (!%p265_p3), %v1664_v3  ;;  %1629 = vmatpush3.bf16.msra.mxu1 (!%p265_p3), %v1664_v3  ;;  %359 = vst.msk [vmem:[#allocation2 + $0x38] sm:$0xff] (!%p265_p3), %vm351_vm0, %v1749_v48  ;;  %360 = vst.msk [vmem:[#allocation2 + $0x40] sm:$0xff] (!%p265_p3), %vm351_vm0, %v1749_v48 }
   0xd   : > { %1512 = vmatprep.subr.bf16.mxu0 (!%p265_p3), %v1665_v4  ;;  %1622 = vmatprep.subr.bf16.mxu1 (!%p265_p3), %v1665_v4  ;;  %361 = vst.msk [vmem:[#allocation2 + $0x48] sm:$0xff] (!%p265_p3), %vm351_vm0, %v1749_v48  ;;  %362 = vst.msk [vmem:[#allocation2 + $0x50] sm:$0xff] (!%p265_p3), %vm351_vm0, %v1749_v48 }
   0xe   : > { %s2120_s25 = smov (!%p314_p4, %s1386_s25), 63  ;;  %363 = vst.msk [vmem:[#allocation2 + $0x58] sm:$0xff] %vm351_vm0, %v1749_v48  ;;  %364 = vst.msk [vmem:[#allocation2 + $0x60] sm:$0xff] %vm351_vm0, %v1749_v48  ;;  %v416_v51 = vld [vmem:[#allocation2] sm:$0xff] }
   0xf   : > { %s1475_s16 = sshll.u32 %s2120_s25, 3  ;;  %365 = vst.msk [vmem:[#allocation2 + $0x68] sm:$0xff] %vm351_vm0, %v1749_v48  ;;  %366 = vst.msk [vmem:[#allocation2 + $0x70] sm:$0xff] %vm351_vm0, %v1749_v48  ;;  %v417_v59 = vld [vmem:[#allocation2 + $0x8] sm:$0xff]  ;;  %s1390_s18 = sshll.u32 %s2120_s25, 2 }
  0x10   : > { %1513 = vmatpush3.bf16.msra.mxu0 %v1666_v5  ;;  %1630 = vmatpush3.bf16.msra.mxu1 %v1666_v5  ;;  %s1836_s21 = scalar_lea.vmem %s2108_s0, %s1475_s16  ;;  %367 = vst.msk [vmem:[#allocation2 + $0x78] sm:$0xff] %vm351_vm0, %v1749_v48  ;;  %368 = vst.msk [vmem:[#allocation2 + $0x80] sm:$0xff] %vm351_vm0, %v1749_v48  ;;  %s1953_s20 = scalar_lea.vmem %s2114_s6, %s1390_s18 }
  0x11   : > { %1514 = vmatprep.subr.bf16.mxu0 %v1667_v6  ;;  %1623 = vmatprep.subr.bf16.mxu1 %v1667_v6  ;;  %v1679_v11 = vld [vmem:[%s1836_s21 + $0x4] ss:$8 sps:$4 sm:$0xff]   ;;  %v1677_v18 = vld [vmem:[%s1836_s21] ss:$8 sps:$4 sm:$0xff]   ;;  %v1683_v20 = vld [vmem:[%s1836_s21 + $0x14] ss:$8 sps:$4 sm:$0xff]  }
  0x12   : > { %v1682_v12 = vld [vmem:[%s1836_s21 + $0x84] ss:$8 sps:$4 sm:$0xff]   ;;  %768 = vmatprep.mubr.bf16.mxu0 %v1679_v11  ;;  %v1680_v19 = vld [vmem:[%s1836_s21 + $0x80] ss:$8 sps:$4 sm:$0xff]   ;;  %v1685_v21 = vld [vmem:[%s1836_s21 + $0x94] ss:$8 sps:$4 sm:$0xff]  }
  0x13   : > { %832 = vmatprep.mubr.bf16.mxu1 %v1682_v12  ;;  %v1687_v22 = vld [vmem:[%s1836_s21 + $0x10] ss:$8 sps:$4 sm:$0xff]   ;;  %v1689_v24 = vld [vmem:[%s1836_s21 + $0x24] ss:$8 sps:$4 sm:$0xff]   ;;  %v1693_v26 = vld [vmem:[%s1836_s21 + $0x20] ss:$8 sps:$4 sm:$0xff]  }
  0x14   : > { %1515 = vmatpush3.bf16.msra.mxu0 %v1668_v7  ;;  %1631 = vmatpush3.bf16.msra.mxu1 %v1668_v7  ;;  %v1688_v23 = vld [vmem:[%s1836_s21 + $0x90] ss:$8 sps:$4 sm:$0xff]   ;;  %v1691_v25 = vld [vmem:[%s1836_s21 + $0xa4] ss:$8 sps:$4 sm:$0xff]   ;;  %v1694_v27 = vld [vmem:[%s1836_s21 + $0xa0] ss:$8 sps:$4 sm:$0xff]  }
  0x15   : > { %1516 = vmatprep.subr.bf16.mxu0 %v1669_v8  ;;  %1624 = vmatprep.subr.bf16.mxu1 %v1669_v8  ;;  %v1695_v28 = vld [vmem:[%s1836_s21 + $0x34] ss:$8 sps:$4 sm:$0xff]   ;;  %v1699_v30 = vld [vmem:[%s1836_s21 + $0x30] ss:$8 sps:$4 sm:$0xff]   ;;  %v1701_v32 = vld [vmem:[%s1836_s21 + $0x44] ss:$8 sps:$4 sm:$0xff]  }
  0x16   : > { %v1697_v29 = vld [vmem:[%s1836_s21 + $0xb4] ss:$8 sps:$4 sm:$0xff]   ;;  %v1700_v31 = vld [vmem:[%s1836_s21 + $0xb0] ss:$8 sps:$4 sm:$0xff]   ;;  %v1703_v33 = vld [vmem:[%s1836_s21 + $0xc4] ss:$8 sps:$4 sm:$0xff]  }
  0x17   : > { %v1705_v34 = vld [vmem:[%s1836_s21 + $0x40] ss:$8 sps:$4 sm:$0xff]   ;;  %v1707_v36 = vld [vmem:[%s1836_s21 + $0x54] ss:$8 sps:$4 sm:$0xff]   ;;  %v1711_v38 = vld [vmem:[%s1836_s21 + $0x50] ss:$8 sps:$4 sm:$0xff]  }
  0x18   : > { %1517 = vmatpush3.bf16.msra.mxu0 %v1670_v9  ;;  %1632 = vmatpush3.bf16.msra.mxu1 %v1670_v9  ;;  %v1706_v35 = vld [vmem:[%s1836_s21 + $0xc0] ss:$8 sps:$4 sm:$0xff]   ;;  %v1709_v37 = vld [vmem:[%s1836_s21 + $0xd4] ss:$8 sps:$4 sm:$0xff]   ;;  %v1712_v39 = vld [vmem:[%s1836_s21 + $0xd0] ss:$8 sps:$4 sm:$0xff]  }
  0x19   : > { %1518 = vmatprep.subr.bf16.mxu0 %v1671_v10  ;;  %1625 = vmatprep.subr.bf16.mxu1 %v1671_v10  ;;  %v1713_v40 = vld [vmem:[%s1836_s21 + $0x64] ss:$8 sps:$4 sm:$0xff]   ;;  %v1717_v42 = vld [vmem:[%s1836_s21 + $0x60] ss:$8 sps:$4 sm:$0xff]   ;;  %v1719_v44 = vld [vmem:[%s1836_s21 + $0x74] ss:$8 sps:$4 sm:$0xff]  }
  0x1a   : > { %v1715_v41 = vld [vmem:[%s1836_s21 + $0xe4] ss:$8 sps:$4 sm:$0xff]   ;;  %v1718_v43 = vld [vmem:[%s1836_s21 + $0xe0] ss:$8 sps:$4 sm:$0xff]   ;;  %v1721_v45 = vld [vmem:[%s1836_s21 + $0xf4] ss:$8 sps:$4 sm:$0xff]  }
  0x1b   : > { %v1723_v46 = vld [vmem:[%s1836_s21 + $0x70] ss:$8 sps:$4 sm:$0xff]   ;;  %369 = vst.msk [vmem:[#allocation2 + $0x88] sm:$0xff] %vm351_vm0, %v1749_v48  ;;  %370 = vst.msk [vmem:[#allocation2 + $0x90] sm:$0xff] %vm351_vm0, %v1749_v48  ;;  %v432_v53 = vld [vmem:[#allocation2 + $0x80] sm:$0xff] }
  0x1c   : > { %1519 = vmatpush3.bf16.msra.mxu0 %v1672_v13  ;;  %1633 = vmatpush3.bf16.msra.mxu1 %v1672_v13  ;;  %v1724_v47 = vld [vmem:[%s1836_s21 + $0xf0] ss:$8 sps:$4 sm:$0xff]   ;;  %371 = vst.msk [vmem:[#allocation2 + $0x98] sm:$0xff] %vm351_vm0, %v1749_v48  ;;  %372 = vst.msk [vmem:[#allocation2 + $0xa0] sm:$0xff] %vm351_vm0, %v1749_v48 }
  0x1d   : > { %1520 = vmatprep.subr.bf16.mxu0 %v1673_v14  ;;  %1626 = vmatprep.subr.bf16.mxu1 %v1673_v14  ;;  %373 = vst.msk [vmem:[#allocation2 + $0xa8] sm:$0xff] %vm351_vm0, %v1749_v48  ;;  %374 = vst.msk [vmem:[#allocation2 + $0xb0] sm:$0xff] %vm351_vm0, %v1749_v48  ;;  %v418_v7 = vld [vmem:[#allocation2 + $0x10] sm:$0xff] }
  0x1e   : > { %375 = vst.msk [vmem:[#allocation2 + $0xb8] sm:$0xff] %vm351_vm0, %v1749_v48  ;;  %376 = vst.msk [vmem:[#allocation2 + $0xc0] sm:$0xff] %vm351_vm0, %v1749_v48 }
  0x1f   : > { %377 = vst.msk [vmem:[#allocation2 + $0xc8] sm:$0xff] %vm351_vm0, %v1749_v48  ;;  %378 = vst.msk [vmem:[#allocation2 + $0xd0] sm:$0xff] %vm351_vm0, %v1749_v48 }
  0x20   : > { %1521 = vmatpush3.bf16.msra.mxu0 %v1674_v15  ;;  %1634 = vmatpush3.bf16.msra.mxu1 %v1674_v15  ;;  %379 = vst.msk [vmem:[#allocation2 + $0xd8] sm:$0xff] %vm351_vm0, %v1749_v48  ;;  %380 = vst.msk [vmem:[#allocation2 + $0xe0] sm:$0xff] %vm351_vm0, %v1749_v48  ;;  %v1930_v15 = vld [vmem:[%s2112_s4] ss:$0 sm:$0xff] }
  0x21   : > { %1522 = vmatprep.subr.bf16.mxu0 %v1675_v16  ;;  %1627 = vmatprep.subr.bf16.mxu1 %v1675_v16  ;;  %381 = vst.msk [vmem:[#allocation2 + $0xe8] sm:$0xff] %vm351_vm0, %v1749_v48  ;;  %382 = vst.msk [vmem:[#allocation2 + $0xf0] sm:$0xff] %vm351_vm0, %v1749_v48  ;;  %v419_v16 = vld [vmem:[#allocation2 + $0x18] sm:$0xff] }
  0x22   : > { %383 = vst.msk [vmem:[#allocation2 + $0xf8] sm:$0xff] %vm351_vm0, %v1749_v48  ;;  %v433_v61 = vld [vmem:[#allocation2 + $0x88] sm:$0xff]  ;;  %v434_v9 = vld [vmem:[#allocation2 + $0x90] sm:$0xff] }
  0x24   : > { %1523 = vmatpush3.bf16.msra.mxu0 %v1676_v17  ;;  %1635 = vmatpush3.bf16.msra.mxu1 %v1676_v17 }
  0x27   : > { %769 = vmatmul.mubr.bf16.vlgmr.msra.gmra.mrb[0].mxu0 %v1677_v18  ;;  %833 = vmatmul.mubr.bf16.vlgmr.msra.gmra.mrb[0].mxu1 %v1680_v19  ;;  %v435_v18 = vld [vmem:[#allocation2 + $0x98] sm:$0xff] }
  0x28   : > { %776 = vmatprep.mubr.bf16.mxu0 %v1683_v20  ;;  %840 = vmatprep.mubr.bf16.mxu1 %v1685_v21 }
  0x2f   : > { %777 = vmatmul.mubr.bf16.gmra.mrb[4].mxu0 %v1687_v22  ;;  %841 = vmatmul.mubr.bf16.gmra.mrb[4].mxu1 %v1688_v23 }
  0x30   : > { %784 = vmatprep.mubr.bf16.mxu0 %v1689_v24  ;;  %848 = vmatprep.mubr.bf16.mxu1 %v1691_v25  ;;  %v1935_v25 = vld [vmem:[%s2113_s5] ss:$0 sm:$0xff] }
  0x37   : > { %785 = vmatmul.mubr.bf16.gmra.mrb[8].mxu0 %v1693_v26  ;;  %849 = vmatmul.mubr.bf16.gmra.mrb[8].mxu1 %v1694_v27 }
  0x38   : > { %792 = vmatprep.mubr.bf16.mxu0 %v1695_v28  ;;  %856 = vmatprep.mubr.bf16.mxu1 %v1697_v29 }
  0x3f   : > { %793 = vmatmul.mubr.bf16.gmra.mrb[12].mxu0 %v1699_v30  ;;  %857 = vmatmul.mubr.bf16.gmra.mrb[12].mxu1 %v1700_v31 }
  0x40   : > { %800 = vmatprep.mubr.bf16.mxu0 %v1701_v32  ;;  %864 = vmatprep.mubr.bf16.mxu1 %v1703_v33 }
  0x47   : > { %801 = vmatmul.mubr.bf16.gmra.mrb[16].mxu0 %v1705_v34  ;;  %865 = vmatmul.mubr.bf16.gmra.mrb[16].mxu1 %v1706_v35 }
  0x48   : > { %808 = vmatprep.mubr.bf16.mxu0 %v1707_v36  ;;  %872 = vmatprep.mubr.bf16.mxu1 %v1709_v37 }
  0x4f   : > { %809 = vmatmul.mubr.bf16.gmra.mrb[20].mxu0 %v1711_v38  ;;  %873 = vmatmul.mubr.bf16.gmra.mrb[20].mxu1 %v1712_v39 }
  0x50   : > { %816 = vmatprep.mubr.bf16.mxu0 %v1713_v40  ;;  %880 = vmatprep.mubr.bf16.mxu1 %v1715_v41 }
  0x57   : > { %817 = vmatmul.mubr.bf16.gmra.mrb[24].mxu0 %v1717_v42  ;;  %881 = vmatmul.mubr.bf16.gmra.mrb[24].mxu1 %v1718_v43 }
  0x58   : > { %824 = vmatprep.mubr.bf16.mxu0 %v1719_v44  ;;  %888 = vmatprep.mubr.bf16.mxu1 %v1721_v45  ;;  %v420_v45 = vld [vmem:[#allocation2 + $0x20] sm:$0xff] }
  0x5f   : > { %825 = vmatmul.mubr.bf16.gmra.mrb[28].mxu0 %v1723_v46  ;;  %889 = vmatmul.mubr.bf16.gmra.mrb[28].mxu1 %v1724_v47  ;;  %v436_v46 = vld [vmem:[#allocation2 + $0xa0] sm:$0xff] }
  0xfa   : > { %v1524_v49 = vpop.f32.mrb[0].mxu0  ;;  %v1572_v50 = vpop.f32.mrb[0].mxu1 }
  0xfb   : > { %v1525_v52 = vpop.f32.mrb[1].mxu0  ;;  %v1573_v54 = vpop.f32.mrb[1].mxu1 }
  0xfc   : > { %v1526_v55 = vadd.f32 %v1525_v52, %v1524_v49  ;;  %v1574_v56 = vadd.f32 %v1573_v54, %v1572_v50  ;;  %v1527_v57 = vpop.f32.mrb[2].mxu0  ;;  %v1575_v58 = vpop.f32.mrb[2].mxu1 }
  0xfd   : > { %v1528_v60 = vpop.f32.mrb[3].mxu0  ;;  %v1576_v62 = vpop.f32.mrb[3].mxu1 }
  0xfe   : > { %v897_v63 = vadd.f32 %v1526_v55, %v416_v51  ;;  %v913_v0 = vadd.f32 %v1574_v56, %v432_v53  ;;  %v1529_v1 = vadd.f32 %v1528_v60, %v1527_v57  ;;  %v1577_v2 = vadd.f32 %v1576_v62, %v1575_v58  ;;  %v421_v57 = vld [vmem:[#allocation2 + $0x28] sm:$0xff] }
  0xff   : > { %v437_v58 = vld [vmem:[#allocation2 + $0xa8] sm:$0xff] }
 0x100   : > { %930 = vst.msk [vmem:[#allocation2] sm:$0xff] %vm351_vm0, %v897_v63  ;;  %946 = vst.msk [vmem:[#allocation2 + $0x80] sm:$0xff] %vm351_vm0, %v913_v0  ;;  %v898_v3 = vadd.f32 %v1529_v1, %v417_v59  ;;  %v914_v4 = vadd.f32 %v1577_v2, %v433_v61 }
 0x102   : > { %931 = vst.msk [vmem:[#allocation2 + $0x8] sm:$0xff] %vm351_vm0, %v898_v3  ;;  %947 = vst.msk [vmem:[#allocation2 + $0x88] sm:$0xff] %vm351_vm0, %v914_v4  ;;  %v1530_v5 = vpop.f32.mrb[4].mxu0  ;;  %v1578_v6 = vpop.f32.mrb[4].mxu1 }
 0x103   : > { %v1531_v8 = vpop.f32.mrb[5].mxu0  ;;  %v1579_v10 = vpop.f32.mrb[5].mxu1 }
 0x104   : > { %v1532_v11 = vadd.f32 %v1531_v8, %v1530_v5  ;;  %v1580_v12 = vadd.f32 %v1579_v10, %v1578_v6  ;;  %v1533_v13 = vpop.f32.mrb[6].mxu0  ;;  %v1581_v14 = vpop.f32.mrb[6].mxu1 }
 0x105   : > { %v1534_v17 = vpop.f32.mrb[7].mxu0  ;;  %v1582_v19 = vpop.f32.mrb[7].mxu1 }
 0x106   : > { %v899_v20 = vadd.f32 %v1532_v11, %v418_v7  ;;  %v915_v21 = vadd.f32 %v1580_v12, %v434_v9  ;;  %v1535_v22 = vadd.f32 %v1534_v17, %v1533_v13  ;;  %v1583_v23 = vadd.f32 %v1582_v19, %v1581_v14 }
 0x107   : > { %v965_v24 = vld [vmem:[#allocation2] sm:$0xff] }
 0x108   : > { %v981_v26 = vld [vmem:[#allocation2 + $0x80] sm:$0xff]  ;;  %v1004_v27 = vmul.f32 %v1930_v15, %v965_v24  ;;  %932 = vst.msk [vmem:[#allocation2 + $0x10] sm:$0xff] %vm351_vm0, %v899_v20  ;;  %948 = vst.msk [vmem:[#allocation2 + $0x90] sm:$0xff] %vm351_vm0, %v915_v21  ;;  %v900_v29 = vadd.f32 %v1535_v22, %v419_v16  ;;  %v916_v30 = vadd.f32 %v1583_v23, %v435_v18  ;;  %v422_v22 = vld [vmem:[#allocation2 + $0x30] sm:$0xff] }
 0x109   : > { %v1020_v28 = vmul.f32 %v1930_v15, %v981_v26  ;;  %v966_v31 = vld [vmem:[#allocation2 + $0x8] sm:$0xff]  ;;  %v438_v23 = vld [vmem:[#allocation2 + $0xb0] sm:$0xff] }
 0x10a   : > { %v982_v32 = vld [vmem:[#allocation2 + $0x88] sm:$0xff]  ;;  %v1043_v33 = vadd.f32 %v1935_v25, %v1004_v27  ;;  %v1005_v35 = vmul.f32 %v1930_v15, %v966_v31  ;;  %933 = vst.msk [vmem:[#allocation2 + $0x18] sm:$0xff] %vm351_vm0, %v900_v29  ;;  %949 = vst.msk [vmem:[#allocation2 + $0x98] sm:$0xff] %vm351_vm0, %v916_v30  ;;  %v1536_v37 = vpop.f32.mrb[8].mxu0  ;;  %v1584_v38 = vpop.f32.mrb[8].mxu1 }
 0x10b   : > { %v1059_v34 = vadd.f32 %v1935_v25, %v1020_v28  ;;  %v1021_v36 = vmul.f32 %v1930_v15, %v982_v32  ;;  %v1537_v39 = vpop.f32.mrb[9].mxu0  ;;  %v1585_v40 = vpop.f32.mrb[9].mxu1 }
 0x10c   : > { %v1075_v41 = vmax.f32 %v1043_v33, 0.0  ;;  %v1044_v43 = vadd.f32 %v1935_v25, %v1005_v35  ;;  %v1539_v47 = vpop.f32.mrb[10].mxu0  ;;  %v1587_v48 = vpop.f32.mrb[10].mxu1  ;;  %v1538_v49 = vadd.f32 %v1537_v39, %v1536_v37  ;;  %v1586_v50 = vadd.f32 %v1585_v40, %v1584_v38  ;;  %v423_v35 = vld [vmem:[#allocation2 + $0x38] sm:$0xff] }
 0x10d   : > { %v1091_v42 = vmax.f32 %v1059_v34, 0.0  ;;  %v1060_v44 = vadd.f32 %v1935_v25, %v1021_v36  ;;  %v1540_v51 = vpop.f32.mrb[11].mxu0  ;;  %v1588_v52 = vpop.f32.mrb[11].mxu1  ;;  %v439_v36 = vld [vmem:[#allocation2 + $0xb8] sm:$0xff] }
 0x10e   : > { %v1476_v53 = vpack.c.bf16 %v1075_v41, %v1075_v41  ;;  %v1076_v55 = vmax.f32 %v1044_v43, 0.0  ;;  %v901_v61 = vadd.f32 %v1538_v49, %v420_v45  ;;  %v917_v62 = vadd.f32 %v1586_v50, %v436_v46 }
 0x10f   : > { %v1492_v54 = vpack.c.bf16 %v1091_v42, %v1091_v42  ;;  %v1092_v56 = vmax.f32 %v1060_v44, 0.0  ;;  %v967_v59 = vld [vmem:[#allocation2 + $0x10] sm:$0xff]  ;;  %v1541_v63 = vadd.f32 %v1540_v51, %v1539_v47  ;;  %v1589_v0 = vadd.f32 %v1588_v52, %v1587_v48 }
 0x110   : > { %v983_v60 = vld [vmem:[#allocation2 + $0x90] sm:$0xff]  ;;  %1236 = vst.msk [vmem:[%s1953_s20] sm:$0xf] %vm1235_vm1, %v1476_v53  ;;  %v1477_v1 = vpack.c.bf16 %v1076_v55, %v1076_v55  ;;  %v1006_v3 = vmul.f32 %v1930_v15, %v967_v59  ;;  %v440_v59 = vld [vmem:[#allocation2 + $0xc0] sm:$0xff] }
 0x111   : > { %1252 = vst.msk [vmem:[%s1953_s20 + $0x40] sm:$0xf] %vm1235_vm1, %v1492_v54  ;;  %v1493_v2 = vpack.c.bf16 %v1092_v56, %v1092_v56  ;;  %v1022_v4 = vmul.f32 %v1930_v15, %v983_v60  ;;  %v968_v5 = vld [vmem:[#allocation2 + $0x18] sm:$0xff]  ;;  %v902_v7 = vadd.f32 %v1541_v63, %v421_v57  ;;  %v918_v8 = vadd.f32 %v1589_v0, %v437_v58  ;;  %v424_v57 = vld [vmem:[#allocation2 + $0x40] sm:$0xff] }
 0x112   : > { %v984_v6 = vld [vmem:[#allocation2 + $0x98] sm:$0xff]  ;;  %934 = vst.msk [vmem:[#allocation2 + $0x20] sm:$0xff] %vm351_vm0, %v901_v61  ;;  %950 = vst.msk [vmem:[#allocation2 + $0xa0] sm:$0xff] %vm351_vm0, %v917_v62  ;;  %v1045_v9 = vadd.f32 %v1935_v25, %v1006_v3  ;;  %v1007_v11 = vmul.f32 %v1930_v15, %v968_v5  ;;  %v1542_v13 = vpop.f32.mrb[12].mxu0  ;;  %v1590_v14 = vpop.f32.mrb[12].mxu1  ;;  %v425_v5 = vld [vmem:[#allocation2 + $0x48] sm:$0xff] }
 0x113   : > { %1237 = vst.msk [vmem:[%s1953_s20 + $0x4] sm:$0xf] %vm1235_vm1, %v1477_v1  ;;  %1253 = vst.msk [vmem:[%s1953_s20 + $0x44] sm:$0xf] %vm1235_vm1, %v1493_v2  ;;  %v1061_v10 = vadd.f32 %v1935_v25, %v1022_v4  ;;  %v1023_v12 = vmul.f32 %v1930_v15, %v984_v6  ;;  %v1543_v16 = vpop.f32.mrb[13].mxu0  ;;  %v1591_v17 = vpop.f32.mrb[13].mxu1 }
 0x114   : > { %935 = vst.msk [vmem:[#allocation2 + $0x28] sm:$0xff] %vm351_vm0, %v902_v7  ;;  %951 = vst.msk [vmem:[#allocation2 + $0xa8] sm:$0xff] %vm351_vm0, %v918_v8  ;;  %v1077_v18 = vmax.f32 %v1045_v9, 0.0  ;;  %v1046_v20 = vadd.f32 %v1935_v25, %v1007_v11  ;;  %v1545_v24 = vpop.f32.mrb[14].mxu0  ;;  %v1593_v26 = vpop.f32.mrb[14].mxu1  ;;  %v1544_v27 = vadd.f32 %v1543_v16, %v1542_v13  ;;  %v1592_v28 = vadd.f32 %v1591_v17, %v1590_v14  ;;  %v441_v7 = vld [vmem:[#allocation2 + $0xc8] sm:$0xff] }
 0x115   : > { %v1093_v19 = vmax.f32 %v1061_v10, 0.0  ;;  %v1062_v21 = vadd.f32 %v1935_v25, %v1023_v12  ;;  %v1546_v29 = vpop.f32.mrb[15].mxu0  ;;  %v1594_v30 = vpop.f32.mrb[15].mxu1 }
 0x116   : > { %v1478_v31 = vpack.c.bf16 %v1077_v18, %v1077_v18  ;;  %v1078_v33 = vmax.f32 %v1046_v20, 0.0  ;;  %v903_v37 = vadd.f32 %v1544_v27, %v422_v22  ;;  %v919_v38 = vadd.f32 %v1592_v28, %v438_v23 }
 0x117   : > { %v1494_v32 = vpack.c.bf16 %v1093_v19, %v1093_v19  ;;  %v1094_v34 = vmax.f32 %v1062_v21, 0.0  ;;  %v1547_v39 = vadd.f32 %v1546_v29, %v1545_v24  ;;  %v1595_v40 = vadd.f32 %v1594_v30, %v1593_v26 }
 0x118   : > { %1238 = vst.msk [vmem:[%s1953_s20 + $0x8] sm:$0xf] %vm1235_vm1, %v1478_v31  ;;  %v1479_v41 = vpack.c.bf16 %v1078_v33, %v1078_v33 }
 0x119   : > { %1254 = vst.msk [vmem:[%s1953_s20 + $0x48] sm:$0xf] %vm1235_vm1, %v1494_v32  ;;  %v1495_v42 = vpack.c.bf16 %v1094_v34, %v1094_v34  ;;  %v969_v43 = vld [vmem:[#allocation2 + $0x20] sm:$0xff]  ;;  %v904_v47 = vadd.f32 %v1547_v39, %v423_v35  ;;  %v920_v48 = vadd.f32 %v1595_v40, %v439_v36  ;;  %v426_v35 = vld [vmem:[#allocation2 + $0x50] sm:$0xff] }
 0x11a   : > { %v985_v44 = vld [vmem:[#allocation2 + $0xa0] sm:$0xff]  ;;  %v1008_v45 = vmul.f32 %v1930_v15, %v969_v43  ;;  %936 = vst.msk [vmem:[#allocation2 + $0x30] sm:$0xff] %vm351_vm0, %v903_v37  ;;  %952 = vst.msk [vmem:[#allocation2 + $0xb0] sm:$0xff] %vm351_vm0, %v919_v38  ;;  %v1548_v51 = vpop.f32.mrb[16].mxu0  ;;  %v1596_v52 = vpop.f32.mrb[16].mxu1  ;;  %v442_v37 = vld [vmem:[#allocation2 + $0xd0] sm:$0xff] }
 0x11b   : > { %v1024_v46 = vmul.f32 %v1930_v15, %v985_v44  ;;  %1239 = vst.msk [vmem:[%s1953_s20 + $0xc] sm:$0xf] %vm1235_vm1, %v1479_v41  ;;  %1255 = vst.msk [vmem:[%s1953_s20 + $0x4c] sm:$0xf] %vm1235_vm1, %v1495_v42  ;;  %v970_v49 = vld [vmem:[#allocation2 + $0x28] sm:$0xff]  ;;  %v1549_v58 = vpop.f32.mrb[17].mxu0 }
 0x11c   : > { %v986_v50 = vld [vmem:[#allocation2 + $0xa8] sm:$0xff]  ;;  %v1047_v53 = vadd.f32 %v1935_v25, %v1008_v45  ;;  %v1009_v55 = vmul.f32 %v1930_v15, %v970_v49  ;;  %937 = vst.msk [vmem:[#allocation2 + $0x38] sm:$0xff] %vm351_vm0, %v904_v47  ;;  %953 = vst.msk [vmem:[#allocation2 + $0xb8] sm:$0xff] %vm351_vm0, %v920_v48  ;;  %v1597_v60 = vpop.f32.mrb[17].mxu1  ;;  %v1550_v61 = vadd.f32 %v1549_v58, %v1548_v51  ;;  %v1551_v63 = vpop.f32.mrb[18].mxu0  ;;  %v427_v47 = vld [vmem:[#allocation2 + $0x58] sm:$0xff] }
 0x11d   : > { %v1063_v54 = vadd.f32 %v1935_v25, %v1024_v46  ;;  %v1025_v56 = vmul.f32 %v1930_v15, %v986_v50  ;;  %v1598_v62 = vadd.f32 %v1597_v60, %v1596_v52  ;;  %v1599_v0 = vpop.f32.mrb[18].mxu1  ;;  %v1552_v6 = vpop.f32.mrb[19].mxu0  ;;  %v443_v49 = vld [vmem:[#allocation2 + $0xd8] sm:$0xff] }
 0x11e   : > { %v1079_v1 = vmax.f32 %v1047_v53, 0.0  ;;  %v1048_v3 = vadd.f32 %v1935_v25, %v1009_v55  ;;  %v1600_v8 = vpop.f32.mrb[19].mxu1  ;;  %v905_v9 = vadd.f32 %v1550_v61, %v424_v57  ;;  %v1553_v11 = vadd.f32 %v1552_v6, %v1551_v63 }
 0x11f   : > { %v1095_v2 = vmax.f32 %v1063_v54, 0.0  ;;  %v1064_v4 = vadd.f32 %v1935_v25, %v1025_v56  ;;  %v921_v10 = vadd.f32 %v1598_v62, %v440_v59  ;;  %v1601_v12 = vadd.f32 %v1600_v8, %v1599_v0 }
 0x120   : > { %v1480_v13 = vpack.c.bf16 %v1079_v1, %v1079_v1  ;;  %v1080_v16 = vmax.f32 %v1048_v3, 0.0  ;;  %938 = vst.msk [vmem:[#allocation2 + $0x40] sm:$0xff] %vm351_vm0, %v905_v9  ;;  %v906_v20 = vadd.f32 %v1553_v11, %v425_v5 }
 0x121   : > { %v1496_v14 = vpack.c.bf16 %v1095_v2, %v1095_v2  ;;  %v1096_v17 = vmax.f32 %v1064_v4, 0.0  ;;  %v971_v18 = vld [vmem:[#allocation2 + $0x30] sm:$0xff]  ;;  %954 = vst.msk [vmem:[#allocation2 + $0xc0] sm:$0xff] %vm351_vm0, %v921_v10  ;;  %v922_v21 = vadd.f32 %v1601_v12, %v441_v7 }
 0x122   : > { %v987_v19 = vld [vmem:[#allocation2 + $0xb0] sm:$0xff]  ;;  %1240 = vst.msk [vmem:[%s1953_s20 + $0x10] sm:$0xf] %vm1235_vm1, %v1480_v13  ;;  %v1481_v22 = vpack.c.bf16 %v1080_v16, %v1080_v16  ;;  %v1010_v24 = vmul.f32 %v1930_v15, %v971_v18  ;;  %v1554_v29 = vpop.f32.mrb[20].mxu0  ;;  %v1602_v30 = vpop.f32.mrb[20].mxu1  ;;  %v428_v18 = vld [vmem:[#allocation2 + $0x60] sm:$0xff] }
 0x123   : > { %1256 = vst.msk [vmem:[%s1953_s20 + $0x50] sm:$0xf] %vm1235_vm1, %v1496_v14  ;;  %v1497_v23 = vpack.c.bf16 %v1096_v17, %v1096_v17  ;;  %v1026_v26 = vmul.f32 %v1930_v15, %v987_v19  ;;  %v972_v27 = vld [vmem:[#allocation2 + $0x38] sm:$0xff]  ;;  %v1555_v36 = vpop.f32.mrb[21].mxu0  ;;  %v1603_v38 = vpop.f32.mrb[21].mxu1  ;;  %v444_v19 = vld [vmem:[#allocation2 + $0xe0] sm:$0xff] }
 0x124   : > { %v988_v28 = vld [vmem:[#allocation2 + $0xb8] sm:$0xff]  ;;  %939 = vst.msk [vmem:[#allocation2 + $0x48] sm:$0xff] %vm351_vm0, %v906_v20  ;;  %955 = vst.msk [vmem:[#allocation2 + $0xc8] sm:$0xff] %vm351_vm0, %v922_v21  ;;  %v1049_v31 = vadd.f32 %v1935_v25, %v1010_v24  ;;  %v1011_v33 = vmul.f32 %v1930_v15, %v972_v27  ;;  %v1556_v39 = vadd.f32 %v1555_v36, %v1554_v29  ;;  %v1557_v41 = vpop.f32.mrb[22].mxu0  ;;  %v1605_v42 = vpop.f32.mrb[22].mxu1 }
 0x125   : > { %1241 = vst.msk [vmem:[%s1953_s20 + $0x14] sm:$0xf] %vm1235_vm1, %v1481_v22  ;;  %1257 = vst.msk [vmem:[%s1953_s20 + $0x54] sm:$0xf] %vm1235_vm1, %v1497_v23  ;;  %v1065_v32 = vadd.f32 %v1935_v25, %v1026_v26  ;;  %v1027_v34 = vmul.f32 %v1930_v15, %v988_v28  ;;  %v1604_v40 = vadd.f32 %v1603_v38, %v1602_v30  ;;  %v1558_v48 = vpop.f32.mrb[23].mxu0  ;;  %v1606_v50 = vpop.f32.mrb[23].mxu1 }
 0x126   : > { %v1081_v43 = vmax.f32 %v1049_v31, 0.0  ;;  %v1050_v45 = vadd.f32 %v1935_v25, %v1011_v33  ;;  %v907_v51 = vadd.f32 %v1556_v39, %v426_v35  ;;  %v1559_v53 = vadd.f32 %v1558_v48, %v1557_v41  ;;  %v429_v31 = vld [vmem:[#allocation2 + $0x68] sm:$0xff] }
 0x127   : > { %v1097_v44 = vmax.f32 %v1065_v32, 0.0  ;;  %v1066_v46 = vadd.f32 %v1935_v25, %v1027_v34  ;;  %v923_v52 = vadd.f32 %v1604_v40, %v442_v37  ;;  %v1607_v54 = vadd.f32 %v1606_v50, %v1605_v42  ;;  %v973_v59 = vld [vmem:[#allocation2 + $0x40] sm:$0xff]  ;;  %v445_v32 = vld [vmem:[#allocation2 + $0xe8] sm:$0xff] }
 0x128   : > { %v1482_v55 = vpack.c.bf16 %v1081_v43, %v1081_v43  ;;  %v1082_v57 = vmax.f32 %v1050_v45, 0.0  ;;  %v989_v60 = vld [vmem:[#allocation2 + $0xc0] sm:$0xff]  ;;  %v1012_v61 = vmul.f32 %v1930_v15, %v973_v59  ;;  %940 = vst.msk [vmem:[#allocation2 + $0x50] sm:$0xff] %vm351_vm0, %v907_v51  ;;  %v908_v63 = vadd.f32 %v1559_v53, %v427_v47  ;;  %v430_v59 = vld [vmem:[#allocation2 + $0x70] sm:$0xff] }
 0x129   : > { %v1498_v56 = vpack.c.bf16 %v1097_v44, %v1097_v44  ;;  %v1098_v58 = vmax.f32 %v1066_v46, 0.0  ;;  %v1028_v62 = vmul.f32 %v1930_v15, %v989_v60  ;;  %956 = vst.msk [vmem:[#allocation2 + $0xd0] sm:$0xff] %vm351_vm0, %v923_v52  ;;  %v924_v0 = vadd.f32 %v1607_v54, %v443_v49  ;;  %v446_v60 = vld [vmem:[#allocation2 + $0xf0] sm:$0xff] }
 0x12a   : > { %1242 = vst.msk [vmem:[%s1953_s20 + $0x18] sm:$0xf] %vm1235_vm1, %v1482_v55  ;;  %v1483_v1 = vpack.c.bf16 %v1082_v57, %v1082_v57  ;;  %v1051_v5 = vadd.f32 %v1935_v25, %v1012_v61  ;;  %v1560_v9 = vpop.f32.mrb[24].mxu0  ;;  %v1608_v10 = vpop.f32.mrb[24].mxu1 }
 0x12b   : > { %1258 = vst.msk [vmem:[%s1953_s20 + $0x58] sm:$0xf] %vm1235_vm1, %v1498_v56  ;;  %v1499_v2 = vpack.c.bf16 %v1098_v58, %v1098_v58  ;;  %v974_v3 = vld [vmem:[#allocation2 + $0x48] sm:$0xff]  ;;  %v1067_v6 = vadd.f32 %v1935_v25, %v1028_v62  ;;  %v1561_v11 = vpop.f32.mrb[25].mxu0  ;;  %v1609_v12 = vpop.f32.mrb[25].mxu1 }
 0x12c   : > { %v990_v4 = vld [vmem:[#allocation2 + $0xc8] sm:$0xff]  ;;  %v1013_v7 = vmul.f32 %v1930_v15, %v974_v3  ;;  %941 = vst.msk [vmem:[#allocation2 + $0x58] sm:$0xff] %vm351_vm0, %v908_v63  ;;  %957 = vst.msk [vmem:[#allocation2 + $0xd8] sm:$0xff] %vm351_vm0, %v924_v0  ;;  %v1083_v13 = vmax.f32 %v1051_v5, 0.0  ;;  %v1563_v20 = vpop.f32.mrb[26].mxu0  ;;  %v1611_v21 = vpop.f32.mrb[26].mxu1  ;;  %v1562_v22 = vadd.f32 %v1561_v11, %v1560_v9  ;;  %v1610_v23 = vadd.f32 %v1609_v12, %v1608_v10 }
 0x12d   : > { %v1029_v8 = vmul.f32 %v1930_v15, %v990_v4  ;;  %1243 = vst.msk [vmem:[%s1953_s20 + $0x1c] sm:$0xf] %vm1235_vm1, %v1483_v1  ;;  %1259 = vst.msk [vmem:[%s1953_s20 + $0x5c] sm:$0xf] %vm1235_vm1, %v1499_v2  ;;  %v1099_v14 = vmax.f32 %v1067_v6, 0.0  ;;  %v1564_v24 = vpop.f32.mrb[27].mxu0 }
 0x12e   : > { %v1052_v16 = vadd.f32 %v1935_v25, %v1013_v7  ;;  %v1612_v26 = vpop.f32.mrb[27].mxu1  ;;  %v1484_v27 = vpack.c.bf16 %v1083_v13, %v1083_v13  ;;  %v909_v35 = vadd.f32 %v1562_v22, %v428_v18  ;;  %v925_v36 = vadd.f32 %v1610_v23, %v444_v19  ;;  %v431_v7 = vld [vmem:[#allocation2 + $0x78] sm:$0xff] }
 0x12f   : > { %v1068_v17 = vadd.f32 %v1935_v25, %v1029_v8  ;;  %v1500_v28 = vpack.c.bf16 %v1099_v14, %v1099_v14  ;;  %v975_v33 = vld [vmem:[#allocation2 + $0x50] sm:$0xff]  ;;  %v1565_v37 = vadd.f32 %v1564_v24, %v1563_v20  ;;  %v1613_v38 = vadd.f32 %v1612_v26, %v1611_v21  ;;  %v447_v8 = vld [vmem:[#allocation2 + $0xf8] sm:$0xff] }
 0x130   : > { %v1084_v29 = vmax.f32 %v1052_v16, 0.0  ;;  %v991_v34 = vld [vmem:[#allocation2 + $0xd0] sm:$0xff]  ;;  %1244 = vst.msk [vmem:[%s1953_s20 + $0x20] sm:$0xf] %vm1235_vm1, %v1484_v27  ;;  %v1014_v41 = vmul.f32 %v1930_v15, %v975_v33 }
 0x131   : > { %v1100_v30 = vmax.f32 %v1068_v17, 0.0  ;;  %1260 = vst.msk [vmem:[%s1953_s20 + $0x60] sm:$0xf] %vm1235_vm1, %v1500_v28  ;;  %v1030_v42 = vmul.f32 %v1930_v15, %v991_v34  ;;  %v910_v45 = vadd.f32 %v1565_v37, %v429_v31  ;;  %v926_v46 = vadd.f32 %v1613_v38, %v445_v32 }
 0x132   : > { %v1485_v39 = vpack.c.bf16 %v1084_v29, %v1084_v29  ;;  %942 = vst.msk [vmem:[#allocation2 + $0x60] sm:$0xff] %vm351_vm0, %v909_v35  ;;  %958 = vst.msk [vmem:[#allocation2 + $0xe0] sm:$0xff] %vm351_vm0, %v925_v36  ;;  %v1053_v47 = vadd.f32 %v1935_v25, %v1014_v41  ;;  %v1566_v51 = vpop.f32.mrb[28].mxu0  ;;  %v1614_v52 = vpop.f32.mrb[28].mxu1 }
 0x133   : > { %v1501_v40 = vpack.c.bf16 %v1100_v30, %v1100_v30  ;;  %v976_v43 = vld [vmem:[#allocation2 + $0x58] sm:$0xff]  ;;  %v1069_v48 = vadd.f32 %v1935_v25, %v1030_v42  ;;  %943 = vst.msk [vmem:[#allocation2 + $0x68] sm:$0xff] %vm351_vm0, %v910_v45  ;;  %959 = vst.msk [vmem:[#allocation2 + $0xe8] sm:$0xff] %vm351_vm0, %v926_v46  ;;  %v1567_v53 = vpop.f32.mrb[29].mxu0  ;;  %v1615_v54 = vpop.f32.mrb[29].mxu1 }
 0x134   : > { %v992_v44 = vld [vmem:[#allocation2 + $0xd8] sm:$0xff]  ;;  %1245 = vst.msk [vmem:[%s1953_s20 + $0x24] sm:$0xf] %vm1235_vm1, %v1485_v39  ;;  %v1015_v49 = vmul.f32 %v1930_v15, %v976_v43  ;;  %v1085_v55 = vmax.f32 %v1053_v47, 0.0  ;;  %v1569_v61 = vpop.f32.mrb[30].mxu0  ;;  %v1617_v62 = vpop.f32.mrb[30].mxu1  ;;  %v1568_v63 = vadd.f32 %v1567_v53, %v1566_v51  ;;  %v1616_v0 = vadd.f32 %v1615_v54, %v1614_v52 }
 0x135   : > { %1261 = vst.msk [vmem:[%s1953_s20 + $0x64] sm:$0xf] %vm1235_vm1, %v1501_v40  ;;  %v1031_v50 = vmul.f32 %v1930_v15, %v992_v44  ;;  %v1101_v56 = vmax.f32 %v1069_v48, 0.0  ;;  %v1570_v1 = vpop.f32.mrb[31].mxu0  ;;  %v1618_v2 = vpop.f32.mrb[31].mxu1 }
 0x136   : > { %v1054_v57 = vadd.f32 %v1935_v25, %v1015_v49  ;;  %v1486_v3 = vpack.c.bf16 %v1085_v55, %v1085_v55  ;;  %v911_v9 = vadd.f32 %v1568_v63, %v430_v59  ;;  %v927_v10 = vadd.f32 %v1616_v0, %v446_v60 }
 0x137   : > { %v1070_v58 = vadd.f32 %v1935_v25, %v1031_v50  ;;  %v1502_v4 = vpack.c.bf16 %v1101_v56, %v1101_v56  ;;  %v1571_v11 = vadd.f32 %v1570_v1, %v1569_v61  ;;  %v1619_v12 = vadd.f32 %v1618_v2, %v1617_v62 }
 0x138   : > { %v1086_v5 = vmax.f32 %v1054_v57, 0.0  ;;  %1246 = vst.msk [vmem:[%s1953_s20 + $0x28] sm:$0xf] %vm1235_vm1, %v1486_v3 }
 0x139   : > { %v1102_v6 = vmax.f32 %v1070_v58, 0.0  ;;  %1262 = vst.msk [vmem:[%s1953_s20 + $0x68] sm:$0xf] %vm1235_vm1, %v1502_v4  ;;  %v977_v16 = vld [vmem:[#allocation2 + $0x60] sm:$0xff]  ;;  %v912_v20 = vadd.f32 %v1571_v11, %v431_v7  ;;  %v928_v21 = vadd.f32 %v1619_v12, %v447_v8 }
 0x13a   : > { %v1487_v13 = vpack.c.bf16 %v1086_v5, %v1086_v5  ;;  %v993_v17 = vld [vmem:[#allocation2 + $0xe0] sm:$0xff]  ;;  %v1016_v18 = vmul.f32 %v1930_v15, %v977_v16  ;;  %944 = vst.msk [vmem:[#allocation2 + $0x70] sm:$0xff] %vm351_vm0, %v911_v9  ;;  %960 = vst.msk [vmem:[#allocation2 + $0xf0] sm:$0xff] %vm351_vm0, %v927_v10  ;;  %v978_v22 = vld [vmem:[#allocation2 + $0x68] sm:$0xff] }
 0x13b   : > { %v1503_v14 = vpack.c.bf16 %v1102_v6, %v1102_v6  ;;  %v1032_v19 = vmul.f32 %v1930_v15, %v993_v17  ;;  %v994_v23 = vld [vmem:[#allocation2 + $0xe8] sm:$0xff]  ;;  %v1017_v27 = vmul.f32 %v1930_v15, %v978_v22  ;;  %945 = vst.msk [vmem:[#allocation2 + $0x78] sm:$0xff] %vm351_vm0, %v912_v20  ;;  %961 = vst.msk [vmem:[#allocation2 + $0xf8] sm:$0xff] %vm351_vm0, %v928_v21 }
 0x13c   : > { %1247 = vst.msk [vmem:[%s1953_s20 + $0x2c] sm:$0xf] %vm1235_vm1, %v1487_v13  ;;  %v1055_v24 = vadd.f32 %v1935_v25, %v1016_v18  ;;  %v1033_v28 = vmul.f32 %v1930_v15, %v994_v23 }
 0x13d   : > { %1263 = vst.msk [vmem:[%s1953_s20 + $0x6c] sm:$0xf] %vm1235_vm1, %v1503_v14  ;;  %v1071_v26 = vadd.f32 %v1935_v25, %v1032_v19  ;;  %v1056_v31 = vadd.f32 %v1935_v25, %v1017_v27 }
 0x13e   : > { %v1087_v29 = vmax.f32 %v1055_v24, 0.0  ;;  %v1072_v32 = vadd.f32 %v1935_v25, %v1033_v28 }
 0x13f   : > { %v1103_v30 = vmax.f32 %v1071_v26, 0.0  ;;  %v1088_v35 = vmax.f32 %v1056_v31, 0.0 }
 0x140   : > { %v1488_v33 = vpack.c.bf16 %v1087_v29, %v1087_v29  ;;  %v1104_v36 = vmax.f32 %v1072_v32, 0.0 }
 0x141   : > { %v1504_v34 = vpack.c.bf16 %v1103_v30, %v1103_v30  ;;  %v979_v37 = vld [vmem:[#allocation2 + $0x70] sm:$0xff]  ;;  %v1489_v39 = vpack.c.bf16 %v1088_v35, %v1088_v35 }
 0x142   : > { %v995_v38 = vld [vmem:[#allocation2 + $0xf0] sm:$0xff]  ;;  %1248 = vst.msk [vmem:[%s1953_s20 + $0x30] sm:$0xf] %vm1235_vm1, %v1488_v33  ;;  %v1505_v40 = vpack.c.bf16 %v1104_v36, %v1104_v36  ;;  %v1018_v41 = vmul.f32 %v1930_v15, %v979_v37  ;;  %v980_v43 = vld [vmem:[#allocation2 + $0x78] sm:$0xff] }
 0x143   : > { %1264 = vst.msk [vmem:[%s1953_s20 + $0x70] sm:$0xf] %vm1235_vm1, %v1504_v34  ;;  %v1034_v42 = vmul.f32 %v1930_v15, %v995_v38  ;;  %v996_v44 = vld [vmem:[#allocation2 + $0xf8] sm:$0xff]  ;;  %1249 = vst.msk [vmem:[%s1953_s20 + $0x34] sm:$0xf] %vm1235_vm1, %v1489_v39  ;;  %v1019_v47 = vmul.f32 %v1930_v15, %v980_v43 }
 0x144   : > { %1265 = vst.msk [vmem:[%s1953_s20 + $0x74] sm:$0xf] %vm1235_vm1, %v1505_v40  ;;  %v1057_v45 = vadd.f32 %v1935_v25, %v1018_v41  ;;  %v1035_v48 = vmul.f32 %v1930_v15, %v996_v44 }
 0x145   : > { %v1073_v46 = vadd.f32 %v1935_v25, %v1034_v42  ;;  %v1058_v51 = vadd.f32 %v1935_v25, %v1019_v47 }
 0x146   : > { %v1089_v49 = vmax.f32 %v1057_v45, 0.0  ;;  %v1074_v52 = vadd.f32 %v1935_v25, %v1035_v48 }
 0x147   : > { %v1105_v50 = vmax.f32 %v1073_v46, 0.0  ;;  %v1090_v55 = vmax.f32 %v1058_v51, 0.0 }
 0x148   : > { %v1490_v53 = vpack.c.bf16 %v1089_v49, %v1089_v49  ;;  %v1106_v56 = vmax.f32 %v1074_v52, 0.0 }
 0x149   : > { %v1506_v54 = vpack.c.bf16 %v1105_v50, %v1105_v50  ;;  %v1491_v57 = vpack.c.bf16 %v1090_v55, %v1090_v55 }
 0x14a   : > { %1250 = vst.msk [vmem:[%s1953_s20 + $0x38] sm:$0xf] %vm1235_vm1, %v1490_v53  ;;  %v1507_v58 = vpack.c.bf16 %v1106_v56, %v1106_v56 }
 0x14b   : > { %1266 = vst.msk [vmem:[%s1953_s20 + $0x78] sm:$0xf] %vm1235_vm1, %v1506_v54  ;;  %1251 = vst.msk [vmem:[%s1953_s20 + $0x3c] sm:$0xf] %vm1235_vm1, %v1491_v57 }
 0x14c   : > { %1267 = vst.msk [vmem:[%s1953_s20 + $0x7c] sm:$0xf] %vm1235_vm1, %v1507_v58 }
 0x14d PF: > { %s16_s23 = sadd.s32 1, %s1747_s23   ;;  %s2115_s21 = smov %s1743_s22 }
 0x14e   : > { %p13_p5 = scmp.ge.s32.totalorder %s16_s23, 4   ;;  %s2116_s22 = smov %s2118_s2 }
 0x150   :  { %15 = sbr.rel (!%p13_p5) target bundleno = 2 (0x2), region = 91 }

// kernel: densenet121_features.127
= control target key start
LH: loop header
LB: loop body
LE: loop exit
PB: predicated region body
PF: predicated region fallthrough
CT: control target
= control target key end

     0   :  { %s895_s1 = inlined_call_operand.vmem [shape: bf16[128,128], index: 1, kind: input, shape index: {}]   ;;  %s896_s0 = inlined_call_operand.vmem [shape: bf16[128,128], index: 0, kind: input, shape index: {}]   ;;  %s897_s2 = inlined_call_operand.vmem [shape: f32[1,128], index: 2, kind: input, shape index: {}]   ;;  %s898_s3 = inlined_call_operand.vmem [shape: f32[1,128], index: 3, kind: input, shape index: {}]   ;;  %s899_s4 = inlined_call_operand.vmem [shape: f32[1,128], index: 4, kind: input, shape index: {}]   ;;  %s900_s5 = inlined_call_operand.vmem [shape: f32[1,128], index: 5, kind: input, shape index: {}]   ;;  %s901_s6 = inlined_call_operand.vmem [shape: bf16[128,128], index: 6, kind: output, shape index: {}]  }
   0x1   :  { %v714_v0 = vld [vmem:[%s895_s1] sm:$0xff]   ;;  %v715_v1 = vld [vmem:[%s895_s1 + $0x8] sm:$0xff]   ;;  %v716_v2 = vld [vmem:[%s895_s1 + $0x10] sm:$0xff]  }
   0x2   :  { %666 = vmatprep.subr.bf16.mxu0 %v714_v0  ;;  %698 = vmatprep.subr.bf16.mxu1 %v714_v0  ;;  %v717_v3 = vld [vmem:[%s895_s1 + $0x18] sm:$0xff]   ;;  %v565_v4 = vld [vmem:[%s896_s0] sm:$0xff]   ;;  %v636_v9 = vld [vmem:[%s896_s0 + $0x8] sm:$0xff]  }
   0x3   :  { %667 = vmatpush3.bf16.msra.mxu0 %v714_v0  ;;  %706 = vmatpush3.bf16.msra.mxu1 %v714_v0  ;;  %v775_v5 = vld [vmem:[%s897_s2] ss:$0 sm:$0xff]  ;;  %v566_v6 = vunpack.c.l.bf16 %v565_v4  ;;  %v567_v7 = vunpack.c.h.bf16 %v565_v4  ;;  %v640_v13 = vld [vmem:[%s896_s0 + $0x28] sm:$0xff]   ;;  %v637_v16 = vld [vmem:[%s896_s0 + $0x10] sm:$0xff]   ;;  %v570_v20 = vunpack.c.l.bf16 %v636_v9  ;;  %v571_v21 = vunpack.c.h.bf16 %v636_v9 }
   0x4   :  { %668 = vmatprep.subr.bf16.mxu0 %v715_v1  ;;  %699 = vmatprep.subr.bf16.mxu1 %v715_v1  ;;  %v639_v8 = vld [vmem:[%s896_s0 + $0x20] sm:$0xff]   ;;  %v586_v24 = vunpack.c.l.bf16 %v640_v13  ;;  %v587_v25 = vunpack.c.h.bf16 %v640_v13  ;;  %v574_v28 = vunpack.c.l.bf16 %v637_v16  ;;  %v641_v31 = vld [vmem:[%s896_s0 + $0x30] sm:$0xff]   ;;  %v719_v32 = vld [vmem:[%s895_s1 + $0x28] sm:$0xff]   ;;  %v575_v40 = vunpack.c.h.bf16 %v637_v16 }
   0x5   :  { %v786_v10 = vld [vmem:[%s898_s3] ss:$0 sm:$0xff]  ;;  %v582_v11 = vunpack.c.l.bf16 %v639_v8  ;;  %v583_v12 = vunpack.c.h.bf16 %v639_v8  ;;  %v83_v14 = vmul.f32 %v566_v6, %v775_v5  ;;  %v84_v15 = vmul.f32 %v567_v7, %v775_v5  ;;  %v638_v44 = vld [vmem:[%s896_s0 + $0x18] sm:$0xff]   ;;  %v720_v48 = vld [vmem:[%s895_s1 + $0x30] sm:$0xff]  }
   0x6   :  { %v718_v17 = vld [vmem:[%s895_s1 + $0x20] sm:$0xff]   ;;  %v85_v35 = vmul.f32 %v570_v20, %v775_v5  ;;  %v86_v36 = vmul.f32 %v571_v21, %v775_v5  ;;  %v93_v38 = vmul.f32 %v586_v24, %v775_v5  ;;  %v94_v39 = vmul.f32 %v587_v25, %v775_v5  ;;  %v642_v47 = vld [vmem:[%s896_s0 + $0x38] sm:$0xff]  }
   0x7   :  { %669 = vmatpush3.bf16.msra.mxu0 %v715_v1  ;;  %707 = vmatpush3.bf16.msra.mxu1 %v715_v1  ;;  %v91_v18 = vmul.f32 %v582_v11, %v775_v5  ;;  %v92_v19 = vmul.f32 %v583_v12, %v775_v5  ;;  %v106_v22 = vadd.f32 %v786_v10, %v83_v14  ;;  %v590_v43 = vunpack.c.l.bf16 %v641_v31  ;;  %v721_v63 = vld [vmem:[%s895_s1 + $0x38] sm:$0xff]  }
   0x8   :  { %670 = vmatprep.subr.bf16.mxu0 %v716_v2  ;;  %700 = vmatprep.subr.bf16.mxu1 %v716_v2  ;;  %v107_v23 = vadd.f32 %v786_v10, %v84_v15  ;;  %v87_v42 = vmul.f32 %v574_v28, %v775_v5  ;;  %v88_v45 = vmul.f32 %v575_v40, %v775_v5  ;;  %v591_v46 = vunpack.c.h.bf16 %v641_v31  ;;  %v853_v28 = vld [vmem:[%s900_s5] ss:$0 sm:$0xff] }
   0x9   :  { %v114_v26 = vadd.f32 %v786_v10, %v91_v18  ;;  %v115_v27 = vadd.f32 %v786_v10, %v92_v19  ;;  %v122_v29 = vmax.f32 %v106_v22, 0.0  ;;  %v108_v49 = vadd.f32 %v786_v10, %v85_v35 }
   0xa   :  { %v123_v30 = vmax.f32 %v107_v23, 0.0  ;;  %v109_v50 = vadd.f32 %v786_v10, %v86_v36  ;;  %v95_v51 = vmul.f32 %v590_v43, %v775_v5  ;;  %v116_v52 = vadd.f32 %v786_v10, %v93_v38 }
   0xb   :  { %671 = vmatpush3.bf16.msra.mxu0 %v716_v2  ;;  %708 = vmatpush3.bf16.msra.mxu1 %v716_v2  ;;  %v130_v33 = vmax.f32 %v114_v26, 0.0  ;;  %v131_v34 = vmax.f32 %v115_v27, 0.0  ;;  %v117_v53 = vadd.f32 %v786_v10, %v94_v39  ;;  %v96_v54 = vmul.f32 %v591_v46, %v775_v5 }
   0xc   :  { %672 = vmatprep.subr.bf16.mxu0 %v717_v3  ;;  %701 = vmatprep.subr.bf16.mxu1 %v717_v3  ;;  %v138_v37 = vpack.c.bf16 %v123_v30, %v122_v29  ;;  %v578_v55 = vunpack.c.l.bf16 %v638_v44  ;;  %v110_v56 = vadd.f32 %v786_v10, %v87_v42  ;;  %v579_v57 = vunpack.c.h.bf16 %v638_v44 }
   0xd   :  { %v142_v41 = vpack.c.bf16 %v131_v34, %v130_v33  ;;  %v594_v58 = vunpack.c.l.bf16 %v642_v47  ;;  %v595_v59 = vunpack.c.h.bf16 %v642_v47  ;;  %v111_v60 = vadd.f32 %v786_v10, %v88_v45 }
   0xe   :  { %682 = vmatprep.mubr.bf16.mxu0 %v138_v37  ;;  %v118_v61 = vadd.f32 %v786_v10, %v95_v51  ;;  %v119_v62 = vadd.f32 %v786_v10, %v96_v54  ;;  %v124_v0 = vmax.f32 %v108_v49, 0.0  ;;  %v125_v1 = vmax.f32 %v109_v50, 0.0 }
   0xf   :  { %673 = vmatpush3.bf16.msra.mxu0 %v717_v3  ;;  %709 = vmatpush3.bf16.msra.mxu1 %v717_v3  ;;  %v132_v2 = vmax.f32 %v116_v52, 0.0  ;;  %v133_v3 = vmax.f32 %v117_v53, 0.0  ;;  %v89_v4 = vmul.f32 %v578_v55, %v775_v5  ;;  %v90_v6 = vmul.f32 %v579_v57, %v775_v5 }
  0x10   :  { %674 = vmatprep.subr.bf16.mxu0 %v718_v17  ;;  %702 = vmatprep.subr.bf16.mxu1 %v718_v17  ;;  %v97_v7 = vmul.f32 %v594_v58, %v775_v5  ;;  %v98_v8 = vmul.f32 %v595_v59, %v775_v5  ;;  %v126_v9 = vmax.f32 %v110_v56, 0.0  ;;  %v127_v11 = vmax.f32 %v111_v60, 0.0 }
  0x11   :  { %690 = vmatprep.mubr.bf16.mxu1 %v142_v41  ;;  %v134_v12 = vmax.f32 %v118_v61, 0.0  ;;  %v135_v13 = vmax.f32 %v119_v62, 0.0  ;;  %v139_v14 = vpack.c.bf16 %v125_v1, %v124_v0  ;;  %v143_v15 = vpack.c.bf16 %v133_v3, %v132_v2 }
  0x12   :  { %v112_v16 = vadd.f32 %v786_v10, %v89_v4  ;;  %v120_v18 = vadd.f32 %v786_v10, %v97_v7  ;;  %v121_v19 = vadd.f32 %v786_v10, %v98_v8  ;;  %v140_v5 = vpack.c.bf16 %v127_v11, %v126_v9 }
  0x13   :  { %675 = vmatpush3.bf16.msra.mxu0 %v718_v17  ;;  %710 = vmatpush3.bf16.msra.mxu1 %v718_v17  ;;  %v113_v17 = vadd.f32 %v786_v10, %v90_v6  ;;  %v144_v20 = vpack.c.bf16 %v135_v13, %v134_v12  ;;  %v530_v10 = vld [vmem:[%s899_s4] ss:$0 sm:$0xff] }
  0x14   :  { %676 = vmatprep.subr.bf16.mxu0 %v719_v32  ;;  %703 = vmatprep.subr.bf16.mxu1 %v719_v32  ;;  %v128_v21 = vmax.f32 %v112_v16, 0.0  ;;  %v136_v23 = vmax.f32 %v120_v18, 0.0  ;;  %v137_v24 = vmax.f32 %v121_v19, 0.0 }
  0x15   :  { %v129_v22 = vmax.f32 %v113_v17, 0.0 }
  0x16   :  { %v145_v26 = vpack.c.bf16 %v137_v24, %v136_v23 }
  0x17   :  { %677 = vmatpush3.bf16.msra.mxu0 %v719_v32  ;;  %711 = vmatpush3.bf16.msra.mxu1 %v719_v32  ;;  %v141_v25 = vpack.c.bf16 %v129_v22, %v128_v21 }
  0x18   :  { %678 = vmatprep.subr.bf16.mxu0 %v720_v48  ;;  %704 = vmatprep.subr.bf16.mxu1 %v720_v48 }
  0x1b   :  { %679 = vmatpush3.bf16.msra.mxu0 %v720_v48  ;;  %712 = vmatpush3.bf16.msra.mxu1 %v720_v48 }
  0x1c   :  { %680 = vmatprep.subr.bf16.mxu0 %v721_v63  ;;  %705 = vmatprep.subr.bf16.mxu1 %v721_v63 }
  0x1f   :  { %681 = vmatpush3.bf16.msra.mxu0 %v721_v63  ;;  %713 = vmatpush3.bf16.msra.mxu1 %v721_v63 }
  0x22   :  { %683 = vmatmul.mubr.bf16.vlgmr.msra.gmra.mrb[0].mxu0 %v139_v14  ;;  %691 = vmatmul.mubr.bf16.vlgmr.msra.gmra.mrb[0].mxu1 %v143_v15 }
  0x23   :  { %686 = vmatprep.mubr.bf16.mxu0 %v140_v5  ;;  %694 = vmatprep.mubr.bf16.mxu1 %v144_v20 }
  0x2a   :  { %687 = vmatmul.mubr.bf16.gmra.mrb[4].mxu0 %v141_v25  ;;  %695 = vmatmul.mubr.bf16.gmra.mrb[4].mxu1 %v145_v26 }
  0xf5   :  { %v684_v27 = vpop.f32.mrb[0].mxu0  ;;  %v692_v29 = vpop.f32.mrb[0].mxu1 }
  0xf6   :  { %v383_v30 = vmul.f32 %v684_v27, %v530_v10  ;;  %v391_v31 = vmul.f32 %v692_v29, %v530_v10  ;;  %v260_v32 = vpop.f32.mrb[1].mxu0  ;;  %v292_v33 = vpop.f32.mrb[1].mxu1 }
  0xf7   :  { %v381_v34 = vmul.f32 %v530_v10, %v260_v32  ;;  %v389_v35 = vmul.f32 %v530_v10, %v292_v33  ;;  %v685_v36 = vpop.f32.mrb[2].mxu0  ;;  %v693_v37 = vpop.f32.mrb[2].mxu1 }
  0xf8   :  { %v406_v38 = vadd.f32 %v853_v28, %v383_v30  ;;  %v414_v39 = vadd.f32 %v853_v28, %v391_v31  ;;  %v384_v40 = vmul.f32 %v685_v36, %v530_v10  ;;  %v392_v41 = vmul.f32 %v693_v37, %v530_v10  ;;  %v263_v42 = vpop.f32.mrb[3].mxu0  ;;  %v295_v43 = vpop.f32.mrb[3].mxu1 }
  0xf9   :  { %v404_v44 = vadd.f32 %v853_v28, %v381_v34  ;;  %v412_v45 = vadd.f32 %v853_v28, %v389_v35  ;;  %v382_v46 = vmul.f32 %v530_v10, %v263_v42  ;;  %v390_v47 = vmul.f32 %v530_v10, %v295_v43 }
  0xfa   :  { %v407_v48 = vadd.f32 %v853_v28, %v384_v40  ;;  %v415_v49 = vadd.f32 %v853_v28, %v392_v41  ;;  %v422_v52 = vmax.f32 %v406_v38, 0.0  ;;  %v430_v53 = vmax.f32 %v414_v39, 0.0 }
  0xfb   :  { %v405_v50 = vadd.f32 %v853_v28, %v382_v46  ;;  %v413_v51 = vadd.f32 %v853_v28, %v390_v47  ;;  %v420_v56 = vmax.f32 %v404_v44, 0.0  ;;  %v428_v57 = vmax.f32 %v412_v45, 0.0 }
  0xfc   :  { %v423_v54 = vmax.f32 %v407_v48, 0.0  ;;  %v431_v55 = vmax.f32 %v415_v49, 0.0 }
  0xfd   :  { %v421_v58 = vmax.f32 %v405_v50, 0.0  ;;  %v429_v59 = vmax.f32 %v413_v51, 0.0  ;;  %v688_v60 = vpop.f32.mrb[4].mxu0  ;;  %v696_v61 = vpop.f32.mrb[4].mxu1 }
  0xfe   :  { %v604_v62 = vpack.c.bf16 %v423_v54, %v422_v52  ;;  %v624_v63 = vpack.c.bf16 %v431_v55, %v430_v53  ;;  %v387_v0 = vmul.f32 %v688_v60, %v530_v10  ;;  %v395_v1 = vmul.f32 %v696_v61, %v530_v10  ;;  %v276_v2 = vpop.f32.mrb[5].mxu0  ;;  %v308_v3 = vpop.f32.mrb[5].mxu1 }
  0xff   :  { %v599_v4 = vpack.c.bf16 %v421_v58, %v420_v56  ;;  %v619_v6 = vpack.c.bf16 %v429_v59, %v428_v57  ;;  %v385_v7 = vmul.f32 %v530_v10, %v276_v2  ;;  %v393_v8 = vmul.f32 %v530_v10, %v308_v3  ;;  %v689_v9 = vpop.f32.mrb[6].mxu0  ;;  %v697_v11 = vpop.f32.mrb[6].mxu1 }
 0x100   :  { %643 = vst [vmem:[%s901_s6 + $0x8] sm:$0xff] %v604_v62   ;;  %647 = vst [vmem:[%s901_s6 + $0x28] sm:$0xff] %v624_v63   ;;  %v410_v12 = vadd.f32 %v853_v28, %v387_v0  ;;  %v418_v13 = vadd.f32 %v853_v28, %v395_v1  ;;  %v388_v14 = vmul.f32 %v689_v9, %v530_v10  ;;  %v279_v16 = vpop.f32.mrb[7].mxu0  ;;  %v311_v17 = vpop.f32.mrb[7].mxu1 }
 0x101   :  { %v396_v15 = vmul.f32 %v697_v11, %v530_v10  ;;  %600 = vst [vmem:[%s901_s6] sm:$0xff] %v599_v4   ;;  %646 = vst [vmem:[%s901_s6 + $0x20] sm:$0xff] %v619_v6   ;;  %v408_v18 = vadd.f32 %v853_v28, %v385_v7  ;;  %v416_v19 = vadd.f32 %v853_v28, %v393_v8 }
 0x102   :  { %v386_v5 = vmul.f32 %v530_v10, %v279_v16  ;;  %v394_v20 = vmul.f32 %v530_v10, %v311_v17  ;;  %v411_v21 = vadd.f32 %v853_v28, %v388_v14  ;;  %v426_v25 = vmax.f32 %v410_v12, 0.0 }
 0x103   :  { %v419_v22 = vadd.f32 %v853_v28, %v396_v15  ;;  %v434_v26 = vmax.f32 %v418_v13, 0.0  ;;  %v424_v30 = vmax.f32 %v408_v18, 0.0  ;;  %v432_v31 = vmax.f32 %v416_v19, 0.0 }
 0x104   :  { %v409_v23 = vadd.f32 %v853_v28, %v386_v5  ;;  %v417_v24 = vadd.f32 %v853_v28, %v394_v20  ;;  %v427_v27 = vmax.f32 %v411_v21, 0.0 }
 0x105   :  { %v435_v29 = vmax.f32 %v419_v22, 0.0 }
 0x106   :  { %v425_v32 = vmax.f32 %v409_v23, 0.0  ;;  %v433_v33 = vmax.f32 %v417_v24, 0.0  ;;  %v614_v34 = vpack.c.bf16 %v427_v27, %v426_v25 }
 0x107   :  { %v634_v35 = vpack.c.bf16 %v435_v29, %v434_v26 }
 0x108   :  { %v609_v36 = vpack.c.bf16 %v425_v32, %v424_v30  ;;  %v629_v10 = vpack.c.bf16 %v433_v33, %v432_v31  ;;  %645 = vst [vmem:[%s901_s6 + $0x18] sm:$0xff] %v614_v34  }
 0x109   :  { %649 = vst [vmem:[%s901_s6 + $0x38] sm:$0xff] %v634_v35  }
 0x10a   :  { %644 = vst [vmem:[%s901_s6 + $0x10] sm:$0xff] %v609_v36   ;;  %648 = vst [vmem:[%s901_s6 + $0x30] sm:$0xff] %v629_v10  }

// kernel: densenet121_features.133
= control target key start
LH: loop header
LB: loop body
LE: loop exit
PB: predicated region body
PF: predicated region fallthrough
CT: control target
= control target key end

     0   :  { %v94_v5 = vlaneseq  ;;  %s1138_s1 = inlined_call_operand.vmem [shape: bf16[256,128], index: 1, kind: input, shape index: {}]   ;;  %s1139_s0 = inlined_call_operand.vmem [shape: bf16[128,256], index: 0, kind: input, shape index: {}]   ;;  %s1140_s2 = inlined_call_operand.vmem [shape: f32[1,256], index: 2, kind: input, shape index: {}]   ;;  %s1141_s3 = inlined_call_operand.vmem [shape: f32[1,256], index: 3, kind: input, shape index: {}]   ;;  %s1142_s4 = inlined_call_operand.vmem [shape: f32[1,128], index: 4, kind: input, shape index: {}]   ;;  %s1143_s5 = inlined_call_operand.vmem [shape: f32[1,128], index: 5, kind: input, shape index: {}]   ;;  %s1144_s6 = inlined_call_operand.vmem [shape: bf16[128,128], index: 6, kind: output, shape index: {}]  }
   0x1   :  { %v843_v0 = vld [vmem:[%s1138_s1 + $0x40] sm:$0xff]   ;;  %v845_v2 = vld [vmem:[%s1138_s1 + $0x48] sm:$0xff]   ;;  %v847_v4 = vld [vmem:[%s1138_s1 + $0x50] sm:$0xff]  }
   0x2   :  { %v844_v1 = vld [vmem:[%s1138_s1] sm:$0xff]   ;;  %763 = vmatprep.subr.bf16.mxu0 %v843_v0  ;;  %827 = vmatprep.subr.bf16.mxu1 %v843_v0  ;;  %v846_v3 = vld [vmem:[%s1138_s1 + $0x8] sm:$0xff]   ;;  %v848_v6 = vld [vmem:[%s1138_s1 + $0x10] sm:$0xff]   ;;  %v95_v8 = vshrl.u32 %v94_v5, 7 }
   0x3   :  { %764 = vmatpush3.bf16.msra.mxu0 %v844_v1  ;;  %835 = vmatpush3.bf16.msra.mxu1 %v844_v1  ;;  %v849_v7 = vld [vmem:[%s1138_s1 + $0x58] sm:$0xff]   ;;  %v851_v10 = vld [vmem:[%s1138_s1 + $0x60] sm:$0xff]   ;;  %v853_v14 = vld [vmem:[%s1138_s1 + $0x68] sm:$0xff]  }
   0x4   :  { %765 = vmatprep.subr.bf16.mxu0 %v845_v2  ;;  %828 = vmatprep.subr.bf16.mxu1 %v845_v2  ;;  %v850_v9 = vld [vmem:[%s1138_s1 + $0x18] sm:$0xff]   ;;  %v96_v11 = vsub.s32 0, %v95_v8  ;;  %v852_v12 = vld [vmem:[%s1138_s1 + $0x20] sm:$0xff]   ;;  %v100_v13 = vsub.s32 1, %v95_v8  ;;  %v45_v16 = vld [vmem:[%s1139_s0 + $0x8] sm:$0xff] }
   0x5   :  { %v44_v15 = vld [vmem:[%s1139_s0] sm:$0xff]  ;;  %v62_v20 = vunpack.c.l.bf16 %v45_v16  ;;  %v63_v21 = vunpack.c.h.bf16 %v45_v16  ;;  %v53_v24 = vld [vmem:[%s1139_s0 + $0x48] sm:$0xff]  ;;  %v956_v29 = vld [vmem:[%s1139_s0 + $0x10] sm:$0xff] }
   0x6   :  { %v92_v17 = vld [vmem:[%s1140_s2] sm:$0x3]  ;;  %v60_v18 = vunpack.c.l.bf16 %v44_v15  ;;  %v61_v19 = vunpack.c.h.bf16 %v44_v15  ;;  %v854_v30 = vld [vmem:[%s1138_s1 + $0x28] sm:$0xff]   ;;  %v78_v33 = vunpack.c.l.bf16 %v53_v24  ;;  %v79_v34 = vunpack.c.h.bf16 %v53_v24  ;;  %v855_v35 = vld [vmem:[%s1138_s1 + $0x70] sm:$0xff]  }
   0x7   :  { %766 = vmatpush3.bf16.msra.mxu0 %v846_v3  ;;  %836 = vmatpush3.bf16.msra.mxu1 %v846_v3  ;;  %v136_v22 = vld [vmem:[%s1141_s3] sm:$0x3]  ;;  %v945_v25 = vrot.slane %v92_v17, %v96_v11  ;;  %v947_v26 = vrot.slane %v92_v17, %v100_v13  ;;  %v47_v39 = vld [vmem:[%s1139_s0 + $0x18] sm:$0xff]  ;;  %v65_v40 = vunpack.c.h.bf16 %v956_v29  ;;  %v856_v49 = vld [vmem:[%s1138_s1 + $0x30] sm:$0xff]  }
   0x8   :  { %767 = vmatprep.subr.bf16.mxu0 %v847_v4  ;;  %829 = vmatprep.subr.bf16.mxu1 %v847_v4  ;;  %v52_v23 = vld [vmem:[%s1139_s0 + $0x40] sm:$0xff]  ;;  %v949_v27 = vrot.slane %v136_v22, %v96_v11  ;;  %v951_v28 = vrot.slane %v136_v22, %v100_v13  ;;  %v67_v53 = vunpack.c.h.bf16 %v47_v39  ;;  %v857_v54 = vld [vmem:[%s1138_s1 + $0x78] sm:$0xff]   ;;  %v54_v59 = vld [vmem:[%s1139_s0 + $0x50] sm:$0xff]  ;;  %v64_v13 = vunpack.c.l.bf16 %v956_v29 }
   0x9   :  { %v76_v31 = vunpack.c.l.bf16 %v52_v23  ;;  %v77_v32 = vunpack.c.h.bf16 %v52_v23  ;;  %v105_v36 = vmul.f32 %v947_v26, %v61_v19  ;;  %v107_v37 = vmul.f32 %v947_v26, %v63_v21  ;;  %v55_v0 = vld [vmem:[%s1139_s0 + $0x58] sm:$0xff] }
   0xa   :  { %v104_v38 = vmul.f32 %v945_v25, %v60_v18  ;;  %v123_v42 = vmul.f32 %v947_v26, %v79_v34  ;;  %v106_v43 = vmul.f32 %v945_v25, %v62_v20  ;;  %v122_v48 = vmul.f32 %v945_v25, %v78_v33  ;;  %v858_v5 = vld [vmem:[%s1138_s1 + $0x38] sm:$0xff]   ;;  %v48_v18 = vld [vmem:[%s1139_s0 + $0x20] sm:$0xff] }
   0xb   :  { %768 = vmatpush3.bf16.msra.mxu0 %v848_v6  ;;  %837 = vmatpush3.bf16.msra.mxu1 %v848_v6  ;;  %v121_v41 = vmul.f32 %v947_v26, %v77_v32  ;;  %v120_v44 = vmul.f32 %v945_v25, %v76_v31  ;;  %v149_v45 = vadd.f32 %v951_v28, %v105_v36  ;;  %v66_v16 = vunpack.c.l.bf16 %v47_v39  ;;  %v49_v31 = vld [vmem:[%s1139_s0 + $0x28] sm:$0xff]  ;;  %v56_v36 = vld [vmem:[%s1139_s0 + $0x60] sm:$0xff] }
   0xc   :  { %769 = vmatprep.subr.bf16.mxu0 %v849_v7  ;;  %830 = vmatprep.subr.bf16.mxu1 %v849_v7  ;;  %v151_v46 = vadd.f32 %v951_v28, %v107_v37  ;;  %v148_v47 = vadd.f32 %v949_v27, %v104_v38  ;;  %v167_v51 = vadd.f32 %v951_v28, %v123_v42  ;;  %v80_v17 = vunpack.c.l.bf16 %v54_v59 }
   0xd   :  { %v165_v50 = vadd.f32 %v951_v28, %v121_v41  ;;  %v150_v52 = vadd.f32 %v949_v27, %v106_v43  ;;  %v181_v55 = vmax.f32 %v149_v45, 0.0  ;;  %v164_v58 = vadd.f32 %v949_v27, %v120_v44  ;;  %v57_v41 = vld [vmem:[%s1139_s0 + $0x68] sm:$0xff] }
   0xe   :  { %v183_v56 = vmax.f32 %v151_v46, 0.0  ;;  %v180_v57 = vmax.f32 %v148_v47, 0.0  ;;  %v199_v61 = vmax.f32 %v167_v51, 0.0  ;;  %v166_v63 = vadd.f32 %v949_v27, %v122_v48 }
   0xf   :  { %770 = vmatpush3.bf16.msra.mxu0 %v850_v9  ;;  %838 = vmatpush3.bf16.msra.mxu1 %v850_v9  ;;  %v197_v60 = vmax.f32 %v165_v50, 0.0  ;;  %v182_v62 = vmax.f32 %v150_v52, 0.0  ;;  %v196_v2 = vmax.f32 %v164_v58, 0.0  ;;  %v109_v3 = vmul.f32 %v947_v26, %v65_v40 }
  0x10   :  { %771 = vmatprep.subr.bf16.mxu0 %v851_v10  ;;  %831 = vmatprep.subr.bf16.mxu1 %v851_v10  ;;  %v213_v1 = vpack.c.bf16 %v183_v56, %v181_v55  ;;  %v111_v4 = vmul.f32 %v947_v26, %v67_v53  ;;  %v198_v8 = vmax.f32 %v166_v63, 0.0  ;;  %v81_v9 = vunpack.c.h.bf16 %v54_v59 }
  0x11   :  { %v221_v6 = vpack.c.bf16 %v199_v61, %v197_v60  ;;  %v212_v7 = vpack.c.bf16 %v182_v62, %v180_v57  ;;  %v153_v10 = vadd.f32 %v951_v28, %v109_v3  ;;  %v108_v22 = vmul.f32 %v945_v25, %v64_v13  ;;  %v50_v62 = vld [vmem:[%s1139_s0 + $0x30] sm:$0xff] }
  0x12   :  { %v155_v11 = vadd.f32 %v951_v28, %v111_v4  ;;  %404 = vmatprep.mubr.bf16.mxu0 %v213_v1  ;;  %v125_v15 = vmul.f32 %v947_v26, %v81_v9  ;;  %v110_v24 = vmul.f32 %v945_v25, %v66_v16  ;;  %v82_v29 = vunpack.c.l.bf16 %v55_v0 }
  0x13   :  { %772 = vmatpush3.bf16.msra.mxu0 %v852_v12  ;;  %839 = vmatpush3.bf16.msra.mxu1 %v852_v12  ;;  %v83_v12 = vunpack.c.h.bf16 %v55_v0  ;;  %v185_v19 = vmax.f32 %v153_v10, 0.0  ;;  %v152_v34 = vadd.f32 %v949_v27, %v108_v22  ;;  %v71_v44 = vunpack.c.h.bf16 %v49_v31 }
  0x14   :  { %773 = vmatprep.subr.bf16.mxu0 %v853_v14  ;;  %832 = vmatprep.subr.bf16.mxu1 %v853_v14  ;;  %v220_v14 = vpack.c.bf16 %v198_v8, %v196_v2  ;;  %v187_v20 = vmax.f32 %v155_v11, 0.0  ;;  %v169_v23 = vadd.f32 %v951_v28, %v125_v15  ;;  %v154_v38 = vadd.f32 %v949_v27, %v110_v24 }
  0x15   :  { %436 = vmatprep.mubr.bf16.mxu1 %v221_v6  ;;  %v127_v21 = vmul.f32 %v947_v26, %v83_v12  ;;  %v126_v39 = vmul.f32 %v945_v25, %v82_v29  ;;  %v184_v43 = vmax.f32 %v152_v34, 0.0  ;;  %v115_v51 = vmul.f32 %v947_v26, %v71_v44  ;;  %v58_v12 = vld [vmem:[%s1139_s0 + $0x70] sm:$0xff] }
  0x16   :  { %v215_v32 = vpack.c.bf16 %v187_v20, %v185_v19  ;;  %v201_v37 = vmax.f32 %v169_v23, 0.0  ;;  %v186_v46 = vmax.f32 %v154_v38, 0.0  ;;  %v87_v53 = vunpack.c.h.bf16 %v57_v41 }
  0x17   :  { %774 = vmatpush3.bf16.msra.mxu0 %v854_v30  ;;  %840 = vmatpush3.bf16.msra.mxu1 %v854_v30  ;;  %v124_v30 = vmul.f32 %v945_v25, %v80_v17  ;;  %v171_v33 = vadd.f32 %v951_v28, %v127_v21  ;;  %v170_v47 = vadd.f32 %v949_v27, %v126_v39  ;;  %v68_v57 = vunpack.c.l.bf16 %v48_v18  ;;  %v59_v17 = vld [vmem:[%s1139_s0 + $0x78] sm:$0xff] }
  0x18   :  { %775 = vmatprep.subr.bf16.mxu0 %v855_v35  ;;  %833 = vmatprep.subr.bf16.mxu1 %v855_v35  ;;  %v69_v35 = vunpack.c.h.bf16 %v48_v18  ;;  %v159_v58 = vadd.f32 %v951_v28, %v115_v51  ;;  %v131_v60 = vmul.f32 %v947_v26, %v87_v53  ;;  %v70_v61 = vunpack.c.l.bf16 %v49_v31 }
  0x19   :  { %v168_v40 = vadd.f32 %v949_v27, %v124_v30  ;;  %v203_v42 = vmax.f32 %v171_v33, 0.0  ;;  %v202_v55 = vmax.f32 %v170_v47, 0.0  ;;  %v112_v1 = vmul.f32 %v945_v25, %v68_v57 }
  0x1a   :  { %v113_v45 = vmul.f32 %v947_v26, %v69_v35  ;;  %v84_v2 = vunpack.c.l.bf16 %v56_v36  ;;  %v191_v3 = vmax.f32 %v159_v58, 0.0  ;;  %v175_v4 = vadd.f32 %v951_v28, %v131_v60 }
  0x1b   :  { %776 = vmatpush3.bf16.msra.mxu0 %v856_v49  ;;  %841 = vmatpush3.bf16.msra.mxu1 %v856_v49  ;;  %v200_v48 = vmax.f32 %v168_v40, 0.0  ;;  %v85_v49 = vunpack.c.h.bf16 %v56_v36  ;;  %v223_v50 = vpack.c.bf16 %v203_v42, %v201_v37  ;;  %v86_v6 = vunpack.c.l.bf16 %v57_v41 }
  0x1c   :  { %777 = vmatprep.subr.bf16.mxu0 %v857_v54  ;;  %834 = vmatprep.subr.bf16.mxu1 %v857_v54  ;;  %v157_v52 = vadd.f32 %v951_v28, %v113_v45  ;;  %v214_v54 = vpack.c.bf16 %v186_v46, %v184_v43  ;;  %v156_v9 = vadd.f32 %v949_v27, %v112_v1  ;;  %v73_v11 = vunpack.c.h.bf16 %v50_v62 }
  0x1d   :  { %v129_v56 = vmul.f32 %v947_v26, %v85_v49  ;;  %v222_v63 = vpack.c.bf16 %v202_v55, %v200_v48  ;;  %v128_v10 = vmul.f32 %v945_v25, %v84_v2  ;;  %v130_v16 = vmul.f32 %v945_v25, %v86_v6 }
  0x1e   :  { %v189_v59 = vmax.f32 %v157_v52, 0.0  ;;  %v188_v18 = vmax.f32 %v156_v9, 0.0  ;;  %v117_v21 = vmul.f32 %v947_v26, %v73_v11  ;;  %v89_v29 = vunpack.c.h.bf16 %v58_v12 }
  0x1f   :  { %778 = vmatpush3.bf16.msra.mxu0 %v858_v5  ;;  %842 = vmatpush3.bf16.msra.mxu1 %v858_v5  ;;  %v173_v0 = vadd.f32 %v951_v28, %v129_v56  ;;  %v114_v5 = vmul.f32 %v945_v25, %v70_v61  ;;  %v172_v19 = vadd.f32 %v949_v27, %v128_v10  ;;  %v91_v33 = vunpack.c.h.bf16 %v59_v17 }
  0x20   :  { %v217_v13 = vpack.c.bf16 %v191_v3, %v189_v59  ;;  %v174_v24 = vadd.f32 %v949_v27, %v130_v16  ;;  %v133_v36 = vmul.f32 %v947_v26, %v89_v29  ;;  %v72_v37 = vunpack.c.l.bf16 %v50_v62 }
  0x21   :  { %v205_v8 = vmax.f32 %v173_v0, 0.0  ;;  %v158_v15 = vadd.f32 %v949_v27, %v114_v5  ;;  %v204_v30 = vmax.f32 %v172_v19, 0.0  ;;  %v135_v40 = vmul.f32 %v947_v26, %v91_v33 }
  0x22   :  { %405 = vmatmul.mubr.bf16.vlgmr.msra.gmra.mrb[0].mxu0 %v212_v7  ;;  %437 = vmatmul.mubr.bf16.vlgmr.msra.gmra.mrb[0].mxu1 %v220_v14  ;;  %v51_v7 = vld [vmem:[%s1139_s0 + $0x38] sm:$0xff]  ;;  %v207_v14 = vmax.f32 %v175_v4, 0.0  ;;  %v206_v35 = vmax.f32 %v174_v24, 0.0  ;;  %v177_v43 = vadd.f32 %v951_v28, %v133_v36  ;;  %v116_v44 = vmul.f32 %v945_v25, %v72_v37 }
  0x23   :  { %412 = vmatprep.mubr.bf16.mxu0 %v215_v32  ;;  %444 = vmatprep.mubr.bf16.mxu1 %v223_v50  ;;  %v75_v20 = vunpack.c.h.bf16 %v51_v7  ;;  %v190_v23 = vmax.f32 %v158_v15, 0.0  ;;  %v161_v32 = vadd.f32 %v951_v28, %v117_v21  ;;  %v74_v41 = vunpack.c.l.bf16 %v51_v7  ;;  %v1080_v7 = vld [vmem:[%s1143_s5] ss:$0 sm:$0xff] }
  0x24   :  { %v225_v22 = vpack.c.bf16 %v207_v14, %v205_v8  ;;  %v224_v42 = vpack.c.bf16 %v206_v35, %v204_v30  ;;  %v88_v45 = vunpack.c.l.bf16 %v58_v12  ;;  %v179_v47 = vadd.f32 %v951_v28, %v135_v40 }
  0x25   :  { %v119_v31 = vmul.f32 %v947_v26, %v75_v20  ;;  %v216_v34 = vpack.c.bf16 %v190_v23, %v188_v18  ;;  %v193_v39 = vmax.f32 %v161_v32, 0.0  ;;  %v118_v48 = vmul.f32 %v945_v25, %v74_v41 }
  0x26   :  { %v90_v49 = vunpack.c.l.bf16 %v59_v17  ;;  %v209_v50 = vmax.f32 %v177_v43, 0.0  ;;  %v160_v51 = vadd.f32 %v949_v27, %v116_v44  ;;  %v132_v26 = vmul.f32 %v945_v25, %v88_v45 }
  0x27   :  { %v163_v38 = vadd.f32 %v951_v28, %v119_v31  ;;  %v211_v53 = vmax.f32 %v179_v47, 0.0 }
  0x28   :  { %v134_v55 = vmul.f32 %v945_v25, %v90_v49  ;;  %v192_v56 = vmax.f32 %v160_v51, 0.0  ;;  %v176_v57 = vadd.f32 %v949_v27, %v132_v26  ;;  %v1075_v25 = vld [vmem:[%s1142_s4] ss:$0 sm:$0xff] }
  0x29   :  { %v195_v46 = vmax.f32 %v163_v38, 0.0  ;;  %v227_v28 = vpack.c.bf16 %v211_v53, %v209_v50 }
  0x2a   :  { %413 = vmatmul.mubr.bf16.gmra.mrb[4].mxu0 %v214_v54  ;;  %445 = vmatmul.mubr.bf16.gmra.mrb[4].mxu1 %v222_v63  ;;  %v162_v54 = vadd.f32 %v949_v27, %v118_v48  ;;  %v178_v59 = vadd.f32 %v949_v27, %v134_v55  ;;  %v208_v60 = vmax.f32 %v176_v57, 0.0 }
  0x2b   :  { %420 = vmatprep.mubr.bf16.mxu0 %v217_v13  ;;  %452 = vmatprep.mubr.bf16.mxu1 %v225_v22  ;;  %v219_v52 = vpack.c.bf16 %v195_v46, %v193_v39 }
  0x2c   :  { %v194_v58 = vmax.f32 %v162_v54, 0.0  ;;  %v210_v62 = vmax.f32 %v178_v59, 0.0 }
  0x2e   :  { %v218_v61 = vpack.c.bf16 %v194_v58, %v192_v56  ;;  %v226_v63 = vpack.c.bf16 %v210_v62, %v208_v60 }
  0x32   :  { %421 = vmatmul.mubr.bf16.gmra.mrb[8].mxu0 %v216_v34  ;;  %453 = vmatmul.mubr.bf16.gmra.mrb[8].mxu1 %v224_v42 }
  0x33   :  { %428 = vmatprep.mubr.bf16.mxu0 %v219_v52  ;;  %460 = vmatprep.mubr.bf16.mxu1 %v227_v28 }
  0x3a   :  { %429 = vmatmul.mubr.bf16.gmra.mrb[12].mxu0 %v218_v61  ;;  %461 = vmatmul.mubr.bf16.gmra.mrb[12].mxu1 %v226_v63 }
  0xf5   :  { %v779_v0 = vpop.f32.mrb[0].mxu0  ;;  %v803_v1 = vpop.f32.mrb[0].mxu1 }
  0xf6   :  { %v780_v2 = vpop.f32.mrb[1].mxu0  ;;  %v804_v3 = vpop.f32.mrb[1].mxu1 }
  0xf7   :  { %v781_v4 = vadd.f32 %v780_v2, %v779_v0  ;;  %v805_v5 = vadd.f32 %v804_v3, %v803_v1  ;;  %v782_v6 = vpop.f32.mrb[2].mxu0  ;;  %v806_v27 = vpop.f32.mrb[2].mxu1 }
  0xf8   :  { %v783_v8 = vpop.f32.mrb[3].mxu0  ;;  %v807_v9 = vpop.f32.mrb[3].mxu1 }
  0xf9   :  { %v527_v10 = vmul.f32 %v781_v4, %v1075_v25  ;;  %v535_v11 = vmul.f32 %v805_v5, %v1075_v25  ;;  %v784_v12 = vadd.f32 %v783_v8, %v782_v6  ;;  %v808_v13 = vadd.f32 %v807_v9, %v806_v27 }
  0xfb   :  { %v550_v14 = vadd.f32 %v1080_v7, %v527_v10  ;;  %v558_v15 = vadd.f32 %v1080_v7, %v535_v11  ;;  %v528_v16 = vmul.f32 %v784_v12, %v1075_v25  ;;  %v536_v17 = vmul.f32 %v808_v13, %v1075_v25 }
  0xfd   :  { %v551_v18 = vadd.f32 %v1080_v7, %v528_v16  ;;  %v559_v19 = vadd.f32 %v1080_v7, %v536_v17  ;;  %v785_v20 = vpop.f32.mrb[4].mxu0  ;;  %v809_v21 = vpop.f32.mrb[4].mxu1  ;;  %v566_v22 = vmax.f32 %v550_v14, 0.0  ;;  %v574_v23 = vmax.f32 %v558_v15, 0.0 }
  0xfe   :  { %v786_v24 = vpop.f32.mrb[5].mxu0  ;;  %v810_v29 = vpop.f32.mrb[5].mxu1 }
  0xff   :  { %v567_v30 = vmax.f32 %v551_v18, 0.0  ;;  %v575_v31 = vmax.f32 %v559_v19, 0.0  ;;  %v787_v32 = vadd.f32 %v786_v24, %v785_v20  ;;  %v811_v33 = vadd.f32 %v810_v29, %v809_v21  ;;  %v788_v34 = vpop.f32.mrb[6].mxu0  ;;  %v812_v35 = vpop.f32.mrb[6].mxu1 }
 0x100   :  { %v789_v36 = vpop.f32.mrb[7].mxu0  ;;  %v813_v37 = vpop.f32.mrb[7].mxu1 }
 0x101   :  { %v719_v38 = vpack.c.bf16 %v567_v30, %v566_v22  ;;  %v739_v39 = vpack.c.bf16 %v575_v31, %v574_v23  ;;  %v529_v40 = vmul.f32 %v787_v32, %v1075_v25  ;;  %v537_v41 = vmul.f32 %v811_v33, %v1075_v25 }
 0x102   :  { %v790_v42 = vadd.f32 %v789_v36, %v788_v34  ;;  %v814_v43 = vadd.f32 %v813_v37, %v812_v35 }
 0x103   :  { %720 = vst [vmem:[%s1144_s6] sm:$0xff] %v719_v38   ;;  %759 = vst [vmem:[%s1144_s6 + $0x20] sm:$0xff] %v739_v39   ;;  %v552_v44 = vadd.f32 %v1080_v7, %v529_v40  ;;  %v560_v45 = vadd.f32 %v1080_v7, %v537_v41 }
 0x104   :  { %v530_v46 = vmul.f32 %v790_v42, %v1075_v25  ;;  %v538_v47 = vmul.f32 %v814_v43, %v1075_v25 }
 0x105   :  { %v791_v48 = vpop.f32.mrb[8].mxu0  ;;  %v815_v49 = vpop.f32.mrb[8].mxu1  ;;  %v568_v57 = vmax.f32 %v552_v44, 0.0  ;;  %v576_v28 = vmax.f32 %v560_v45, 0.0 }
 0x106   :  { %v553_v50 = vadd.f32 %v1080_v7, %v530_v46  ;;  %v561_v51 = vadd.f32 %v1080_v7, %v538_v47  ;;  %v792_v26 = vpop.f32.mrb[9].mxu0  ;;  %v816_v52 = vpop.f32.mrb[9].mxu1 }
 0x107   :  { %v793_v53 = vadd.f32 %v792_v26, %v791_v48  ;;  %v817_v54 = vadd.f32 %v816_v52, %v815_v49  ;;  %v794_v55 = vpop.f32.mrb[10].mxu0  ;;  %v818_v56 = vpop.f32.mrb[10].mxu1 }
 0x108   :  { %v569_v58 = vmax.f32 %v553_v50, 0.0  ;;  %v577_v59 = vmax.f32 %v561_v51, 0.0  ;;  %v795_v60 = vpop.f32.mrb[11].mxu0  ;;  %v819_v61 = vpop.f32.mrb[11].mxu1 }
 0x109   :  { %v531_v62 = vmul.f32 %v793_v53, %v1075_v25  ;;  %v539_v63 = vmul.f32 %v817_v54, %v1075_v25  ;;  %v796_v0 = vadd.f32 %v795_v60, %v794_v55  ;;  %v820_v1 = vadd.f32 %v819_v61, %v818_v56 }
 0x10a   :  { %v724_v2 = vpack.c.bf16 %v569_v58, %v568_v57  ;;  %v744_v3 = vpack.c.bf16 %v577_v59, %v576_v28 }
 0x10b   :  { %v554_v4 = vadd.f32 %v1080_v7, %v531_v62  ;;  %v562_v5 = vadd.f32 %v1080_v7, %v539_v63  ;;  %v532_v6 = vmul.f32 %v796_v0, %v1075_v25  ;;  %v540_v27 = vmul.f32 %v820_v1, %v1075_v25 }
 0x10c   :  { %756 = vst [vmem:[%s1144_s6 + $0x8] sm:$0xff] %v724_v2   ;;  %760 = vst [vmem:[%s1144_s6 + $0x28] sm:$0xff] %v744_v3  }
 0x10d   :  { %v555_v8 = vadd.f32 %v1080_v7, %v532_v6  ;;  %v563_v9 = vadd.f32 %v1080_v7, %v540_v27  ;;  %v797_v10 = vpop.f32.mrb[12].mxu0  ;;  %v570_v11 = vmax.f32 %v554_v4, 0.0  ;;  %v821_v12 = vpop.f32.mrb[12].mxu1  ;;  %v578_v14 = vmax.f32 %v562_v5, 0.0 }
 0x10e   :  { %v798_v13 = vpop.f32.mrb[13].mxu0  ;;  %v822_v18 = vpop.f32.mrb[13].mxu1 }
 0x10f   :  { %v571_v15 = vmax.f32 %v555_v8, 0.0  ;;  %v579_v16 = vmax.f32 %v563_v9, 0.0  ;;  %v799_v17 = vadd.f32 %v798_v13, %v797_v10  ;;  %v800_v19 = vpop.f32.mrb[14].mxu0  ;;  %v823_v20 = vadd.f32 %v822_v18, %v821_v12  ;;  %v824_v21 = vpop.f32.mrb[14].mxu1 }
 0x110   :  { %v801_v22 = vpop.f32.mrb[15].mxu0  ;;  %v825_v31 = vpop.f32.mrb[15].mxu1 }
 0x111   :  { %v729_v23 = vpack.c.bf16 %v571_v15, %v570_v11  ;;  %v749_v24 = vpack.c.bf16 %v579_v16, %v578_v14  ;;  %v533_v29 = vmul.f32 %v799_v17, %v1075_v25  ;;  %v802_v30 = vadd.f32 %v801_v22, %v800_v19 }
 0x112   :  { %v541_v32 = vmul.f32 %v823_v20, %v1075_v25  ;;  %v826_v33 = vadd.f32 %v825_v31, %v824_v21 }
 0x113   :  { %757 = vst [vmem:[%s1144_s6 + $0x10] sm:$0xff] %v729_v23   ;;  %761 = vst [vmem:[%s1144_s6 + $0x30] sm:$0xff] %v749_v24   ;;  %v556_v34 = vadd.f32 %v1080_v7, %v533_v29  ;;  %v534_v35 = vmul.f32 %v802_v30, %v1075_v25 }
 0x114   :  { %v564_v36 = vadd.f32 %v1080_v7, %v541_v32  ;;  %v542_v37 = vmul.f32 %v826_v33, %v1075_v25 }
 0x115   :  { %v557_v38 = vadd.f32 %v1080_v7, %v534_v35  ;;  %v572_v40 = vmax.f32 %v556_v34, 0.0 }
 0x116   :  { %v565_v39 = vadd.f32 %v1080_v7, %v542_v37  ;;  %v580_v42 = vmax.f32 %v564_v36, 0.0 }
 0x117   :  { %v573_v41 = vmax.f32 %v557_v38, 0.0 }
 0x118   :  { %v581_v43 = vmax.f32 %v565_v39, 0.0 }
 0x119   :  { %v734_v44 = vpack.c.bf16 %v573_v41, %v572_v40 }
 0x11a   :  { %v754_v45 = vpack.c.bf16 %v581_v43, %v580_v42 }
 0x11b   :  { %758 = vst [vmem:[%s1144_s6 + $0x18] sm:$0xff] %v734_v44  }
 0x11c   :  { %762 = vst [vmem:[%s1144_s6 + $0x38] sm:$0xff] %v754_v45  }

// kernel: densenet121_features.128
= control target key start
LH: loop header
LB: loop body
LE: loop exit
PB: predicated region body
PF: predicated region fallthrough
CT: control target
= control target key end

     0   :  { %s1658_s21 = smov 0   ;;  %s1660_s22 = smov 0   ;;  %s1941_s0 = inlined_call_operand.vmem [shape: bf16[128,1152], index: 0, kind: input, shape index: {}]   ;;  %s1942_s1 = inlined_call_operand.vmem [shape: bf16[1152,32], index: 1, kind: input, shape index: {}]   ;;  %s1943_s2 = inlined_call_operand.vmem [shape: f32[1,1152], index: 2, kind: input, shape index: {}, may-alias: {2,3}]   ;;  %s1944_s3 = inlined_call_operand.vmem [shape: f32[1,1152], index: 3, kind: input, shape index: {}, may-alias: {2,3}]   ;;  %s1945_s4 = inlined_call_operand.vmem [shape: f32[1,32], index: 4, kind: input, shape index: {}, may-alias: {4,5}]   ;;  %s1946_s5 = inlined_call_operand.vmem [shape: f32[1,32], index: 5, kind: input, shape index: {}, may-alias: {4,5}]   ;;  %s1947_s6 = inlined_call_operand.vmem [shape: bf16[128,32], index: 6, kind: output, shape index: {}]  }
   0x1   :  { %s1662_s23 = smov 0   ;;  %s1664_s24 = smov 0  }
   0x2   :  { %s1666_s2 = smov 0  }
   0x3 LB: > { %s25_s3 = sadd.s32 1, %s1616_s24  ;;  %p44_p1 = scmp.ne.s32.totalorder %s1608_s22, %s1604_s21  ;;  %s1620_s2 = sphi %s1666_s2, %s16_s2   ;;  %s1616_s24 = sphi %s1664_s24, %s1951_s24   ;;  %s1612_s23 = sphi %s1662_s23, %s1950_s23   ;;  %s1608_s22 = sphi %s1660_s22, %s1949_s22   ;;  %s1604_s21 = sphi %s1658_s21, %s1948_s21  }
   0x4   : > { %p26_p0 = scmp.ge.s32.totalorder %s25_s3, 3  ;;  %p45_p2 = scmp.eq.s32.totalorder %s1620_s2, 0 }
   0x5   : > { %s37_s5 = sadd.s32 1, %s1608_s22  ;;  %p1248_p5 = scmp.ge.s32.totalorder %s1620_s2, 3 }
   0x6   : > { %s1953_s3 = smov (%p26_p0, %s25_s3), 0  ;;  %p46_p3 = por %p45_p2, %p44_p1 }
   0x7   : > { %s33_s4 = ssub.s32 %s1616_s24, %s1953_s3  ;;  %222 = sbr.rel (%p1248_p5) target bundleno = 37 (0x25), region = 24 }
   0x8   : > { %p35_p4 = scmp.eq.s32.totalorder %s33_s4, 0 }
   0xa   : > { %s1693_s25 = scalar_select %p35_p4, %s1608_s22, %s37_s5  }
   0xe   : > { %225 = sbr.rel (!%p46_p3) target bundleno = 37 (0x25), region = 28  ;;  %s227_s26 = sand.u32 (%p46_p3), 1, %s1608_s22  }
   0xf   : > { %s1354_s27 = smul.u32 (%p46_p3), 12, %s1616_s24 }
  0x10   : > { %s1483_s28 = smul.u32 (%p46_p3), 192, %s227_s26 }
  0x11   : > { %s1701_s7 = scalar_lea.vmem (%p46_p3), %s1941_s0, %s1354_s27 }
  0x12   : > { %v250_v0 = vld [vmem:[%s1701_s7] sm:$0xff] (%p46_p3)  ;;  %v254_v2 = vld [vmem:[%s1701_s7 + $0x48] sm:$0xff] (%p46_p3)  ;;  %s1706_s8 = scalar_lea.vmem (%p46_p3), [#allocation3], %s1483_s28  ;;  %v258_v4 = vld [vmem:[%s1701_s7 + $0x90] sm:$0xff] (%p46_p3) }
  0x13   : > { %v252_v1 = vld [vmem:[%s1701_s7 + $0x24] sm:$0xff] (%p46_p3)  ;;  %251 = vst [vmem:[%s1706_s8] sm:$0xff] (%p46_p3), %v250_v0  ;;  %255 = vst [vmem:[%s1706_s8 + $0x18] sm:$0xff] (%p46_p3), %v254_v2  ;;  %v256_v3 = vld [vmem:[%s1701_s7 + $0x6c] sm:$0xff] (%p46_p3) }
  0x14   : > { %253 = vst [vmem:[%s1706_s8 + $0xc] sm:$0xff] (%p46_p3), %v252_v1  ;;  %v260_v5 = vld [vmem:[%s1701_s7 + $0xb4] sm:$0xff] (%p46_p3)  ;;  %257 = vst [vmem:[%s1706_s8 + $0x24] sm:$0xff] (%p46_p3), %v256_v3  ;;  %v264_v7 = vld [vmem:[%s1701_s7 + $0xfc] sm:$0xff] (%p46_p3) }
  0x15   : > { %259 = vst [vmem:[%s1706_s8 + $0x30] sm:$0xff] %v258_v4  ;;  %261 = vst [vmem:[%s1706_s8 + $0x3c] sm:$0xff] %v260_v5  ;;  %v262_v6 = vld [vmem:[%s1701_s7 + $0xd8] sm:$0xff]  ;;  %v266_v8 = vld [vmem:[%s1701_s7 + $0x120] sm:$0xff] }
  0x16   : > { %263 = vst [vmem:[%s1706_s8 + $0x48] sm:$0xff] %v262_v6  ;;  %265 = vst [vmem:[%s1706_s8 + $0x54] sm:$0xff] %v264_v7  ;;  %v268_v9 = vld [vmem:[%s1701_s7 + $0x144] sm:$0xff]  ;;  %v272_v11 = vld [vmem:[%s1701_s7 + $0x18c] sm:$0xff] }
  0x17   : > { %267 = vst [vmem:[%s1706_s8 + $0x60] sm:$0xff] %v266_v8  ;;  %v270_v10 = vld [vmem:[%s1701_s7 + $0x168] sm:$0xff]  ;;  %269 = vst [vmem:[%s1706_s8 + $0x6c] sm:$0xff] %v268_v9  ;;  %v274_v12 = vld [vmem:[%s1701_s7 + $0x1b0] sm:$0xff] }
  0x18   : > { %271 = vst [vmem:[%s1706_s8 + $0x78] sm:$0xff] %v270_v10  ;;  %273 = vst [vmem:[%s1706_s8 + $0x84] sm:$0xff] %v272_v11  ;;  %v276_v13 = vld [vmem:[%s1701_s7 + $0x1d4] sm:$0xff]  ;;  %v280_v15 = vld [vmem:[%s1701_s7 + $0x21c] sm:$0xff] }
  0x19   : > { %v278_v14 = vld [vmem:[%s1701_s7 + $0x1f8] sm:$0xff]  ;;  %275 = vst [vmem:[%s1706_s8 + $0x90] sm:$0xff] %v274_v12  ;;  %277 = vst [vmem:[%s1706_s8 + $0x9c] sm:$0xff] %v276_v13  ;;  %v1250_v16 = vld [vmem:[%s1701_s7 + $0x8] sm:$0xf] }
  0x1a   : > { %279 = vst [vmem:[%s1706_s8 + $0xa8] sm:$0xff] %v278_v14  ;;  %v1252_v17 = vld [vmem:[%s1701_s7 + $0x2c] sm:$0xf]  ;;  %281 = vst [vmem:[%s1706_s8 + $0xb4] sm:$0xff] %v280_v15  ;;  %v1254_v18 = vld [vmem:[%s1701_s7 + $0x50] sm:$0xf] }
  0x1b   : > { %1251 = vst [vmem:[%s1706_s8 + $0x8] sm:$0xf] %v1250_v16  ;;  %1253 = vst [vmem:[%s1706_s8 + $0x14] sm:$0xf] %v1252_v17  ;;  %v1256_v19 = vld [vmem:[%s1701_s7 + $0x74] sm:$0xf] }
  0x1c   : > { %v1258_v20 = vld [vmem:[%s1701_s7 + $0x98] sm:$0xf]  ;;  %1255 = vst [vmem:[%s1706_s8 + $0x20] sm:$0xf] %v1254_v18  ;;  %1257 = vst [vmem:[%s1706_s8 + $0x2c] sm:$0xf] %v1256_v19 }
  0x1d   : > { %1259 = vst [vmem:[%s1706_s8 + $0x38] sm:$0xf] %v1258_v20  ;;  %v1260_v21 = vld [vmem:[%s1701_s7 + $0xbc] sm:$0xf]  ;;  %v1262_v22 = vld [vmem:[%s1701_s7 + $0xe0] sm:$0xf] }
  0x1e   : > { %v1264_v23 = vld [vmem:[%s1701_s7 + $0x104] sm:$0xf]  ;;  %1261 = vst [vmem:[%s1706_s8 + $0x44] sm:$0xf] %v1260_v21  ;;  %1263 = vst [vmem:[%s1706_s8 + $0x50] sm:$0xf] %v1262_v22 }
  0x1f   : > { %1265 = vst [vmem:[%s1706_s8 + $0x5c] sm:$0xf] %v1264_v23  ;;  %v1266_v24 = vld [vmem:[%s1701_s7 + $0x128] sm:$0xf]  ;;  %v1268_v25 = vld [vmem:[%s1701_s7 + $0x14c] sm:$0xf] }
  0x20   : > { %v1270_v26 = vld [vmem:[%s1701_s7 + $0x170] sm:$0xf]  ;;  %1267 = vst [vmem:[%s1706_s8 + $0x68] sm:$0xf] %v1266_v24  ;;  %1269 = vst [vmem:[%s1706_s8 + $0x74] sm:$0xf] %v1268_v25 }
  0x21   : > { %1271 = vst [vmem:[%s1706_s8 + $0x80] sm:$0xf] %v1270_v26  ;;  %v1272_v27 = vld [vmem:[%s1701_s7 + $0x194] sm:$0xf]  ;;  %v1274_v28 = vld [vmem:[%s1701_s7 + $0x1b8] sm:$0xf] }
  0x22   : > { %v1276_v29 = vld [vmem:[%s1701_s7 + $0x1dc] sm:$0xf]  ;;  %1273 = vst [vmem:[%s1706_s8 + $0x8c] sm:$0xf] %v1272_v27  ;;  %1275 = vst [vmem:[%s1706_s8 + $0x98] sm:$0xf] %v1274_v28 }
  0x23   : > { %1277 = vst [vmem:[%s1706_s8 + $0xa4] sm:$0xf] %v1276_v29  ;;  %v1278_v30 = vld [vmem:[%s1701_s7 + $0x200] sm:$0xf]  ;;  %v1280_v31 = vld [vmem:[%s1701_s7 + $0x224] sm:$0xf] }
  0x24   : > { %1279 = vst [vmem:[%s1706_s8 + $0xb0] sm:$0xf] %v1278_v30  ;;  %1281 = vst [vmem:[%s1706_s8 + $0xbc] sm:$0xf] %v1280_v31 }
  0x25 PF: > { %p1282_p6 = scmp.ge.s32.totalorder %s1620_s2, 1  ;;  %p350_p7 = scmp.lt.s32.totalorder %s1620_s2, 4 }
  0x27   : > { %p351_p8 = pnand %p1282_p6, %p350_p7 }
  0x28   : > { %s357_s9 = sand.u32 (!%p351_p8), 1, %s1604_s21   ;;  %s401_s10 = smul.u32 (!%p351_p8), 48, %s1612_s23 }
  0x29   : > { %354 = sbr.rel (%p351_p8) target bundleno = 379 (0x17b), region = 66  ;;  %p1284_p10 = scmp.ne.s32.totalorder (!%p351_p8), %s1612_s23, 0 }
  0x2a   : > { %s1484_s11 = smul.u32 (!%p351_p8), 192, %s357_s9  ;;  %p402_p9 = scmp.lt.s32.totalorder (!%p351_p8), %s401_s10, 143 }
  0x2c   : > { %s1778_s16 = scalar_lea.vmem (!%p351_p8), [#allocation3], %s1484_s11 }
  0x30   : > { %s1955_s10 = smov (!%p402_p9, %s401_s10), 143  ;;  %427 = sbr.rel (%p1284_p10) target bundleno = 58 (0x3a), region = 74 }
  0x31   : > { %s1283_s12 = sshll.u32 %s1955_s10, 2  ;;  %vm428_vm0 = vcmask (!%p1284_p10), 261120   ;;  %v1622_v32 = vmov (!%p1284_p10), 0.0  }
  0x32   : > { %s1776_s15 = scalar_lea.vmem %s1942_s1, %s1283_s12  ;;  %429 = vst.msk [vmem:[#allocation2] sm:$0xff] (!%p1284_p10), %vm428_vm0, %v1622_v32  ;;  %430 = vst.msk [vmem:[#allocation2 + $0x8] sm:$0xff] (!%p1284_p10), %vm428_vm0, %v1622_v32 }
  0x33   : > { %431 = vst.msk [vmem:[#allocation2 + $0x10] sm:$0xff] (!%p1284_p10), %vm428_vm0, %v1622_v32  ;;  %432 = vst.msk [vmem:[#allocation2 + $0x18] sm:$0xff] (!%p1284_p10), %vm428_vm0, %v1622_v32 }
  0x34   : > { %433 = vst.msk [vmem:[#allocation2 + $0x20] sm:$0xff] (!%p1284_p10), %vm428_vm0, %v1622_v32  ;;  %434 = vst.msk [vmem:[#allocation2 + $0x28] sm:$0xff] (!%p1284_p10), %vm428_vm0, %v1622_v32 }
  0x35   : > { %435 = vst.msk [vmem:[#allocation2 + $0x30] sm:$0xff] (!%p1284_p10), %vm428_vm0, %v1622_v32  ;;  %436 = vst.msk [vmem:[#allocation2 + $0x38] sm:$0xff] (!%p1284_p10), %vm428_vm0, %v1622_v32 }
  0x36   : > { %437 = vst.msk [vmem:[#allocation2 + $0x40] sm:$0xff] (!%p1284_p10), %vm428_vm0, %v1622_v32  ;;  %438 = vst.msk [vmem:[#allocation2 + $0x48] sm:$0xff] (!%p1284_p10), %vm428_vm0, %v1622_v32 }
  0x37   : > { %439 = vst.msk [vmem:[#allocation2 + $0x50] sm:$0xff] %vm428_vm0, %v1622_v32  ;;  %440 = vst.msk [vmem:[#allocation2 + $0x58] sm:$0xff] %vm428_vm0, %v1622_v32 }
  0x38   : > { %441 = vst.msk [vmem:[#allocation2 + $0x60] sm:$0xff] %vm428_vm0, %v1622_v32  ;;  %442 = vst.msk [vmem:[#allocation2 + $0x68] sm:$0xff] %vm428_vm0, %v1622_v32 }
  0x39   : > { %443 = vst.msk [vmem:[#allocation2 + $0x70] sm:$0xff] %vm428_vm0, %v1622_v32  ;;  %444 = vst.msk [vmem:[#allocation2 + $0x78] sm:$0xff] %vm428_vm0, %v1622_v32 }
  0x3a PF: > { %v1526_v33 = vld [vmem:[%s1776_s15 + $0x40] sm:$0xff]   ;;  %v1529_v36 = vld [vmem:[%s1776_s15 + $0x48] sm:$0xff]   ;;  %v1532_v39 = vld [vmem:[%s1776_s15 + $0x50] sm:$0xff]   ;;  %vm1023_vm1 = vcmask 261120   ;;  %p1333_p11 = scmp.ne.s32.totalorder %s1612_s23, 2 }
  0x3b   : > { %v1527_v34 = vld [vmem:[%s1776_s15] sm:$0xff]   ;;  %1371 = vmatprep.subr.bf16.mxu0 %v1526_v33  ;;  %v1530_v37 = vld [vmem:[%s1776_s15 + $0x8] sm:$0xff]   ;;  %v1533_v40 = vld [vmem:[%s1776_s15 + $0x10] sm:$0xff]   ;;  %vm1124_vm2 = vcmask (!%p1333_p11), 257024  }
  0x3c   : > { %v1528_v35 = vld [vmem:[%s1776_s15 + $0x80] sm:$0xff]   ;;  %1372 = vmatpush3.bf16.msra.mxu0 %v1527_v34  ;;  %v1531_v38 = vld [vmem:[%s1776_s15 + $0x88] sm:$0xff]   ;;  %v1534_v41 = vld [vmem:[%s1776_s15 + $0x90] sm:$0xff]  }
  0x3d   : > { %1451 = vmatprep.subr.bf16.mxu1 %v1528_v35  ;;  %1373 = vmatprep.subr.bf16.mxu0 %v1529_v36  ;;  %v1535_v42 = vld [vmem:[%s1776_s15 + $0x58] sm:$0xff]   ;;  %v1538_v45 = vld [vmem:[%s1776_s15 + $0x60] sm:$0xff]   ;;  %v1541_v48 = vld [vmem:[%s1776_s15 + $0x68] sm:$0xff]  }
  0x3e   : > { %1452 = vmatpush3.bf16.msra.mxu1 %v1528_v35  ;;  %v1536_v43 = vld [vmem:[%s1776_s15 + $0x18] sm:$0xff]   ;;  %v1540_v46 = vld [vmem:[%s1776_s15 + $0xa0] sm:$0xff]   ;;  %v1543_v49 = vld [vmem:[%s1776_s15 + $0xa8] sm:$0xff]  }
  0x3f   : > { %1453 = vmatprep.subr.bf16.mxu1 %v1531_v38  ;;  %v1537_v44 = vld [vmem:[%s1776_s15 + $0x98] sm:$0xff]   ;;  %v1539_v47 = vld [vmem:[%s1776_s15 + $0x20] sm:$0xff]   ;;  %v1542_v50 = vld [vmem:[%s1776_s15 + $0x28] sm:$0xff]  }
  0x40   : > { %1374 = vmatpush3.bf16.msra.mxu0 %v1530_v37  ;;  %v1544_v51 = vld [vmem:[%s1776_s15 + $0x70] sm:$0xff]   ;;  %v1547_v54 = vld [vmem:[%s1776_s15 + $0x78] sm:$0xff]   ;;  %v1550_v59 = vld [vmem:[%s1778_s16] ss:$12 sps:$4 sm:$0xff]  }
  0x41   : > { %1375 = vmatprep.subr.bf16.mxu0 %v1532_v39  ;;  %v1545_v52 = vld [vmem:[%s1776_s15 + $0x30] sm:$0xff]   ;;  %v1549_v55 = vld [vmem:[%s1776_s15 + $0xb8] sm:$0xff]   ;;  %v1554_v61 = vld [vmem:[%s1778_s16 + $0x20] ss:$12 sps:$4 sm:$0xff]  }
  0x42   : > { %1454 = vmatpush3.bf16.msra.mxu1 %v1531_v38  ;;  %v1546_v53 = vld [vmem:[%s1776_s15 + $0xb0] sm:$0xff]   ;;  %v1548_v58 = vld [vmem:[%s1776_s15 + $0x38] sm:$0xff]   ;;  %v1570_v5 = vld [vmem:[%s1778_s16 + $0x80] ss:$12 sps:$4 sm:$0xff]  }
  0x43   : > { %1455 = vmatprep.subr.bf16.mxu1 %v1534_v41  ;;  %v1552_v56 = vld [vmem:[%s1778_s16 + $0x4] ss:$12 sps:$4 sm:$0xff]   ;;  %v1553_v57 = vld [vmem:[%s1778_s16 + $0x8] ss:$12 sps:$4 sm:$0xff]   ;;  %v1563_v4 = vld [vmem:[%s1778_s16 + $0x4c] ss:$12 sps:$4 sm:$0xff]  }
  0x44   : > { %1376 = vmatpush3.bf16.msra.mxu0 %v1533_v40  ;;  %845 = vmatprep.mubr.bf16.mxu0 %v1552_v56  ;;  %v1555_v60 = vld [vmem:[%s1778_s16 + $0x1c] ss:$12 sps:$4 sm:$0xff]   ;;  %v1561_v62 = vld [vmem:[%s1778_s16 + $0x38] ss:$12 sps:$4 sm:$0xff]   ;;  %v1558_v0 = vld [vmem:[%s1778_s16 + $0x34] ss:$12 sps:$4 sm:$0xff]  }
  0x45   : > { %1377 = vmatprep.subr.bf16.mxu0 %v1535_v42  ;;  %1467 = vmatprep.mubr.bf16.mxu1 %v1553_v57  ;;  %v1557_v63 = vld [vmem:[%s1778_s16 + $0x18] ss:$12 sps:$4 sm:$0xff]   ;;  %v1562_v1 = vld [vmem:[%s1778_s16 + $0x50] ss:$12 sps:$4 sm:$0xff]   ;;  %v1569_v2 = vld [vmem:[%s1778_s16 + $0x68] ss:$12 sps:$4 sm:$0xff]  }
  0x46   : > { %1456 = vmatpush3.bf16.msra.mxu1 %v1534_v41  ;;  %v1560_v3 = vld [vmem:[%s1778_s16 + $0x30] ss:$12 sps:$4 sm:$0xff]   ;;  %v1577_v6 = vld [vmem:[%s1778_s16 + $0x98] ss:$12 sps:$4 sm:$0xff]   ;;  %v1565_v7 = vld [vmem:[%s1778_s16 + $0x48] ss:$12 sps:$4 sm:$0xff]  }
  0x47   : > { %1457 = vmatprep.subr.bf16.mxu1 %v1537_v44  ;;  %v1566_v8 = vld [vmem:[%s1778_s16 + $0x64] ss:$12 sps:$4 sm:$0xff]   ;;  %v1568_v10 = vld [vmem:[%s1778_s16 + $0x60] ss:$12 sps:$4 sm:$0xff]   ;;  %v1571_v11 = vld [vmem:[%s1778_s16 + $0x7c] ss:$12 sps:$4 sm:$0xff]  }
  0x48   : > { %1378 = vmatpush3.bf16.msra.mxu0 %v1536_v43  ;;  %v1578_v9 = vld [vmem:[%s1778_s16 + $0xb0] ss:$12 sps:$4 sm:$0xff]   ;;  %v1573_v12 = vld [vmem:[%s1778_s16 + $0x78] ss:$12 sps:$4 sm:$0xff]   ;;  %v1574_v13 = vld [vmem:[%s1778_s16 + $0x94] ss:$12 sps:$4 sm:$0xff]  }
  0x49   : > { %1379 = vmatprep.subr.bf16.mxu0 %v1538_v45  ;;  %v1576_v14 = vld [vmem:[%s1778_s16 + $0x90] ss:$12 sps:$4 sm:$0xff]   ;;  %v1579_v15 = vld [vmem:[%s1778_s16 + $0xac] ss:$12 sps:$4 sm:$0xff]   ;;  %v1581_v16 = vld [vmem:[%s1778_s16 + $0xa8] ss:$12 sps:$4 sm:$0xff]  }
  0x4a   : > { %1458 = vmatpush3.bf16.msra.mxu1 %v1537_v44  ;;  %v477_v23 = vld [vmem:[#allocation2] sm:$0xff]  ;;  %v478_v28 = vld [vmem:[#allocation2 + $0x8] sm:$0xff]  ;;  %v479_v38 = vld [vmem:[#allocation2 + $0x10] sm:$0xff] }
  0x4b   : > { %1459 = vmatprep.subr.bf16.mxu1 %v1540_v46  ;;  %v480_v44 = vld [vmem:[#allocation2 + $0x18] sm:$0xff] }
  0x4c   : > { %1380 = vmatpush3.bf16.msra.mxu0 %v1539_v47 }
  0x4d   : > { %1381 = vmatprep.subr.bf16.mxu0 %v1541_v48 }
  0x4e   : > { %1460 = vmatpush3.bf16.msra.mxu1 %v1540_v46 }
  0x4f   : > { %1461 = vmatprep.subr.bf16.mxu1 %v1543_v49 }
  0x50   : > { %1382 = vmatpush3.bf16.msra.mxu0 %v1542_v50 }
  0x51   : > { %1383 = vmatprep.subr.bf16.mxu0 %v1544_v51 }
  0x52   : > { %1462 = vmatpush3.bf16.msra.mxu1 %v1543_v49 }
  0x53   : > { %1463 = vmatprep.subr.bf16.mxu1 %v1546_v53 }
  0x54   : > { %1384 = vmatpush3.bf16.msra.mxu0 %v1545_v52 }
  0x55   : > { %1385 = vmatprep.subr.bf16.mxu0 %v1547_v54 }
  0x56   : > { %1464 = vmatpush3.bf16.msra.mxu1 %v1546_v53 }
  0x57   : > { %1465 = vmatprep.subr.bf16.mxu1 %v1549_v55 }
  0x58   : > { %1386 = vmatpush3.bf16.msra.mxu0 %v1548_v58 }
  0x5a   : > { %1466 = vmatpush3.bf16.msra.mxu1 %v1549_v55  ;;  %v481_v55 = vld [vmem:[#allocation2 + $0x20] sm:$0xff] }
  0x5b   : > { %846 = vmatmul.mubr.bf16.vlgmr.msra.gmra.mrb[0].mxu0 %v1550_v59 }
  0x5c   : > { %853 = vmatprep.mubr.bf16.mxu0 %v1555_v60  ;;  %v482_v60 = vld [vmem:[#allocation2 + $0x28] sm:$0xff] }
  0x5d   : > { %1468 = vmatmul.mubr.bf16.vlgmr.msra.gmra.mrb[0].mxu1 %v1554_v61 }
  0x5e   : > { %1471 = vmatprep.mubr.bf16.mxu1 %v1561_v62 }
  0x63   : > { %854 = vmatmul.mubr.bf16.gmra.mrb[4].mxu0 %v1557_v63 }
  0x64   : > { %861 = vmatprep.mubr.bf16.mxu0 %v1558_v0 }
  0x65   : > { %1472 = vmatmul.mubr.bf16.gmra.mrb[4].mxu1 %v1562_v1 }
  0x66   : > { %1475 = vmatprep.mubr.bf16.mxu1 %v1569_v2 }
  0x6b   : > { %862 = vmatmul.mubr.bf16.gmra.mrb[8].mxu0 %v1560_v3 }
  0x6c   : > { %869 = vmatprep.mubr.bf16.mxu0 %v1563_v4 }
  0x6d   : > { %1476 = vmatmul.mubr.bf16.gmra.mrb[8].mxu1 %v1570_v5 }
  0x6e   : > { %1479 = vmatprep.mubr.bf16.mxu1 %v1577_v6  ;;  %v483_v6 = vld [vmem:[#allocation2 + $0x30] sm:$0xff] }
  0x73   : > { %870 = vmatmul.mubr.bf16.gmra.mrb[12].mxu0 %v1565_v7 }
  0x74   : > { %877 = vmatprep.mubr.bf16.mxu0 %v1566_v8 }
  0x75   : > { %1480 = vmatmul.mubr.bf16.gmra.mrb[12].mxu1 %v1578_v9 }
  0x7b   : > { %878 = vmatmul.mubr.bf16.gmra.mrb[16].mxu0 %v1568_v10 }
  0x7c   : > { %885 = vmatprep.mubr.bf16.mxu0 %v1571_v11 }
  0x83   : > { %886 = vmatmul.mubr.bf16.gmra.mrb[20].mxu0 %v1573_v12  ;;  %v484_v12 = vld [vmem:[#allocation2 + $0x38] sm:$0xff] }
  0x84   : > { %893 = vmatprep.mubr.bf16.mxu0 %v1574_v13 }
  0x8b   : > { %894 = vmatmul.mubr.bf16.gmra.mrb[24].mxu0 %v1576_v14 }
  0x8c   : > { %901 = vmatprep.mubr.bf16.mxu0 %v1579_v15 }
  0x93   : > { %902 = vmatmul.mubr.bf16.gmra.mrb[28].mxu0 %v1581_v16 }
 0x12e   : > { %v1387_v17 = vpop.f32.mrb[0].mxu0 }
 0x12f   : > { %v1388_v18 = vpop.f32.mrb[1].mxu0 }
 0x130   : > { %v1389_v19 = vadd.f32 %v1388_v18, %v1387_v17  ;;  %v1390_v20 = vpop.f32.mrb[2].mxu0  ;;  %v1469_v21 = vpop.f32.mrb[0].mxu1 }
 0x131   : > { %v1391_v22 = vpop.f32.mrb[3].mxu0  ;;  %v944_v24 = vpop.f32.mrb[1].mxu1 }
 0x132   : > { %v1392_v25 = vadd.f32 %v1391_v22, %v1390_v20  ;;  %v945_v26 = vadd.f32 %v1389_v19, %v944_v24  ;;  %v1470_v27 = vpop.f32.mrb[2].mxu1  ;;  %v485_v22 = vld [vmem:[#allocation2 + $0x40] sm:$0xff] }
 0x133   : > { %v947_v29 = vpop.f32.mrb[3].mxu1 }
 0x134   : > { %v1007_v30 = vadd.f32 %v945_v26, %v477_v23  ;;  %v948_v31 = vadd.f32 %v1392_v25, %v947_v29  ;;  %v486_v25 = vld [vmem:[#allocation2 + $0x48] sm:$0xff] }
 0x136   : > { %1024 = vst.msk [vmem:[#allocation2] sm:$0xff] %vm1023_vm1, %v1007_v30  ;;  %v1008_v32 = vadd.f32 %v948_v31, %v478_v28  ;;  %v1393_v33 = vpop.f32.mrb[4].mxu0 }
 0x137   : > { %v1394_v34 = vpop.f32.mrb[5].mxu0 }
 0x138   : > { %1025 = vst.msk [vmem:[#allocation2 + $0x8] sm:$0xff] %vm1023_vm1, %v1008_v32  ;;  %v1395_v35 = vadd.f32 %v1394_v34, %v1393_v33  ;;  %v1396_v36 = vpop.f32.mrb[6].mxu0  ;;  %v1473_v37 = vpop.f32.mrb[4].mxu1  ;;  %v487_v33 = vld [vmem:[#allocation2 + $0x50] sm:$0xff] }
 0x139   : > { %v1397_v39 = vpop.f32.mrb[7].mxu0  ;;  %v960_v40 = vpop.f32.mrb[5].mxu1 }
 0x13a   : > { %v953_v41 = vadd.f32 %v1469_v21, %v1395_v35  ;;  %v1398_v42 = vadd.f32 %v1397_v39, %v1396_v36  ;;  %v1474_v43 = vpop.f32.mrb[6].mxu1 }
 0x13b   : > { %v963_v45 = vpop.f32.mrb[7].mxu1 }
 0x13c   : > { %v1009_v46 = vadd.f32 %v953_v41, %v479_v38  ;;  %v956_v47 = vadd.f32 %v1470_v27, %v1398_v42 }
 0x13e   : > { %1026 = vst.msk [vmem:[#allocation2 + $0x10] sm:$0xff] %vm1023_vm1, %v1009_v46  ;;  %v1010_v48 = vadd.f32 %v956_v47, %v480_v44  ;;  %v1399_v49 = vpop.f32.mrb[8].mxu0  ;;  %v489_v46 = vld [vmem:[#allocation2 + $0x60] sm:$0xff] }
 0x13f   : > { %v1400_v50 = vpop.f32.mrb[9].mxu0 }
 0x140   : > { %1027 = vst.msk [vmem:[#allocation2 + $0x18] sm:$0xff] %vm1023_vm1, %v1010_v48  ;;  %v1401_v51 = vadd.f32 %v1400_v50, %v1399_v49  ;;  %v1402_v52 = vpop.f32.mrb[10].mxu0  ;;  %v1477_v53 = vpop.f32.mrb[8].mxu1  ;;  %v490_v49 = vld [vmem:[#allocation2 + $0x68] sm:$0xff] }
 0x141   : > { %v1403_v54 = vpop.f32.mrb[11].mxu0  ;;  %v976_v56 = vpop.f32.mrb[9].mxu1 }
 0x142   : > { %v1404_v57 = vadd.f32 %v1403_v54, %v1402_v52  ;;  %v961_v58 = vadd.f32 %v1401_v51, %v960_v40  ;;  %v1478_v59 = vpop.f32.mrb[10].mxu1 }
 0x143   : > { %v979_v61 = vpop.f32.mrb[11].mxu1 }
 0x144   : > { %v1011_v62 = vadd.f32 %v961_v58, %v481_v55  ;;  %v964_v63 = vadd.f32 %v1404_v57, %v963_v45  ;;  %v491_v57 = vld [vmem:[#allocation2 + $0x70] sm:$0xff] }
 0x146   : > { %1028 = vst.msk [vmem:[#allocation2 + $0x20] sm:$0xff] %vm1023_vm1, %v1011_v62  ;;  %v1012_v0 = vadd.f32 %v964_v63, %v482_v60  ;;  %v1405_v1 = vpop.f32.mrb[12].mxu0 }
 0x147   : > { %v1406_v2 = vpop.f32.mrb[13].mxu0 }
 0x148   : > { %1029 = vst.msk [vmem:[#allocation2 + $0x28] sm:$0xff] %vm1023_vm1, %v1012_v0  ;;  %v1407_v3 = vadd.f32 %v1406_v2, %v1405_v1  ;;  %v1408_v4 = vpop.f32.mrb[14].mxu0  ;;  %v1481_v5 = vpop.f32.mrb[12].mxu1  ;;  %v1044_v1 = vld [vmem:[#allocation2] sm:$0xff] (!%p1333_p11)  ;;  %v1045_v2 = vld [vmem:[#allocation2 + $0x8] sm:$0xff] (!%p1333_p11) }
 0x149   : > { %v1409_v7 = vpop.f32.mrb[15].mxu0  ;;  %v992_v8 = vpop.f32.mrb[13].mxu1 }
 0x14a   : > { %v969_v9 = vadd.f32 %v1473_v37, %v1407_v3  ;;  %v1410_v10 = vadd.f32 %v1409_v7, %v1408_v4  ;;  %v1482_v11 = vpop.f32.mrb[14].mxu1  ;;  %v488_v37 = vld [vmem:[#allocation2 + $0x58] sm:$0xff]  ;;  %v1046_v3 = vld [vmem:[#allocation2 + $0x10] sm:$0xff] (!%p1333_p11)  ;;  %v1355_v4 = vpack.c.bf16 (!%p1333_p11), %v1044_v1, %v1044_v1 }
 0x14b   : > { %v995_v13 = vpop.f32.mrb[15].mxu1  ;;  %v1357_v7 = vpack.c.bf16 (!%p1333_p11), %v1046_v3, %v1046_v3 }
 0x14c   : > { %v1013_v14 = vadd.f32 %v969_v9, %v483_v6  ;;  %v972_v15 = vadd.f32 %v1474_v43, %v1410_v10  ;;  %v1356_v6 = vpack.c.bf16 (!%p1333_p11), %v1045_v2, %v1045_v2  ;;  %1125 = vst.msk [vmem:[%s1947_s6] sm:$0xf] (!%p1333_p11), %vm1124_vm2, %v1355_v4 }
 0x14d   : > { %1127 = vst.msk [vmem:[%s1947_s6 + $0x8] sm:$0xf] (!%p1333_p11), %vm1124_vm2, %v1357_v7 }
 0x14e   : > { %1030 = vst.msk [vmem:[#allocation2 + $0x30] sm:$0xff] %vm1023_vm1, %v1013_v14  ;;  %v1014_v16 = vadd.f32 %v972_v15, %v484_v12  ;;  %v1411_v17 = vpop.f32.mrb[16].mxu0 }
 0x14f   : > { %v1412_v18 = vpop.f32.mrb[17].mxu0  ;;  %v1049_v9 = vld [vmem:[#allocation2 + $0x28] sm:$0xff] (!%p1333_p11)  ;;  %1126 = vst.msk [vmem:[%s1947_s6 + $0x4] sm:$0xf] (!%p1333_p11), %vm1124_vm2, %v1356_v6 }
 0x150   : > { %1031 = vst.msk [vmem:[#allocation2 + $0x38] sm:$0xff] %vm1023_vm1, %v1014_v16  ;;  %v1413_v19 = vadd.f32 %v1412_v18, %v1411_v17  ;;  %v1414_v20 = vpop.f32.mrb[18].mxu0  ;;  %v1360_v12 = vpack.c.bf16 (!%p1333_p11), %v1049_v9, %v1049_v9 }
 0x151   : > { %v1415_v21 = vpop.f32.mrb[19].mxu0 }
 0x152   : > { %v1416_v23 = vadd.f32 %v1415_v21, %v1414_v20  ;;  %v977_v24 = vadd.f32 %v1413_v19, %v976_v56  ;;  %1130 = vst.msk [vmem:[%s1947_s6 + $0x14] sm:$0xf] (!%p1333_p11), %vm1124_vm2, %v1360_v12 }
 0x154   : > { %v1015_v26 = vadd.f32 %v977_v24, %v485_v22  ;;  %v980_v27 = vadd.f32 %v1416_v23, %v979_v61  ;;  %v492_v61 = vld [vmem:[#allocation2 + $0x78] sm:$0xff] }
 0x156   : > { %1032 = vst.msk [vmem:[#allocation2 + $0x40] sm:$0xff] %vm1023_vm1, %v1015_v26  ;;  %v1016_v28 = vadd.f32 %v980_v27, %v486_v25  ;;  %v1417_v29 = vpop.f32.mrb[20].mxu0 }
 0x157   : > { %v1418_v30 = vpop.f32.mrb[21].mxu0  ;;  %v1051_v14 = vld [vmem:[#allocation2 + $0x38] sm:$0xff] (!%p1333_p11) }
 0x158   : > { %1033 = vst.msk [vmem:[#allocation2 + $0x48] sm:$0xff] %vm1023_vm1, %v1016_v28  ;;  %v1419_v31 = vadd.f32 %v1418_v30, %v1417_v29  ;;  %v1420_v32 = vpop.f32.mrb[22].mxu0  ;;  %v1362_v17 = vpack.c.bf16 (!%p1333_p11), %v1051_v14, %v1051_v14 }
 0x159   : > { %v1421_v34 = vpop.f32.mrb[23].mxu0 }
 0x15a   : > { %v985_v35 = vadd.f32 %v1477_v53, %v1419_v31  ;;  %v1422_v36 = vadd.f32 %v1421_v34, %v1420_v32  ;;  %1132 = vst.msk [vmem:[%s1947_s6 + $0x1c] sm:$0xf] (!%p1333_p11), %vm1124_vm2, %v1362_v17 }
 0x15c   : > { %v1017_v38 = vadd.f32 %v985_v35, %v487_v33  ;;  %v988_v39 = vadd.f32 %v1478_v59, %v1422_v36 }
 0x15d   : > { %v1052_v15 = vld [vmem:[#allocation2 + $0x40] sm:$0xff] (!%p1333_p11) }
 0x15e   : > { %1034 = vst.msk [vmem:[#allocation2 + $0x50] sm:$0xff] %vm1023_vm1, %v1017_v38  ;;  %v1018_v40 = vadd.f32 %v988_v39, %v488_v37  ;;  %v1423_v41 = vpop.f32.mrb[24].mxu0  ;;  %v1363_v18 = vpack.c.bf16 (!%p1333_p11), %v1052_v15, %v1052_v15 }
 0x15f   : > { %v1424_v42 = vpop.f32.mrb[25].mxu0  ;;  %v1053_v19 = vld [vmem:[#allocation2 + $0x48] sm:$0xff] (!%p1333_p11) }
 0x160   : > { %1035 = vst.msk [vmem:[#allocation2 + $0x58] sm:$0xff] %vm1023_vm1, %v1018_v40  ;;  %v1425_v43 = vadd.f32 %v1424_v42, %v1423_v41  ;;  %v1426_v44 = vpop.f32.mrb[26].mxu0  ;;  %v1364_v22 = vpack.c.bf16 (!%p1333_p11), %v1053_v19, %v1053_v19 }
 0x161   : > { %v1427_v45 = vpop.f32.mrb[27].mxu0  ;;  %1133 = vst.msk [vmem:[%s1947_s6 + $0x20] sm:$0xf] (!%p1333_p11), %vm1124_vm2, %v1363_v18 }
 0x162   : > { %v1428_v47 = vadd.f32 %v1427_v45, %v1426_v44  ;;  %v993_v48 = vadd.f32 %v1425_v43, %v992_v8  ;;  %v1048_v8 = vld [vmem:[#allocation2 + $0x20] sm:$0xff] (!%p1333_p11)  ;;  %1134 = vst.msk [vmem:[%s1947_s6 + $0x24] sm:$0xf] (!%p1333_p11), %vm1124_vm2, %v1364_v22 }
 0x164   : > { %v1019_v50 = vadd.f32 %v993_v48, %v489_v46  ;;  %v996_v51 = vadd.f32 %v1428_v47, %v995_v13  ;;  %v1050_v13 = vld [vmem:[#allocation2 + $0x30] sm:$0xff] (!%p1333_p11) }
 0x165   : > { %v1361_v16 = vpack.c.bf16 (!%p1333_p11), %v1050_v13, %v1050_v13  ;;  %v1054_v20 = vld [vmem:[#allocation2 + $0x50] sm:$0xff] (!%p1333_p11) }
 0x166   : > { %1036 = vst.msk [vmem:[#allocation2 + $0x60] sm:$0xff] %vm1023_vm1, %v1019_v50  ;;  %v1020_v52 = vadd.f32 %v996_v51, %v490_v49  ;;  %v1429_v53 = vpop.f32.mrb[28].mxu0  ;;  %v1365_v23 = vpack.c.bf16 (!%p1333_p11), %v1054_v20, %v1054_v20 }
 0x167   : > { %v1430_v54 = vpop.f32.mrb[29].mxu0  ;;  %v1055_v21 = vld [vmem:[#allocation2 + $0x58] sm:$0xff] (!%p1333_p11)  ;;  %1131 = vst.msk [vmem:[%s1947_s6 + $0x18] sm:$0xf] (!%p1333_p11), %vm1124_vm2, %v1361_v16 }
 0x168   : > { %1037 = vst.msk [vmem:[#allocation2 + $0x68] sm:$0xff] %vm1023_vm1, %v1020_v52  ;;  %v1431_v55 = vadd.f32 %v1430_v54, %v1429_v53  ;;  %v1432_v56 = vpop.f32.mrb[30].mxu0  ;;  %v1366_v24 = vpack.c.bf16 (!%p1333_p11), %v1055_v21, %v1055_v21 }
 0x169   : > { %v1433_v58 = vpop.f32.mrb[31].mxu0  ;;  %1135 = vst.msk [vmem:[%s1947_s6 + $0x28] sm:$0xf] (!%p1333_p11), %vm1124_vm2, %v1365_v23 }
 0x16a   : > { %v1001_v59 = vadd.f32 %v1481_v5, %v1431_v55  ;;  %v1434_v60 = vadd.f32 %v1433_v58, %v1432_v56  ;;  %1043 = sbr.rel (%p1333_p11) target bundleno = 379 (0x17b), region = 78  ;;  %v1047_v5 = vld [vmem:[#allocation2 + $0x18] sm:$0xff] (!%p1333_p11)  ;;  %1136 = vst.msk [vmem:[%s1947_s6 + $0x2c] sm:$0xf] (!%p1333_p11), %vm1124_vm2, %v1366_v24 }
 0x16b   : > { %v1358_v10 = vpack.c.bf16 (!%p1333_p11), %v1047_v5, %v1047_v5 }
 0x16c   : > { %v1021_v62 = vadd.f32 %v1001_v59, %v491_v57  ;;  %v1004_v63 = vadd.f32 %v1482_v11, %v1434_v60  ;;  %v1359_v11 = vpack.c.bf16 (!%p1333_p11), %v1048_v8, %v1048_v8 }
 0x16d   : > { %1128 = vst.msk [vmem:[%s1947_s6 + $0xc] sm:$0xf] (!%p1333_p11), %vm1124_vm2, %v1358_v10  ;;  %v1056_v25 = vld [vmem:[#allocation2 + $0x60] sm:$0xff] (!%p1333_p11) }
 0x16e   : > { %1038 = vst.msk [vmem:[#allocation2 + $0x70] sm:$0xff] %vm1023_vm1, %v1021_v62  ;;  %v1022_v0 = vadd.f32 %v1004_v63, %v492_v61  ;;  %v1367_v28 = vpack.c.bf16 (!%p1333_p11), %v1056_v25, %v1056_v25 }
 0x16f   : > { %1129 = vst.msk [vmem:[%s1947_s6 + $0x10] sm:$0xf] (!%p1333_p11), %vm1124_vm2, %v1359_v11  ;;  %v1057_v26 = vld [vmem:[#allocation2 + $0x68] sm:$0xff] (!%p1333_p11) }
 0x170   : > { %1039 = vst.msk [vmem:[#allocation2 + $0x78] sm:$0xff] %vm1023_vm1, %v1022_v0  ;;  %v1368_v29 = vpack.c.bf16 (!%p1333_p11), %v1057_v26, %v1057_v26 }
 0x171   : > { %1137 = vst.msk [vmem:[%s1947_s6 + $0x30] sm:$0xf] %vm1124_vm2, %v1367_v28 }
 0x172   : > { %1138 = vst.msk [vmem:[%s1947_s6 + $0x34] sm:$0xf] %vm1124_vm2, %v1368_v29 }
 0x175   : > { %v1058_v27 = vld [vmem:[#allocation2 + $0x70] sm:$0xff] }
 0x176   : > { %v1369_v30 = vpack.c.bf16 %v1058_v27, %v1058_v27 }
 0x177   : > { %v1059_v31 = vld [vmem:[#allocation2 + $0x78] sm:$0xff] }
 0x178   : > { %v1370_v32 = vpack.c.bf16 %v1059_v31, %v1059_v31  ;;  %1139 = vst.msk [vmem:[%s1947_s6 + $0x38] sm:$0xf] %vm1124_vm2, %v1369_v30 }
 0x17a   : > { %1140 = vst.msk [vmem:[%s1947_s6 + $0x3c] sm:$0xf] %vm1124_vm2, %v1370_v32 }
 0x17b PF: > { %s16_s2 = sadd.s32 1, %s1620_s2   ;;  %s1948_s21 = smov %s1608_s22 }
 0x17c   : > { %p13_p12 = scmp.ge.s32.totalorder %s16_s2, 5   ;;  %s1949_s22 = smov %s1693_s25 }
 0x17d   : > { %s1950_s23 = smov %s1616_s24  ;;  %s1951_s24 = smov %s1953_s3 }
 0x17e   :  { %15 = sbr.rel (!%p13_p12) target bundleno = 3 (0x3), region = 128 }

// kernel: densenet121_features.139
= control target key start
LH: loop header
LB: loop body
LE: loop exit
PB: predicated region body
PF: predicated region fallthrough
CT: control target
= control target key end

     0   :  { %v94_v5 = vlaneseq  ;;  %s1032_s1 = inlined_call_operand.vmem [shape: bf16[256,128], index: 1, kind: input, shape index: {}]   ;;  %s1033_s4 = inlined_call_operand.vmem [shape: f32[1,128], index: 4, kind: input, shape index: {}, may-alias: {4,5}]   ;;  %s1034_s5 = inlined_call_operand.vmem [shape: f32[1,128], index: 5, kind: input, shape index: {}, may-alias: {4,5}]   ;;  %s1035_s0 = inlined_call_operand.vmem [shape: bf16[128,256], index: 0, kind: input, shape index: {}]   ;;  %s1036_s2 = inlined_call_operand.vmem [shape: f32[1,256], index: 2, kind: input, shape index: {}]   ;;  %s1037_s3 = inlined_call_operand.vmem [shape: f32[1,256], index: 3, kind: input, shape index: {}]   ;;  %s1038_s6 = inlined_call_operand.vmem [shape: bf16[128,128], index: 6, kind: output, shape index: {}]  }
   0x1   :  { %v779_v0 = vld [vmem:[%s1032_s1 + $0x40] sm:$0xff]   ;;  %v781_v2 = vld [vmem:[%s1032_s1 + $0x48] sm:$0xff]   ;;  %v783_v4 = vld [vmem:[%s1032_s1 + $0x50] sm:$0xff]  }
   0x2   :  { %v780_v1 = vld [vmem:[%s1032_s1] sm:$0xff]   ;;  %699 = vmatprep.subr.bf16.mxu0 %v779_v0  ;;  %763 = vmatprep.subr.bf16.mxu1 %v779_v0  ;;  %v782_v3 = vld [vmem:[%s1032_s1 + $0x8] sm:$0xff]   ;;  %v784_v6 = vld [vmem:[%s1032_s1 + $0x10] sm:$0xff]   ;;  %v95_v8 = vshrl.u32 %v94_v5, 7 }
   0x3   :  { %700 = vmatpush3.bf16.msra.mxu0 %v780_v1  ;;  %771 = vmatpush3.bf16.msra.mxu1 %v780_v1  ;;  %v785_v7 = vld [vmem:[%s1032_s1 + $0x58] sm:$0xff]   ;;  %v787_v10 = vld [vmem:[%s1032_s1 + $0x60] sm:$0xff]   ;;  %v789_v14 = vld [vmem:[%s1032_s1 + $0x68] sm:$0xff]  }
   0x4   :  { %701 = vmatprep.subr.bf16.mxu0 %v781_v2  ;;  %764 = vmatprep.subr.bf16.mxu1 %v781_v2  ;;  %v786_v9 = vld [vmem:[%s1032_s1 + $0x18] sm:$0xff]   ;;  %v96_v11 = vsub.s32 0, %v95_v8  ;;  %v788_v12 = vld [vmem:[%s1032_s1 + $0x20] sm:$0xff]   ;;  %v100_v13 = vsub.s32 1, %v95_v8  ;;  %v45_v16 = vld [vmem:[%s1035_s0 + $0x8] sm:$0xff] }
   0x5   :  { %v44_v15 = vld [vmem:[%s1035_s0] sm:$0xff]  ;;  %v62_v20 = vunpack.c.l.bf16 %v45_v16  ;;  %v63_v21 = vunpack.c.h.bf16 %v45_v16  ;;  %v53_v24 = vld [vmem:[%s1035_s0 + $0x48] sm:$0xff]  ;;  %v892_v29 = vld [vmem:[%s1035_s0 + $0x10] sm:$0xff] }
   0x6   :  { %v92_v17 = vld [vmem:[%s1036_s2] sm:$0x3]  ;;  %v60_v18 = vunpack.c.l.bf16 %v44_v15  ;;  %v61_v19 = vunpack.c.h.bf16 %v44_v15  ;;  %v790_v30 = vld [vmem:[%s1032_s1 + $0x28] sm:$0xff]   ;;  %v78_v33 = vunpack.c.l.bf16 %v53_v24  ;;  %v79_v34 = vunpack.c.h.bf16 %v53_v24  ;;  %v791_v35 = vld [vmem:[%s1032_s1 + $0x70] sm:$0xff]  }
   0x7   :  { %702 = vmatpush3.bf16.msra.mxu0 %v782_v3  ;;  %772 = vmatpush3.bf16.msra.mxu1 %v782_v3  ;;  %v136_v22 = vld [vmem:[%s1037_s3] sm:$0x3]  ;;  %v881_v25 = vrot.slane %v92_v17, %v96_v11  ;;  %v883_v26 = vrot.slane %v92_v17, %v100_v13  ;;  %v47_v39 = vld [vmem:[%s1035_s0 + $0x18] sm:$0xff]  ;;  %v65_v40 = vunpack.c.h.bf16 %v892_v29  ;;  %v792_v49 = vld [vmem:[%s1032_s1 + $0x30] sm:$0xff]  }
   0x8   :  { %703 = vmatprep.subr.bf16.mxu0 %v783_v4  ;;  %765 = vmatprep.subr.bf16.mxu1 %v783_v4  ;;  %v52_v23 = vld [vmem:[%s1035_s0 + $0x40] sm:$0xff]  ;;  %v885_v27 = vrot.slane %v136_v22, %v96_v11  ;;  %v887_v28 = vrot.slane %v136_v22, %v100_v13  ;;  %v67_v53 = vunpack.c.h.bf16 %v47_v39  ;;  %v793_v54 = vld [vmem:[%s1032_s1 + $0x78] sm:$0xff]   ;;  %v54_v59 = vld [vmem:[%s1035_s0 + $0x50] sm:$0xff]  ;;  %v64_v13 = vunpack.c.l.bf16 %v892_v29 }
   0x9   :  { %v76_v31 = vunpack.c.l.bf16 %v52_v23  ;;  %v77_v32 = vunpack.c.h.bf16 %v52_v23  ;;  %v105_v36 = vmul.f32 %v883_v26, %v61_v19  ;;  %v107_v37 = vmul.f32 %v883_v26, %v63_v21  ;;  %v55_v0 = vld [vmem:[%s1035_s0 + $0x58] sm:$0xff] }
   0xa   :  { %v104_v38 = vmul.f32 %v881_v25, %v60_v18  ;;  %v123_v42 = vmul.f32 %v883_v26, %v79_v34  ;;  %v106_v43 = vmul.f32 %v881_v25, %v62_v20  ;;  %v122_v48 = vmul.f32 %v881_v25, %v78_v33  ;;  %v794_v5 = vld [vmem:[%s1032_s1 + $0x38] sm:$0xff]   ;;  %v48_v18 = vld [vmem:[%s1035_s0 + $0x20] sm:$0xff] }
   0xb   :  { %704 = vmatpush3.bf16.msra.mxu0 %v784_v6  ;;  %773 = vmatpush3.bf16.msra.mxu1 %v784_v6  ;;  %v121_v41 = vmul.f32 %v883_v26, %v77_v32  ;;  %v120_v44 = vmul.f32 %v881_v25, %v76_v31  ;;  %v149_v45 = vadd.f32 %v887_v28, %v105_v36  ;;  %v66_v16 = vunpack.c.l.bf16 %v47_v39  ;;  %v49_v31 = vld [vmem:[%s1035_s0 + $0x28] sm:$0xff]  ;;  %v56_v36 = vld [vmem:[%s1035_s0 + $0x60] sm:$0xff] }
   0xc   :  { %705 = vmatprep.subr.bf16.mxu0 %v785_v7  ;;  %766 = vmatprep.subr.bf16.mxu1 %v785_v7  ;;  %v151_v46 = vadd.f32 %v887_v28, %v107_v37  ;;  %v148_v47 = vadd.f32 %v885_v27, %v104_v38  ;;  %v167_v51 = vadd.f32 %v887_v28, %v123_v42  ;;  %v80_v17 = vunpack.c.l.bf16 %v54_v59 }
   0xd   :  { %v165_v50 = vadd.f32 %v887_v28, %v121_v41  ;;  %v150_v52 = vadd.f32 %v885_v27, %v106_v43  ;;  %v181_v55 = vmax.f32 %v149_v45, 0.0  ;;  %v164_v58 = vadd.f32 %v885_v27, %v120_v44  ;;  %v57_v41 = vld [vmem:[%s1035_s0 + $0x68] sm:$0xff] }
   0xe   :  { %v183_v56 = vmax.f32 %v151_v46, 0.0  ;;  %v180_v57 = vmax.f32 %v148_v47, 0.0  ;;  %v199_v61 = vmax.f32 %v167_v51, 0.0  ;;  %v166_v63 = vadd.f32 %v885_v27, %v122_v48 }
   0xf   :  { %706 = vmatpush3.bf16.msra.mxu0 %v786_v9  ;;  %774 = vmatpush3.bf16.msra.mxu1 %v786_v9  ;;  %v197_v60 = vmax.f32 %v165_v50, 0.0  ;;  %v182_v62 = vmax.f32 %v150_v52, 0.0  ;;  %v196_v2 = vmax.f32 %v164_v58, 0.0  ;;  %v109_v3 = vmul.f32 %v883_v26, %v65_v40 }
  0x10   :  { %707 = vmatprep.subr.bf16.mxu0 %v787_v10  ;;  %767 = vmatprep.subr.bf16.mxu1 %v787_v10  ;;  %v213_v1 = vpack.c.bf16 %v183_v56, %v181_v55  ;;  %v111_v4 = vmul.f32 %v883_v26, %v67_v53  ;;  %v198_v8 = vmax.f32 %v166_v63, 0.0  ;;  %v81_v9 = vunpack.c.h.bf16 %v54_v59 }
  0x11   :  { %v221_v6 = vpack.c.bf16 %v199_v61, %v197_v60  ;;  %v212_v7 = vpack.c.bf16 %v182_v62, %v180_v57  ;;  %v153_v10 = vadd.f32 %v887_v28, %v109_v3  ;;  %v108_v22 = vmul.f32 %v881_v25, %v64_v13  ;;  %v50_v62 = vld [vmem:[%s1035_s0 + $0x30] sm:$0xff] }
  0x12   :  { %v155_v11 = vadd.f32 %v887_v28, %v111_v4  ;;  %404 = vmatprep.mubr.bf16.mxu0 %v213_v1  ;;  %v125_v15 = vmul.f32 %v883_v26, %v81_v9  ;;  %v110_v24 = vmul.f32 %v881_v25, %v66_v16  ;;  %v82_v29 = vunpack.c.l.bf16 %v55_v0 }
  0x13   :  { %708 = vmatpush3.bf16.msra.mxu0 %v788_v12  ;;  %775 = vmatpush3.bf16.msra.mxu1 %v788_v12  ;;  %v83_v12 = vunpack.c.h.bf16 %v55_v0  ;;  %v185_v19 = vmax.f32 %v153_v10, 0.0  ;;  %v152_v34 = vadd.f32 %v885_v27, %v108_v22  ;;  %v71_v44 = vunpack.c.h.bf16 %v49_v31 }
  0x14   :  { %709 = vmatprep.subr.bf16.mxu0 %v789_v14  ;;  %768 = vmatprep.subr.bf16.mxu1 %v789_v14  ;;  %v220_v14 = vpack.c.bf16 %v198_v8, %v196_v2  ;;  %v187_v20 = vmax.f32 %v155_v11, 0.0  ;;  %v169_v23 = vadd.f32 %v887_v28, %v125_v15  ;;  %v154_v38 = vadd.f32 %v885_v27, %v110_v24 }
  0x15   :  { %436 = vmatprep.mubr.bf16.mxu1 %v221_v6  ;;  %v127_v21 = vmul.f32 %v883_v26, %v83_v12  ;;  %v126_v39 = vmul.f32 %v881_v25, %v82_v29  ;;  %v184_v43 = vmax.f32 %v152_v34, 0.0  ;;  %v115_v51 = vmul.f32 %v883_v26, %v71_v44  ;;  %v58_v12 = vld [vmem:[%s1035_s0 + $0x70] sm:$0xff] }
  0x16   :  { %v215_v32 = vpack.c.bf16 %v187_v20, %v185_v19  ;;  %v201_v37 = vmax.f32 %v169_v23, 0.0  ;;  %v186_v46 = vmax.f32 %v154_v38, 0.0  ;;  %v87_v53 = vunpack.c.h.bf16 %v57_v41 }
  0x17   :  { %710 = vmatpush3.bf16.msra.mxu0 %v790_v30  ;;  %776 = vmatpush3.bf16.msra.mxu1 %v790_v30  ;;  %v124_v30 = vmul.f32 %v881_v25, %v80_v17  ;;  %v171_v33 = vadd.f32 %v887_v28, %v127_v21  ;;  %v170_v47 = vadd.f32 %v885_v27, %v126_v39  ;;  %v68_v57 = vunpack.c.l.bf16 %v48_v18  ;;  %v59_v17 = vld [vmem:[%s1035_s0 + $0x78] sm:$0xff] }
  0x18   :  { %711 = vmatprep.subr.bf16.mxu0 %v791_v35  ;;  %769 = vmatprep.subr.bf16.mxu1 %v791_v35  ;;  %v69_v35 = vunpack.c.h.bf16 %v48_v18  ;;  %v159_v58 = vadd.f32 %v887_v28, %v115_v51  ;;  %v131_v60 = vmul.f32 %v883_v26, %v87_v53  ;;  %v70_v61 = vunpack.c.l.bf16 %v49_v31 }
  0x19   :  { %v168_v40 = vadd.f32 %v885_v27, %v124_v30  ;;  %v203_v42 = vmax.f32 %v171_v33, 0.0  ;;  %v202_v55 = vmax.f32 %v170_v47, 0.0  ;;  %v112_v1 = vmul.f32 %v881_v25, %v68_v57 }
  0x1a   :  { %v113_v45 = vmul.f32 %v883_v26, %v69_v35  ;;  %v84_v2 = vunpack.c.l.bf16 %v56_v36  ;;  %v191_v3 = vmax.f32 %v159_v58, 0.0  ;;  %v175_v4 = vadd.f32 %v887_v28, %v131_v60 }
  0x1b   :  { %712 = vmatpush3.bf16.msra.mxu0 %v792_v49  ;;  %777 = vmatpush3.bf16.msra.mxu1 %v792_v49  ;;  %v200_v48 = vmax.f32 %v168_v40, 0.0  ;;  %v85_v49 = vunpack.c.h.bf16 %v56_v36  ;;  %v223_v50 = vpack.c.bf16 %v203_v42, %v201_v37  ;;  %v86_v6 = vunpack.c.l.bf16 %v57_v41 }
  0x1c   :  { %713 = vmatprep.subr.bf16.mxu0 %v793_v54  ;;  %770 = vmatprep.subr.bf16.mxu1 %v793_v54  ;;  %v157_v52 = vadd.f32 %v887_v28, %v113_v45  ;;  %v214_v54 = vpack.c.bf16 %v186_v46, %v184_v43  ;;  %v156_v9 = vadd.f32 %v885_v27, %v112_v1  ;;  %v73_v11 = vunpack.c.h.bf16 %v50_v62 }
  0x1d   :  { %v129_v56 = vmul.f32 %v883_v26, %v85_v49  ;;  %v222_v63 = vpack.c.bf16 %v202_v55, %v200_v48  ;;  %v128_v10 = vmul.f32 %v881_v25, %v84_v2  ;;  %v130_v16 = vmul.f32 %v881_v25, %v86_v6 }
  0x1e   :  { %v189_v59 = vmax.f32 %v157_v52, 0.0  ;;  %v188_v18 = vmax.f32 %v156_v9, 0.0  ;;  %v117_v21 = vmul.f32 %v883_v26, %v73_v11  ;;  %v89_v29 = vunpack.c.h.bf16 %v58_v12 }
  0x1f   :  { %714 = vmatpush3.bf16.msra.mxu0 %v794_v5  ;;  %778 = vmatpush3.bf16.msra.mxu1 %v794_v5  ;;  %v173_v0 = vadd.f32 %v887_v28, %v129_v56  ;;  %v114_v5 = vmul.f32 %v881_v25, %v70_v61  ;;  %v172_v19 = vadd.f32 %v885_v27, %v128_v10  ;;  %v91_v33 = vunpack.c.h.bf16 %v59_v17 }
  0x20   :  { %v217_v13 = vpack.c.bf16 %v191_v3, %v189_v59  ;;  %v174_v24 = vadd.f32 %v885_v27, %v130_v16  ;;  %v133_v36 = vmul.f32 %v883_v26, %v89_v29  ;;  %v72_v37 = vunpack.c.l.bf16 %v50_v62 }
  0x21   :  { %v205_v8 = vmax.f32 %v173_v0, 0.0  ;;  %v158_v15 = vadd.f32 %v885_v27, %v114_v5  ;;  %v204_v30 = vmax.f32 %v172_v19, 0.0  ;;  %v135_v40 = vmul.f32 %v883_v26, %v91_v33 }
  0x22   :  { %405 = vmatmul.mubr.bf16.vlgmr.msra.gmra.mrb[0].mxu0 %v212_v7  ;;  %437 = vmatmul.mubr.bf16.vlgmr.msra.gmra.mrb[0].mxu1 %v220_v14  ;;  %v51_v7 = vld [vmem:[%s1035_s0 + $0x38] sm:$0xff]  ;;  %v207_v14 = vmax.f32 %v175_v4, 0.0  ;;  %v206_v35 = vmax.f32 %v174_v24, 0.0  ;;  %v177_v43 = vadd.f32 %v887_v28, %v133_v36  ;;  %v116_v44 = vmul.f32 %v881_v25, %v72_v37 }
  0x23   :  { %412 = vmatprep.mubr.bf16.mxu0 %v215_v32  ;;  %444 = vmatprep.mubr.bf16.mxu1 %v223_v50  ;;  %v75_v20 = vunpack.c.h.bf16 %v51_v7  ;;  %v190_v23 = vmax.f32 %v158_v15, 0.0  ;;  %v161_v32 = vadd.f32 %v887_v28, %v117_v21  ;;  %v74_v41 = vunpack.c.l.bf16 %v51_v7 }
  0x24   :  { %v225_v22 = vpack.c.bf16 %v207_v14, %v205_v8  ;;  %v224_v42 = vpack.c.bf16 %v206_v35, %v204_v30  ;;  %v88_v45 = vunpack.c.l.bf16 %v58_v12  ;;  %v179_v47 = vadd.f32 %v887_v28, %v135_v40 }
  0x25   :  { %v119_v31 = vmul.f32 %v883_v26, %v75_v20  ;;  %v216_v34 = vpack.c.bf16 %v190_v23, %v188_v18  ;;  %v193_v39 = vmax.f32 %v161_v32, 0.0  ;;  %v118_v48 = vmul.f32 %v881_v25, %v74_v41 }
  0x26   :  { %v90_v49 = vunpack.c.l.bf16 %v59_v17  ;;  %v209_v50 = vmax.f32 %v177_v43, 0.0  ;;  %v160_v51 = vadd.f32 %v885_v27, %v116_v44  ;;  %v132_v26 = vmul.f32 %v881_v25, %v88_v45 }
  0x27   :  { %v163_v38 = vadd.f32 %v887_v28, %v119_v31  ;;  %v211_v53 = vmax.f32 %v179_v47, 0.0 }
  0x28   :  { %v134_v55 = vmul.f32 %v881_v25, %v90_v49  ;;  %v192_v56 = vmax.f32 %v160_v51, 0.0  ;;  %v176_v57 = vadd.f32 %v885_v27, %v132_v26 }
  0x29   :  { %v195_v46 = vmax.f32 %v163_v38, 0.0  ;;  %v227_v28 = vpack.c.bf16 %v211_v53, %v209_v50 }
  0x2a   :  { %413 = vmatmul.mubr.bf16.gmra.mrb[4].mxu0 %v214_v54  ;;  %445 = vmatmul.mubr.bf16.gmra.mrb[4].mxu1 %v222_v63  ;;  %v162_v54 = vadd.f32 %v885_v27, %v118_v48  ;;  %v178_v59 = vadd.f32 %v885_v27, %v134_v55  ;;  %v208_v60 = vmax.f32 %v176_v57, 0.0 }
  0x2b   :  { %420 = vmatprep.mubr.bf16.mxu0 %v217_v13  ;;  %452 = vmatprep.mubr.bf16.mxu1 %v225_v22  ;;  %v219_v52 = vpack.c.bf16 %v195_v46, %v193_v39 }
  0x2c   :  { %v194_v58 = vmax.f32 %v162_v54, 0.0  ;;  %v210_v62 = vmax.f32 %v178_v59, 0.0 }
  0x2e   :  { %v218_v61 = vpack.c.bf16 %v194_v58, %v192_v56  ;;  %v226_v63 = vpack.c.bf16 %v210_v62, %v208_v60 }
  0x32   :  { %421 = vmatmul.mubr.bf16.gmra.mrb[8].mxu0 %v216_v34  ;;  %453 = vmatmul.mubr.bf16.gmra.mrb[8].mxu1 %v224_v42 }
  0x33   :  { %428 = vmatprep.mubr.bf16.mxu0 %v219_v52  ;;  %460 = vmatprep.mubr.bf16.mxu1 %v227_v28 }
  0x3a   :  { %429 = vmatmul.mubr.bf16.gmra.mrb[12].mxu0 %v218_v61  ;;  %461 = vmatmul.mubr.bf16.gmra.mrb[12].mxu1 %v226_v63 }
  0xf5   :  { %v715_v0 = vpop.f32.mrb[0].mxu0  ;;  %v739_v1 = vpop.f32.mrb[0].mxu1 }
  0xf6   :  { %v716_v2 = vpop.f32.mrb[1].mxu0  ;;  %v740_v3 = vpop.f32.mrb[1].mxu1 }
  0xf7   :  { %v717_v25 = vadd.f32 %v716_v2, %v715_v0  ;;  %v741_v4 = vadd.f32 %v740_v3, %v739_v1  ;;  %v718_v5 = vpop.f32.mrb[2].mxu0  ;;  %v742_v6 = vpop.f32.mrb[2].mxu1 }
  0xf8   :  { %v719_v7 = vpop.f32.mrb[3].mxu0  ;;  %v743_v8 = vpop.f32.mrb[3].mxu1 }
  0xf9   :  { %v720_v9 = vadd.f32 %v719_v7, %v718_v5  ;;  %v744_v10 = vadd.f32 %v743_v8, %v742_v6 }
  0xfb   :  { %v655_v27 = vpack.c.bf16 %v720_v9, %v717_v25  ;;  %v675_v11 = vpack.c.bf16 %v744_v10, %v741_v4 }
  0xfd   :  { %656 = vst [vmem:[%s1038_s6] sm:$0xff] %v655_v27   ;;  %695 = vst [vmem:[%s1038_s6 + $0x20] sm:$0xff] %v675_v11   ;;  %v721_v12 = vpop.f32.mrb[4].mxu0  ;;  %v745_v13 = vpop.f32.mrb[4].mxu1 }
  0xfe   :  { %v722_v14 = vpop.f32.mrb[5].mxu0  ;;  %v746_v15 = vpop.f32.mrb[5].mxu1 }
  0xff   :  { %v723_v16 = vadd.f32 %v722_v14, %v721_v12  ;;  %v747_v17 = vadd.f32 %v746_v15, %v745_v13  ;;  %v724_v18 = vpop.f32.mrb[6].mxu0  ;;  %v748_v19 = vpop.f32.mrb[6].mxu1 }
 0x100   :  { %v725_v20 = vpop.f32.mrb[7].mxu0  ;;  %v749_v21 = vpop.f32.mrb[7].mxu1 }
 0x101   :  { %v726_v22 = vadd.f32 %v725_v20, %v724_v18  ;;  %v750_v23 = vadd.f32 %v749_v21, %v748_v19 }
 0x103   :  { %v660_v24 = vpack.c.bf16 %v726_v22, %v723_v16  ;;  %v680_v29 = vpack.c.bf16 %v750_v23, %v747_v17 }
 0x105   :  { %692 = vst [vmem:[%s1038_s6 + $0x8] sm:$0xff] %v660_v24   ;;  %696 = vst [vmem:[%s1038_s6 + $0x28] sm:$0xff] %v680_v29   ;;  %v727_v30 = vpop.f32.mrb[8].mxu0  ;;  %v751_v31 = vpop.f32.mrb[8].mxu1 }
 0x106   :  { %v728_v32 = vpop.f32.mrb[9].mxu0  ;;  %v752_v33 = vpop.f32.mrb[9].mxu1 }
 0x107   :  { %v729_v34 = vadd.f32 %v728_v32, %v727_v30  ;;  %v753_v35 = vadd.f32 %v752_v33, %v751_v31  ;;  %v730_v36 = vpop.f32.mrb[10].mxu0  ;;  %v754_v37 = vpop.f32.mrb[10].mxu1 }
 0x108   :  { %v731_v38 = vpop.f32.mrb[11].mxu0  ;;  %v755_v39 = vpop.f32.mrb[11].mxu1 }
 0x109   :  { %v732_v40 = vadd.f32 %v731_v38, %v730_v36  ;;  %v756_v41 = vadd.f32 %v755_v39, %v754_v37 }
 0x10b   :  { %v665_v42 = vpack.c.bf16 %v732_v40, %v729_v34  ;;  %v685_v43 = vpack.c.bf16 %v756_v41, %v753_v35 }
 0x10d   :  { %693 = vst [vmem:[%s1038_s6 + $0x10] sm:$0xff] %v665_v42   ;;  %697 = vst [vmem:[%s1038_s6 + $0x30] sm:$0xff] %v685_v43   ;;  %v733_v44 = vpop.f32.mrb[12].mxu0  ;;  %v757_v45 = vpop.f32.mrb[12].mxu1 }
 0x10e   :  { %v734_v46 = vpop.f32.mrb[13].mxu0  ;;  %v758_v48 = vpop.f32.mrb[13].mxu1 }
 0x10f   :  { %v735_v47 = vadd.f32 %v734_v46, %v733_v44  ;;  %v736_v49 = vpop.f32.mrb[14].mxu0  ;;  %v759_v50 = vadd.f32 %v758_v48, %v757_v45  ;;  %v760_v51 = vpop.f32.mrb[14].mxu1 }
 0x110   :  { %v737_v26 = vpop.f32.mrb[15].mxu0  ;;  %v761_v53 = vpop.f32.mrb[15].mxu1 }
 0x111   :  { %v738_v52 = vadd.f32 %v737_v26, %v736_v49  ;;  %v762_v54 = vadd.f32 %v761_v53, %v760_v51 }
 0x113   :  { %v670_v55 = vpack.c.bf16 %v738_v52, %v735_v47  ;;  %v690_v56 = vpack.c.bf16 %v762_v54, %v759_v50 }
 0x115   :  { %694 = vst [vmem:[%s1038_s6 + $0x18] sm:$0xff] %v670_v55   ;;  %698 = vst [vmem:[%s1038_s6 + $0x38] sm:$0xff] %v690_v56  }

// kernel: densenet121_features.141
= control target key start
LH: loop header
LB: loop body
LE: loop exit
PB: predicated region body
PF: predicated region fallthrough
CT: control target
= control target key end

     0   :  { %s411_s1 = inlined_call_operand.vmem [shape: bf16[128,128], index: 1, kind: input, shape index: {}]   ;;  %s412_s0 = inlined_call_operand.vmem [shape: bf16[32,128], index: 0, kind: input, shape index: {}]   ;;  %s413_s2 = inlined_call_operand.vmem [shape: f32[1,128], index: 2, kind: input, shape index: {}]   ;;  %s414_s3 = inlined_call_operand.vmem [shape: f32[1,128], index: 3, kind: input, shape index: {}]   ;;  %s415_s4 = inlined_call_operand.vmem [shape: f32[1,128], index: 4, kind: input, shape index: {}]   ;;  %s416_s5 = inlined_call_operand.vmem [shape: f32[1,128], index: 5, kind: input, shape index: {}]   ;;  %s417_s6 = inlined_call_operand.vmem [shape: bf16[32,128], index: 6, kind: output, shape index: {}]  }
   0x1   :  { %v320_v0 = vld [vmem:[%s411_s1] sm:$0xff]   ;;  %v321_v1 = vld [vmem:[%s411_s1 + $0x8] sm:$0xff]   ;;  %v322_v2 = vld [vmem:[%s411_s1 + $0x10] sm:$0xff]  }
   0x2   :  { %300 = vmatprep.subr.bf16.mxu0 %v320_v0  ;;  %v323_v3 = vld [vmem:[%s411_s1 + $0x18] sm:$0xff]   ;;  %v271_v4 = vld [vmem:[%s412_s0] sm:$0xff]   ;;  %v288_v9 = vld [vmem:[%s412_s0 + $0x8] sm:$0xff]  }
   0x3   :  { %301 = vmatpush3.bf16.msra.mxu0 %v320_v0  ;;  %v250_v5 = vld [vmem:[%s413_s2] ss:$0 sm:$0xff]  ;;  %v272_v6 = vunpack.c.l.bf16 %v271_v4  ;;  %v273_v7 = vunpack.c.h.bf16 %v271_v4  ;;  %v276_v15 = vunpack.c.l.bf16 %v288_v9  ;;  %v277_v16 = vunpack.c.h.bf16 %v288_v9  ;;  %v325_v19 = vld [vmem:[%s411_s1 + $0x28] sm:$0xff]   ;;  %v326_v23 = vld [vmem:[%s411_s1 + $0x30] sm:$0xff]  }
   0x4   :  { %302 = vmatprep.subr.bf16.mxu0 %v321_v1  ;;  %v251_v8 = vld [vmem:[%s414_s3] ss:$0 sm:$0xff]  ;;  %v327_v26 = vld [vmem:[%s411_s1 + $0x38] sm:$0xff]  }
   0x5   :  { %v47_v10 = vmul.f32 %v272_v6, %v250_v5  ;;  %v48_v11 = vmul.f32 %v273_v7, %v250_v5  ;;  %v324_v12 = vld [vmem:[%s411_s1 + $0x20] sm:$0xff]   ;;  %v49_v21 = vmul.f32 %v276_v15, %v250_v5  ;;  %v50_v22 = vmul.f32 %v277_v16, %v250_v5 }
   0x6   :  { %v260_v30 = vld [vmem:[%s415_s4] ss:$0 sm:$0xff] }
   0x7   :  { %303 = vmatpush3.bf16.msra.mxu0 %v321_v1  ;;  %v58_v13 = vadd.f32 %v251_v8, %v47_v10  ;;  %v59_v14 = vadd.f32 %v251_v8, %v48_v11  ;;  %v60_v24 = vadd.f32 %v251_v8, %v49_v21  ;;  %v61_v25 = vadd.f32 %v251_v8, %v50_v22  ;;  %v261_v32 = vld [vmem:[%s416_s5] ss:$0 sm:$0xff] }
   0x8   :  { %304 = vmatprep.subr.bf16.mxu0 %v322_v2 }
   0x9   :  { %v62_v17 = vmax.f32 %v58_v13, 0.0  ;;  %v63_v18 = vmax.f32 %v59_v14, 0.0  ;;  %v64_v27 = vmax.f32 %v60_v24, 0.0  ;;  %v65_v28 = vmax.f32 %v61_v25, 0.0 }
   0xb   :  { %305 = vmatpush3.bf16.msra.mxu0 %v322_v2  ;;  %v66_v20 = vpack.c.bf16 %v63_v18, %v62_v17  ;;  %v67_v29 = vpack.c.bf16 %v65_v28, %v64_v27 }
   0xc   :  { %306 = vmatprep.subr.bf16.mxu0 %v323_v3 }
   0xd   :  { %316 = vmatprep.mubr.bf16.mxu0 %v66_v20 }
   0xf   :  { %307 = vmatpush3.bf16.msra.mxu0 %v323_v3 }
  0x10   :  { %308 = vmatprep.subr.bf16.mxu0 %v324_v12 }
  0x13   :  { %309 = vmatpush3.bf16.msra.mxu0 %v324_v12 }
  0x14   :  { %310 = vmatprep.subr.bf16.mxu0 %v325_v19 }
  0x17   :  { %311 = vmatpush3.bf16.msra.mxu0 %v325_v19 }
  0x18   :  { %312 = vmatprep.subr.bf16.mxu0 %v326_v23 }
  0x1b   :  { %313 = vmatpush3.bf16.msra.mxu0 %v326_v23 }
  0x1c   :  { %314 = vmatprep.subr.bf16.mxu0 %v327_v26 }
  0x1f   :  { %315 = vmatpush3.bf16.msra.mxu0 %v327_v26 }
  0x22   :  { %317 = vmatmul.mubr.bf16.vlgmr.msra.gmra.mrb[0].mxu0 %v67_v29 }
  0xf5   :  { %v318_v31 = vpop.f32.mrb[0].mxu0 }
  0xf6   :  { %v209_v33 = vmul.f32 %v318_v31, %v260_v30  ;;  %v170_v34 = vpop.f32.mrb[1].mxu0 }
  0xf7   :  { %v207_v35 = vmul.f32 %v260_v30, %v170_v34  ;;  %v319_v36 = vpop.f32.mrb[2].mxu0 }
  0xf8   :  { %v220_v37 = vadd.f32 %v261_v32, %v209_v33  ;;  %v210_v38 = vmul.f32 %v319_v36, %v260_v30  ;;  %v173_v39 = vpop.f32.mrb[3].mxu0 }
  0xf9   :  { %v218_v40 = vadd.f32 %v261_v32, %v207_v35  ;;  %v208_v41 = vmul.f32 %v260_v30, %v173_v39 }
  0xfa   :  { %v221_v42 = vadd.f32 %v261_v32, %v210_v38  ;;  %v224_v44 = vmax.f32 %v220_v37, 0.0 }
  0xfb   :  { %v219_v43 = vadd.f32 %v261_v32, %v208_v41  ;;  %v222_v46 = vmax.f32 %v218_v40, 0.0 }
  0xfc   :  { %v225_v45 = vmax.f32 %v221_v42, 0.0 }
  0xfd   :  { %v223_v47 = vmax.f32 %v219_v43, 0.0 }
  0xfe   :  { %v286_v48 = vpack.c.bf16 %v225_v45, %v224_v44 }
  0xff   :  { %v281_v49 = vpack.c.bf16 %v223_v47, %v222_v46 }
 0x100   :  { %289 = vst [vmem:[%s417_s6 + $0x8] sm:$0xff] %v286_v48  }
 0x101   :  { %282 = vst [vmem:[%s417_s6] sm:$0xff] %v281_v49  }

// kernel: densenet121_features.140
= control target key start
LH: loop header
LB: loop body
LE: loop exit
PB: predicated region body
PF: predicated region fallthrough
CT: control target
= control target key end

     0   :  { %s199_s0 = inlined_call_operand.vmem [shape: bf16[32,128], index: 0, kind: input, shape index: {}]   ;;  %s200_s1 = inlined_call_operand.vmem [shape: bf16[32,128], index: 1, kind: input, shape index: {}]   ;;  %s201_s2 = inlined_call_operand.vmem [shape: bf16[32,128], index: 2, kind: input, shape index: {}]   ;;  %s202_s3 = inlined_call_operand.vmem [shape: bf16[32,128], index: 3, kind: input, shape index: {}]   ;;  %s203_s4 = inlined_call_operand.vmem [shape: bf16[32,128], index: 4, kind: output, shape index: {}]  }
   0x1   :  { %v98_v0 = vld [vmem:[%s199_s0] sm:$0xff]   ;;  %v139_v8 = vld [vmem:[%s199_s0 + $0x8] sm:$0xff]  }
   0x2   :  { %v106_v1 = vld [vmem:[%s200_s1] sm:$0xff]   ;;  %v99_v3 = vunpack.c.l.bf16 %v98_v0  ;;  %v100_v4 = vunpack.c.h.bf16 %v98_v0  ;;  %v140_v9 = vld [vmem:[%s200_s1 + $0x8] sm:$0xff]   ;;  %v103_v17 = vunpack.c.l.bf16 %v139_v8  ;;  %v104_v18 = vunpack.c.h.bf16 %v139_v8 }
   0x3   :  { %v114_v2 = vld [vmem:[%s201_s2] sm:$0xff]   ;;  %v107_v5 = vunpack.c.l.bf16 %v106_v1  ;;  %v108_v6 = vunpack.c.h.bf16 %v106_v1  ;;  %v141_v14 = vld [vmem:[%s201_s2 + $0x8] sm:$0xff]   ;;  %v111_v20 = vunpack.c.l.bf16 %v140_v9  ;;  %v112_v21 = vunpack.c.h.bf16 %v140_v9 }
   0x4   :  { %v122_v7 = vld [vmem:[%s202_s3] sm:$0xff]   ;;  %v115_v10 = vunpack.c.l.bf16 %v114_v2  ;;  %v116_v11 = vunpack.c.h.bf16 %v114_v2  ;;  %v142_v19 = vld [vmem:[%s202_s3 + $0x8] sm:$0xff]   ;;  %v119_v22 = vunpack.c.l.bf16 %v141_v14  ;;  %v120_v23 = vunpack.c.h.bf16 %v141_v14 }
   0x5   :  { %v123_v12 = vunpack.c.l.bf16 %v122_v7  ;;  %v124_v13 = vunpack.c.h.bf16 %v122_v7  ;;  %v33_v15 = vadd.f32 %v107_v5, %v99_v3  ;;  %v34_v16 = vadd.f32 %v108_v6, %v100_v4 }
   0x6   :  { %v35_v26 = vadd.f32 %v111_v20, %v103_v17  ;;  %v36_v27 = vadd.f32 %v112_v21, %v104_v18  ;;  %v127_v28 = vunpack.c.l.bf16 %v142_v19  ;;  %v128_v29 = vunpack.c.h.bf16 %v142_v19 }
   0x7   :  { %v45_v24 = vadd.f32 %v115_v10, %v33_v15  ;;  %v46_v25 = vadd.f32 %v116_v11, %v34_v16 }
   0x8   :  { %v47_v32 = vadd.f32 %v119_v22, %v35_v26  ;;  %v48_v33 = vadd.f32 %v120_v23, %v36_v27 }
   0x9   :  { %v57_v30 = vadd.f32 %v123_v12, %v45_v24  ;;  %v58_v31 = vadd.f32 %v124_v13, %v46_v25 }
   0xa   :  { %v59_v36 = vadd.f32 %v127_v28, %v47_v32  ;;  %v60_v37 = vadd.f32 %v128_v29, %v48_v33 }
   0xb   :  { %v61_v34 = vmul.f32 0.25, %v57_v30  ;;  %v62_v35 = vmul.f32 0.25, %v58_v31 }
   0xc   :  { %v63_v39 = vmul.f32 0.25, %v59_v36  ;;  %v64_v40 = vmul.f32 0.25, %v60_v37 }
   0xd   :  { %v132_v38 = vpack.c.bf16 %v62_v35, %v61_v34 }
   0xe   :  { %v137_v41 = vpack.c.bf16 %v64_v40, %v63_v39 }
   0xf   :  { %133 = vst [vmem:[%s203_s4] sm:$0xff] %v132_v38  }
  0x10   :  { %143 = vst [vmem:[%s203_s4 + $0x8] sm:$0xff] %v137_v41  }

// kernel: densenet121_features.143
= control target key start
LH: loop header
LB: loop body
LE: loop exit
PB: predicated region body
PF: predicated region fallthrough
CT: control target
= control target key end

     0   :  { %v46_v5 = vlaneseq  ;;  %s552_s1 = inlined_call_operand.vmem [shape: bf16[256,128], index: 1, kind: input, shape index: {}]   ;;  %s553_s0 = inlined_call_operand.vmem [shape: bf16[32,256], index: 0, kind: input, shape index: {}]   ;;  %s554_s2 = inlined_call_operand.vmem [shape: f32[1,256], index: 2, kind: input, shape index: {}]   ;;  %s555_s3 = inlined_call_operand.vmem [shape: f32[1,256], index: 3, kind: input, shape index: {}]   ;;  %s556_s4 = inlined_call_operand.vmem [shape: f32[1,128], index: 4, kind: input, shape index: {}]   ;;  %s557_s5 = inlined_call_operand.vmem [shape: f32[1,128], index: 5, kind: input, shape index: {}]   ;;  %s558_s6 = inlined_call_operand.vmem [shape: bf16[32,128], index: 6, kind: output, shape index: {}]  }
   0x1   :  { %v423_v0 = vld [vmem:[%s552_s1 + $0x40] sm:$0xff]   ;;  %v425_v2 = vld [vmem:[%s552_s1 + $0x48] sm:$0xff]   ;;  %v427_v4 = vld [vmem:[%s552_s1 + $0x50] sm:$0xff]  }
   0x2   :  { %v424_v1 = vld [vmem:[%s552_s1] sm:$0xff]   ;;  %379 = vmatprep.subr.bf16.mxu0 %v423_v0  ;;  %407 = vmatprep.subr.bf16.mxu1 %v423_v0  ;;  %v426_v3 = vld [vmem:[%s552_s1 + $0x8] sm:$0xff]   ;;  %v428_v6 = vld [vmem:[%s552_s1 + $0x10] sm:$0xff]   ;;  %v47_v8 = vshrl.u32 %v46_v5, 7 }
   0x3   :  { %380 = vmatpush3.bf16.msra.mxu0 %v424_v1  ;;  %415 = vmatpush3.bf16.msra.mxu1 %v424_v1  ;;  %v429_v7 = vld [vmem:[%s552_s1 + $0x58] sm:$0xff]   ;;  %v431_v10 = vld [vmem:[%s552_s1 + $0x60] sm:$0xff]   ;;  %v433_v14 = vld [vmem:[%s552_s1 + $0x68] sm:$0xff]  }
   0x4   :  { %381 = vmatprep.subr.bf16.mxu0 %v425_v2  ;;  %408 = vmatprep.subr.bf16.mxu1 %v425_v2  ;;  %v430_v9 = vld [vmem:[%s552_s1 + $0x18] sm:$0xff]   ;;  %v48_v11 = vsub.s32 0, %v47_v8  ;;  %v432_v12 = vld [vmem:[%s552_s1 + $0x20] sm:$0xff]   ;;  %v52_v13 = vsub.s32 1, %v47_v8  ;;  %v33_v16 = vld [vmem:[%s553_s0 + $0x8] sm:$0xff] }
   0x5   :  { %v32_v15 = vld [vmem:[%s553_s0] sm:$0xff]  ;;  %v38_v20 = vunpack.c.l.bf16 %v33_v16  ;;  %v39_v21 = vunpack.c.h.bf16 %v33_v16  ;;  %v34_v23 = vld [vmem:[%s553_s0 + $0x10] sm:$0xff]  ;;  %v35_v24 = vld [vmem:[%s553_s0 + $0x18] sm:$0xff] }
   0x6   :  { %v44_v17 = vld [vmem:[%s554_s2] sm:$0x3]  ;;  %v36_v18 = vunpack.c.l.bf16 %v32_v15  ;;  %v37_v19 = vunpack.c.h.bf16 %v32_v15  ;;  %v434_v29 = vld [vmem:[%s552_s1 + $0x28] sm:$0xff]   ;;  %v40_v30 = vunpack.c.l.bf16 %v34_v23  ;;  %v41_v31 = vunpack.c.h.bf16 %v34_v23  ;;  %v435_v34 = vld [vmem:[%s552_s1 + $0x70] sm:$0xff]  }
   0x7   :  { %382 = vmatpush3.bf16.msra.mxu0 %v426_v3  ;;  %416 = vmatpush3.bf16.msra.mxu1 %v426_v3  ;;  %v64_v22 = vld [vmem:[%s555_s3] sm:$0x3]  ;;  %v49_v25 = vrot.slane %v44_v17, %v48_v11  ;;  %v53_v26 = vrot.slane %v44_v17, %v52_v13  ;;  %v42_v32 = vunpack.c.l.bf16 %v35_v24  ;;  %v43_v33 = vunpack.c.h.bf16 %v35_v24  ;;  %v436_v46 = vld [vmem:[%s552_s1 + $0x30] sm:$0xff]   ;;  %v437_v50 = vld [vmem:[%s552_s1 + $0x78] sm:$0xff]  }
   0x8   :  { %383 = vmatprep.subr.bf16.mxu0 %v427_v4  ;;  %409 = vmatprep.subr.bf16.mxu1 %v427_v4  ;;  %v69_v27 = vrot.slane %v64_v22, %v48_v11  ;;  %v73_v28 = vrot.slane %v64_v22, %v52_v13  ;;  %v438_v61 = vld [vmem:[%s552_s1 + $0x38] sm:$0xff]   ;;  %v358_v5 = vld [vmem:[%s556_s4] ss:$0 sm:$0xff] }
   0x9   :  { %v57_v35 = vmul.f32 %v53_v26, %v37_v19  ;;  %v59_v36 = vmul.f32 %v53_v26, %v39_v21  ;;  %v56_v37 = vmul.f32 %v49_v25, %v36_v18  ;;  %v61_v38 = vmul.f32 %v53_v26, %v41_v31  ;;  %v359_v11 = vld [vmem:[%s557_s5] ss:$0 sm:$0xff] }
   0xa   :  { %v63_v39 = vmul.f32 %v53_v26, %v43_v33  ;;  %v58_v40 = vmul.f32 %v49_v25, %v38_v20  ;;  %v60_v41 = vmul.f32 %v49_v25, %v40_v30  ;;  %v62_v45 = vmul.f32 %v49_v25, %v42_v32 }
   0xb   :  { %384 = vmatpush3.bf16.msra.mxu0 %v428_v6  ;;  %417 = vmatpush3.bf16.msra.mxu1 %v428_v6  ;;  %v77_v42 = vadd.f32 %v73_v28, %v57_v35  ;;  %v79_v43 = vadd.f32 %v73_v28, %v59_v36  ;;  %v76_v44 = vadd.f32 %v69_v27, %v56_v37 }
   0xc   :  { %385 = vmatprep.subr.bf16.mxu0 %v429_v7  ;;  %410 = vmatprep.subr.bf16.mxu1 %v429_v7  ;;  %v81_v47 = vadd.f32 %v73_v28, %v61_v38  ;;  %v83_v48 = vadd.f32 %v73_v28, %v63_v39  ;;  %v78_v49 = vadd.f32 %v69_v27, %v58_v40 }
   0xd   :  { %v85_v51 = vmax.f32 %v77_v42, 0.0  ;;  %v87_v52 = vmax.f32 %v79_v43, 0.0  ;;  %v80_v53 = vadd.f32 %v69_v27, %v60_v41  ;;  %v82_v56 = vadd.f32 %v69_v27, %v62_v45 }
   0xe   :  { %v89_v54 = vmax.f32 %v81_v47, 0.0  ;;  %v91_v55 = vmax.f32 %v83_v48, 0.0  ;;  %v84_v58 = vmax.f32 %v76_v44, 0.0  ;;  %v86_v59 = vmax.f32 %v78_v49, 0.0 }
   0xf   :  { %386 = vmatpush3.bf16.msra.mxu0 %v430_v9  ;;  %418 = vmatpush3.bf16.msra.mxu1 %v430_v9  ;;  %v93_v57 = vpack.c.bf16 %v87_v52, %v85_v51  ;;  %v88_v60 = vmax.f32 %v80_v53, 0.0  ;;  %v90_v63 = vmax.f32 %v82_v56, 0.0 }
  0x10   :  { %387 = vmatprep.subr.bf16.mxu0 %v431_v10  ;;  %411 = vmatprep.subr.bf16.mxu1 %v431_v10  ;;  %v95_v62 = vpack.c.bf16 %v91_v55, %v89_v54  ;;  %v92_v0 = vpack.c.bf16 %v86_v59, %v84_v58 }
  0x11   :  { %260 = vmatprep.mubr.bf16.mxu0 %v93_v57  ;;  %v94_v1 = vpack.c.bf16 %v90_v63, %v88_v60 }
  0x12   :  { %268 = vmatprep.mubr.bf16.mxu1 %v95_v62 }
  0x13   :  { %388 = vmatpush3.bf16.msra.mxu0 %v432_v12  ;;  %419 = vmatpush3.bf16.msra.mxu1 %v432_v12 }
  0x14   :  { %389 = vmatprep.subr.bf16.mxu0 %v433_v14  ;;  %412 = vmatprep.subr.bf16.mxu1 %v433_v14 }
  0x17   :  { %390 = vmatpush3.bf16.msra.mxu0 %v434_v29  ;;  %420 = vmatpush3.bf16.msra.mxu1 %v434_v29 }
  0x18   :  { %391 = vmatprep.subr.bf16.mxu0 %v435_v34  ;;  %413 = vmatprep.subr.bf16.mxu1 %v435_v34 }
  0x1b   :  { %392 = vmatpush3.bf16.msra.mxu0 %v436_v46  ;;  %421 = vmatpush3.bf16.msra.mxu1 %v436_v46 }
  0x1c   :  { %393 = vmatprep.subr.bf16.mxu0 %v437_v50  ;;  %414 = vmatprep.subr.bf16.mxu1 %v437_v50 }
  0x1f   :  { %394 = vmatpush3.bf16.msra.mxu0 %v438_v61  ;;  %422 = vmatpush3.bf16.msra.mxu1 %v438_v61 }
  0x22   :  { %261 = vmatmul.mubr.bf16.vlgmr.msra.gmra.mrb[0].mxu0 %v92_v0  ;;  %269 = vmatmul.mubr.bf16.vlgmr.msra.gmra.mrb[0].mxu1 %v94_v1 }
  0xf5   :  { %v395_v2 = vpop.f32.mrb[0].mxu0  ;;  %v401_v3 = vpop.f32.mrb[0].mxu1 }
  0xf6   :  { %v396_v4 = vpop.f32.mrb[1].mxu0  ;;  %v402_v6 = vpop.f32.mrb[1].mxu1 }
  0xf7   :  { %v397_v7 = vadd.f32 %v396_v4, %v395_v2  ;;  %v403_v8 = vadd.f32 %v402_v6, %v401_v3  ;;  %v398_v9 = vpop.f32.mrb[2].mxu0  ;;  %v404_v10 = vpop.f32.mrb[2].mxu1 }
  0xf8   :  { %v399_v12 = vpop.f32.mrb[3].mxu0  ;;  %v405_v13 = vpop.f32.mrb[3].mxu1 }
  0xf9   :  { %v299_v14 = vmul.f32 %v397_v7, %v358_v5  ;;  %v301_v15 = vmul.f32 %v403_v8, %v358_v5  ;;  %v400_v16 = vadd.f32 %v399_v12, %v398_v9  ;;  %v406_v17 = vadd.f32 %v405_v13, %v404_v10 }
  0xfb   :  { %v310_v18 = vadd.f32 %v359_v11, %v299_v14  ;;  %v312_v19 = vadd.f32 %v359_v11, %v301_v15  ;;  %v300_v20 = vmul.f32 %v400_v16, %v358_v5  ;;  %v302_v21 = vmul.f32 %v406_v17, %v358_v5 }
  0xfd   :  { %v311_v22 = vadd.f32 %v359_v11, %v300_v20  ;;  %v313_v23 = vadd.f32 %v359_v11, %v302_v21  ;;  %v314_v24 = vmax.f32 %v310_v18, 0.0  ;;  %v316_v25 = vmax.f32 %v312_v19, 0.0 }
  0xff   :  { %v315_v26 = vmax.f32 %v311_v22, 0.0  ;;  %v317_v27 = vmax.f32 %v313_v23, 0.0 }
 0x101   :  { %v371_v28 = vpack.c.bf16 %v315_v26, %v314_v24  ;;  %v376_v29 = vpack.c.bf16 %v317_v27, %v316_v25 }
 0x103   :  { %372 = vst [vmem:[%s558_s6] sm:$0xff] %v371_v28   ;;  %378 = vst [vmem:[%s558_s6 + $0x8] sm:$0xff] %v376_v29  }

// kernel: densenet121_features.142
= control target key start
LH: loop header
LB: loop body
LE: loop exit
PB: predicated region body
PF: predicated region fallthrough
CT: control target
= control target key end

     0   :  { %s1130_s21 = smov 0   ;;  %s1132_s22 = smov 0   ;;  %s1247_s0 = inlined_call_operand.vmem [shape: bf16[32,1152], index: 0, kind: input, shape index: {}]   ;;  %s1248_s1 = inlined_call_operand.vmem [shape: bf16[1152,32], index: 1, kind: input, shape index: {}]   ;;  %s1249_s2 = inlined_call_operand.vmem [shape: f32[1,1152], index: 2, kind: input, shape index: {}, may-alias: {2,3}]   ;;  %s1250_s3 = inlined_call_operand.vmem [shape: f32[1,1152], index: 3, kind: input, shape index: {}, may-alias: {2,3}]   ;;  %s1251_s4 = inlined_call_operand.vmem [shape: f32[1,32], index: 4, kind: input, shape index: {}, may-alias: {4,5}]   ;;  %s1252_s5 = inlined_call_operand.vmem [shape: f32[1,32], index: 5, kind: input, shape index: {}, may-alias: {4,5}]   ;;  %s1253_s6 = inlined_call_operand.vmem [shape: bf16[32,32], index: 6, kind: output, shape index: {}]  }
   0x1   :  { %s1134_s23 = smov 0   ;;  %s1136_s24 = smov 0  }
   0x2   :  { %s1138_s2 = smov 0  }
   0x3 LB: > { %s25_s3 = sadd.s32 1, %s1088_s24  ;;  %p44_p1 = scmp.ne.s32.totalorder %s1080_s22, %s1076_s21  ;;  %s1092_s2 = sphi %s1138_s2, %s16_s2   ;;  %s1088_s24 = sphi %s1136_s24, %s1257_s24   ;;  %s1084_s23 = sphi %s1134_s23, %s1256_s23   ;;  %s1080_s22 = sphi %s1132_s22, %s1255_s22   ;;  %s1076_s21 = sphi %s1130_s21, %s1254_s21  }
   0x4   : > { %p26_p0 = scmp.ge.s32.totalorder %s25_s3, 3  ;;  %p45_p2 = scmp.eq.s32.totalorder %s1092_s2, 0 }
   0x5   : > { %s37_s5 = sadd.s32 1, %s1080_s22  ;;  %p864_p5 = scmp.ge.s32.totalorder %s1092_s2, 3 }
   0x6   : > { %s1259_s3 = smov (%p26_p0, %s25_s3), 0  ;;  %p46_p3 = por %p45_p2, %p44_p1 }
   0x7   : > { %s33_s4 = ssub.s32 %s1088_s24, %s1259_s3  ;;  %222 = sbr.rel (%p864_p5) target bundleno = 23 (0x17), region = 24 }
   0x8   : > { %p35_p4 = scmp.eq.s32.totalorder %s33_s4, 0 }
   0xa   : > { %s1165_s25 = scalar_select %p35_p4, %s1080_s22, %s37_s5  }
   0xe   : > { %225 = sbr.rel (!%p46_p3) target bundleno = 23 (0x17), region = 28  ;;  %s227_s26 = sand.u32 (%p46_p3), 1, %s1080_s22  }
   0xf   : > { %s916_s27 = smul.u32 (%p46_p3), 12, %s1088_s24 }
  0x10   : > { %s979_s28 = smul.u32 (%p46_p3), 48, %s227_s26 }
  0x11   : > { %s235_s7 = scalar_lea.vmem (%p46_p3), %s1247_s0, %s916_s27 }
  0x12   : > { %v250_v0 = vld [vmem:[%s235_s7] sm:$0xff] (%p46_p3)  ;;  %v254_v2 = vld [vmem:[%s235_s7 + $0x48] sm:$0xff] (%p46_p3)  ;;  %s229_s8 = scalar_lea.vmem (%p46_p3), [#allocation3], %s979_s28  ;;  %v870_v6 = vld [vmem:[%s235_s7 + $0x50] sm:$0xf] (%p46_p3) }
  0x13   : > { %v252_v1 = vld [vmem:[%s235_s7 + $0x24] sm:$0xff] (%p46_p3)  ;;  %251 = vst [vmem:[%s229_s8] sm:$0xff] (%p46_p3), %v250_v0  ;;  %255 = vst [vmem:[%s229_s8 + $0x18] sm:$0xff] (%p46_p3), %v254_v2  ;;  %v256_v3 = vld [vmem:[%s235_s7 + $0x6c] sm:$0xff] (%p46_p3) }
  0x14   : > { %253 = vst [vmem:[%s229_s8 + $0xc] sm:$0xff] (%p46_p3), %v252_v1  ;;  %v866_v4 = vld [vmem:[%s235_s7 + $0x8] sm:$0xf] (%p46_p3)  ;;  %v868_v5 = vld [vmem:[%s235_s7 + $0x2c] sm:$0xf] (%p46_p3)  ;;  %257 = vst [vmem:[%s229_s8 + $0x24] sm:$0xff] (%p46_p3), %v256_v3 }
  0x15   : > { %867 = vst [vmem:[%s229_s8 + $0x8] sm:$0xf] %v866_v4  ;;  %869 = vst [vmem:[%s229_s8 + $0x14] sm:$0xf] %v868_v5  ;;  %v872_v7 = vld [vmem:[%s235_s7 + $0x74] sm:$0xf] }
  0x16   : > { %871 = vst [vmem:[%s229_s8 + $0x20] sm:$0xf] %v870_v6  ;;  %873 = vst [vmem:[%s229_s8 + $0x2c] sm:$0xf] %v872_v7 }
  0x17 PF: > { %p874_p6 = scmp.ge.s32.totalorder %s1092_s2, 1  ;;  %p302_p7 = scmp.lt.s32.totalorder %s1092_s2, 4 }
  0x19   : > { %p303_p8 = pnand %p874_p6, %p302_p7 }
  0x1a   : > { %s309_s9 = sand.u32 (!%p303_p8), 1, %s1076_s21   ;;  %s353_s10 = smul.u32 (!%p303_p8), 48, %s1084_s23 }
  0x1b   : > { %306 = sbr.rel (%p303_p8) target bundleno = 314 (0x13a), region = 66  ;;  %p876_p10 = scmp.ne.s32.totalorder (!%p303_p8), %s1084_s23, 0 }
  0x1c   : > { %s980_s11 = smul.u32 (!%p303_p8), 48, %s309_s9  ;;  %p354_p9 = scmp.lt.s32.totalorder (!%p303_p8), %s353_s10, 143 }
  0x1e   : > { %s1182_s16 = scalar_lea.vmem (!%p303_p8), [#allocation3], %s980_s11 }
  0x22   : > { %s1261_s10 = smov (!%p354_p9, %s353_s10), 143  ;;  %379 = sbr.rel (%p876_p10) target bundleno = 41 (0x29), region = 74 }
  0x23   : > { %s875_s12 = sshll.u32 %s1261_s10, 2  ;;  %vm380_vm0 = vcmask (!%p876_p10), 261120   ;;  %v1094_v8 = vmov (!%p876_p10), 0.0  }
  0x24   : > { %s1180_s15 = scalar_lea.vmem %s1248_s1, %s875_s12  ;;  %381 = vst.msk [vmem:[#allocation2] sm:$0xff] (!%p876_p10), %vm380_vm0, %v1094_v8  ;;  %382 = vst.msk [vmem:[#allocation2 + $0x8] sm:$0xff] (!%p876_p10), %vm380_vm0, %v1094_v8 }
  0x25   : > { %383 = vst.msk [vmem:[#allocation2 + $0x10] sm:$0xff] (!%p876_p10), %vm380_vm0, %v1094_v8  ;;  %384 = vst.msk [vmem:[#allocation2 + $0x18] sm:$0xff] (!%p876_p10), %vm380_vm0, %v1094_v8 }
  0x29 PF: > { %v1022_v9 = vld [vmem:[%s1180_s15 + $0x40] sm:$0xff]   ;;  %v1025_v12 = vld [vmem:[%s1180_s15 + $0x48] sm:$0xff]   ;;  %v1028_v15 = vld [vmem:[%s1180_s15 + $0x50] sm:$0xff]   ;;  %vm723_vm1 = vcmask 261120   ;;  %p907_p11 = scmp.ne.s32.totalorder %s1084_s23, 2 }
  0x2a   : > { %v1023_v10 = vld [vmem:[%s1180_s15] sm:$0xff]   ;;  %921 = vmatprep.subr.bf16.mxu0 %v1022_v9  ;;  %v1026_v13 = vld [vmem:[%s1180_s15 + $0x8] sm:$0xff]   ;;  %v1029_v16 = vld [vmem:[%s1180_s15 + $0x10] sm:$0xff]   ;;  %vm752_vm2 = vcmask (!%p907_p11), 257024  }
  0x2b   : > { %v1024_v11 = vld [vmem:[%s1180_s15 + $0x80] sm:$0xff]   ;;  %922 = vmatpush3.bf16.msra.mxu0 %v1023_v10  ;;  %v1027_v14 = vld [vmem:[%s1180_s15 + $0x88] sm:$0xff]   ;;  %v1030_v17 = vld [vmem:[%s1180_s15 + $0x90] sm:$0xff]  }
  0x2c   : > { %959 = vmatprep.subr.bf16.mxu1 %v1024_v11  ;;  %923 = vmatprep.subr.bf16.mxu0 %v1025_v12  ;;  %v1031_v18 = vld [vmem:[%s1180_s15 + $0x58] sm:$0xff]   ;;  %v1034_v21 = vld [vmem:[%s1180_s15 + $0x60] sm:$0xff]   ;;  %v1037_v24 = vld [vmem:[%s1180_s15 + $0x68] sm:$0xff]  }
  0x2d   : > { %960 = vmatpush3.bf16.msra.mxu1 %v1024_v11  ;;  %v1032_v19 = vld [vmem:[%s1180_s15 + $0x18] sm:$0xff]   ;;  %v1036_v22 = vld [vmem:[%s1180_s15 + $0xa0] sm:$0xff]   ;;  %v1039_v25 = vld [vmem:[%s1180_s15 + $0xa8] sm:$0xff]  }
  0x2e   : > { %961 = vmatprep.subr.bf16.mxu1 %v1027_v14  ;;  %v1033_v20 = vld [vmem:[%s1180_s15 + $0x98] sm:$0xff]   ;;  %v1035_v23 = vld [vmem:[%s1180_s15 + $0x20] sm:$0xff]   ;;  %v1038_v26 = vld [vmem:[%s1180_s15 + $0x28] sm:$0xff]  }
  0x2f   : > { %924 = vmatpush3.bf16.msra.mxu0 %v1026_v13  ;;  %v1040_v27 = vld [vmem:[%s1180_s15 + $0x70] sm:$0xff]   ;;  %v1043_v30 = vld [vmem:[%s1180_s15 + $0x78] sm:$0xff]   ;;  %v393_v45 = vld [vmem:[#allocation2] sm:$0xff] }
  0x30   : > { %925 = vmatprep.subr.bf16.mxu0 %v1028_v15  ;;  %v1041_v28 = vld [vmem:[%s1180_s15 + $0x30] sm:$0xff]   ;;  %v1045_v31 = vld [vmem:[%s1180_s15 + $0xb8] sm:$0xff]   ;;  %v394_v50 = vld [vmem:[#allocation2 + $0x8] sm:$0xff] }
  0x31   : > { %962 = vmatpush3.bf16.msra.mxu1 %v1027_v14  ;;  %v1042_v29 = vld [vmem:[%s1180_s15 + $0xb0] sm:$0xff]   ;;  %v1044_v34 = vld [vmem:[%s1180_s15 + $0x38] sm:$0xff]  }
  0x32   : > { %963 = vmatprep.subr.bf16.mxu1 %v1030_v17  ;;  %v1048_v32 = vld [vmem:[%s1182_s16 + $0x4] ss:$12 sps:$4 sm:$0xff]   ;;  %v1049_v33 = vld [vmem:[%s1182_s16 + $0x8] ss:$12 sps:$4 sm:$0xff]   ;;  %v1046_v35 = vld [vmem:[%s1182_s16] ss:$12 sps:$4 sm:$0xff]  }
  0x33   : > { %926 = vmatpush3.bf16.msra.mxu0 %v1029_v16  ;;  %653 = vmatprep.mubr.bf16.mxu0 %v1048_v32  ;;  %v1051_v36 = vld [vmem:[%s1182_s16 + $0x1c] ss:$12 sps:$4 sm:$0xff]   ;;  %v1050_v37 = vld [vmem:[%s1182_s16 + $0x20] ss:$12 sps:$4 sm:$0xff]   ;;  %v1053_v38 = vld [vmem:[%s1182_s16 + $0x18] ss:$12 sps:$4 sm:$0xff]  }
  0x34   : > { %927 = vmatprep.subr.bf16.mxu0 %v1031_v18  ;;  %975 = vmatprep.mubr.bf16.mxu1 %v1049_v33  ;;  %v395_v59 = vld [vmem:[#allocation2 + $0x10] sm:$0xff]  ;;  %v396_v63 = vld [vmem:[#allocation2 + $0x18] sm:$0xff] }
  0x35   : > { %964 = vmatpush3.bf16.msra.mxu1 %v1030_v17 }
  0x36   : > { %965 = vmatprep.subr.bf16.mxu1 %v1033_v20 }
  0x37   : > { %928 = vmatpush3.bf16.msra.mxu0 %v1032_v19 }
  0x38   : > { %929 = vmatprep.subr.bf16.mxu0 %v1034_v21 }
  0x39   : > { %966 = vmatpush3.bf16.msra.mxu1 %v1033_v20 }
  0x3a   : > { %967 = vmatprep.subr.bf16.mxu1 %v1036_v22 }
  0x3b   : > { %930 = vmatpush3.bf16.msra.mxu0 %v1035_v23 }
  0x3c   : > { %931 = vmatprep.subr.bf16.mxu0 %v1037_v24 }
  0x3d   : > { %968 = vmatpush3.bf16.msra.mxu1 %v1036_v22 }
  0x3e   : > { %969 = vmatprep.subr.bf16.mxu1 %v1039_v25 }
  0x3f   : > { %932 = vmatpush3.bf16.msra.mxu0 %v1038_v26 }
  0x40   : > { %933 = vmatprep.subr.bf16.mxu0 %v1040_v27 }
  0x41   : > { %970 = vmatpush3.bf16.msra.mxu1 %v1039_v25 }
  0x42   : > { %971 = vmatprep.subr.bf16.mxu1 %v1042_v29 }
  0x43   : > { %934 = vmatpush3.bf16.msra.mxu0 %v1041_v28 }
  0x44   : > { %935 = vmatprep.subr.bf16.mxu0 %v1043_v30 }
  0x45   : > { %972 = vmatpush3.bf16.msra.mxu1 %v1042_v29 }
  0x46   : > { %973 = vmatprep.subr.bf16.mxu1 %v1045_v31 }
  0x47   : > { %936 = vmatpush3.bf16.msra.mxu0 %v1044_v34 }
  0x49   : > { %974 = vmatpush3.bf16.msra.mxu1 %v1045_v31 }
  0x4a   : > { %654 = vmatmul.mubr.bf16.vlgmr.msra.gmra.mrb[0].mxu0 %v1046_v35 }
  0x4b   : > { %661 = vmatprep.mubr.bf16.mxu0 %v1051_v36 }
  0x4c   : > { %976 = vmatmul.mubr.bf16.vlgmr.msra.gmra.mrb[0].mxu1 %v1050_v37 }
  0x52   : > { %662 = vmatmul.mubr.bf16.gmra.mrb[4].mxu0 %v1053_v38 }
 0x11d   : > { %v937_v39 = vpop.f32.mrb[0].mxu0 }
 0x11e   : > { %v938_v40 = vpop.f32.mrb[1].mxu0 }
 0x11f   : > { %v939_v41 = vadd.f32 %v938_v40, %v937_v39  ;;  %v940_v42 = vpop.f32.mrb[2].mxu0  ;;  %v977_v43 = vpop.f32.mrb[0].mxu1 }
 0x120   : > { %v941_v44 = vpop.f32.mrb[3].mxu0  ;;  %v704_v46 = vpop.f32.mrb[1].mxu1 }
 0x121   : > { %v942_v47 = vadd.f32 %v941_v44, %v940_v42  ;;  %v705_v48 = vadd.f32 %v939_v41, %v704_v46  ;;  %v978_v49 = vpop.f32.mrb[2].mxu1 }
 0x122   : > { %v707_v51 = vpop.f32.mrb[3].mxu1 }
 0x123   : > { %v719_v52 = vadd.f32 %v705_v48, %v393_v45  ;;  %v708_v53 = vadd.f32 %v942_v47, %v707_v51 }
 0x125   : > { %724 = vst.msk [vmem:[#allocation2] sm:$0xff] %vm723_vm1, %v719_v52  ;;  %v720_v54 = vadd.f32 %v708_v53, %v394_v50  ;;  %v943_v55 = vpop.f32.mrb[4].mxu0 }
 0x126   : > { %v944_v56 = vpop.f32.mrb[5].mxu0 }
 0x127   : > { %725 = vst.msk [vmem:[#allocation2 + $0x8] sm:$0xff] %vm723_vm1, %v720_v54  ;;  %v945_v57 = vadd.f32 %v944_v56, %v943_v55  ;;  %v946_v58 = vpop.f32.mrb[6].mxu0 }
 0x128   : > { %v947_v60 = vpop.f32.mrb[7].mxu0 }
 0x129   : > { %v713_v61 = vadd.f32 %v977_v43, %v945_v57  ;;  %v948_v62 = vadd.f32 %v947_v60, %v946_v58  ;;  %731 = sbr.rel (%p907_p11) target bundleno = 314 (0x13a), region = 78 }
 0x12b   : > { %v721_v0 = vadd.f32 %v713_v61, %v395_v59  ;;  %v716_v1 = vadd.f32 %v978_v49, %v948_v62 }
 0x12c   : > { %v732_v3 = vld [vmem:[#allocation2] sm:$0xff] (!%p907_p11) }
 0x12d   : > { %726 = vst.msk [vmem:[#allocation2 + $0x10] sm:$0xff] %vm723_vm1, %v721_v0  ;;  %v722_v2 = vadd.f32 %v716_v1, %v396_v63  ;;  %v917_v6 = vpack.c.bf16 (!%p907_p11), %v732_v3, %v732_v3 }
 0x12e   : > { %v733_v4 = vld [vmem:[#allocation2 + $0x8] sm:$0xff] (!%p907_p11) }
 0x12f   : > { %727 = vst.msk [vmem:[#allocation2 + $0x18] sm:$0xff] %vm723_vm1, %v722_v2  ;;  %v918_v7 = vpack.c.bf16 (!%p907_p11), %v733_v4, %v733_v4 }
 0x130   : > { %753 = vst.msk [vmem:[%s1253_s6] sm:$0xf] %vm752_vm2, %v917_v6 }
 0x131   : > { %754 = vst.msk [vmem:[%s1253_s6 + $0x4] sm:$0xf] %vm752_vm2, %v918_v7 }
 0x134   : > { %v734_v5 = vld [vmem:[#allocation2 + $0x10] sm:$0xff] }
 0x135   : > { %v919_v8 = vpack.c.bf16 %v734_v5, %v734_v5 }
 0x136   : > { %v735_v9 = vld [vmem:[#allocation2 + $0x18] sm:$0xff] }
 0x137   : > { %v920_v10 = vpack.c.bf16 %v735_v9, %v735_v9  ;;  %755 = vst.msk [vmem:[%s1253_s6 + $0x8] sm:$0xf] %vm752_vm2, %v919_v8 }
 0x139   : > { %756 = vst.msk [vmem:[%s1253_s6 + $0xc] sm:$0xf] %vm752_vm2, %v920_v10 }
 0x13a PF: > { %s16_s2 = sadd.s32 1, %s1092_s2   ;;  %s1254_s21 = smov %s1080_s22 }
 0x13b   : > { %p13_p12 = scmp.ge.s32.totalorder %s16_s2, 5   ;;  %s1255_s22 = smov %s1165_s25 }
 0x13c   : > { %s1256_s23 = smov %s1088_s24  ;;  %s1257_s24 = smov %s1259_s3 }
 0x13d   :  { %15 = sbr.rel (!%p13_p12) target bundleno = 3 (0x3), region = 128 }

// kernel: densenet121_features.151
= control target key start
LH: loop header
LB: loop body
LE: loop exit
PB: predicated region body
PF: predicated region fallthrough
CT: control target
= control target key end

     0   :  { %v54_v13 = vlaneseq  ;;  %s757_s1 = inlined_call_operand.vmem [shape: bf16[384,128], index: 1, kind: input, shape index: {}]   ;;  %s758_s0 = inlined_call_operand.vmem [shape: bf16[32,384], index: 0, kind: input, shape index: {}]   ;;  %s759_s2 = inlined_call_operand.vmem [shape: f32[1,384], index: 2, kind: input, shape index: {}]   ;;  %s760_s3 = inlined_call_operand.vmem [shape: f32[1,384], index: 3, kind: input, shape index: {}]   ;;  %s761_s4 = inlined_call_operand.vmem [shape: f32[1,128], index: 4, kind: input, shape index: {}]   ;;  %s762_s5 = inlined_call_operand.vmem [shape: f32[1,128], index: 5, kind: input, shape index: {}]   ;;  %s763_s6 = inlined_call_operand.vmem [shape: bf16[32,128], index: 6, kind: output, shape index: {}]  }
   0x1   :  { %v590_v0 = vld [vmem:[%s757_s1 + $0x40] sm:$0xff]   ;;  %v593_v3 = vld [vmem:[%s757_s1 + $0x48] sm:$0xff]   ;;  %v596_v6 = vld [vmem:[%s757_s1 + $0x50] sm:$0xff]  }
   0x2   :  { %v591_v1 = vld [vmem:[%s757_s1] sm:$0xff]   ;;  %532 = vmatprep.subr.bf16.mxu0 %v590_v0  ;;  %v594_v4 = vld [vmem:[%s757_s1 + $0x8] sm:$0xff]   ;;  %v597_v7 = vld [vmem:[%s757_s1 + $0x10] sm:$0xff]   ;;  %v55_v17 = vshrl.u32 %v54_v13, 7 }
   0x3   :  { %v592_v2 = vld [vmem:[%s757_s1 + $0x80] sm:$0xff]   ;;  %533 = vmatpush3.bf16.msra.mxu0 %v591_v1  ;;  %v595_v5 = vld [vmem:[%s757_s1 + $0x88] sm:$0xff]   ;;  %v598_v8 = vld [vmem:[%s757_s1 + $0x90] sm:$0xff]  }
   0x4   :  { %570 = vmatprep.subr.bf16.mxu1 %v592_v2  ;;  %534 = vmatprep.subr.bf16.mxu0 %v593_v3  ;;  %v599_v9 = vld [vmem:[%s757_s1 + $0x58] sm:$0xff]   ;;  %v602_v12 = vld [vmem:[%s757_s1 + $0x60] sm:$0xff]   ;;  %v605_v16 = vld [vmem:[%s757_s1 + $0x68] sm:$0xff]   ;;  %v60_v22 = vsub.s32 1, %v55_v17  ;;  %v56_v24 = vsub.s32 0, %v55_v17  ;;  %v64_v26 = vsub.s32 2, %v55_v17 }
   0x5   :  { %571 = vmatpush3.bf16.msra.mxu1 %v592_v2  ;;  %v600_v10 = vld [vmem:[%s757_s1 + $0x18] sm:$0xff]   ;;  %v604_v14 = vld [vmem:[%s757_s1 + $0xa0] sm:$0xff]   ;;  %v607_v18 = vld [vmem:[%s757_s1 + $0xa8] sm:$0xff]  }
   0x6   :  { %572 = vmatprep.subr.bf16.mxu1 %v595_v5  ;;  %v601_v11 = vld [vmem:[%s757_s1 + $0x98] sm:$0xff]   ;;  %v603_v15 = vld [vmem:[%s757_s1 + $0x20] sm:$0xff]   ;;  %v606_v19 = vld [vmem:[%s757_s1 + $0x28] sm:$0xff]  }
   0x7   :  { %535 = vmatpush3.bf16.msra.mxu0 %v594_v4  ;;  %v608_v20 = vld [vmem:[%s757_s1 + $0x70] sm:$0xff]   ;;  %v611_v25 = vld [vmem:[%s757_s1 + $0x78] sm:$0xff]   ;;  %v32_v27 = vld [vmem:[%s758_s0] sm:$0xff] }
   0x8   :  { %536 = vmatprep.subr.bf16.mxu0 %v596_v6  ;;  %v609_v21 = vld [vmem:[%s757_s1 + $0x30] sm:$0xff]   ;;  %v52_v29 = vld [vmem:[%s759_s2] sm:$0x7]  ;;  %v40_v30 = vunpack.c.l.bf16 %v32_v27  ;;  %v41_v31 = vunpack.c.h.bf16 %v32_v27  ;;  %v613_v36 = vld [vmem:[%s757_s1 + $0xb8] sm:$0xff]  }
   0x9   :  { %573 = vmatpush3.bf16.msra.mxu1 %v595_v5  ;;  %v610_v23 = vld [vmem:[%s757_s1 + $0xb0] sm:$0xff]   ;;  %v81_v34 = vld [vmem:[%s760_s3] sm:$0x7]  ;;  %v61_v37 = vrot.slane %v52_v29, %v60_v22  ;;  %v57_v39 = vrot.slane %v52_v29, %v56_v24  ;;  %v612_v42 = vld [vmem:[%s757_s1 + $0x38] sm:$0xff]   ;;  %v65_v45 = vrot.slane %v52_v29, %v64_v26 }
   0xa   :  { %574 = vmatprep.subr.bf16.mxu1 %v598_v8  ;;  %v34_v28 = vld [vmem:[%s758_s0 + $0xc] sm:$0xff]  ;;  %v33_v35 = vld [vmem:[%s758_s0 + $0x8] ss:$12 sps:$4 sm:$0xff]   ;;  %v90_v38 = vrot.slane %v81_v34, %v60_v22  ;;  %v86_v40 = vrot.slane %v81_v34, %v56_v24  ;;  %v94_v46 = vrot.slane %v81_v34, %v64_v26  ;;  %v36_v63 = vld [vmem:[%s758_s0 + $0x18] sm:$0xff] }
   0xb   :  { %537 = vmatpush3.bf16.msra.mxu0 %v597_v7  ;;  %v43_v32 = vunpack.c.l.bf16 %v34_v28  ;;  %v44_v33 = vunpack.c.h.bf16 %v34_v28  ;;  %v37_v41 = vld [vmem:[%s758_s0 + $0x20] ss:$12 sps:$4 sm:$0xff]   ;;  %v42_v43 = vunpack.c.l.bf16 %v33_v35  ;;  %v45_v44 = vunpack.c.h.bf16 %v33_v35  ;;  %v38_v0 = vld [vmem:[%s758_s0 + $0x24] sm:$0xff] }
   0xc   :  { %538 = vmatprep.subr.bf16.mxu0 %v599_v9  ;;  %v70_v47 = vmul.f32 %v61_v37, %v41_v31  ;;  %v69_v49 = vmul.f32 %v57_v39, %v40_v30  ;;  %v48_v53 = vunpack.c.l.bf16 %v37_v41  ;;  %v51_v54 = vunpack.c.h.bf16 %v37_v41 }
   0xd   :  { %575 = vmatpush3.bf16.msra.mxu1 %v598_v8  ;;  %v73_v48 = vmul.f32 %v61_v37, %v44_v33  ;;  %v72_v50 = vmul.f32 %v57_v39, %v43_v32  ;;  %v71_v51 = vmul.f32 %v65_v45, %v42_v43  ;;  %v74_v52 = vmul.f32 %v65_v45, %v45_v44  ;;  %v512_v44 = vld [vmem:[%s762_s5] ss:$0 sm:$0xff] }
   0xe   :  { %576 = vmatprep.subr.bf16.mxu1 %v601_v11  ;;  %v99_v55 = vadd.f32 %v90_v38, %v70_v47  ;;  %v98_v57 = vadd.f32 %v86_v40, %v69_v49  ;;  %v77_v61 = vmul.f32 %v65_v45, %v48_v53  ;;  %v80_v62 = vmul.f32 %v65_v45, %v51_v54 }
   0xf   :  { %539 = vmatpush3.bf16.msra.mxu0 %v600_v10  ;;  %v102_v56 = vadd.f32 %v90_v38, %v73_v48  ;;  %v101_v58 = vadd.f32 %v86_v40, %v72_v50  ;;  %v100_v59 = vadd.f32 %v94_v46, %v71_v51  ;;  %v103_v60 = vadd.f32 %v94_v46, %v74_v52 }
  0x10   :  { %540 = vmatprep.subr.bf16.mxu0 %v602_v12  ;;  %v111_v1 = vmax.f32 %v99_v55, 0.0  ;;  %v110_v3 = vmax.f32 %v98_v57, 0.0  ;;  %v106_v7 = vadd.f32 %v94_v46, %v77_v61  ;;  %v109_v8 = vadd.f32 %v94_v46, %v80_v62 }
  0x11   :  { %577 = vmatpush3.bf16.msra.mxu1 %v601_v11  ;;  %v114_v2 = vmax.f32 %v102_v56, 0.0  ;;  %v113_v4 = vmax.f32 %v101_v58, 0.0  ;;  %v112_v5 = vmax.f32 %v100_v59, 0.0  ;;  %v115_v6 = vmax.f32 %v103_v60, 0.0 }
  0x12   :  { %578 = vmatprep.subr.bf16.mxu1 %v604_v14  ;;  %v47_v11 = vunpack.c.h.bf16 %v36_v63  ;;  %v50_v12 = vunpack.c.h.bf16 %v38_v0 }
  0x13   :  { %541 = vmatpush3.bf16.msra.mxu0 %v603_v15  ;;  %v123_v9 = vpack.c.bf16 %v114_v2, %v111_v1  ;;  %v122_v10 = vpack.c.bf16 %v113_v4, %v110_v3  ;;  %v124_v13 = vpack.c.bf16 %v115_v6, %v112_v5  ;;  %v121_v15 = vmax.f32 %v109_v8, 0.0 }
  0x14   :  { %542 = vmatprep.subr.bf16.mxu0 %v605_v16  ;;  %v46_v16 = vunpack.c.l.bf16 %v36_v63  ;;  %v76_v17 = vmul.f32 %v61_v37, %v47_v11 }
  0x15   :  { %579 = vmatpush3.bf16.msra.mxu1 %v604_v14  ;;  %v118_v14 = vmax.f32 %v106_v7, 0.0  ;;  %356 = vmatprep.mubr.bf16.mxu0 %v123_v9 }
  0x16   :  { %580 = vmatprep.subr.bf16.mxu1 %v607_v18  ;;  %586 = vmatprep.mubr.bf16.mxu1 %v124_v13  ;;  %v105_v22 = vadd.f32 %v90_v38, %v76_v17 }
  0x17   :  { %543 = vmatpush3.bf16.msra.mxu0 %v606_v19  ;;  %v49_v19 = vunpack.c.l.bf16 %v38_v0 }
  0x18   :  { %544 = vmatprep.subr.bf16.mxu0 %v608_v20  ;;  %v127_v20 = vpack.c.bf16 %v121_v15, %v118_v14  ;;  %v117_v26 = vmax.f32 %v105_v22, 0.0 }
  0x19   :  { %581 = vmatpush3.bf16.msra.mxu1 %v607_v18  ;;  %v79_v18 = vmul.f32 %v61_v37, %v50_v12  ;;  %v78_v24 = vmul.f32 %v57_v39, %v49_v19 }
  0x1a   :  { %582 = vmatprep.subr.bf16.mxu1 %v610_v23 }
  0x1b   :  { %545 = vmatpush3.bf16.msra.mxu0 %v609_v21  ;;  %v75_v21 = vmul.f32 %v57_v39, %v46_v16  ;;  %v107_v28 = vadd.f32 %v86_v40, %v78_v24 }
  0x1c   :  { %546 = vmatprep.subr.bf16.mxu0 %v611_v25 }
  0x1d   :  { %583 = vmatpush3.bf16.msra.mxu1 %v610_v23  ;;  %v108_v23 = vadd.f32 %v90_v38, %v79_v18  ;;  %v104_v25 = vadd.f32 %v86_v40, %v75_v21  ;;  %v119_v31 = vmax.f32 %v107_v28, 0.0  ;;  %v511_v38 = vld [vmem:[%s761_s4] ss:$0 sm:$0xff] }
  0x1e   :  { %584 = vmatprep.subr.bf16.mxu1 %v613_v36 }
  0x1f   :  { %547 = vmatpush3.bf16.msra.mxu0 %v612_v42  ;;  %v120_v27 = vmax.f32 %v108_v23, 0.0  ;;  %v116_v29 = vmax.f32 %v104_v25, 0.0 }
  0x21   :  { %585 = vmatpush3.bf16.msra.mxu1 %v613_v36  ;;  %v126_v30 = vpack.c.bf16 %v120_v27, %v117_v26  ;;  %v125_v32 = vpack.c.bf16 %v119_v31, %v116_v29 }
  0x22   :  { %357 = vmatmul.mubr.bf16.vlgmr.msra.gmra.mrb[0].mxu0 %v122_v10 }
  0x23   :  { %364 = vmatprep.mubr.bf16.mxu0 %v126_v30 }
  0x24   :  { %587 = vmatmul.mubr.bf16.vlgmr.msra.gmra.mrb[0].mxu1 %v127_v20 }
  0x2a   :  { %365 = vmatmul.mubr.bf16.gmra.mrb[4].mxu0 %v125_v32 }
  0xf5   :  { %v548_v33 = vpop.f32.mrb[0].mxu0 }
  0xf6   :  { %v549_v34 = vpop.f32.mrb[1].mxu0 }
  0xf7   :  { %v550_v35 = vadd.f32 %v549_v34, %v548_v33  ;;  %v551_v36 = vpop.f32.mrb[2].mxu0  ;;  %v588_v37 = vpop.f32.mrb[0].mxu1 }
  0xf8   :  { %v552_v41 = vpop.f32.mrb[3].mxu0  ;;  %v407_v42 = vpop.f32.mrb[1].mxu1 }
  0xf9   :  { %v553_v39 = vadd.f32 %v552_v41, %v551_v36  ;;  %v408_v43 = vadd.f32 %v550_v35, %v407_v42  ;;  %v589_v40 = vpop.f32.mrb[2].mxu1 }
  0xfa   :  { %v410_v45 = vpop.f32.mrb[3].mxu1 }
  0xfb   :  { %v444_v46 = vmul.f32 %v511_v38, %v408_v43  ;;  %v411_v47 = vadd.f32 %v553_v39, %v410_v45 }
  0xfd   :  { %v455_v48 = vadd.f32 %v512_v44, %v444_v46  ;;  %v445_v49 = vmul.f32 %v511_v38, %v411_v47  ;;  %v554_v50 = vpop.f32.mrb[4].mxu0 }
  0xfe   :  { %v555_v52 = vpop.f32.mrb[5].mxu0 }
  0xff   :  { %v456_v51 = vadd.f32 %v512_v44, %v445_v49  ;;  %v556_v53 = vadd.f32 %v555_v52, %v554_v50  ;;  %v557_v54 = vpop.f32.mrb[6].mxu0  ;;  %v459_v55 = vmax.f32 %v455_v48, 0.0 }
 0x100   :  { %v558_v57 = vpop.f32.mrb[7].mxu0 }
 0x101   :  { %v460_v56 = vmax.f32 %v456_v51, 0.0  ;;  %v416_v58 = vadd.f32 %v588_v37, %v556_v53  ;;  %v559_v59 = vadd.f32 %v558_v57, %v557_v54 }
 0x103   :  { %v524_v60 = vpack.c.bf16 %v460_v56, %v459_v55  ;;  %v446_v61 = vmul.f32 %v511_v38, %v416_v58  ;;  %v419_v62 = vadd.f32 %v589_v40, %v559_v59 }
 0x105   :  { %525 = vst [vmem:[%s763_s6] sm:$0xff] %v524_v60   ;;  %v457_v63 = vadd.f32 %v512_v44, %v446_v61  ;;  %v447_v0 = vmul.f32 %v511_v38, %v419_v62 }
 0x107   :  { %v458_v1 = vadd.f32 %v512_v44, %v447_v0  ;;  %v461_v2 = vmax.f32 %v457_v63, 0.0 }
 0x109   :  { %v462_v3 = vmax.f32 %v458_v1, 0.0 }
 0x10b   :  { %v529_v4 = vpack.c.bf16 %v462_v3, %v461_v2 }
 0x10d   :  { %531 = vst [vmem:[%s763_s6 + $0x8] sm:$0xff] %v529_v4  }

// kernel: densenet121_features.159
= control target key start
LH: loop header
LB: loop body
LE: loop exit
PB: predicated region body
PF: predicated region fallthrough
CT: control target
= control target key end

     0   :  { %v58_v23 = vlaneseq  ;;  %s899_s1 = inlined_call_operand.vmem [shape: bf16[512,128], index: 1, kind: input, shape index: {}]   ;;  %s900_s0 = inlined_call_operand.vmem [shape: bf16[32,512], index: 0, kind: input, shape index: {}]   ;;  %s901_s2 = inlined_call_operand.vmem [shape: f32[1,512], index: 2, kind: input, shape index: {}]   ;;  %s902_s3 = inlined_call_operand.vmem [shape: f32[1,512], index: 3, kind: input, shape index: {}]   ;;  %s903_s4 = inlined_call_operand.vmem [shape: f32[1,128], index: 4, kind: input, shape index: {}]   ;;  %s904_s5 = inlined_call_operand.vmem [shape: f32[1,128], index: 5, kind: input, shape index: {}]   ;;  %s905_s6 = inlined_call_operand.vmem [shape: bf16[32,128], index: 6, kind: output, shape index: {}]  }
   0x1   :  { %v688_v0 = vld [vmem:[%s899_s1 + $0x40] sm:$0xff]   ;;  %v692_v4 = vld [vmem:[%s899_s1 + $0x48] sm:$0xff]   ;;  %v696_v8 = vld [vmem:[%s899_s1 + $0x50] sm:$0xff]  }
   0x2   :  { %v689_v1 = vld [vmem:[%s899_s1 + $0xc0] sm:$0xff]   ;;  %632 = vmatprep.subr.bf16.mxu0 %v688_v0  ;;  %v693_v5 = vld [vmem:[%s899_s1 + $0xc8] sm:$0xff]   ;;  %v697_v9 = vld [vmem:[%s899_s1 + $0xd0] sm:$0xff]   ;;  %v59_v28 = vshrl.u32 %v58_v23, 7 }
   0x3   :  { %v690_v2 = vld [vmem:[%s899_s1] sm:$0xff]   ;;  %660 = vmatprep.subr.bf16.mxu1 %v689_v1  ;;  %v694_v6 = vld [vmem:[%s899_s1 + $0x8] sm:$0xff]   ;;  %v698_v10 = vld [vmem:[%s899_s1 + $0x10] sm:$0xff]  }
   0x4   :  { %v691_v3 = vld [vmem:[%s899_s1 + $0x80] sm:$0xff]   ;;  %633 = vmatpush3.bf16.msra.mxu0 %v690_v2  ;;  %v695_v7 = vld [vmem:[%s899_s1 + $0x88] sm:$0xff]   ;;  %v699_v11 = vld [vmem:[%s899_s1 + $0x90] sm:$0xff]   ;;  %v64_v33 = vsub.s32 1, %v59_v28  ;;  %v72_v35 = vsub.s32 3, %v59_v28  ;;  %v60_v39 = vsub.s32 0, %v59_v28 }
   0x5   :  { %661 = vmatpush3.bf16.msra.mxu1 %v691_v3  ;;  %634 = vmatprep.subr.bf16.mxu0 %v692_v4  ;;  %v700_v12 = vld [vmem:[%s899_s1 + $0x58] sm:$0xff]   ;;  %v704_v16 = vld [vmem:[%s899_s1 + $0x60] sm:$0xff]   ;;  %v708_v20 = vld [vmem:[%s899_s1 + $0x68] sm:$0xff]   ;;  %v68_v40 = vsub.s32 2, %v59_v28 }
   0x6   :  { %662 = vmatprep.subr.bf16.mxu1 %v693_v5  ;;  %v701_v13 = vld [vmem:[%s899_s1 + $0xd8] sm:$0xff]   ;;  %v705_v17 = vld [vmem:[%s899_s1 + $0xe0] sm:$0xff]   ;;  %v709_v21 = vld [vmem:[%s899_s1 + $0xe8] sm:$0xff]  }
   0x7   :  { %v702_v14 = vld [vmem:[%s899_s1 + $0x18] sm:$0xff]   ;;  %v706_v18 = vld [vmem:[%s899_s1 + $0x20] sm:$0xff]   ;;  %v710_v22 = vld [vmem:[%s899_s1 + $0x28] sm:$0xff]  }
   0x8   :  { %635 = vmatpush3.bf16.msra.mxu0 %v694_v6  ;;  %v703_v15 = vld [vmem:[%s899_s1 + $0x98] sm:$0xff]   ;;  %v707_v19 = vld [vmem:[%s899_s1 + $0xa0] sm:$0xff]   ;;  %v711_v24 = vld [vmem:[%s899_s1 + $0xa8] sm:$0xff]  }
   0x9   :  { %663 = vmatpush3.bf16.msra.mxu1 %v695_v7  ;;  %636 = vmatprep.subr.bf16.mxu0 %v696_v8  ;;  %v712_v25 = vld [vmem:[%s899_s1 + $0x70] sm:$0xff]   ;;  %v716_v30 = vld [vmem:[%s899_s1 + $0x78] sm:$0xff]   ;;  %v32_v36 = vld [vmem:[%s900_s0] sm:$0xff] }
   0xa   :  { %664 = vmatprep.subr.bf16.mxu1 %v697_v9  ;;  %v713_v26 = vld [vmem:[%s899_s1 + $0xf0] sm:$0xff]   ;;  %v717_v31 = vld [vmem:[%s899_s1 + $0xf8] sm:$0xff]   ;;  %v56_v38 = vld [vmem:[%s901_s2] sm:$0xf]  ;;  %v40_v41 = vunpack.c.l.bf16 %v32_v36  ;;  %v41_v42 = vunpack.c.h.bf16 %v32_v36 }
   0xb   :  { %v714_v27 = vld [vmem:[%s899_s1 + $0x30] sm:$0xff]   ;;  %v718_v32 = vld [vmem:[%s899_s1 + $0x38] sm:$0xff]   ;;  %v94_v45 = vld [vmem:[%s902_s3] sm:$0xf]  ;;  %v65_v48 = vrot.slane %v56_v38, %v64_v33  ;;  %v73_v54 = vrot.slane %v56_v38, %v72_v35  ;;  %v61_v58 = vrot.slane %v56_v38, %v60_v39  ;;  %v69_v62 = vrot.slane %v56_v38, %v68_v40 }
   0xc   :  { %637 = vmatpush3.bf16.msra.mxu0 %v698_v10  ;;  %v715_v29 = vld [vmem:[%s899_s1 + $0xb0] sm:$0xff]   ;;  %v719_v34 = vld [vmem:[%s899_s1 + $0xb8] sm:$0xff]   ;;  %v33_v46 = vld [vmem:[%s900_s0 + $0x8] sm:$0xff]  ;;  %v103_v49 = vrot.slane %v94_v45, %v64_v33  ;;  %v111_v55 = vrot.slane %v94_v45, %v72_v35  ;;  %v99_v59 = vrot.slane %v94_v45, %v60_v39  ;;  %v869_v63 = vrot.slane %v94_v45, %v68_v40 }
   0xd   :  { %665 = vmatpush3.bf16.msra.mxu1 %v699_v11  ;;  %638 = vmatprep.subr.bf16.mxu0 %v700_v12  ;;  %v34_v37 = vld [vmem:[%s900_s0 + $0x10] sm:$0xff]  ;;  %v35_v47 = vld [vmem:[%s900_s0 + $0x18] sm:$0xff]  ;;  %v42_v50 = vunpack.c.l.bf16 %v33_v46  ;;  %v43_v51 = vunpack.c.h.bf16 %v33_v46  ;;  %v79_v56 = vmul.f32 %v65_v48, %v41_v42  ;;  %v78_v2 = vmul.f32 %v61_v58, %v40_v41  ;;  %v36_v8 = vld [vmem:[%s900_s0 + $0x20] sm:$0xff] }
   0xe   :  { %666 = vmatprep.subr.bf16.mxu1 %v701_v13  ;;  %v44_v43 = vunpack.c.l.bf16 %v34_v37  ;;  %v45_v44 = vunpack.c.h.bf16 %v34_v37  ;;  %v46_v52 = vunpack.c.l.bf16 %v35_v47  ;;  %v47_v53 = vunpack.c.h.bf16 %v35_v47  ;;  %v38_v13 = vld [vmem:[%s900_s0 + $0x30] sm:$0xff] }
   0xf   :  { %v81_v60 = vmul.f32 %v73_v54, %v43_v51  ;;  %v117_v0 = vadd.f32 %v103_v49, %v79_v56  ;;  %v80_v6 = vmul.f32 %v69_v62, %v42_v50  ;;  %v116_v11 = vadd.f32 %v99_v59, %v78_v2 }
  0x10   :  { %639 = vmatpush3.bf16.msra.mxu0 %v702_v14  ;;  %v83_v57 = vmul.f32 %v65_v48, %v45_v44  ;;  %v85_v61 = vmul.f32 %v73_v54, %v47_v53  ;;  %v82_v3 = vmul.f32 %v61_v58, %v44_v43  ;;  %v84_v7 = vmul.f32 %v69_v62, %v46_v52 }
  0x11   :  { %667 = vmatpush3.bf16.msra.mxu1 %v703_v15  ;;  %640 = vmatprep.subr.bf16.mxu0 %v704_v16  ;;  %v119_v4 = vadd.f32 %v111_v55, %v81_v60  ;;  %v133_v9 = vmax.f32 %v117_v0, 0.0  ;;  %v118_v16 = vadd.f32 %v869_v63, %v80_v6  ;;  %v49_v23 = vunpack.c.h.bf16 %v36_v8 }
  0x12   :  { %668 = vmatprep.subr.bf16.mxu1 %v705_v17  ;;  %v121_v1 = vadd.f32 %v103_v49, %v83_v57  ;;  %v123_v5 = vadd.f32 %v111_v55, %v85_v61  ;;  %v120_v12 = vadd.f32 %v99_v59, %v82_v3  ;;  %v122_v17 = vadd.f32 %v869_v63, %v84_v7 }
  0x13   :  { %v135_v14 = vmax.f32 %v119_v4, 0.0  ;;  %v52_v35 = vunpack.c.l.bf16 %v38_v13 }
  0x14   :  { %641 = vmatpush3.bf16.msra.mxu0 %v706_v18  ;;  %v137_v10 = vmax.f32 %v121_v1, 0.0  ;;  %v139_v15 = vmax.f32 %v123_v5, 0.0  ;;  %v37_v18 = vld [vmem:[%s900_s0 + $0x28] sm:$0xff] }
  0x15   :  { %669 = vmatpush3.bf16.msra.mxu1 %v707_v19  ;;  %642 = vmatprep.subr.bf16.mxu0 %v708_v20  ;;  %v39_v19 = vld [vmem:[%s900_s0 + $0x38] sm:$0xff]  ;;  %v50_v39 = vunpack.c.l.bf16 %v37_v18  ;;  %v90_v42 = vmul.f32 %v61_v58, %v52_v35 }
  0x16   :  { %670 = vmatprep.subr.bf16.mxu1 %v709_v21  ;;  %v149_v20 = vpack.c.bf16 %v137_v10, %v133_v9  ;;  %v132_v21 = vmax.f32 %v116_v11, 0.0  ;;  %v54_v43 = vunpack.c.l.bf16 %v39_v19 }
  0x17   :  { %v88_v47 = vmul.f32 %v69_v62, %v50_v39  ;;  %v128_v52 = vadd.f32 %v99_v59, %v90_v42 }
  0x18   :  { %643 = vmatpush3.bf16.msra.mxu0 %v710_v22  ;;  %v136_v22 = vmax.f32 %v120_v12, 0.0  ;;  %448 = vmatprep.mubr.bf16.mxu0 %v149_v20 }
  0x19   :  { %671 = vmatpush3.bf16.msra.mxu1 %v711_v24  ;;  %644 = vmatprep.subr.bf16.mxu0 %v712_v25  ;;  %v151_v24 = vpack.c.bf16 %v139_v15, %v135_v14  ;;  %v134_v25 = vmax.f32 %v118_v16, 0.0  ;;  %v126_v57 = vadd.f32 %v869_v63, %v88_v47  ;;  %v144_v61 = vmax.f32 %v128_v52, 0.0  ;;  %v612_v14 = vld [vmem:[%s904_s5] ss:$0 sm:$0xff] }
  0x1a   :  { %672 = vmatprep.subr.bf16.mxu1 %v713_v26  ;;  %v138_v26 = vmax.f32 %v122_v17, 0.0  ;;  %v148_v28 = vpack.c.bf16 %v136_v22, %v132_v21 }
  0x1b   :  { %497 = vmatprep.mubr.bf16.mxu1 %v151_v24 }
  0x1c   :  { %645 = vmatpush3.bf16.msra.mxu0 %v714_v27  ;;  %v53_v27 = vunpack.c.h.bf16 %v38_v13 }
  0x1d   :  { %673 = vmatpush3.bf16.msra.mxu1 %v715_v29  ;;  %646 = vmatprep.subr.bf16.mxu0 %v716_v30  ;;  %v87_v29 = vmul.f32 %v65_v48, %v49_v23  ;;  %v51_v30 = vunpack.c.h.bf16 %v37_v18 }
  0x1e   :  { %674 = vmatprep.subr.bf16.mxu1 %v717_v31  ;;  %v55_v31 = vunpack.c.h.bf16 %v39_v19  ;;  %v91_v33 = vmul.f32 %v65_v48, %v53_v27  ;;  %v92_v48 = vmul.f32 %v69_v62, %v54_v43 }
  0x1f   :  { %v125_v36 = vadd.f32 %v103_v49, %v87_v29  ;;  %v89_v37 = vmul.f32 %v73_v54, %v51_v30 }
  0x20   :  { %647 = vmatpush3.bf16.msra.mxu0 %v718_v32  ;;  %v150_v32 = vpack.c.bf16 %v138_v26, %v134_v25  ;;  %v93_v38 = vmul.f32 %v73_v54, %v55_v31  ;;  %v129_v40 = vadd.f32 %v103_v49, %v91_v33  ;;  %v130_v49 = vadd.f32 %v869_v63, %v92_v48  ;;  %v611_v63 = vld [vmem:[%s903_s4] ss:$0 sm:$0xff] }
  0x21   :  { %675 = vmatpush3.bf16.msra.mxu1 %v719_v34  ;;  %v48_v34 = vunpack.c.l.bf16 %v36_v8  ;;  %v141_v44 = vmax.f32 %v125_v36, 0.0  ;;  %v127_v45 = vadd.f32 %v111_v55, %v89_v37 }
  0x22   :  { %v131_v46 = vadd.f32 %v111_v55, %v93_v38  ;;  %v145_v50 = vmax.f32 %v129_v40, 0.0  ;;  %v146_v2 = vmax.f32 %v130_v49, 0.0 }
  0x23   :  { %449 = vmatmul.mubr.bf16.vlgmr.msra.gmra.mrb[0].mxu0 %v148_v28  ;;  %v86_v41 = vmul.f32 %v61_v58, %v48_v34  ;;  %v143_v53 = vmax.f32 %v127_v45, 0.0  ;;  %v142_v58 = vmax.f32 %v126_v57, 0.0 }
  0x24   :  { %498 = vmatmul.mubr.bf16.vlgmr.msra.gmra.mrb[0].mxu1 %v150_v32  ;;  %v147_v56 = vmax.f32 %v131_v46, 0.0  ;;  %v153_v60 = vpack.c.bf16 %v145_v50, %v141_v44 }
  0x25   :  { %v124_v51 = vadd.f32 %v99_v59, %v86_v41  ;;  %v154_v55 = vpack.c.bf16 %v146_v2, %v142_v58 }
  0x26   :  { %v155_v0 = vpack.c.bf16 %v147_v56, %v143_v53  ;;  %456 = vmatprep.mubr.bf16.mxu0 %v153_v60 }
  0x27   :  { %v140_v54 = vmax.f32 %v124_v51, 0.0 }
  0x28   :  { %505 = vmatprep.mubr.bf16.mxu1 %v155_v0 }
  0x29   :  { %v152_v1 = vpack.c.bf16 %v144_v61, %v140_v54 }
  0x2b   :  { %457 = vmatmul.mubr.bf16.gmra.mrb[4].mxu0 %v152_v1 }
  0x2c   :  { %506 = vmatmul.mubr.bf16.gmra.mrb[4].mxu1 %v154_v55 }
  0xf6   :  { %v648_v59 = vpop.f32.mrb[0].mxu0 }
  0xf7   :  { %v676_v62 = vpop.f32.mrb[0].mxu1  ;;  %v649_v3 = vpop.f32.mrb[1].mxu0 }
  0xf8   :  { %v650_v4 = vadd.f32 %v649_v3, %v648_v59  ;;  %v677_v5 = vpop.f32.mrb[1].mxu1  ;;  %v651_v6 = vpop.f32.mrb[2].mxu0 }
  0xf9   :  { %v678_v7 = vadd.f32 %v677_v5, %v676_v62  ;;  %v679_v8 = vpop.f32.mrb[2].mxu1  ;;  %v652_v9 = vpop.f32.mrb[3].mxu0 }
  0xfa   :  { %v653_v10 = vadd.f32 %v652_v9, %v651_v6  ;;  %v680_v11 = vpop.f32.mrb[3].mxu1 }
  0xfb   :  { %v500_v12 = vadd.f32 %v678_v7, %v650_v4  ;;  %v681_v13 = vadd.f32 %v680_v11, %v679_v8 }
  0xfd   :  { %v536_v15 = vmul.f32 %v611_v63, %v500_v12  ;;  %v503_v16 = vadd.f32 %v681_v13, %v653_v10 }
  0xfe   :  { %v654_v19 = vpop.f32.mrb[4].mxu0 }
  0xff   :  { %v547_v17 = vadd.f32 %v612_v14, %v536_v15  ;;  %v537_v18 = vmul.f32 %v611_v63, %v503_v16  ;;  %v655_v20 = vpop.f32.mrb[5].mxu0  ;;  %v682_v22 = vpop.f32.mrb[4].mxu1 }
 0x100   :  { %v656_v23 = vadd.f32 %v655_v20, %v654_v19  ;;  %v657_v24 = vpop.f32.mrb[6].mxu0  ;;  %v683_v25 = vpop.f32.mrb[5].mxu1 }
 0x101   :  { %v548_v21 = vadd.f32 %v612_v14, %v537_v18  ;;  %v658_v26 = vpop.f32.mrb[7].mxu0  ;;  %v551_v27 = vmax.f32 %v547_v17, 0.0  ;;  %v684_v29 = vadd.f32 %v683_v25, %v682_v22  ;;  %v685_v30 = vpop.f32.mrb[6].mxu1 }
 0x102   :  { %v659_v31 = vadd.f32 %v658_v26, %v657_v24  ;;  %v686_v32 = vpop.f32.mrb[7].mxu1 }
 0x103   :  { %v552_v28 = vmax.f32 %v548_v21, 0.0  ;;  %v508_v34 = vadd.f32 %v684_v29, %v656_v23  ;;  %v687_v35 = vadd.f32 %v686_v32, %v685_v30 }
 0x105   :  { %v624_v33 = vpack.c.bf16 %v552_v28, %v551_v27  ;;  %v538_v36 = vmul.f32 %v611_v63, %v508_v34  ;;  %v511_v37 = vadd.f32 %v687_v35, %v659_v31 }
 0x107   :  { %625 = vst [vmem:[%s905_s6] sm:$0xff] %v624_v33   ;;  %v549_v38 = vadd.f32 %v612_v14, %v538_v36  ;;  %v539_v39 = vmul.f32 %v611_v63, %v511_v37 }
 0x109   :  { %v550_v40 = vadd.f32 %v612_v14, %v539_v39  ;;  %v553_v41 = vmax.f32 %v549_v38, 0.0 }
 0x10b   :  { %v554_v42 = vmax.f32 %v550_v40, 0.0 }
 0x10d   :  { %v629_v43 = vpack.c.bf16 %v554_v42, %v553_v41 }
 0x10f   :  { %631 = vst [vmem:[%s905_s6 + $0x8] sm:$0xff] %v629_v43  }

// kernel: densenet121_features.166
= control target key start
LH: loop header
LB: loop body
LE: loop exit
PB: predicated region body
PF: predicated region fallthrough
CT: control target
= control target key end

     0   :  { %s92_s0 = inlined_call_operand.vmem [shape: bf16[8,256], index: 0, kind: input, shape index: {}]   ;;  %s93_s1 = inlined_call_operand.vmem [shape: bf16[8,256], index: 1, kind: input, shape index: {}]   ;;  %s94_s2 = inlined_call_operand.vmem [shape: bf16[8,256], index: 2, kind: input, shape index: {}]   ;;  %s95_s3 = inlined_call_operand.vmem [shape: bf16[8,256], index: 3, kind: input, shape index: {}]   ;;  %s96_s4 = inlined_call_operand.vmem [shape: bf16[8,256], index: 4, kind: output, shape index: {}]  }
   0x1   :  { %v17_v0 = vld [vmem:[%s92_s0] sm:$0xff] }
   0x2   :  { %v20_v1 = vld [vmem:[%s93_s1] sm:$0xff]  ;;  %v18_v3 = vunpack.c.l.bf16 %v17_v0  ;;  %v19_v4 = vunpack.c.h.bf16 %v17_v0 }
   0x3   :  { %v25_v2 = vld [vmem:[%s94_s2] sm:$0xff]  ;;  %v21_v5 = vunpack.c.l.bf16 %v20_v1  ;;  %v22_v6 = vunpack.c.h.bf16 %v20_v1 }
   0x4   :  { %v30_v7 = vld [vmem:[%s95_s3] sm:$0xff]  ;;  %v26_v8 = vunpack.c.l.bf16 %v25_v2  ;;  %v27_v9 = vunpack.c.h.bf16 %v25_v2 }
   0x5   :  { %v23_v10 = vadd.f32 %v21_v5, %v18_v3  ;;  %v24_v11 = vadd.f32 %v22_v6, %v19_v4  ;;  %v31_v12 = vunpack.c.l.bf16 %v30_v7  ;;  %v32_v13 = vunpack.c.h.bf16 %v30_v7 }
   0x7   :  { %v28_v14 = vadd.f32 %v26_v8, %v23_v10  ;;  %v29_v15 = vadd.f32 %v27_v9, %v24_v11 }
   0x9   :  { %v33_v16 = vadd.f32 %v31_v12, %v28_v14  ;;  %v34_v17 = vadd.f32 %v32_v13, %v29_v15 }
   0xb   :  { %v35_v18 = vmul.f32 0.25, %v33_v16  ;;  %v36_v19 = vmul.f32 0.25, %v34_v17 }
   0xd   :  { %v51_v20 = vpack.c.bf16 %v36_v19, %v35_v18 }
   0xf   :  { %45 = vst [vmem:[%s96_s4] sm:$0xff] %v51_v20 }

// kernel: densenet121_features.165
= control target key start
LH: loop header
LB: loop body
LE: loop exit
PB: predicated region body
PF: predicated region fallthrough
CT: control target
= control target key end

     0   :  { %v61_v37 = vlaneseq  ;;  %s1217_s1 = inlined_call_operand.vmem [shape: bf16[512,256], index: 1, kind: input, shape index: {}]   ;;  %s1218_s4 = inlined_call_operand.vmem [shape: f32[1,256], index: 4, kind: input, shape index: {}, may-alias: {4,5}]   ;;  %s1219_s5 = inlined_call_operand.vmem [shape: f32[1,256], index: 5, kind: input, shape index: {}, may-alias: {4,5}]   ;;  %s1220_s0 = inlined_call_operand.vmem [shape: bf16[32,512], index: 0, kind: input, shape index: {}]   ;;  %s1221_s2 = inlined_call_operand.vmem [shape: f32[1,512], index: 2, kind: input, shape index: {}]   ;;  %s1222_s3 = inlined_call_operand.vmem [shape: f32[1,512], index: 3, kind: input, shape index: {}]   ;;  %s1223_s6 = inlined_call_operand.vmem [shape: bf16[32,256], index: 6, kind: output, shape index: {}]  }
   0x1   :  { %v796_v0 = vld [vmem:[%s1217_s1 + $0x4] ss:$8 sps:$4 sm:$0xff]   ;;  %v800_v2 = vld [vmem:[%s1217_s1] ss:$8 sps:$4 sm:$0xff]   ;;  %v802_v4 = vld [vmem:[%s1217_s1 + $0x14] ss:$8 sps:$4 sm:$0xff]  }
   0x2   :  { %v798_v1 = vld [vmem:[%s1217_s1 + $0x104] ss:$8 sps:$4 sm:$0xff]   ;;  %551 = vmatprep.subr.bf16.mxu1 %v796_v0  ;;  %v801_v3 = vld [vmem:[%s1217_s1 + $0x100] ss:$8 sps:$4 sm:$0xff]   ;;  %v804_v5 = vld [vmem:[%s1217_s1 + $0x114] ss:$8 sps:$4 sm:$0xff]  }
   0x3   :  { %604 = vmatprep.subr.bf16.mxu0 %v798_v1  ;;  %552 = vmatpush1.bf16.msra.mxu1 %v800_v2  ;;  %v806_v6 = vld [vmem:[%s1217_s1 + $0x10] ss:$8 sps:$4 sm:$0xff]   ;;  %v808_v8 = vld [vmem:[%s1217_s1 + $0x24] ss:$8 sps:$4 sm:$0xff]   ;;  %v812_v10 = vld [vmem:[%s1217_s1 + $0x20] ss:$8 sps:$4 sm:$0xff]  }
   0x4   :  { %605 = vmatpush1.bf16.msra.mxu0 %v801_v3  ;;  %553 = vmatprep.subr.bf16.mxu1 %v802_v4  ;;  %v807_v7 = vld [vmem:[%s1217_s1 + $0x110] ss:$8 sps:$4 sm:$0xff]   ;;  %v810_v9 = vld [vmem:[%s1217_s1 + $0x124] ss:$8 sps:$4 sm:$0xff]   ;;  %v813_v11 = vld [vmem:[%s1217_s1 + $0x120] ss:$8 sps:$4 sm:$0xff]  }
   0x5   :  { %606 = vmatprep.subr.bf16.mxu0 %v804_v5  ;;  %v814_v12 = vld [vmem:[%s1217_s1 + $0x34] ss:$8 sps:$4 sm:$0xff]   ;;  %v818_v14 = vld [vmem:[%s1217_s1 + $0x30] ss:$8 sps:$4 sm:$0xff]   ;;  %v820_v16 = vld [vmem:[%s1217_s1 + $0x44] ss:$8 sps:$4 sm:$0xff]  }
   0x6   :  { %v816_v13 = vld [vmem:[%s1217_s1 + $0x134] ss:$8 sps:$4 sm:$0xff]   ;;  %v819_v15 = vld [vmem:[%s1217_s1 + $0x130] ss:$8 sps:$4 sm:$0xff]   ;;  %v822_v17 = vld [vmem:[%s1217_s1 + $0x144] ss:$8 sps:$4 sm:$0xff]  }
   0x7   :  { %554 = vmatpush1.bf16.msra.mxu1 %v806_v6  ;;  %v824_v18 = vld [vmem:[%s1217_s1 + $0x40] ss:$8 sps:$4 sm:$0xff]   ;;  %v826_v20 = vld [vmem:[%s1217_s1 + $0x54] ss:$8 sps:$4 sm:$0xff]   ;;  %v830_v22 = vld [vmem:[%s1217_s1 + $0x50] ss:$8 sps:$4 sm:$0xff]  }
   0x8   :  { %607 = vmatpush1.bf16.msra.mxu0 %v807_v7  ;;  %555 = vmatprep.subr.bf16.mxu1 %v808_v8  ;;  %v825_v19 = vld [vmem:[%s1217_s1 + $0x140] ss:$8 sps:$4 sm:$0xff]   ;;  %v828_v21 = vld [vmem:[%s1217_s1 + $0x154] ss:$8 sps:$4 sm:$0xff]   ;;  %v831_v23 = vld [vmem:[%s1217_s1 + $0x150] ss:$8 sps:$4 sm:$0xff]  }
   0x9   :  { %608 = vmatprep.subr.bf16.mxu0 %v810_v9  ;;  %v832_v24 = vld [vmem:[%s1217_s1 + $0x64] ss:$8 sps:$4 sm:$0xff]   ;;  %v836_v26 = vld [vmem:[%s1217_s1 + $0x60] ss:$8 sps:$4 sm:$0xff]   ;;  %v838_v28 = vld [vmem:[%s1217_s1 + $0x74] ss:$8 sps:$4 sm:$0xff]  }
   0xa   :  { %v834_v25 = vld [vmem:[%s1217_s1 + $0x164] ss:$8 sps:$4 sm:$0xff]   ;;  %v837_v27 = vld [vmem:[%s1217_s1 + $0x160] ss:$8 sps:$4 sm:$0xff]   ;;  %v840_v29 = vld [vmem:[%s1217_s1 + $0x174] ss:$8 sps:$4 sm:$0xff]  }
   0xb   :  { %556 = vmatpush1.bf16.msra.mxu1 %v812_v10  ;;  %v842_v30 = vld [vmem:[%s1217_s1 + $0x70] ss:$8 sps:$4 sm:$0xff]   ;;  %v844_v32 = vld [vmem:[%s1217_s1 + $0x84] ss:$8 sps:$4 sm:$0xff]   ;;  %v848_v34 = vld [vmem:[%s1217_s1 + $0x80] ss:$8 sps:$4 sm:$0xff]  }
   0xc   :  { %609 = vmatpush1.bf16.msra.mxu0 %v813_v11  ;;  %557 = vmatprep.subr.bf16.mxu1 %v814_v12  ;;  %v843_v31 = vld [vmem:[%s1217_s1 + $0x170] ss:$8 sps:$4 sm:$0xff]   ;;  %v846_v33 = vld [vmem:[%s1217_s1 + $0x184] ss:$8 sps:$4 sm:$0xff]   ;;  %v849_v35 = vld [vmem:[%s1217_s1 + $0x180] ss:$8 sps:$4 sm:$0xff]  }
   0xd   :  { %610 = vmatprep.subr.bf16.mxu0 %v816_v13  ;;  %v850_v36 = vld [vmem:[%s1217_s1 + $0x94] ss:$8 sps:$4 sm:$0xff]   ;;  %v854_v39 = vld [vmem:[%s1217_s1 + $0x90] ss:$8 sps:$4 sm:$0xff]   ;;  %v856_v41 = vld [vmem:[%s1217_s1 + $0xa4] ss:$8 sps:$4 sm:$0xff]  }
   0xe   :  { %v852_v38 = vld [vmem:[%s1217_s1 + $0x194] ss:$8 sps:$4 sm:$0xff]   ;;  %v855_v40 = vld [vmem:[%s1217_s1 + $0x190] ss:$8 sps:$4 sm:$0xff]   ;;  %v62_v42 = vshrl.u32 %v61_v37, 7  ;;  %v35_v50 = vld [vmem:[%s1220_s0] sm:$0xff] }
   0xf   :  { %558 = vmatpush1.bf16.msra.mxu1 %v818_v14  ;;  %v858_v43 = vld [vmem:[%s1217_s1 + $0x1a4] ss:$8 sps:$4 sm:$0xff]   ;;  %v860_v44 = vld [vmem:[%s1217_s1 + $0xa0] ss:$8 sps:$4 sm:$0xff]   ;;  %v862_v46 = vld [vmem:[%s1217_s1 + $0xb4] ss:$8 sps:$4 sm:$0xff]   ;;  %v43_v54 = vunpack.c.l.bf16 %v35_v50  ;;  %v44_v55 = vunpack.c.h.bf16 %v35_v50 }
  0x10   :  { %611 = vmatpush1.bf16.msra.mxu0 %v819_v15  ;;  %559 = vmatprep.subr.bf16.mxu1 %v820_v16  ;;  %v861_v45 = vld [vmem:[%s1217_s1 + $0x1a0] ss:$8 sps:$4 sm:$0xff]   ;;  %v67_v47 = vsub.s32 1, %v62_v42  ;;  %v864_v48 = vld [vmem:[%s1217_s1 + $0x1b4] ss:$8 sps:$4 sm:$0xff]   ;;  %v75_v51 = vsub.s32 3, %v62_v42 }
  0x11   :  { %612 = vmatprep.subr.bf16.mxu0 %v822_v17  ;;  %v866_v49 = vld [vmem:[%s1217_s1 + $0xb0] ss:$8 sps:$4 sm:$0xff]   ;;  %v63_v52 = vsub.s32 0, %v62_v42  ;;  %v59_v56 = vld [vmem:[%s1221_s2] sm:$0xf]  ;;  %v71_v58 = vsub.s32 2, %v62_v42 }
  0x12   :  { %v37_v53 = vld [vmem:[%s1220_s0 + $0x10] sm:$0xff]  ;;  %v97_v57 = vld [vmem:[%s1222_s3] sm:$0xf]  ;;  %v1083_v62 = vrot.slane %v59_v56, %v67_v47  ;;  %v36_v0 = vld [vmem:[%s1220_s0 + $0x8] sm:$0xff]  ;;  %v1106_v11 = vrot.slane %v59_v56, %v75_v51 }
  0x13   :  { %560 = vmatpush1.bf16.msra.mxu1 %v824_v18  ;;  %v867_v59 = vld [vmem:[%s1217_s1 + $0x1b0] ss:$8 sps:$4 sm:$0xff]   ;;  %v47_v60 = vunpack.c.l.bf16 %v37_v53  ;;  %v48_v61 = vunpack.c.h.bf16 %v37_v53  ;;  %v1085_v63 = vrot.slane %v97_v57, %v67_v47  ;;  %v868_v2 = vld [vmem:[%s1217_s1 + $0xc4] ss:$8 sps:$4 sm:$0xff]   ;;  %v45_v4 = vunpack.c.l.bf16 %v36_v0  ;;  %v872_v18 = vld [vmem:[%s1217_s1 + $0xc0] ss:$8 sps:$4 sm:$0xff]  }
  0x14   :  { %613 = vmatpush1.bf16.msra.mxu0 %v825_v19  ;;  %561 = vmatprep.subr.bf16.mxu1 %v826_v20  ;;  %v38_v1 = vld [vmem:[%s1220_s0 + $0x18] sm:$0xff]  ;;  %v870_v3 = vld [vmem:[%s1217_s1 + $0x1c4] ss:$8 sps:$4 sm:$0xff]   ;;  %v46_v5 = vunpack.c.h.bf16 %v36_v0  ;;  %v82_v9 = vmul.f32 %v1083_v62, %v44_v55  ;;  %v1108_v12 = vrot.slane %v97_v57, %v75_v51  ;;  %v1113_v13 = vld [vmem:[%s1220_s0 + $0x30] sm:$0xff]  ;;  %v1115_v14 = vrot.slane %v59_v56, %v63_v52 }
  0x15   :  { %614 = vmatprep.subr.bf16.mxu0 %v828_v21  ;;  %v49_v6 = vunpack.c.l.bf16 %v38_v1  ;;  %v50_v7 = vunpack.c.h.bf16 %v38_v1  ;;  %v1102_v8 = vld [vmem:[%s1220_s0 + $0x20] sm:$0xff]  ;;  %v86_v10 = vmul.f32 %v1083_v62, %v48_v61  ;;  %v1117_v15 = vrot.slane %v97_v57, %v63_v52  ;;  %v40_v37 = vld [vmem:[%s1220_s0 + $0x28] sm:$0xff]  ;;  %v886_v61 = vld [vmem:[%s1217_s1 + $0xf4] ss:$8 sps:$4 sm:$0xff]  }
  0x16   :  { %v1119_v16 = vrot.slane %v59_v56, %v71_v58  ;;  %v1121_v17 = vrot.slane %v97_v57, %v71_v58  ;;  %v873_v19 = vld [vmem:[%s1217_s1 + $0x1c0] ss:$8 sps:$4 sm:$0xff]   ;;  %v120_v20 = vadd.f32 %v1085_v63, %v82_v9  ;;  %v54_v51 = vunpack.c.h.bf16 %v40_v37 }
  0x17   :  { %562 = vmatpush1.bf16.msra.mxu1 %v830_v22  ;;  %v124_v21 = vadd.f32 %v1085_v63, %v86_v10  ;;  %v84_v22 = vmul.f32 %v1106_v11, %v46_v5  ;;  %v884_v55 = vld [vmem:[%s1217_s1 + $0xe0] ss:$8 sps:$4 sm:$0xff]  }
  0x18   :  { %615 = vmatpush1.bf16.msra.mxu0 %v831_v23  ;;  %563 = vmatprep.subr.bf16.mxu1 %v832_v24  ;;  %v52_v23 = vunpack.c.h.bf16 %v1102_v8  ;;  %v874_v24 = vld [vmem:[%s1217_s1 + $0xd4] ss:$8 sps:$4 sm:$0xff]   ;;  %v885_v56 = vld [vmem:[%s1217_s1 + $0x1e0] ss:$8 sps:$4 sm:$0xff]  }
  0x19   :  { %616 = vmatprep.subr.bf16.mxu0 %v834_v25  ;;  %v876_v25 = vld [vmem:[%s1217_s1 + $0x1d4] ss:$8 sps:$4 sm:$0xff]  }
  0x1a   :  { %v90_v42 = vmul.f32 %v1083_v62, %v52_v23 }
  0x1b   :  { %564 = vmatpush1.bf16.msra.mxu1 %v836_v26  ;;  %v88_v26 = vmul.f32 %v1106_v11, %v50_v7  ;;  %v890_v7 = vld [vmem:[%s1217_s1 + $0xf0] ss:$8 sps:$4 sm:$0xff]  }
  0x1c   :  { %617 = vmatpush1.bf16.msra.mxu0 %v837_v27  ;;  %565 = vmatprep.subr.bf16.mxu1 %v838_v28  ;;  %v81_v27 = vmul.f32 %v1115_v14, %v43_v54  ;;  %v85_v28 = vmul.f32 %v1115_v14, %v47_v60  ;;  %v128_v57 = vadd.f32 %v1085_v63, %v90_v42  ;;  %v51_v60 = vunpack.c.l.bf16 %v1102_v8 }
  0x1d   :  { %618 = vmatprep.subr.bf16.mxu0 %v840_v29  ;;  %v56_v29 = vunpack.c.h.bf16 %v1113_v13 }
  0x1e   :  { %v123_v47 = vadd.f32 %v1117_v15, %v85_v28  ;;  %v89_v9 = vmul.f32 %v1115_v14, %v51_v60 }
  0x1f   :  { %566 = vmatpush1.bf16.msra.mxu1 %v842_v30  ;;  %v136_v30 = vmax.f32 %v120_v20, 0.0  ;;  %v94_v50 = vmul.f32 %v1083_v62, %v56_v29  ;;  %v888_v62 = vld [vmem:[%s1217_s1 + $0x1f4] ss:$8 sps:$4 sm:$0xff]  }
  0x20   :  { %619 = vmatpush1.bf16.msra.mxu0 %v843_v31  ;;  %567 = vmatprep.subr.bf16.mxu1 %v844_v32  ;;  %v140_v31 = vmax.f32 %v124_v21, 0.0  ;;  %v122_v32 = vadd.f32 %v1108_v12, %v84_v22  ;;  %v139_v0 = vmax.f32 %v123_v47, 0.0 }
  0x21   :  { %620 = vmatprep.subr.bf16.mxu0 %v846_v33  ;;  %v83_v33 = vmul.f32 %v1119_v16, %v45_v4  ;;  %v132_v58 = vadd.f32 %v1085_v63, %v94_v50  ;;  %v53_v63 = vunpack.c.l.bf16 %v40_v37 }
  0x23   :  { %568 = vmatpush1.bf16.msra.mxu1 %v848_v34  ;;  %v126_v34 = vadd.f32 %v1108_v12, %v88_v26 }
  0x24   :  { %621 = vmatpush1.bf16.msra.mxu0 %v849_v35  ;;  %569 = vmatprep.subr.bf16.mxu1 %v850_v36  ;;  %v119_v35 = vadd.f32 %v1117_v15, %v81_v27  ;;  %v87_v36 = vmul.f32 %v1119_v16, %v49_v6 }
  0x25   :  { %622 = vmatprep.subr.bf16.mxu0 %v852_v38  ;;  %v878_v38 = vld [vmem:[%s1217_s1 + $0xd0] ss:$8 sps:$4 sm:$0xff]  }
  0x26   :  { %v135_v53 = vmax.f32 %v119_v35, 0.0 }
  0x27   :  { %570 = vmatpush1.bf16.msra.mxu1 %v854_v39  ;;  %v879_v39 = vld [vmem:[%s1217_s1 + $0x1d0] ss:$8 sps:$4 sm:$0xff]  }
  0x28   :  { %623 = vmatpush1.bf16.msra.mxu0 %v855_v40  ;;  %571 = vmatprep.subr.bf16.mxu1 %v856_v41  ;;  %v152_v40 = vpack.c.bf16 %v140_v31, %v136_v30  ;;  %v138_v41 = vmax.f32 %v122_v32, 0.0  ;;  %v151_v22 = vpack.c.bf16 %v139_v0, %v135_v53 }
  0x29   :  { %624 = vmatprep.subr.bf16.mxu0 %v858_v43  ;;  %v42_v43 = vld [vmem:[%s1220_s0 + $0x38] sm:$0xff] }
  0x2a   :  { %583 = vmatprep.mubr.bf16.mxu1 %v152_v40  ;;  %v58_v54 = vunpack.c.h.bf16 %v42_v43  ;;  %v57_v6 = vunpack.c.l.bf16 %v42_v43 }
  0x2b   :  { %572 = vmatpush1.bf16.msra.mxu1 %v860_v44  ;;  %v880_v44 = vld [vmem:[%s1217_s1 + $0xe4] ss:$8 sps:$4 sm:$0xff]  }
  0x2c   :  { %625 = vmatpush1.bf16.msra.mxu0 %v861_v45  ;;  %573 = vmatprep.subr.bf16.mxu1 %v862_v46  ;;  %v882_v45 = vld [vmem:[%s1217_s1 + $0x1e4] ss:$8 sps:$4 sm:$0xff]   ;;  %v142_v46 = vmax.f32 %v126_v34, 0.0  ;;  %v96_v1 = vmul.f32 %v1106_v11, %v58_v54  ;;  %v95_v21 = vmul.f32 %v1119_v16, %v57_v6 }
  0x2d   :  { %626 = vmatprep.subr.bf16.mxu0 %v864_v48  ;;  %v121_v48 = vadd.f32 %v1121_v17, %v83_v33 }
  0x2e   :  { %v154_v52 = vpack.c.bf16 %v142_v46, %v138_v41  ;;  %v134_v8 = vadd.f32 %v1108_v12, %v96_v1  ;;  %v133_v26 = vadd.f32 %v1121_v17, %v95_v21 }
  0x2f   :  { %574 = vmatpush1.bf16.msra.mxu1 %v866_v49  ;;  %v125_v49 = vadd.f32 %v1121_v17, %v87_v36 }
  0x30   :  { %627 = vmatpush1.bf16.msra.mxu0 %v867_v59  ;;  %575 = vmatprep.subr.bf16.mxu1 %v868_v2  ;;  %v92_v59 = vmul.f32 %v1106_v11, %v54_v51  ;;  %v55_v2 = vunpack.c.l.bf16 %v1113_v13  ;;  %v91_v11 = vmul.f32 %v1119_v16, %v53_v63  ;;  %v891_v13 = vld [vmem:[%s1217_s1 + $0x1f0] ss:$8 sps:$4 sm:$0xff]   ;;  %v149_v31 = vmax.f32 %v133_v26, 0.0 }
  0x31   :  { %628 = vmatprep.subr.bf16.mxu0 %v870_v3  ;;  %636 = vmatprep.mubr.bf16.mxu0 %v154_v52  ;;  %v137_v3 = vmax.f32 %v121_v48, 0.0  ;;  %v141_v4 = vmax.f32 %v125_v49, 0.0 }
  0x32   :  { %v130_v5 = vadd.f32 %v1108_v12, %v92_v59  ;;  %v93_v10 = vmul.f32 %v1115_v14, %v55_v2  ;;  %v150_v12 = vmax.f32 %v134_v8, 0.0  ;;  %v127_v14 = vadd.f32 %v1117_v15, %v89_v9 }
  0x33   :  { %576 = vmatpush1.bf16.msra.mxu1 %v872_v18  ;;  %v144_v18 = vmax.f32 %v128_v57, 0.0  ;;  %v153_v23 = vpack.c.bf16 %v141_v4, %v137_v3 }
  0x34   :  { %629 = vmatpush1.bf16.msra.mxu0 %v873_v19  ;;  %577 = vmatprep.subr.bf16.mxu1 %v874_v24  ;;  %v148_v19 = vmax.f32 %v132_v58, 0.0  ;;  %v146_v20 = vmax.f32 %v130_v5, 0.0  ;;  %v131_v24 = vadd.f32 %v1117_v15, %v93_v10  ;;  %v143_v16 = vmax.f32 %v127_v14, 0.0 }
  0x35   :  { %630 = vmatprep.subr.bf16.mxu0 %v876_v25  ;;  %v129_v25 = vadd.f32 %v1121_v17, %v91_v11 }
  0x36   :  { %v156_v27 = vpack.c.bf16 %v148_v19, %v144_v18  ;;  %v158_v28 = vpack.c.bf16 %v150_v12, %v146_v20  ;;  %v147_v29 = vmax.f32 %v131_v24, 0.0 }
  0x37   :  { %578 = vmatpush1.bf16.msra.mxu1 %v878_v38  ;;  %v145_v30 = vmax.f32 %v129_v25, 0.0 }
  0x38   :  { %631 = vmatpush1.bf16.msra.mxu0 %v879_v39  ;;  %579 = vmatprep.subr.bf16.mxu1 %v880_v44  ;;  %v155_v32 = vpack.c.bf16 %v147_v29, %v143_v16 }
  0x39   :  { %632 = vmatprep.subr.bf16.mxu0 %v882_v45  ;;  %v157_v33 = vpack.c.bf16 %v149_v31, %v145_v30 }
  0x3b   :  { %580 = vmatpush1.bf16.msra.mxu1 %v884_v55 }
  0x3c   :  { %633 = vmatpush1.bf16.msra.mxu0 %v885_v56  ;;  %581 = vmatprep.subr.bf16.mxu1 %v886_v61 }
  0x3d   :  { %634 = vmatprep.subr.bf16.mxu0 %v888_v62 }
  0x3f   :  { %582 = vmatpush1.bf16.msra.mxu1 %v890_v7 }
  0x40   :  { %635 = vmatpush1.bf16.msra.mxu0 %v891_v13 }
  0x42   :  { %584 = vmatmul.mubr.bf16.vlgmr.msra.gmra.mrb[0].mxu1 %v151_v22 }
  0x43   :  { %637 = vmatmul.mubr.bf16.vlgmr.msra.gmra.mrb[0].mxu0 %v153_v23  ;;  %593 = vmatprep.mubr.bf16.mxu1 %v156_v27 }
  0x44   :  { %646 = vmatprep.mubr.bf16.mxu0 %v158_v28 }
  0x4a   :  { %594 = vmatmul.mubr.bf16.gmra.mrb[4].mxu1 %v155_v32 }
  0x4b   :  { %647 = vmatmul.mubr.bf16.gmra.mrb[4].mxu0 %v157_v33 }
 0x115   :  { %v585_v15 = vpop.f32.mrb[0].mxu1 }
 0x116   :  { %v638_v34 = vpop.f32.mrb[0].mxu0  ;;  %v587_v17 = vpop.f32.mrb[1].mxu1 }
 0x117   :  { %v639_v35 = vadd.f32 %v638_v34, %v585_v15  ;;  %v640_v36 = vpop.f32.mrb[1].mxu0  ;;  %v589_v38 = vpop.f32.mrb[2].mxu1 }
 0x118   :  { %v641_v37 = vadd.f32 %v640_v36, %v587_v17  ;;  %v642_v39 = vpop.f32.mrb[2].mxu0  ;;  %v591_v41 = vpop.f32.mrb[3].mxu1 }
 0x119   :  { %v643_v40 = vadd.f32 %v642_v39, %v589_v38  ;;  %v644_v42 = vpop.f32.mrb[3].mxu0 }
 0x11a   :  { %v784_v43 = vpack.c.bf16 %v641_v37, %v639_v35  ;;  %v645_v44 = vadd.f32 %v644_v42, %v591_v41 }
 0x11c   :  { %708 = vst [vmem:[%s1223_s6] sm:$0xff] %v784_v43  ;;  %v785_v45 = vpack.c.bf16 %v645_v44, %v643_v40 }
 0x11d   :  { %v595_v46 = vpop.f32.mrb[4].mxu1 }
 0x11e   :  { %709 = vst [vmem:[%s1223_s6 + $0x8] sm:$0xff] %v785_v45  ;;  %v648_v47 = vpop.f32.mrb[4].mxu0  ;;  %v597_v49 = vpop.f32.mrb[5].mxu1 }
 0x11f   :  { %v649_v48 = vadd.f32 %v648_v47, %v595_v46  ;;  %v650_v50 = vpop.f32.mrb[5].mxu0  ;;  %v599_v52 = vpop.f32.mrb[6].mxu1 }
 0x120   :  { %v651_v51 = vadd.f32 %v650_v50, %v597_v49  ;;  %v652_v53 = vpop.f32.mrb[6].mxu0  ;;  %v601_v55 = vpop.f32.mrb[7].mxu1 }
 0x121   :  { %v653_v54 = vadd.f32 %v652_v53, %v599_v52  ;;  %v654_v56 = vpop.f32.mrb[7].mxu0 }
 0x122   :  { %v786_v57 = vpack.c.bf16 %v651_v51, %v649_v48  ;;  %v655_v58 = vadd.f32 %v654_v56, %v601_v55 }
 0x124   :  { %710 = vst [vmem:[%s1223_s6 + $0x10] sm:$0xff] %v786_v57  ;;  %v787_v59 = vpack.c.bf16 %v655_v58, %v653_v54 }
 0x126   :  { %711 = vst [vmem:[%s1223_s6 + $0x18] sm:$0xff] %v787_v59 }

// kernel: densenet121_features.167
= control target key start
LH: loop header
LB: loop body
LE: loop exit
PB: predicated region body
PF: predicated region fallthrough
CT: control target
= control target key end

     0   :  { %v34_v5 = vlaneseq  ;;  %s419_s1 = inlined_call_operand.vmem [shape: bf16[256,128], index: 1, kind: input, shape index: {}]   ;;  %s420_s0 = inlined_call_operand.vmem [shape: bf16[8,256], index: 0, kind: input, shape index: {}]   ;;  %s421_s2 = inlined_call_operand.vmem [shape: f32[1,256], index: 2, kind: input, shape index: {}]   ;;  %s422_s3 = inlined_call_operand.vmem [shape: f32[1,256], index: 3, kind: input, shape index: {}]   ;;  %s423_s4 = inlined_call_operand.vmem [shape: f32[1,128], index: 4, kind: input, shape index: {}]   ;;  %s424_s5 = inlined_call_operand.vmem [shape: f32[1,128], index: 5, kind: input, shape index: {}]   ;;  %s425_s6 = inlined_call_operand.vmem [shape: bf16[8,128], index: 6, kind: output, shape index: {}]  }
   0x1   :  { %v302_v0 = vld [vmem:[%s419_s1 + $0x40] sm:$0xff]   ;;  %v304_v2 = vld [vmem:[%s419_s1 + $0x48] sm:$0xff]   ;;  %v306_v4 = vld [vmem:[%s419_s1 + $0x50] sm:$0xff]  }
   0x2   :  { %v303_v1 = vld [vmem:[%s419_s1] sm:$0xff]   ;;  %280 = vmatprep.subr.bf16.mxu0 %v302_v0  ;;  %v305_v3 = vld [vmem:[%s419_s1 + $0x8] sm:$0xff]   ;;  %v307_v6 = vld [vmem:[%s419_s1 + $0x10] sm:$0xff]   ;;  %v35_v8 = vshrl.u32 %v34_v5, 7 }
   0x3   :  { %281 = vmatpush3.bf16.msra.mxu0 %v303_v1  ;;  %v308_v7 = vld [vmem:[%s419_s1 + $0x58] sm:$0xff]   ;;  %v310_v10 = vld [vmem:[%s419_s1 + $0x60] sm:$0xff]   ;;  %v312_v14 = vld [vmem:[%s419_s1 + $0x68] sm:$0xff]  }
   0x4   :  { %282 = vmatprep.subr.bf16.mxu0 %v304_v2  ;;  %v309_v9 = vld [vmem:[%s419_s1 + $0x18] sm:$0xff]   ;;  %v36_v11 = vsub.s32 0, %v35_v8  ;;  %v40_v12 = vsub.s32 1, %v35_v8  ;;  %v311_v13 = vld [vmem:[%s419_s1 + $0x20] sm:$0xff]   ;;  %v313_v24 = vld [vmem:[%s419_s1 + $0x28] sm:$0xff]  }
   0x5   :  { %v29_v15 = vld [vmem:[%s420_s0] sm:$0xff]  ;;  %v314_v27 = vld [vmem:[%s419_s1 + $0x70] sm:$0xff]   ;;  %v316_v32 = vld [vmem:[%s419_s1 + $0x78] sm:$0xff]  }
   0x6   :  { %v32_v16 = vld [vmem:[%s421_s2] sm:$0x3]  ;;  %v30_v18 = vunpack.c.l.bf16 %v29_v15  ;;  %v31_v19 = vunpack.c.h.bf16 %v29_v15  ;;  %v315_v30 = vld [vmem:[%s419_s1 + $0x30] sm:$0xff]   ;;  %v317_v35 = vld [vmem:[%s419_s1 + $0x38] sm:$0xff]  }
   0x7   :  { %283 = vmatpush3.bf16.msra.mxu0 %v305_v3  ;;  %v46_v17 = vld [vmem:[%s422_s3] sm:$0x3]  ;;  %v37_v20 = vrot.slane %v32_v16, %v36_v11  ;;  %v41_v21 = vrot.slane %v32_v16, %v40_v12 }
   0x8   :  { %284 = vmatprep.subr.bf16.mxu0 %v306_v4  ;;  %v51_v22 = vrot.slane %v46_v17, %v36_v11  ;;  %v55_v23 = vrot.slane %v46_v17, %v40_v12  ;;  %v278_v39 = vld [vmem:[%s423_s4] ss:$0 sm:$0xff] }
   0x9   :  { %v45_v25 = vmul.f32 %v41_v21, %v31_v19  ;;  %v44_v26 = vmul.f32 %v37_v20, %v30_v18  ;;  %v279_v42 = vld [vmem:[%s424_s5] ss:$0 sm:$0xff] }
   0xb   :  { %285 = vmatpush3.bf16.msra.mxu0 %v307_v6  ;;  %v59_v28 = vadd.f32 %v55_v23, %v45_v25  ;;  %v58_v29 = vadd.f32 %v51_v22, %v44_v26 }
   0xc   :  { %286 = vmatprep.subr.bf16.mxu0 %v308_v7 }
   0xd   :  { %v61_v31 = vmax.f32 %v59_v28, 0.0  ;;  %v60_v34 = vmax.f32 %v58_v29, 0.0 }
   0xf   :  { %287 = vmatpush3.bf16.msra.mxu0 %v309_v9  ;;  %v63_v33 = vpack.c.bf16 %v61_v31, %v61_v31  ;;  %v62_v36 = vpack.c.bf16 %v60_v34, %v60_v34 }
  0x10   :  { %288 = vmatprep.subr.bf16.mxu0 %v310_v10 }
  0x11   :  { %225 = vmatprep.mubr.bf16.mxu0 %v63_v33 }
  0x13   :  { %289 = vmatpush3.bf16.msra.mxu0 %v311_v13 }
  0x14   :  { %290 = vmatprep.subr.bf16.mxu0 %v312_v14 }
  0x17   :  { %291 = vmatpush3.bf16.msra.mxu0 %v313_v24 }
  0x18   :  { %292 = vmatprep.subr.bf16.mxu0 %v314_v27 }
  0x1b   :  { %293 = vmatpush3.bf16.msra.mxu0 %v315_v30 }
  0x1c   :  { %294 = vmatprep.subr.bf16.mxu0 %v316_v32 }
  0x1f   :  { %295 = vmatpush3.bf16.msra.mxu0 %v317_v35 }
  0x22   :  { %226 = vmatmul.mubr.bf16.vlgmr.msra.gmra.mrb[0].mxu0 %v62_v36 }
  0xf5   :  { %v296_v37 = vpop.f32.mrb[0].mxu0 }
  0xf6   :  { %v297_v38 = vpop.f32.mrb[1].mxu0 }
  0xf7   :  { %v298_v40 = vadd.f32 %v297_v38, %v296_v37  ;;  %v299_v41 = vpop.f32.mrb[2].mxu0 }
  0xf8   :  { %v300_v43 = vpop.f32.mrb[3].mxu0 }
  0xf9   :  { %v246_v44 = vmul.f32 %v298_v40, %v278_v39 }
  0xfb   :  { %v254_v45 = vadd.f32 %v279_v42, %v246_v44 }
  0xfd   :  { %v255_v46 = vmax.f32 %v254_v45, 0.0 }
  0xff   :  { %v256_v47 = vpack.c.bf16 %v255_v46, %v255_v46 }
 0x101   :  { %257 = vst [vmem:[%s425_s6] sm:$0xf] %v256_v47 }

// kernel: densenet121_features.169
= control target key start
LH: loop header
LB: loop body
LE: loop exit
PB: predicated region body
PF: predicated region fallthrough
CT: control target
= control target key end

     0   :  { %v485_v1 = vmov 0.0   ;;  %vm486_vm0 = vmmov 0   ;;  %v36_v14 = vlaneseq  ;;  %s624_s1 = inlined_call_operand.vmem [shape: bf16[384,128], index: 1, kind: input, shape index: {}]   ;;  %s625_s0 = inlined_call_operand.vmem [shape: bf16[8,384], index: 0, kind: input, shape index: {}]   ;;  %s626_s2 = inlined_call_operand.vmem [shape: f32[1,384], index: 2, kind: input, shape index: {}]   ;;  %s627_s3 = inlined_call_operand.vmem [shape: f32[1,384], index: 3, kind: input, shape index: {}]   ;;  %s628_s4 = inlined_call_operand.vmem [shape: f32[1,128], index: 4, kind: input, shape index: {}]   ;;  %s629_s5 = inlined_call_operand.vmem [shape: f32[1,128], index: 5, kind: input, shape index: {}]   ;;  %s630_s6 = inlined_call_operand.vmem [shape: bf16[8,128], index: 6, kind: output, shape index: {}]  }
   0x1   :  { %v461_v0 = vld [vmem:[%s624_s1 + $0x40] sm:$0xff]   ;;  %439 = vmatprep.subr.bf16.mxu1 %v485_v1  ;;  %455 = vmatprep.mubr.msk.bf16.mxu1 %vm486_vm0, %v485_v1  ;;  %v464_v4 = vld [vmem:[%s624_s1 + $0x48] sm:$0xff]   ;;  %v467_v7 = vld [vmem:[%s624_s1 + $0x50] sm:$0xff]  }
   0x2   :  { %v462_v2 = vld [vmem:[%s624_s1] sm:$0xff]   ;;  %408 = vmatprep.subr.bf16.mxu0 %v461_v0  ;;  %v465_v5 = vld [vmem:[%s624_s1 + $0x8] sm:$0xff]   ;;  %v468_v8 = vld [vmem:[%s624_s1 + $0x10] sm:$0xff]   ;;  %v37_v18 = vshrl.u32 %v36_v14, 7 }
   0x3   :  { %v463_v3 = vld [vmem:[%s624_s1 + $0x80] sm:$0xff]   ;;  %409 = vmatpush3.bf16.msra.mxu0 %v462_v2  ;;  %v466_v6 = vld [vmem:[%s624_s1 + $0x88] sm:$0xff]   ;;  %v469_v9 = vld [vmem:[%s624_s1 + $0x90] sm:$0xff]  }
   0x4   :  { %440 = vmatpush3.bf16.msra.mxu1 %v463_v3  ;;  %410 = vmatprep.subr.bf16.mxu0 %v464_v4  ;;  %v470_v10 = vld [vmem:[%s624_s1 + $0x58] sm:$0xff]   ;;  %v473_v13 = vld [vmem:[%s624_s1 + $0x60] sm:$0xff]   ;;  %v476_v17 = vld [vmem:[%s624_s1 + $0x68] sm:$0xff]   ;;  %v42_v22 = vsub.s32 1, %v37_v18  ;;  %v38_v24 = vsub.s32 0, %v37_v18  ;;  %v46_v26 = vsub.s32 2, %v37_v18 }
   0x5   :  { %441 = vmatprep.subr.bf16.mxu1 %v485_v1  ;;  %v471_v11 = vld [vmem:[%s624_s1 + $0x18] sm:$0xff]   ;;  %v474_v15 = vld [vmem:[%s624_s1 + $0x20] sm:$0xff]   ;;  %v477_v19 = vld [vmem:[%s624_s1 + $0x28] sm:$0xff]  }
   0x6   :  { %v472_v12 = vld [vmem:[%s624_s1 + $0x98] sm:$0xff]   ;;  %v475_v16 = vld [vmem:[%s624_s1 + $0xa0] sm:$0xff]   ;;  %v478_v20 = vld [vmem:[%s624_s1 + $0xa8] sm:$0xff]  }
   0x7   :  { %411 = vmatpush3.bf16.msra.mxu0 %v465_v5  ;;  %v479_v21 = vld [vmem:[%s624_s1 + $0x70] sm:$0xff]   ;;  %v482_v27 = vld [vmem:[%s624_s1 + $0x78] sm:$0xff]   ;;  %v29_v28 = vld [vmem:[%s625_s0] sm:$0xff] }
   0x8   :  { %442 = vmatpush3.bf16.msra.mxu1 %v466_v6  ;;  %412 = vmatprep.subr.bf16.mxu0 %v467_v7  ;;  %v480_v23 = vld [vmem:[%s624_s1 + $0x30] sm:$0xff]   ;;  %v30_v29 = vld [vmem:[%s625_s0 + $0x8] sm:$0xf]  ;;  %v34_v30 = vld [vmem:[%s626_s2] sm:$0x7]  ;;  %v31_v31 = vunpack.c.l.bf16 %v29_v28  ;;  %v32_v32 = vunpack.c.h.bf16 %v29_v28 }
   0x9   :  { %443 = vmatprep.subr.bf16.mxu1 %v485_v1  ;;  %v481_v25 = vld [vmem:[%s624_s1 + $0xb0] sm:$0xff]   ;;  %v33_v33 = vunpack.c.l.bf16 %v30_v29  ;;  %v43_v34 = vrot.slane %v34_v30, %v42_v22  ;;  %v54_v35 = vld [vmem:[%s627_s3] sm:$0x7]  ;;  %v39_v37 = vrot.slane %v34_v30, %v38_v24  ;;  %v47_v39 = vrot.slane %v34_v30, %v46_v26  ;;  %v483_v40 = vld [vmem:[%s624_s1 + $0x38] sm:$0xff]  }
   0xa   :  { %v63_v36 = vrot.slane %v54_v35, %v42_v22  ;;  %v59_v38 = vrot.slane %v54_v35, %v38_v24  ;;  %v67_v42 = vrot.slane %v54_v35, %v46_v26  ;;  %v484_v43 = vld [vmem:[%s624_s1 + $0xb8] sm:$0xff]   ;;  %v406_v62 = vld [vmem:[%s628_s4] ss:$0 sm:$0xff] }
   0xb   :  { %413 = vmatpush3.bf16.msra.mxu0 %v468_v8  ;;  %v52_v41 = vmul.f32 %v43_v34, %v32_v32  ;;  %v51_v44 = vmul.f32 %v39_v37, %v31_v31  ;;  %v53_v45 = vmul.f32 %v47_v39, %v33_v33  ;;  %v407_v2 = vld [vmem:[%s629_s5] ss:$0 sm:$0xff] }
   0xc   :  { %444 = vmatpush3.bf16.msra.mxu1 %v469_v9  ;;  %414 = vmatprep.subr.bf16.mxu0 %v470_v10 }
   0xd   :  { %445 = vmatprep.subr.bf16.mxu1 %v485_v1  ;;  %v72_v46 = vadd.f32 %v63_v36, %v52_v41  ;;  %v71_v47 = vadd.f32 %v59_v38, %v51_v44  ;;  %v73_v48 = vadd.f32 %v67_v42, %v53_v45 }
   0xf   :  { %415 = vmatpush3.bf16.msra.mxu0 %v471_v11  ;;  %v75_v49 = vmax.f32 %v72_v46, 0.0  ;;  %v74_v50 = vmax.f32 %v71_v47, 0.0  ;;  %v76_v51 = vmax.f32 %v73_v48, 0.0 }
  0x10   :  { %446 = vmatpush3.bf16.msra.mxu1 %v472_v12  ;;  %416 = vmatprep.subr.bf16.mxu0 %v473_v13 }
  0x11   :  { %447 = vmatprep.subr.bf16.mxu1 %v485_v1  ;;  %v78_v52 = vpack.c.bf16 %v75_v49, %v75_v49  ;;  %v77_v53 = vpack.c.bf16 %v74_v50, %v74_v50  ;;  %v79_v54 = vpack.c.bf16 %v76_v51, %v76_v51 }
  0x13   :  { %417 = vmatpush3.bf16.msra.mxu0 %v474_v15  ;;  %305 = vmatprep.mubr.bf16.mxu0 %v78_v52 }
  0x14   :  { %448 = vmatpush3.bf16.msra.mxu1 %v475_v16  ;;  %418 = vmatprep.subr.bf16.mxu0 %v476_v17 }
  0x15   :  { %449 = vmatprep.subr.bf16.mxu1 %v485_v1 }
  0x17   :  { %419 = vmatpush3.bf16.msra.mxu0 %v477_v19 }
  0x18   :  { %450 = vmatpush3.bf16.msra.mxu1 %v478_v20  ;;  %420 = vmatprep.subr.bf16.mxu0 %v479_v21 }
  0x19   :  { %451 = vmatprep.subr.bf16.mxu1 %v485_v1 }
  0x1b   :  { %421 = vmatpush3.bf16.msra.mxu0 %v480_v23 }
  0x1c   :  { %452 = vmatpush3.bf16.msra.mxu1 %v481_v25  ;;  %422 = vmatprep.subr.bf16.mxu0 %v482_v27 }
  0x1d   :  { %453 = vmatprep.subr.bf16.mxu1 %v485_v1 }
  0x1f   :  { %423 = vmatpush3.bf16.msra.mxu0 %v483_v40 }
  0x20   :  { %454 = vmatpush3.bf16.msra.mxu1 %v484_v43 }
  0x22   :  { %306 = vmatmul.mubr.bf16.vlgmr.msra.gmra.mrb[0].mxu0 %v77_v53 }
  0x23   :  { %456 = vmatmul.mubr.bf16.vlgmr.msra.gmra.mrb[0].mxu1 %v79_v54 }
  0xf5   :  { %v424_v55 = vpop.f32.mrb[0].mxu0 }
  0xf6   :  { %v347_v56 = vpop.f32.mrb[0].mxu1  ;;  %v425_v57 = vpop.f32.mrb[1].mxu0 }
  0xf7   :  { %v457_v58 = vpop.f32.mrb[1].mxu1  ;;  %v426_v59 = vadd.f32 %v425_v57, %v424_v55  ;;  %v427_v60 = vpop.f32.mrb[2].mxu0 }
  0xf8   :  { %v350_v61 = vpop.f32.mrb[2].mxu1  ;;  %v428_v63 = vpop.f32.mrb[3].mxu0 }
  0xf9   :  { %v458_v0 = vpop.f32.mrb[3].mxu1  ;;  %v348_v1 = vadd.f32 %v426_v59, %v347_v56 }
  0xfb   :  { %v366_v3 = vmul.f32 %v406_v62, %v348_v1 }
  0xfd   :  { %v374_v4 = vadd.f32 %v407_v2, %v366_v3 }
  0xff   :  { %v375_v5 = vmax.f32 %v374_v4, 0.0 }
 0x101   :  { %v376_v6 = vpack.c.bf16 %v375_v5, %v375_v5 }
 0x103   :  { %377 = vst [vmem:[%s630_s6] sm:$0xf] %v376_v6 }

// kernel: densenet121_features.168
= control target key start
LH: loop header
LB: loop body
LE: loop exit
PB: predicated region body
PF: predicated region fallthrough
CT: control target
= control target key end

     0   :  { %s942_s21 = smov 0   ;;  %s944_s22 = smov 0   ;;  %s1014_s0 = inlined_call_operand.vmem [shape: bf16[8,1152], index: 0, kind: input, shape index: {}]   ;;  %s1015_s1 = inlined_call_operand.vmem [shape: bf16[1152,32], index: 1, kind: input, shape index: {}]   ;;  %s1016_s2 = inlined_call_operand.vmem [shape: f32[1,1152], index: 2, kind: input, shape index: {}, may-alias: {2,3}]   ;;  %s1017_s3 = inlined_call_operand.vmem [shape: f32[1,1152], index: 3, kind: input, shape index: {}, may-alias: {2,3}]   ;;  %s1018_s4 = inlined_call_operand.vmem [shape: f32[1,32], index: 4, kind: input, shape index: {}, may-alias: {4,5}]   ;;  %s1019_s5 = inlined_call_operand.vmem [shape: f32[1,32], index: 5, kind: input, shape index: {}, may-alias: {4,5}]   ;;  %s1020_s6 = inlined_call_operand.vmem [shape: bf16[8,32], index: 6, kind: output, shape index: {}]  }
   0x1   :  { %s946_s23 = smov 0  }
   0x2 LB: > { %s25_s2 = sadd.s32 1, %s898_s22  ;;  %p740_p0 = scmp.ge.s32.totalorder %s902_s23, 1  ;;  %s902_s23 = sphi %s946_s23, %s16_s23   ;;  %s898_s22 = sphi %s944_s22, %s1022_s22   ;;  %s894_s21 = sphi %s942_s21, %s1021_s21  }
   0x3   : > { %p26_p1 = scmp.ge.s32.totalorder %s25_s2, 3  ;;  %p262_p2 = scmp.lt.s32.totalorder %s902_s23, 4 }
   0x5   : > { %s1024_s2 = smov (%p26_p1, %s25_s2), 0  ;;  %p263_p3 = pnand %p740_p0, %p262_p2 }
   0x6   : > { %s308_s3 = smul.u32 (!%p263_p3), 3, %s894_s21  ;;  %p743_p6 = scmp.ne.s32.totalorder (!%p263_p3), %s894_s21, 0 }
   0x7   : > { %266 = sbr.rel (%p263_p3) target bundleno = 287 (0x11f), region = 44 }
   0x8   : > { %s318_s4 = smul.u32 (!%p263_p3), 48, %s894_s21  ;;  %p311_p4 = scmp.lt.s32.totalorder (!%p263_p3), %s308_s3, 8 }
   0xa   : > { %p319_p5 = scmp.lt.s32.totalorder (!%p263_p3), %s318_s4, 143 }
   0xe   : > { %s1026_s3 = smov (!%p311_p4, %s308_s3), 8  ;;  %s1028_s4 = smov (!%p319_p5, %s318_s4), 143 }
   0xf   : > { %s741_s5 = sshll.u32 %s1026_s3, 2  ;;  %s742_s27 = sshll.u32 %s1028_s4, 2  ;;  %vm343_vm0 = vcmask (!%p743_p6), 261120   ;;  %v904_v0 = vmov (!%p743_p6), 0.0  }
  0x10   : > { %s967_s26 = scalar_lea.vmem %s1014_s0, %s741_s5  ;;  %s972_s30 = scalar_lea.vmem %s1015_s1, %s742_s27  ;;  %344 = vst.msk [vmem:[#allocation2] sm:$0xff] (!%p743_p6), %vm343_vm0, %v904_v0 }
  0x11   : > { %342 = sbr.rel (%p743_p6) target bundleno = 24 (0x18), region = 48 }
  0x18 PF: > { %v853_v1 = vld [vmem:[%s972_s30 + $0x40] sm:$0xff]   ;;  %v905_v2 = vmov 0.0   ;;  %vm906_vm1 = vmmov 0   ;;  %v856_v5 = vld [vmem:[%s972_s30 + $0x48] sm:$0xff]   ;;  %v859_v8 = vld [vmem:[%s972_s30 + $0x50] sm:$0xff]   ;;  %vm632_vm2 = vcmask 261120  }
  0x19   : > { %806 = vmatprep.subr.bf16.mxu1 %v905_v2  ;;  %v854_v3 = vld [vmem:[%s972_s30] sm:$0xff]   ;;  %775 = vmatprep.subr.bf16.mxu0 %v853_v1  ;;  %v857_v6 = vld [vmem:[%s972_s30 + $0x8] sm:$0xff]   ;;  %v860_v9 = vld [vmem:[%s972_s30 + $0x10] sm:$0xff]   ;;  %p771_p7 = scmp.ne.s32.totalorder %s894_s21, 2 }
  0x1a   : > { %v855_v4 = vld [vmem:[%s972_s30 + $0x80] sm:$0xff]   ;;  %822 = vmatprep.mubr.msk.bf16.mxu1 %vm906_vm1, %v905_v2  ;;  %776 = vmatpush3.bf16.msra.mxu0 %v854_v3  ;;  %v858_v7 = vld [vmem:[%s972_s30 + $0x88] sm:$0xff]   ;;  %v861_v10 = vld [vmem:[%s972_s30 + $0x90] sm:$0xff]   ;;  %vm640_vm3 = vcmask (!%p771_p7), 257024  }
  0x1b   : > { %807 = vmatpush3.bf16.msra.mxu1 %v855_v4  ;;  %777 = vmatprep.subr.bf16.mxu0 %v856_v5  ;;  %v862_v11 = vld [vmem:[%s972_s30 + $0x58] sm:$0xff]   ;;  %v865_v14 = vld [vmem:[%s972_s30 + $0x60] sm:$0xff]   ;;  %v868_v17 = vld [vmem:[%s972_s30 + $0x68] sm:$0xff]  }
  0x1c   : > { %808 = vmatprep.subr.bf16.mxu1 %v905_v2  ;;  %v863_v12 = vld [vmem:[%s972_s30 + $0x18] sm:$0xff]   ;;  %v866_v15 = vld [vmem:[%s972_s30 + $0x20] sm:$0xff]   ;;  %v869_v18 = vld [vmem:[%s972_s30 + $0x28] sm:$0xff]  }
  0x1d   : > { %v864_v13 = vld [vmem:[%s972_s30 + $0x98] sm:$0xff]   ;;  %v867_v16 = vld [vmem:[%s972_s30 + $0xa0] sm:$0xff]   ;;  %v870_v19 = vld [vmem:[%s972_s30 + $0xa8] sm:$0xff]  }
  0x1e   : > { %778 = vmatpush3.bf16.msra.mxu0 %v857_v6  ;;  %v871_v20 = vld [vmem:[%s972_s30 + $0x70] sm:$0xff]   ;;  %v874_v23 = vld [vmem:[%s972_s30 + $0x78] sm:$0xff]   ;;  %v345_v24 = vld [vmem:[%s967_s26] sm:$0xff] }
  0x1f   : > { %809 = vmatpush3.bf16.msra.mxu1 %v858_v7  ;;  %779 = vmatprep.subr.bf16.mxu0 %v859_v8  ;;  %v872_v21 = vld [vmem:[%s972_s30 + $0x30] sm:$0xff]   ;;  %v745_v25 = vcombine.high %v345_v24, %v345_v24  ;;  %v875_v26 = vld [vmem:[%s972_s30 + $0x38] sm:$0xff]   ;;  %v744_v28 = vcombine.low %v345_v24, %v345_v24  ;;  %v879_v29 = vld [vmem:[%s967_s26 + $0x8] ss:$0 sps:$4 sm:$0xff]  }
  0x20   : > { %810 = vmatprep.subr.bf16.mxu1 %v905_v2  ;;  %v873_v22 = vld [vmem:[%s972_s30 + $0xb0] sm:$0xff]   ;;  %v876_v27 = vld [vmem:[%s972_s30 + $0xb8] sm:$0xff]   ;;  %v347_v36 = vld [vmem:[#allocation2] sm:$0xff] }
  0x21   : > { %583 = vmatprep.mubr.bf16.mxu0 %v745_v25 }
  0x22   : > { %780 = vmatpush3.bf16.msra.mxu0 %v860_v9 }
  0x23   : > { %811 = vmatpush3.bf16.msra.mxu1 %v861_v10  ;;  %781 = vmatprep.subr.bf16.mxu0 %v862_v11 }
  0x24   : > { %812 = vmatprep.subr.bf16.mxu1 %v905_v2 }
  0x26   : > { %782 = vmatpush3.bf16.msra.mxu0 %v863_v12 }
  0x27   : > { %813 = vmatpush3.bf16.msra.mxu1 %v864_v13  ;;  %783 = vmatprep.subr.bf16.mxu0 %v865_v14 }
  0x28   : > { %814 = vmatprep.subr.bf16.mxu1 %v905_v2 }
  0x2a   : > { %784 = vmatpush3.bf16.msra.mxu0 %v866_v15 }
  0x2b   : > { %815 = vmatpush3.bf16.msra.mxu1 %v867_v16  ;;  %785 = vmatprep.subr.bf16.mxu0 %v868_v17 }
  0x2c   : > { %816 = vmatprep.subr.bf16.mxu1 %v905_v2 }
  0x2e   : > { %786 = vmatpush3.bf16.msra.mxu0 %v869_v18 }
  0x2f   : > { %817 = vmatpush3.bf16.msra.mxu1 %v870_v19  ;;  %787 = vmatprep.subr.bf16.mxu0 %v871_v20 }
  0x30   : > { %818 = vmatprep.subr.bf16.mxu1 %v905_v2 }
  0x32   : > { %788 = vmatpush3.bf16.msra.mxu0 %v872_v21 }
  0x33   : > { %819 = vmatpush3.bf16.msra.mxu1 %v873_v22  ;;  %789 = vmatprep.subr.bf16.mxu0 %v874_v23 }
  0x34   : > { %820 = vmatprep.subr.bf16.mxu1 %v905_v2 }
  0x36   : > { %790 = vmatpush3.bf16.msra.mxu0 %v875_v26 }
  0x37   : > { %821 = vmatpush3.bf16.msra.mxu1 %v876_v27 }
  0x39   : > { %584 = vmatmul.mubr.bf16.vlgmr.msra.gmra.mrb[0].mxu0 %v744_v28 }
  0x3a   : > { %823 = vmatmul.mubr.bf16.vlgmr.msra.gmra.mrb[0].mxu1 %v879_v29 }
 0x10c   : > { %v791_v30 = vpop.f32.mrb[0].mxu0 }
 0x10d   : > { %v625_v31 = vpop.f32.mrb[0].mxu1  ;;  %v792_v32 = vpop.f32.mrb[1].mxu0 }
 0x10e   : > { %v793_v33 = vadd.f32 %v792_v32, %v791_v30  ;;  %v824_v34 = vpop.f32.mrb[1].mxu1  ;;  %v794_v35 = vpop.f32.mrb[2].mxu0  ;;  %637 = sbr.rel (%p771_p7) target bundleno = 287 (0x11f), region = 52 }
 0x10f   : > { %v628_v37 = vpop.f32.mrb[2].mxu1  ;;  %v795_v38 = vpop.f32.mrb[3].mxu0 }
 0x110   : > { %v626_v39 = vadd.f32 %v793_v33, %v625_v31  ;;  %v825_v40 = vpop.f32.mrb[3].mxu1 }
 0x112   : > { %v631_v41 = vadd.f32 %v626_v39, %v347_v36 }
 0x114   : > { %633 = vst.msk [vmem:[#allocation2] sm:$0xff] %vm632_vm2, %v631_v41 }
 0x11b   : > { %v638_v42 = vld [vmem:[#allocation2] sm:$0xff] }
 0x11c   : > { %v639_v43 = vpack.c.bf16 %v638_v42, %v638_v42 }
 0x11e   : > { %641 = vst.msk [vmem:[%s1020_s6] sm:$0xf] %vm640_vm3, %v639_v43 }
 0x11f PF: > { %s16_s23 = sadd.s32 1, %s902_s23   ;;  %s1021_s21 = smov %s898_s22 }
 0x120   : > { %p13_p8 = scmp.ge.s32.totalorder %s16_s23, 5   ;;  %s1022_s22 = smov %s1024_s2 }
 0x122   :  { %15 = sbr.rel (!%p13_p8) target bundleno = 2 (0x2), region = 91 }

// kernel: densenet121_features.177
= control target key start
LH: loop header
LB: loop body
LE: loop exit
PB: predicated region body
PF: predicated region fallthrough
CT: control target
= control target key end

     0   :  { %v37_v21 = vlaneseq  ;;  %s723_s1 = inlined_call_operand.vmem [shape: bf16[512,128], index: 1, kind: input, shape index: {}]   ;;  %s724_s0 = inlined_call_operand.vmem [shape: bf16[8,512], index: 0, kind: input, shape index: {}]   ;;  %s725_s2 = inlined_call_operand.vmem [shape: f32[1,512], index: 2, kind: input, shape index: {}]   ;;  %s726_s3 = inlined_call_operand.vmem [shape: f32[1,512], index: 3, kind: input, shape index: {}]   ;;  %s727_s4 = inlined_call_operand.vmem [shape: f32[1,128], index: 4, kind: input, shape index: {}]   ;;  %s728_s5 = inlined_call_operand.vmem [shape: f32[1,128], index: 5, kind: input, shape index: {}]   ;;  %s729_s6 = inlined_call_operand.vmem [shape: bf16[8,128], index: 6, kind: output, shape index: {}]  }
   0x1   :  { %v539_v0 = vld [vmem:[%s723_s1 + $0x40] sm:$0xff]   ;;  %v543_v4 = vld [vmem:[%s723_s1 + $0x48] sm:$0xff]   ;;  %v547_v8 = vld [vmem:[%s723_s1 + $0x50] sm:$0xff]  }
   0x2   :  { %v540_v1 = vld [vmem:[%s723_s1 + $0xc0] sm:$0xff]   ;;  %495 = vmatprep.subr.bf16.mxu0 %v539_v0  ;;  %v544_v5 = vld [vmem:[%s723_s1 + $0xc8] sm:$0xff]   ;;  %v548_v9 = vld [vmem:[%s723_s1 + $0xd0] sm:$0xff]   ;;  %v38_v26 = vshrl.u32 %v37_v21, 7 }
   0x3   :  { %v541_v2 = vld [vmem:[%s723_s1] sm:$0xff]   ;;  %517 = vmatprep.subr.bf16.mxu1 %v540_v1  ;;  %v545_v6 = vld [vmem:[%s723_s1 + $0x8] sm:$0xff]   ;;  %v549_v10 = vld [vmem:[%s723_s1 + $0x10] sm:$0xff]  }
   0x4   :  { %v542_v3 = vld [vmem:[%s723_s1 + $0x80] sm:$0xff]   ;;  %496 = vmatpush3.bf16.msra.mxu0 %v541_v2  ;;  %v546_v7 = vld [vmem:[%s723_s1 + $0x88] sm:$0xff]   ;;  %v550_v11 = vld [vmem:[%s723_s1 + $0x90] sm:$0xff]   ;;  %v43_v31 = vsub.s32 1, %v38_v26  ;;  %v51_v33 = vsub.s32 3, %v38_v26  ;;  %v39_v35 = vsub.s32 0, %v38_v26 }
   0x5   :  { %518 = vmatpush3.bf16.msra.mxu1 %v542_v3  ;;  %497 = vmatprep.subr.bf16.mxu0 %v543_v4  ;;  %v551_v12 = vld [vmem:[%s723_s1 + $0x58] sm:$0xff]   ;;  %v555_v16 = vld [vmem:[%s723_s1 + $0x60] sm:$0xff]   ;;  %v559_v20 = vld [vmem:[%s723_s1 + $0x68] sm:$0xff]   ;;  %v47_v37 = vsub.s32 2, %v38_v26 }
   0x6   :  { %519 = vmatprep.subr.bf16.mxu1 %v544_v5  ;;  %v552_v13 = vld [vmem:[%s723_s1 + $0xd8] sm:$0xff]   ;;  %v556_v17 = vld [vmem:[%s723_s1 + $0xe0] sm:$0xff]   ;;  %v560_v22 = vld [vmem:[%s723_s1 + $0xe8] sm:$0xff]  }
   0x7   :  { %v553_v14 = vld [vmem:[%s723_s1 + $0x18] sm:$0xff]   ;;  %v557_v18 = vld [vmem:[%s723_s1 + $0x20] sm:$0xff]   ;;  %v561_v23 = vld [vmem:[%s723_s1 + $0x28] sm:$0xff]  }
   0x8   :  { %498 = vmatpush3.bf16.msra.mxu0 %v545_v6  ;;  %v554_v15 = vld [vmem:[%s723_s1 + $0x98] sm:$0xff]   ;;  %v558_v19 = vld [vmem:[%s723_s1 + $0xa0] sm:$0xff]   ;;  %v562_v24 = vld [vmem:[%s723_s1 + $0xa8] sm:$0xff]  }
   0x9   :  { %520 = vmatpush3.bf16.msra.mxu1 %v546_v7  ;;  %499 = vmatprep.subr.bf16.mxu0 %v547_v8  ;;  %v563_v25 = vld [vmem:[%s723_s1 + $0x70] sm:$0xff]   ;;  %v567_v30 = vld [vmem:[%s723_s1 + $0x78] sm:$0xff]   ;;  %v29_v38 = vld [vmem:[%s724_s0] sm:$0xff] }
   0xa   :  { %521 = vmatprep.subr.bf16.mxu1 %v548_v9  ;;  %v564_v27 = vld [vmem:[%s723_s1 + $0xf0] sm:$0xff]   ;;  %v568_v32 = vld [vmem:[%s723_s1 + $0xf8] sm:$0xff]   ;;  %v35_v39 = vld [vmem:[%s725_s2] sm:$0xf]  ;;  %v31_v41 = vunpack.c.l.bf16 %v29_v38  ;;  %v32_v42 = vunpack.c.h.bf16 %v29_v38 }
   0xb   :  { %v565_v28 = vld [vmem:[%s723_s1 + $0x30] sm:$0xff]   ;;  %v569_v34 = vld [vmem:[%s723_s1 + $0x38] sm:$0xff]   ;;  %v61_v40 = vld [vmem:[%s726_s3] sm:$0xf]  ;;  %v44_v43 = vrot.slane %v35_v39, %v43_v31  ;;  %v52_v48 = vrot.slane %v35_v39, %v51_v33  ;;  %v40_v51 = vrot.slane %v35_v39, %v39_v35  ;;  %v48_v53 = vrot.slane %v35_v39, %v47_v37 }
   0xc   :  { %500 = vmatpush3.bf16.msra.mxu0 %v549_v10  ;;  %v566_v29 = vld [vmem:[%s723_s1 + $0xb0] sm:$0xff]   ;;  %v570_v36 = vld [vmem:[%s723_s1 + $0xb8] sm:$0xff]   ;;  %v70_v44 = vrot.slane %v61_v40, %v43_v31  ;;  %v30_v45 = vld [vmem:[%s724_s0 + $0x8] sm:$0xff]  ;;  %v78_v49 = vrot.slane %v61_v40, %v51_v33  ;;  %v66_v52 = vrot.slane %v61_v40, %v39_v35  ;;  %v74_v55 = vrot.slane %v61_v40, %v47_v37 }
   0xd   :  { %522 = vmatpush3.bf16.msra.mxu1 %v550_v11  ;;  %501 = vmatprep.subr.bf16.mxu0 %v551_v12  ;;  %v33_v46 = vunpack.c.l.bf16 %v30_v45  ;;  %v34_v47 = vunpack.c.h.bf16 %v30_v45  ;;  %v58_v50 = vmul.f32 %v44_v43, %v32_v42  ;;  %v57_v57 = vmul.f32 %v40_v51, %v31_v41 }
   0xe   :  { %523 = vmatprep.subr.bf16.mxu1 %v552_v13 }
   0xf   :  { %v60_v54 = vmul.f32 %v52_v48, %v34_v47  ;;  %v84_v56 = vadd.f32 %v70_v44, %v58_v50  ;;  %v59_v58 = vmul.f32 %v48_v53, %v33_v46  ;;  %v83_v61 = vadd.f32 %v66_v52, %v57_v57 }
  0x10   :  { %502 = vmatpush3.bf16.msra.mxu0 %v553_v14  ;;  %v493_v14 = vld [vmem:[%s727_s4] ss:$0 sm:$0xff] }
  0x11   :  { %524 = vmatpush3.bf16.msra.mxu1 %v554_v15  ;;  %503 = vmatprep.subr.bf16.mxu0 %v555_v16  ;;  %v86_v59 = vadd.f32 %v78_v49, %v60_v54  ;;  %v88_v60 = vmax.f32 %v84_v56, 0.0  ;;  %v85_v62 = vadd.f32 %v74_v55, %v59_v58  ;;  %v87_v1 = vmax.f32 %v83_v61, 0.0 }
  0x12   :  { %525 = vmatprep.subr.bf16.mxu1 %v556_v17 }
  0x13   :  { %v90_v63 = vmax.f32 %v86_v59, 0.0  ;;  %v92_v0 = vpack.c.bf16 %v88_v60, %v88_v60  ;;  %v89_v2 = vmax.f32 %v85_v62, 0.0  ;;  %v91_v4 = vpack.c.bf16 %v87_v1, %v87_v1 }
  0x14   :  { %504 = vmatpush3.bf16.msra.mxu0 %v557_v18  ;;  %v494_v18 = vld [vmem:[%s728_s5] ss:$0 sm:$0xff] }
  0x15   :  { %526 = vmatpush3.bf16.msra.mxu1 %v558_v19  ;;  %505 = vmatprep.subr.bf16.mxu0 %v559_v20  ;;  %v94_v3 = vpack.c.bf16 %v90_v63, %v90_v63  ;;  %v93_v5 = vpack.c.bf16 %v89_v2, %v89_v2 }
  0x16   :  { %527 = vmatprep.subr.bf16.mxu1 %v560_v22  ;;  %384 = vmatprep.mubr.bf16.mxu0 %v92_v0 }
  0x17   :  { %424 = vmatprep.mubr.bf16.mxu1 %v94_v3 }
  0x18   :  { %506 = vmatpush3.bf16.msra.mxu0 %v561_v23 }
  0x19   :  { %528 = vmatpush3.bf16.msra.mxu1 %v562_v24  ;;  %507 = vmatprep.subr.bf16.mxu0 %v563_v25 }
  0x1a   :  { %529 = vmatprep.subr.bf16.mxu1 %v564_v27 }
  0x1c   :  { %508 = vmatpush3.bf16.msra.mxu0 %v565_v28 }
  0x1d   :  { %530 = vmatpush3.bf16.msra.mxu1 %v566_v29  ;;  %509 = vmatprep.subr.bf16.mxu0 %v567_v30 }
  0x1e   :  { %531 = vmatprep.subr.bf16.mxu1 %v568_v32 }
  0x20   :  { %510 = vmatpush3.bf16.msra.mxu0 %v569_v34 }
  0x21   :  { %532 = vmatpush3.bf16.msra.mxu1 %v570_v36 }
  0x23   :  { %385 = vmatmul.mubr.bf16.vlgmr.msra.gmra.mrb[0].mxu0 %v91_v4 }
  0x24   :  { %425 = vmatmul.mubr.bf16.vlgmr.msra.gmra.mrb[0].mxu1 %v93_v5 }
  0xf6   :  { %v511_v6 = vpop.f32.mrb[0].mxu0 }
  0xf7   :  { %v533_v7 = vpop.f32.mrb[0].mxu1  ;;  %v512_v8 = vpop.f32.mrb[1].mxu0 }
  0xf8   :  { %v534_v9 = vpop.f32.mrb[1].mxu1  ;;  %v513_v10 = vadd.f32 %v512_v8, %v511_v6  ;;  %v514_v12 = vpop.f32.mrb[2].mxu0 }
  0xf9   :  { %v535_v11 = vadd.f32 %v534_v9, %v533_v7  ;;  %v536_v13 = vpop.f32.mrb[2].mxu1  ;;  %v515_v15 = vpop.f32.mrb[3].mxu0 }
  0xfa   :  { %v537_v16 = vpop.f32.mrb[3].mxu1 }
  0xfb   :  { %v427_v17 = vadd.f32 %v535_v11, %v513_v10 }
  0xfd   :  { %v445_v19 = vmul.f32 %v493_v14, %v427_v17 }
  0xff   :  { %v453_v20 = vadd.f32 %v494_v18, %v445_v19 }
 0x101   :  { %v454_v21 = vmax.f32 %v453_v20, 0.0 }
 0x103   :  { %v455_v22 = vpack.c.bf16 %v454_v21, %v454_v21 }
 0x105   :  { %456 = vst [vmem:[%s729_s6] sm:$0xf] %v455_v22 }

// kernel: densenet121_features.185
= control target key start
LH: loop header
LB: loop body
LE: loop exit
PB: predicated region body
PF: predicated region fallthrough
CT: control target
= control target key end

     0   :  { %s990_s21 = smov 0   ;;  %s992_s22 = smov 0   ;;  %s1098_s0 = inlined_call_operand.vmem [shape: bf16[8,768], index: 0, kind: input, shape index: {}]   ;;  %s1099_s1 = inlined_call_operand.vmem [shape: bf16[768,128], index: 1, kind: input, shape index: {}]   ;;  %s1100_s2 = inlined_call_operand.vmem [shape: f32[1,768], index: 2, kind: input, shape index: {}]   ;;  %s1101_s3 = inlined_call_operand.vmem [shape: f32[1,768], index: 3, kind: input, shape index: {}]   ;;  %s1102_s4 = inlined_call_operand.vmem [shape: f32[1,128], index: 4, kind: input, shape index: {}]   ;;  %s1103_s5 = inlined_call_operand.vmem [shape: f32[1,128], index: 5, kind: input, shape index: {}]   ;;  %s1104_s6 = inlined_call_operand.vmem [shape: bf16[8,128], index: 6, kind: output, shape index: {}]  }
   0x1   :  { %s994_s23 = smov 0  }
   0x2 LB: > { %s25_s24 = sadd.s32 1, %s946_s22  ;;  %p792_p0 = scmp.ge.s32.totalorder %s950_s23, 1  ;;  %s950_s23 = sphi %s994_s23, %s16_s23   ;;  %s946_s22 = sphi %s992_s22, %s1106_s22   ;;  %s942_s21 = sphi %s990_s21, %s1105_s21  }
   0x3   : > { %p26_p1 = scmp.ge.s32.totalorder %s25_s24, 2  ;;  %p262_p2 = scmp.lt.s32.totalorder %s950_s23, 3 }
   0x5   : > { %s1108_s24 = smov (%p26_p1, %s25_s24), 0  ;;  %p263_p3 = pnand %p792_p0, %p262_p2 }
   0x6   : > { %s308_s25 = smul.u32 (!%p263_p3), 3, %s942_s21  ;;  %p795_p6 = scmp.ne.s32.totalorder (!%p263_p3), %s942_s21, 0 }
   0x7   : > { %266 = sbr.rel (%p263_p3) target bundleno = 294 (0x126), region = 44 }
   0x8   : > { %s318_s26 = smul.u32 (!%p263_p3), 48, %s942_s21  ;;  %p311_p4 = scmp.lt.s32.totalorder (!%p263_p3), %s308_s25, 5 }
   0xa   : > { %p319_p5 = scmp.lt.s32.totalorder (!%p263_p3), %s318_s26, 95 }
   0xe   : > { %s1110_s25 = smov (!%p311_p4, %s308_s25), 5  ;;  %s1112_s26 = smov (!%p319_p5, %s318_s26), 95 }
   0xf   : > { %s793_s27 = sshll.u32 %s1110_s25, 2  ;;  %s327_s30 = scalar_lea.vmem %s1100_s2, %s1110_s25  ;;  %v952_v0 = vmov (!%p795_p6), 0.0  }
  0x10   : > { %s1022_s9 = scalar_lea.vmem %s1098_s0, %s793_s27  ;;  %s794_s10 = sshll.u32 %s1112_s26, 2  ;;  %343 = vst [vmem:[#allocation2] sm:$0xff] (!%p795_p6), %v952_v0 }
  0x11   : > { %s1027_s13 = scalar_lea.vmem %s1099_s1, %s794_s10  ;;  %s332_s16 = scalar_lea.vmem %s1101_s3, %s1110_s25 }
  0x12   : > { %342 = sbr.rel (%p795_p6) target bundleno = 25 (0x19), region = 48 }
  0x19 PF: > { %v904_v1 = vld [vmem:[%s1027_s13 + $0x40] sm:$0xff]   ;;  %v953_v2 = vmov 0.0   ;;  %vm954_vm0 = vmmov 0   ;;  %v907_v5 = vld [vmem:[%s1027_s13 + $0x48] sm:$0xff]   ;;  %v910_v8 = vld [vmem:[%s1027_s13 + $0x50] sm:$0xff]   ;;  %v351_v15 = vlaneseq  ;;  %p820_p7 = scmp.ne.s32.totalorder %s942_s21, 1 }
  0x1a   : > { %857 = vmatprep.subr.bf16.mxu1 %v953_v2  ;;  %v905_v3 = vld [vmem:[%s1027_s13] sm:$0xff]   ;;  %826 = vmatprep.subr.bf16.mxu0 %v904_v1  ;;  %v908_v6 = vld [vmem:[%s1027_s13 + $0x8] sm:$0xff]   ;;  %v911_v9 = vld [vmem:[%s1027_s13 + $0x10] sm:$0xff]  }
  0x1b   : > { %v906_v4 = vld [vmem:[%s1027_s13 + $0x80] sm:$0xff]   ;;  %873 = vmatprep.mubr.msk.bf16.mxu1 %vm954_vm0, %v953_v2  ;;  %827 = vmatpush3.bf16.msra.mxu0 %v905_v3  ;;  %v909_v7 = vld [vmem:[%s1027_s13 + $0x88] sm:$0xff]   ;;  %v912_v10 = vld [vmem:[%s1027_s13 + $0x90] sm:$0xff]   ;;  %v352_v19 = vshrl.u32 %v351_v15, 7 }
  0x1c   : > { %858 = vmatpush3.bf16.msra.mxu1 %v906_v4  ;;  %828 = vmatprep.subr.bf16.mxu0 %v907_v5  ;;  %v913_v11 = vld [vmem:[%s1027_s13 + $0x58] sm:$0xff]   ;;  %v916_v14 = vld [vmem:[%s1027_s13 + $0x60] sm:$0xff]   ;;  %v919_v18 = vld [vmem:[%s1027_s13 + $0x68] sm:$0xff]  }
  0x1d   : > { %859 = vmatprep.subr.bf16.mxu1 %v953_v2  ;;  %v914_v12 = vld [vmem:[%s1027_s13 + $0x18] sm:$0xff]   ;;  %v917_v16 = vld [vmem:[%s1027_s13 + $0x20] sm:$0xff]   ;;  %v920_v20 = vld [vmem:[%s1027_s13 + $0x28] sm:$0xff]   ;;  %v357_v23 = vsub.s32 1, %v352_v19  ;;  %v353_v25 = vsub.s32 0, %v352_v19  ;;  %v361_v27 = vsub.s32 2, %v352_v19 }
  0x1e   : > { %v915_v13 = vld [vmem:[%s1027_s13 + $0x98] sm:$0xff]   ;;  %v918_v17 = vld [vmem:[%s1027_s13 + $0xa0] sm:$0xff]   ;;  %v921_v21 = vld [vmem:[%s1027_s13 + $0xa8] sm:$0xff]  }
  0x1f   : > { %829 = vmatpush3.bf16.msra.mxu0 %v908_v6  ;;  %v922_v22 = vld [vmem:[%s1027_s13 + $0x70] sm:$0xff]   ;;  %v925_v28 = vld [vmem:[%s1027_s13 + $0x78] sm:$0xff]   ;;  %v344_v29 = vld [vmem:[%s1022_s9] sm:$0xff] }
  0x20   : > { %860 = vmatpush3.bf16.msra.mxu1 %v909_v7  ;;  %830 = vmatprep.subr.bf16.mxu0 %v910_v8  ;;  %v923_v24 = vld [vmem:[%s1027_s13 + $0x30] sm:$0xff]   ;;  %v349_v30 = vld [vmem:[%s327_s30] sm:$0x7]  ;;  %v346_v32 = vunpack.c.l.bf16 %v344_v29  ;;  %v347_v33 = vunpack.c.h.bf16 %v344_v29  ;;  %v345_v36 = vld [vmem:[%s1022_s9 + $0x8] sm:$0xf] }
  0x21   : > { %861 = vmatprep.subr.bf16.mxu1 %v953_v2  ;;  %v924_v26 = vld [vmem:[%s1027_s13 + $0xb0] sm:$0xff]   ;;  %v369_v31 = vld [vmem:[%s332_s16] sm:$0x7]  ;;  %v358_v34 = vrot.slane %v349_v30, %v357_v23  ;;  %v354_v37 = vrot.slane %v349_v30, %v353_v25  ;;  %v348_v39 = vunpack.c.l.bf16 %v345_v36  ;;  %v362_v40 = vrot.slane %v349_v30, %v361_v27  ;;  %v926_v41 = vld [vmem:[%s1027_s13 + $0x38] sm:$0xff]  }
  0x22   : > { %v378_v35 = vrot.slane %v369_v31, %v357_v23  ;;  %v374_v38 = vrot.slane %v369_v31, %v353_v25  ;;  %v382_v43 = vrot.slane %v369_v31, %v361_v27  ;;  %v927_v44 = vld [vmem:[%s1027_s13 + $0xb8] sm:$0xff]   ;;  %v395_v63 = vld [vmem:[#allocation2] sm:$0xff] }
  0x23   : > { %831 = vmatpush3.bf16.msra.mxu0 %v911_v9  ;;  %v367_v42 = vmul.f32 %v358_v34, %v347_v33  ;;  %v366_v45 = vmul.f32 %v354_v37, %v346_v32  ;;  %v368_v46 = vmul.f32 %v362_v40, %v348_v39  ;;  %v821_v5 = vld [vmem:[%s1102_s4] ss:$0 sm:$0xff] (!%p820_p7) }
  0x24   : > { %862 = vmatpush3.bf16.msra.mxu1 %v912_v10  ;;  %832 = vmatprep.subr.bf16.mxu0 %v913_v11  ;;  %v822_v6 = vld [vmem:[%s1103_s5] ss:$0 sm:$0xff] (!%p820_p7) }
  0x25   : > { %863 = vmatprep.subr.bf16.mxu1 %v953_v2  ;;  %v387_v47 = vadd.f32 %v378_v35, %v367_v42  ;;  %v386_v48 = vadd.f32 %v374_v38, %v366_v45  ;;  %v388_v49 = vadd.f32 %v382_v43, %v368_v46 }
  0x27   : > { %833 = vmatpush3.bf16.msra.mxu0 %v914_v12  ;;  %v390_v50 = vmax.f32 %v387_v47, 0.0  ;;  %v389_v51 = vmax.f32 %v386_v48, 0.0  ;;  %v391_v52 = vmax.f32 %v388_v49, 0.0 }
  0x28   : > { %864 = vmatpush3.bf16.msra.mxu1 %v915_v13  ;;  %834 = vmatprep.subr.bf16.mxu0 %v916_v14 }
  0x29   : > { %865 = vmatprep.subr.bf16.mxu1 %v953_v2  ;;  %v393_v53 = vpack.c.bf16 %v390_v50, %v390_v50  ;;  %v392_v54 = vpack.c.bf16 %v389_v51, %v389_v51  ;;  %v394_v55 = vpack.c.bf16 %v391_v52, %v391_v52 }
  0x2b   : > { %835 = vmatpush3.bf16.msra.mxu0 %v917_v16  ;;  %620 = vmatprep.mubr.bf16.mxu0 %v393_v53 }
  0x2c   : > { %866 = vmatpush3.bf16.msra.mxu1 %v918_v17  ;;  %836 = vmatprep.subr.bf16.mxu0 %v919_v18 }
  0x2d   : > { %867 = vmatprep.subr.bf16.mxu1 %v953_v2 }
  0x2f   : > { %837 = vmatpush3.bf16.msra.mxu0 %v920_v20 }
  0x30   : > { %868 = vmatpush3.bf16.msra.mxu1 %v921_v21  ;;  %838 = vmatprep.subr.bf16.mxu0 %v922_v22 }
  0x31   : > { %869 = vmatprep.subr.bf16.mxu1 %v953_v2 }
  0x33   : > { %839 = vmatpush3.bf16.msra.mxu0 %v923_v24 }
  0x34   : > { %870 = vmatpush3.bf16.msra.mxu1 %v924_v26  ;;  %840 = vmatprep.subr.bf16.mxu0 %v925_v28 }
  0x35   : > { %871 = vmatprep.subr.bf16.mxu1 %v953_v2 }
  0x37   : > { %841 = vmatpush3.bf16.msra.mxu0 %v926_v41 }
  0x38   : > { %872 = vmatpush3.bf16.msra.mxu1 %v927_v44 }
  0x3a   : > { %621 = vmatmul.mubr.bf16.vlgmr.msra.gmra.mrb[0].mxu0 %v392_v54 }
  0x3b   : > { %874 = vmatmul.mubr.bf16.vlgmr.msra.gmra.mrb[0].mxu1 %v394_v55 }
 0x10d   : > { %v842_v56 = vpop.f32.mrb[0].mxu0 }
 0x10e   : > { %v662_v57 = vpop.f32.mrb[0].mxu1  ;;  %v843_v58 = vpop.f32.mrb[1].mxu0 }
 0x10f   : > { %v875_v59 = vpop.f32.mrb[1].mxu1  ;;  %v844_v60 = vadd.f32 %v843_v58, %v842_v56  ;;  %v845_v61 = vpop.f32.mrb[2].mxu0  ;;  %673 = sbr.rel (%p820_p7) target bundleno = 294 (0x126), region = 52 }
 0x110   : > { %v665_v62 = vpop.f32.mrb[2].mxu1  ;;  %v846_v0 = vpop.f32.mrb[3].mxu0 }
 0x111   : > { %v876_v1 = vpop.f32.mrb[3].mxu1  ;;  %v663_v2 = vadd.f32 %v844_v60, %v662_v57 }
 0x113   : > { %v668_v3 = vadd.f32 %v663_v2, %v395_v63 }
 0x115   : > { %669 = vst [vmem:[#allocation2] sm:$0xff] %v668_v3 }
 0x11c   : > { %v674_v4 = vld [vmem:[#allocation2] sm:$0xff] }
 0x11d   : > { %v682_v7 = vmul.f32 %v821_v5, %v674_v4 }
 0x11f   : > { %v690_v8 = vadd.f32 %v822_v6, %v682_v7 }
 0x121   : > { %v691_v9 = vmax.f32 %v690_v8, 0.0 }
 0x123   : > { %v692_v10 = vpack.c.bf16 %v691_v9, %v691_v9 }
 0x125   : > { %693 = vst [vmem:[%s1104_s6] sm:$0xf] %v692_v10 }
 0x126 PF: > { %s16_s23 = sadd.s32 1, %s950_s23   ;;  %s1105_s21 = smov %s946_s22 }
 0x127   : > { %p13_p8 = scmp.ge.s32.totalorder %s16_s23, 4   ;;  %s1106_s22 = smov %s1108_s24 }
 0x129   :  { %15 = sbr.rel (!%p13_p8) target bundleno = 2 (0x2), region = 91 }

// kernel: densenet121_features.201
= control target key start
LH: loop header
LB: loop body
LE: loop exit
PB: predicated region body
PF: predicated region fallthrough
CT: control target
= control target key end

     0   :  { %s1078_s21 = smov 0   ;;  %s1080_s22 = smov 0   ;;  %s1185_s0 = inlined_call_operand.vmem [shape: bf16[8,1024], index: 0, kind: input, shape index: {}]   ;;  %s1186_s1 = inlined_call_operand.vmem [shape: bf16[1024,128], index: 1, kind: input, shape index: {}]   ;;  %s1187_s2 = inlined_call_operand.vmem [shape: f32[1,1024], index: 2, kind: input, shape index: {}]   ;;  %s1188_s3 = inlined_call_operand.vmem [shape: f32[1,1024], index: 3, kind: input, shape index: {}]   ;;  %s1189_s4 = inlined_call_operand.vmem [shape: f32[1,128], index: 4, kind: input, shape index: {}]   ;;  %s1190_s5 = inlined_call_operand.vmem [shape: f32[1,128], index: 5, kind: input, shape index: {}]   ;;  %s1191_s6 = inlined_call_operand.vmem [shape: bf16[8,128], index: 6, kind: output, shape index: {}]  }
   0x1   :  { %s1082_s23 = smov 0  }
   0x2 LB: > { %s25_s24 = sadd.s32 1, %s1036_s22  ;;  %p871_p0 = scmp.ge.s32.totalorder %s1040_s23, 1  ;;  %s1040_s23 = sphi %s1082_s23, %s16_s23   ;;  %s1036_s22 = sphi %s1080_s22, %s1193_s22   ;;  %s1032_s21 = sphi %s1078_s21, %s1192_s21  }
   0x3   : > { %p26_p1 = scmp.ge.s32.totalorder %s25_s24, 2  ;;  %p262_p2 = scmp.lt.s32.totalorder %s1040_s23, 3 }
   0x5   : > { %s1195_s24 = smov (%p26_p1, %s25_s24), 0  ;;  %p263_p3 = pnand %p871_p0, %p262_p2 }
   0x6   : > { %s872_s25 = sshll.u32 (!%p263_p3), %s1032_s21, 2  ;;  %s874_s26 = sshll.u32 (!%p263_p3), %s1032_s21, 6 }
   0x7   : > { %266 = sbr.rel (%p263_p3) target bundleno = 296 (0x128), region = 44  ;;  %p311_p4 = scmp.lt.s32.totalorder (!%p263_p3), %s872_s25, 7 }
   0x8   : > { %p319_p5 = scmp.lt.s32.totalorder (!%p263_p3), %s874_s26, 127  ;;  %p878_p6 = scmp.ne.s32.totalorder (!%p263_p3), %s1032_s21, 0 }
   0xe   : > { %s1197_s25 = smov (!%p311_p4, %s872_s25), 7  ;;  %s1199_s26 = smov (!%p319_p5, %s874_s26), 127 }
   0xf   : > { %s873_s27 = sshll.u32 %s1197_s25, 2  ;;  %s327_s30 = scalar_lea.vmem %s1187_s2, %s1197_s25  ;;  %v1042_v0 = vmov (!%p878_p6), 0.0  }
  0x10   : > { %s1110_s9 = scalar_lea.vmem %s1185_s0, %s873_s27  ;;  %s875_s10 = sshll.u32 %s1199_s26, 2  ;;  %343 = vst [vmem:[#allocation2] sm:$0xff] (!%p878_p6), %v1042_v0 }
  0x11   : > { %s1115_s13 = scalar_lea.vmem %s1186_s1, %s875_s10  ;;  %s332_s16 = scalar_lea.vmem %s1188_s3, %s1197_s25 }
  0x12   : > { %342 = sbr.rel (%p878_p6) target bundleno = 25 (0x19), region = 48 }
  0x19 PF: > { %v986_v1 = vld [vmem:[%s1115_s13 + $0x40] sm:$0xff]   ;;  %v990_v5 = vld [vmem:[%s1115_s13 + $0x48] sm:$0xff]   ;;  %v994_v9 = vld [vmem:[%s1115_s13 + $0x50] sm:$0xff]   ;;  %v352_v22 = vlaneseq  ;;  %p911_p7 = scmp.ne.s32.totalorder %s1032_s21, 1 }
  0x1a   : > { %v987_v2 = vld [vmem:[%s1115_s13 + $0xc0] sm:$0xff]   ;;  %917 = vmatprep.subr.bf16.mxu0 %v986_v1  ;;  %v991_v6 = vld [vmem:[%s1115_s13 + $0xc8] sm:$0xff]   ;;  %v995_v10 = vld [vmem:[%s1115_s13 + $0xd0] sm:$0xff]  }
  0x1b   : > { %v988_v3 = vld [vmem:[%s1115_s13] sm:$0xff]   ;;  %939 = vmatprep.subr.bf16.mxu1 %v987_v2  ;;  %v992_v7 = vld [vmem:[%s1115_s13 + $0x8] sm:$0xff]   ;;  %v996_v11 = vld [vmem:[%s1115_s13 + $0x10] sm:$0xff]   ;;  %v353_v27 = vshrl.u32 %v352_v22, 7 }
  0x1c   : > { %v989_v4 = vld [vmem:[%s1115_s13 + $0x80] sm:$0xff]   ;;  %918 = vmatpush3.bf16.msra.mxu0 %v988_v3  ;;  %v993_v8 = vld [vmem:[%s1115_s13 + $0x88] sm:$0xff]   ;;  %v997_v12 = vld [vmem:[%s1115_s13 + $0x90] sm:$0xff]  }
  0x1d   : > { %940 = vmatpush3.bf16.msra.mxu1 %v989_v4  ;;  %919 = vmatprep.subr.bf16.mxu0 %v990_v5  ;;  %v998_v13 = vld [vmem:[%s1115_s13 + $0x58] sm:$0xff]   ;;  %v1002_v17 = vld [vmem:[%s1115_s13 + $0x60] sm:$0xff]   ;;  %v1006_v21 = vld [vmem:[%s1115_s13 + $0x68] sm:$0xff]   ;;  %v358_v32 = vsub.s32 1, %v353_v27  ;;  %v366_v34 = vsub.s32 3, %v353_v27  ;;  %v354_v36 = vsub.s32 0, %v353_v27 }
  0x1e   : > { %941 = vmatprep.subr.bf16.mxu1 %v991_v6  ;;  %v999_v14 = vld [vmem:[%s1115_s13 + $0xd8] sm:$0xff]   ;;  %v1003_v18 = vld [vmem:[%s1115_s13 + $0xe0] sm:$0xff]   ;;  %v1007_v23 = vld [vmem:[%s1115_s13 + $0xe8] sm:$0xff]   ;;  %v362_v38 = vsub.s32 2, %v353_v27 }
  0x1f   : > { %v1000_v15 = vld [vmem:[%s1115_s13 + $0x18] sm:$0xff]   ;;  %v1004_v19 = vld [vmem:[%s1115_s13 + $0x20] sm:$0xff]   ;;  %v1008_v24 = vld [vmem:[%s1115_s13 + $0x28] sm:$0xff]  }
  0x20   : > { %920 = vmatpush3.bf16.msra.mxu0 %v992_v7  ;;  %v1001_v16 = vld [vmem:[%s1115_s13 + $0x98] sm:$0xff]   ;;  %v1005_v20 = vld [vmem:[%s1115_s13 + $0xa0] sm:$0xff]   ;;  %v1009_v25 = vld [vmem:[%s1115_s13 + $0xa8] sm:$0xff]  }
  0x21   : > { %942 = vmatpush3.bf16.msra.mxu1 %v993_v8  ;;  %921 = vmatprep.subr.bf16.mxu0 %v994_v9  ;;  %v1010_v26 = vld [vmem:[%s1115_s13 + $0x70] sm:$0xff]   ;;  %v1014_v31 = vld [vmem:[%s1115_s13 + $0x78] sm:$0xff]   ;;  %v344_v39 = vld [vmem:[%s1110_s9] sm:$0xff] }
  0x22   : > { %943 = vmatprep.subr.bf16.mxu1 %v995_v10  ;;  %v1011_v28 = vld [vmem:[%s1115_s13 + $0xf0] sm:$0xff]   ;;  %v1015_v33 = vld [vmem:[%s1115_s13 + $0xf8] sm:$0xff]   ;;  %v350_v40 = vld [vmem:[%s327_s30] sm:$0xf]  ;;  %v346_v42 = vunpack.c.l.bf16 %v344_v39  ;;  %v347_v43 = vunpack.c.h.bf16 %v344_v39 }
  0x23   : > { %v1012_v29 = vld [vmem:[%s1115_s13 + $0x30] sm:$0xff]   ;;  %v1016_v35 = vld [vmem:[%s1115_s13 + $0x38] sm:$0xff]   ;;  %v376_v41 = vld [vmem:[%s332_s16] sm:$0xf]  ;;  %v359_v44 = vrot.slane %v350_v40, %v358_v32  ;;  %v367_v49 = vrot.slane %v350_v40, %v366_v34  ;;  %v355_v52 = vrot.slane %v350_v40, %v354_v36  ;;  %v363_v54 = vrot.slane %v350_v40, %v362_v38 }
  0x24   : > { %922 = vmatpush3.bf16.msra.mxu0 %v996_v11  ;;  %v1013_v30 = vld [vmem:[%s1115_s13 + $0xb0] sm:$0xff]   ;;  %v1017_v37 = vld [vmem:[%s1115_s13 + $0xb8] sm:$0xff]   ;;  %v385_v45 = vrot.slane %v376_v41, %v358_v32  ;;  %v345_v46 = vld [vmem:[%s1110_s9 + $0x8] sm:$0xff]  ;;  %v393_v50 = vrot.slane %v376_v41, %v366_v34  ;;  %v381_v53 = vrot.slane %v376_v41, %v354_v36  ;;  %v389_v56 = vrot.slane %v376_v41, %v362_v38 }
  0x25   : > { %944 = vmatpush3.bf16.msra.mxu1 %v997_v12  ;;  %923 = vmatprep.subr.bf16.mxu0 %v998_v13  ;;  %v348_v47 = vunpack.c.l.bf16 %v345_v46  ;;  %v349_v48 = vunpack.c.h.bf16 %v345_v46  ;;  %v373_v51 = vmul.f32 %v359_v44, %v347_v43  ;;  %v372_v58 = vmul.f32 %v355_v52, %v346_v42  ;;  %v913_v22 = vld [vmem:[%s1190_s5] ss:$0 sm:$0xff] (!%p911_p7) }
  0x26   : > { %945 = vmatprep.subr.bf16.mxu1 %v999_v14 }
  0x27   : > { %v375_v55 = vmul.f32 %v367_v49, %v349_v48  ;;  %v399_v57 = vadd.f32 %v385_v45, %v373_v51  ;;  %v374_v59 = vmul.f32 %v363_v54, %v348_v47  ;;  %v398_v62 = vadd.f32 %v381_v53, %v372_v58 }
  0x28   : > { %924 = vmatpush3.bf16.msra.mxu0 %v1000_v15  ;;  %v410_v15 = vld [vmem:[#allocation2] sm:$0xff] }
  0x29   : > { %946 = vmatpush3.bf16.msra.mxu1 %v1001_v16  ;;  %925 = vmatprep.subr.bf16.mxu0 %v1002_v17  ;;  %v401_v60 = vadd.f32 %v393_v50, %v375_v55  ;;  %v403_v61 = vmax.f32 %v399_v57, 0.0  ;;  %v400_v63 = vadd.f32 %v389_v56, %v374_v59  ;;  %v402_v2 = vmax.f32 %v398_v62, 0.0 }
  0x2a   : > { %947 = vmatprep.subr.bf16.mxu1 %v1003_v18 }
  0x2b   : > { %v405_v0 = vmax.f32 %v401_v60, 0.0  ;;  %v407_v1 = vpack.c.bf16 %v403_v61, %v403_v61  ;;  %v404_v3 = vmax.f32 %v400_v63, 0.0  ;;  %v406_v5 = vpack.c.bf16 %v402_v2, %v402_v2 }
  0x2c   : > { %926 = vmatpush3.bf16.msra.mxu0 %v1004_v19 }
  0x2d   : > { %948 = vmatpush3.bf16.msra.mxu1 %v1005_v20  ;;  %927 = vmatprep.subr.bf16.mxu0 %v1006_v21  ;;  %v409_v4 = vpack.c.bf16 %v405_v0, %v405_v0  ;;  %v408_v6 = vpack.c.bf16 %v404_v3, %v404_v3  ;;  %v912_v21 = vld [vmem:[%s1189_s4] ss:$0 sm:$0xff] (!%p911_p7) }
  0x2e   : > { %949 = vmatprep.subr.bf16.mxu1 %v1007_v23  ;;  %699 = vmatprep.mubr.bf16.mxu0 %v407_v1 }
  0x2f   : > { %739 = vmatprep.mubr.bf16.mxu1 %v409_v4 }
  0x30   : > { %928 = vmatpush3.bf16.msra.mxu0 %v1008_v24 }
  0x31   : > { %950 = vmatpush3.bf16.msra.mxu1 %v1009_v25  ;;  %929 = vmatprep.subr.bf16.mxu0 %v1010_v26 }
  0x32   : > { %951 = vmatprep.subr.bf16.mxu1 %v1011_v28 }
  0x34   : > { %930 = vmatpush3.bf16.msra.mxu0 %v1012_v29 }
  0x35   : > { %952 = vmatpush3.bf16.msra.mxu1 %v1013_v30  ;;  %931 = vmatprep.subr.bf16.mxu0 %v1014_v31 }
  0x36   : > { %953 = vmatprep.subr.bf16.mxu1 %v1015_v33 }
  0x38   : > { %932 = vmatpush3.bf16.msra.mxu0 %v1016_v35 }
  0x39   : > { %954 = vmatpush3.bf16.msra.mxu1 %v1017_v37 }
  0x3b   : > { %700 = vmatmul.mubr.bf16.vlgmr.msra.gmra.mrb[0].mxu0 %v406_v5 }
  0x3c   : > { %740 = vmatmul.mubr.bf16.vlgmr.msra.gmra.mrb[0].mxu1 %v408_v6 }
 0x10e   : > { %v933_v7 = vpop.f32.mrb[0].mxu0 }
 0x10f   : > { %v955_v8 = vpop.f32.mrb[0].mxu1  ;;  %v934_v9 = vpop.f32.mrb[1].mxu0 }
 0x110   : > { %v956_v10 = vpop.f32.mrb[1].mxu1  ;;  %v935_v11 = vadd.f32 %v934_v9, %v933_v7  ;;  %v936_v13 = vpop.f32.mrb[2].mxu0 }
 0x111   : > { %v957_v12 = vadd.f32 %v956_v10, %v955_v8  ;;  %v958_v14 = vpop.f32.mrb[2].mxu1  ;;  %v937_v16 = vpop.f32.mrb[3].mxu0  ;;  %752 = sbr.rel (%p911_p7) target bundleno = 296 (0x128), region = 52 }
 0x112   : > { %v959_v17 = vpop.f32.mrb[3].mxu1 }
 0x113   : > { %v742_v18 = vadd.f32 %v957_v12, %v935_v11 }
 0x115   : > { %v747_v19 = vadd.f32 %v742_v18, %v410_v15 }
 0x117   : > { %748 = vst [vmem:[#allocation2] sm:$0xff] %v747_v19 }
 0x11e   : > { %v753_v20 = vld [vmem:[#allocation2] sm:$0xff] }
 0x11f   : > { %v761_v23 = vmul.f32 %v912_v21, %v753_v20 }
 0x121   : > { %v769_v24 = vadd.f32 %v913_v22, %v761_v23 }
 0x123   : > { %v770_v25 = vmax.f32 %v769_v24, 0.0 }
 0x125   : > { %v771_v26 = vpack.c.bf16 %v770_v25, %v770_v25 }
 0x127   : > { %772 = vst [vmem:[%s1191_s6] sm:$0xf] %v771_v26 }
 0x128 PF: > { %s16_s23 = sadd.s32 1, %s1040_s23   ;;  %s1192_s21 = smov %s1036_s22 }
 0x129   : > { %p13_p8 = scmp.ge.s32.totalorder %s16_s23, 4   ;;  %s1193_s22 = smov %s1195_s24 }
 0x12b   :  { %15 = sbr.rel (!%p13_p8) target bundleno = 2 (0x2), region = 91 }

// kernel: densenet121_features.216
= control target key start
LH: loop header
LB: loop body
LE: loop exit
PB: predicated region body
PF: predicated region fallthrough
CT: control target
= control target key end

     0   :  { %s138_s0 = inlined_call_operand.vmem [shape: bf16[8,512], index: 0, kind: input, shape index: {}]   ;;  %s139_s1 = inlined_call_operand.vmem [shape: bf16[8,512], index: 1, kind: input, shape index: {}]   ;;  %s140_s2 = inlined_call_operand.vmem [shape: bf16[8,512], index: 2, kind: input, shape index: {}]   ;;  %s141_s3 = inlined_call_operand.vmem [shape: bf16[8,512], index: 3, kind: input, shape index: {}]   ;;  %s142_s4 = inlined_call_operand.vmem [shape: bf16[8,512], index: 4, kind: output, shape index: {}]  }
   0x1   :  { %v17_v0 = vld [vmem:[%s138_s0] sm:$0xff]  ;;  %v18_v8 = vld [vmem:[%s138_s0 + $0x8] sm:$0xff] }
   0x2   :  { %v23_v1 = vld [vmem:[%s139_s1] sm:$0xff]  ;;  %v19_v3 = vunpack.c.l.bf16 %v17_v0  ;;  %v20_v4 = vunpack.c.h.bf16 %v17_v0  ;;  %v24_v9 = vld [vmem:[%s139_s1 + $0x8] sm:$0xff]  ;;  %v21_v17 = vunpack.c.l.bf16 %v18_v8  ;;  %v22_v18 = vunpack.c.h.bf16 %v18_v8 }
   0x3   :  { %v33_v2 = vld [vmem:[%s140_s2] sm:$0xff]  ;;  %v25_v5 = vunpack.c.l.bf16 %v23_v1  ;;  %v26_v6 = vunpack.c.h.bf16 %v23_v1  ;;  %v34_v14 = vld [vmem:[%s140_s2 + $0x8] sm:$0xff]  ;;  %v27_v20 = vunpack.c.l.bf16 %v24_v9  ;;  %v28_v21 = vunpack.c.h.bf16 %v24_v9 }
   0x4   :  { %v43_v7 = vld [vmem:[%s141_s3] sm:$0xff]  ;;  %v35_v10 = vunpack.c.l.bf16 %v33_v2  ;;  %v36_v11 = vunpack.c.h.bf16 %v33_v2  ;;  %v44_v19 = vld [vmem:[%s141_s3 + $0x8] sm:$0xff]  ;;  %v37_v22 = vunpack.c.l.bf16 %v34_v14  ;;  %v38_v23 = vunpack.c.h.bf16 %v34_v14 }
   0x5   :  { %v45_v12 = vunpack.c.l.bf16 %v43_v7  ;;  %v46_v13 = vunpack.c.h.bf16 %v43_v7  ;;  %v29_v15 = vadd.f32 %v25_v5, %v19_v3  ;;  %v30_v16 = vadd.f32 %v26_v6, %v20_v4 }
   0x6   :  { %v31_v26 = vadd.f32 %v27_v20, %v21_v17  ;;  %v32_v27 = vadd.f32 %v28_v21, %v22_v18  ;;  %v47_v28 = vunpack.c.l.bf16 %v44_v19  ;;  %v48_v29 = vunpack.c.h.bf16 %v44_v19 }
   0x7   :  { %v39_v24 = vadd.f32 %v35_v10, %v29_v15  ;;  %v40_v25 = vadd.f32 %v36_v11, %v30_v16 }
   0x8   :  { %v41_v32 = vadd.f32 %v37_v22, %v31_v26  ;;  %v42_v33 = vadd.f32 %v38_v23, %v32_v27 }
   0x9   :  { %v49_v30 = vadd.f32 %v45_v12, %v39_v24  ;;  %v50_v31 = vadd.f32 %v46_v13, %v40_v25 }
   0xa   :  { %v51_v36 = vadd.f32 %v47_v28, %v41_v32  ;;  %v52_v37 = vadd.f32 %v48_v29, %v42_v33 }
   0xb   :  { %v53_v34 = vmul.f32 0.25, %v49_v30  ;;  %v54_v35 = vmul.f32 0.25, %v50_v31 }
   0xc   :  { %v55_v39 = vmul.f32 0.25, %v51_v36  ;;  %v56_v40 = vmul.f32 0.25, %v52_v37 }
   0xd   :  { %v81_v38 = vpack.c.bf16 %v54_v35, %v53_v34 }
   0xe   :  { %v82_v41 = vpack.c.bf16 %v56_v40, %v55_v39 }
   0xf   :  { %73 = vst [vmem:[%s142_s4] sm:$0xff] %v81_v38 }
  0x10   :  { %74 = vst [vmem:[%s142_s4 + $0x8] sm:$0xff] %v82_v41 }

// kernel: densenet121_features.215
= control target key start
LH: loop header
LB: loop body
LE: loop exit
PB: predicated region body
PF: predicated region fallthrough
CT: control target
= control target key end

     0   :  { %s1910_s21 = smov 0   ;;  %s1912_s22 = smov 0   ;;  %s2118_s0 = inlined_call_operand.vmem [shape: bf16[8,1024], index: 0, kind: input, shape index: {}]   ;;  %s2119_s1 = inlined_call_operand.vmem [shape: bf16[1024,512], index: 1, kind: input, shape index: {}]   ;;  %s2120_s2 = inlined_call_operand.vmem [shape: f32[1,1024], index: 2, kind: input, shape index: {}]   ;;  %s2121_s3 = inlined_call_operand.vmem [shape: f32[1,1024], index: 3, kind: input, shape index: {}]   ;;  %s2122_s4 = inlined_call_operand.vmem [shape: f32[1,512], index: 4, kind: input, shape index: {}, may-alias: {4,5}]   ;;  %s2123_s5 = inlined_call_operand.vmem [shape: f32[1,512], index: 5, kind: input, shape index: {}, may-alias: {4,5}]   ;;  %s2124_s6 = inlined_call_operand.vmem [shape: bf16[8,512], index: 6, kind: output, shape index: {}]  }
   0x1   :  { %s1914_s23 = smov 0  }
   0x2 LB: > { %s25_s4 = sadd.s32 1, %s1868_s22  ;;  %p1487_p0 = scmp.ge.s32.totalorder %s1872_s23, 1  ;;  %s1872_s23 = sphi %s1914_s23, %s16_s23   ;;  %s1868_s22 = sphi %s1912_s22, %s2126_s22   ;;  %s1864_s21 = sphi %s1910_s21, %s2125_s21  }
   0x3   : > { %p26_p1 = scmp.ge.s32.totalorder %s25_s4, 2  ;;  %p263_p2 = scmp.lt.s32.totalorder %s1872_s23, 3 }
   0x5   : > { %s2128_s4 = smov (%p26_p1, %s25_s4), 0  ;;  %p264_p3 = pnand %p1487_p0, %p263_p2 }
   0x6   : > { %s1488_s5 = sshll.u32 (!%p264_p3), %s1864_s21, 2  ;;  %s1490_s24 = sshll.u32 (!%p264_p3), %s1864_s21, 6 }
   0x7   : > { %267 = sbr.rel (%p264_p3) target bundleno = 383 (0x17f), region = 44  ;;  %p314_p4 = scmp.lt.s32.totalorder (!%p264_p3), %s1488_s5, 7 }
   0x8   : > { %p322_p5 = scmp.lt.s32.totalorder (!%p264_p3), %s1490_s24, 127  ;;  %p1495_p6 = scmp.ne.s32.totalorder (!%p264_p3), %s1864_s21, 0 }
   0xe   : > { %s2130_s5 = smov (!%p314_p4, %s1488_s5), 7  ;;  %s2132_s24 = smov (!%p322_p5, %s1490_s24), 127 }
   0xf   : > { %s1489_s25 = sshll.u32 %s2130_s5, 2  ;;  %s331_s28 = scalar_lea.vmem %s2120_s2, %s2130_s5  ;;  %v1874_v0 = vmov (!%p1495_p6), 0.0  }
  0x10   : > { %s1942_s7 = scalar_lea.vmem %s2118_s0, %s1489_s25  ;;  %s1630_s8 = sshll.u32 %s2132_s24, 4  ;;  %347 = vst [vmem:[#allocation2] sm:$0xff] (!%p1495_p6), %v1874_v0  ;;  %348 = vst [vmem:[#allocation2 + $0x8] sm:$0xff] (!%p1495_p6), %v1874_v0 }
  0x11   : > { %s1947_s11 = scalar_lea.vmem %s2119_s1, %s1630_s8  ;;  %s336_s14 = scalar_lea.vmem %s2121_s3, %s2130_s5  ;;  %349 = vst [vmem:[#allocation2 + $0x10] sm:$0xff] (!%p1495_p6), %v1874_v0  ;;  %350 = vst [vmem:[#allocation2 + $0x18] sm:$0xff] (!%p1495_p6), %v1874_v0 }
  0x12   : > { %346 = sbr.rel (%p1495_p6) target bundleno = 25 (0x19), region = 48 }
  0x19 PF: > { %v1658_v1 = vld [vmem:[%s1947_s11 + $0x4] ss:$16 sps:$4 sm:$0xff]   ;;  %v1662_v3 = vld [vmem:[%s1947_s11] ss:$16 sps:$4 sm:$0xff]   ;;  %v359_v38 = vlaneseq  ;;  %v352_v58 = vld [vmem:[%s1942_s7 + $0x8] sm:$0xff]  ;;  %p1624_p7 = scmp.ne.s32.totalorder %s1864_s21, 1 }
  0x1a   : > { %v1660_v2 = vld [vmem:[%s1947_s11 + $0x204] ss:$16 sps:$4 sm:$0xff]   ;;  %1189 = vmatprep.subr.bf16.mxu0 %v1658_v1  ;;  %v1663_v4 = vld [vmem:[%s1947_s11 + $0x200] ss:$16 sps:$4 sm:$0xff]   ;;  %v356_v63 = vunpack.c.h.bf16 %v352_v58 }
  0x1b   : > { %1230 = vmatprep.subr.bf16.mxu1 %v1660_v2  ;;  %v1664_v5 = vld [vmem:[%s1947_s11 + $0x24] ss:$16 sps:$4 sm:$0xff]   ;;  %1190 = vmatpush1.bf16.msra.mxu0 %v1662_v3  ;;  %v1668_v7 = vld [vmem:[%s1947_s11 + $0x20] ss:$16 sps:$4 sm:$0xff]   ;;  %v360_v43 = vshrl.u32 %v359_v38, 7 }
  0x1c   : > { %1231 = vmatpush1.bf16.msra.mxu1 %v1663_v4  ;;  %v1666_v6 = vld [vmem:[%s1947_s11 + $0x224] ss:$16 sps:$4 sm:$0xff]   ;;  %1191 = vmatprep.subr.bf16.mxu0 %v1664_v5  ;;  %v1669_v8 = vld [vmem:[%s1947_s11 + $0x220] ss:$16 sps:$4 sm:$0xff]   ;;  %v1759_v38 = vld [vmem:[%s1947_s11 + $0x20c] ss:$16 sps:$4 sm:$0xff]  }
  0x1d   : > { %1232 = vmatprep.subr.bf16.mxu1 %v1666_v6  ;;  %v1670_v9 = vld [vmem:[%s1947_s11 + $0x44] ss:$16 sps:$4 sm:$0xff]   ;;  %v1674_v11 = vld [vmem:[%s1947_s11 + $0x40] ss:$16 sps:$4 sm:$0xff]   ;;  %v365_v48 = vsub.s32 1, %v360_v43  ;;  %v373_v50 = vsub.s32 3, %v360_v43 }
  0x1e   : > { %v1672_v10 = vld [vmem:[%s1947_s11 + $0x244] ss:$16 sps:$4 sm:$0xff]   ;;  %v1675_v12 = vld [vmem:[%s1947_s11 + $0x240] ss:$16 sps:$4 sm:$0xff]   ;;  %v361_v54 = vsub.s32 0, %v360_v43  ;;  %v369_v59 = vsub.s32 2, %v360_v43 }
  0x1f   : > { %1192 = vmatpush1.bf16.msra.mxu0 %v1668_v7  ;;  %v1676_v13 = vld [vmem:[%s1947_s11 + $0x64] ss:$16 sps:$4 sm:$0xff]   ;;  %v1680_v15 = vld [vmem:[%s1947_s11 + $0x60] ss:$16 sps:$4 sm:$0xff]   ;;  %v355_v7 = vunpack.c.l.bf16 %v352_v58  ;;  %v1762_v43 = vld [vmem:[%s1947_s11 + $0x2c] ss:$16 sps:$4 sm:$0xff]  }
  0x20   : > { %1233 = vmatpush1.bf16.msra.mxu1 %v1669_v8  ;;  %1193 = vmatprep.subr.bf16.mxu0 %v1670_v9  ;;  %v1678_v14 = vld [vmem:[%s1947_s11 + $0x264] ss:$16 sps:$4 sm:$0xff]   ;;  %v1681_v16 = vld [vmem:[%s1947_s11 + $0x260] ss:$16 sps:$4 sm:$0xff]   ;;  %v1781_v58 = vld [vmem:[%s1947_s11 + $0x288] ss:$16 sps:$4 sm:$0xff]  }
  0x21   : > { %1234 = vmatprep.subr.bf16.mxu1 %v1672_v10  ;;  %v1682_v17 = vld [vmem:[%s1947_s11 + $0x84] ss:$16 sps:$4 sm:$0xff]   ;;  %v1686_v19 = vld [vmem:[%s1947_s11 + $0x80] ss:$16 sps:$4 sm:$0xff]  }
  0x22   : > { %v1684_v18 = vld [vmem:[%s1947_s11 + $0x284] ss:$16 sps:$4 sm:$0xff]   ;;  %v1687_v20 = vld [vmem:[%s1947_s11 + $0x280] ss:$16 sps:$4 sm:$0xff]  }
  0x23   : > { %1194 = vmatpush1.bf16.msra.mxu0 %v1674_v11  ;;  %v1688_v21 = vld [vmem:[%s1947_s11 + $0xa4] ss:$16 sps:$4 sm:$0xff]   ;;  %v1692_v23 = vld [vmem:[%s1947_s11 + $0xa0] ss:$16 sps:$4 sm:$0xff]  }
  0x24   : > { %1235 = vmatpush1.bf16.msra.mxu1 %v1675_v12  ;;  %1195 = vmatprep.subr.bf16.mxu0 %v1676_v13  ;;  %v1690_v22 = vld [vmem:[%s1947_s11 + $0x2a4] ss:$16 sps:$4 sm:$0xff]   ;;  %v1693_v24 = vld [vmem:[%s1947_s11 + $0x2a0] ss:$16 sps:$4 sm:$0xff]  }
  0x25   : > { %1236 = vmatprep.subr.bf16.mxu1 %v1678_v14  ;;  %v1694_v25 = vld [vmem:[%s1947_s11 + $0xc4] ss:$16 sps:$4 sm:$0xff]   ;;  %v1698_v27 = vld [vmem:[%s1947_s11 + $0xc0] ss:$16 sps:$4 sm:$0xff]  }
  0x26   : > { %v1696_v26 = vld [vmem:[%s1947_s11 + $0x2c4] ss:$16 sps:$4 sm:$0xff]   ;;  %v1699_v28 = vld [vmem:[%s1947_s11 + $0x2c0] ss:$16 sps:$4 sm:$0xff]  }
  0x27   : > { %1196 = vmatpush1.bf16.msra.mxu0 %v1680_v15  ;;  %v1700_v29 = vld [vmem:[%s1947_s11 + $0xe4] ss:$16 sps:$4 sm:$0xff]   ;;  %v1704_v31 = vld [vmem:[%s1947_s11 + $0xe0] ss:$16 sps:$4 sm:$0xff]  }
  0x28   : > { %1237 = vmatpush1.bf16.msra.mxu1 %v1681_v16  ;;  %1197 = vmatprep.subr.bf16.mxu0 %v1682_v17  ;;  %v1702_v30 = vld [vmem:[%s1947_s11 + $0x2e4] ss:$16 sps:$4 sm:$0xff]   ;;  %v1705_v32 = vld [vmem:[%s1947_s11 + $0x2e0] ss:$16 sps:$4 sm:$0xff]  }
  0x29   : > { %1238 = vmatprep.subr.bf16.mxu1 %v1684_v18  ;;  %v1706_v33 = vld [vmem:[%s1947_s11 + $0x104] ss:$16 sps:$4 sm:$0xff]   ;;  %v1710_v35 = vld [vmem:[%s1947_s11 + $0x100] ss:$16 sps:$4 sm:$0xff]  }
  0x2a   : > { %v1708_v34 = vld [vmem:[%s1947_s11 + $0x304] ss:$16 sps:$4 sm:$0xff]   ;;  %v1711_v36 = vld [vmem:[%s1947_s11 + $0x300] ss:$16 sps:$4 sm:$0xff]  }
  0x2b   : > { %1198 = vmatpush1.bf16.msra.mxu0 %v1686_v19  ;;  %v1712_v37 = vld [vmem:[%s1947_s11 + $0x124] ss:$16 sps:$4 sm:$0xff]   ;;  %v1716_v40 = vld [vmem:[%s1947_s11 + $0x120] ss:$16 sps:$4 sm:$0xff]  }
  0x2c   : > { %1239 = vmatpush1.bf16.msra.mxu1 %v1687_v20  ;;  %1199 = vmatprep.subr.bf16.mxu0 %v1688_v21  ;;  %v1714_v39 = vld [vmem:[%s1947_s11 + $0x324] ss:$16 sps:$4 sm:$0xff]   ;;  %v1717_v41 = vld [vmem:[%s1947_s11 + $0x320] ss:$16 sps:$4 sm:$0xff]  }
  0x2d   : > { %1240 = vmatprep.subr.bf16.mxu1 %v1690_v22  ;;  %v1718_v42 = vld [vmem:[%s1947_s11 + $0x144] ss:$16 sps:$4 sm:$0xff]   ;;  %v1722_v45 = vld [vmem:[%s1947_s11 + $0x140] ss:$16 sps:$4 sm:$0xff]  }
  0x2e   : > { %v1720_v44 = vld [vmem:[%s1947_s11 + $0x344] ss:$16 sps:$4 sm:$0xff]   ;;  %v1723_v46 = vld [vmem:[%s1947_s11 + $0x340] ss:$16 sps:$4 sm:$0xff]  }
  0x2f   : > { %1200 = vmatpush1.bf16.msra.mxu0 %v1692_v23  ;;  %v1724_v47 = vld [vmem:[%s1947_s11 + $0x164] ss:$16 sps:$4 sm:$0xff]   ;;  %v1728_v51 = vld [vmem:[%s1947_s11 + $0x160] ss:$16 sps:$4 sm:$0xff]  }
  0x30   : > { %1241 = vmatpush1.bf16.msra.mxu1 %v1693_v24  ;;  %1201 = vmatprep.subr.bf16.mxu0 %v1694_v25  ;;  %v1726_v49 = vld [vmem:[%s1947_s11 + $0x364] ss:$16 sps:$4 sm:$0xff]   ;;  %v1729_v52 = vld [vmem:[%s1947_s11 + $0x360] ss:$16 sps:$4 sm:$0xff]  }
  0x31   : > { %1242 = vmatprep.subr.bf16.mxu1 %v1696_v26  ;;  %v351_v53 = vld [vmem:[%s1942_s7] sm:$0xff] }
  0x32   : > { %v354_v55 = vunpack.c.h.bf16 %v351_v53  ;;  %v357_v56 = vld [vmem:[%s331_s28] sm:$0xf]  ;;  %v1730_v60 = vld [vmem:[%s1947_s11 + $0x184] ss:$16 sps:$4 sm:$0xff]   ;;  %v353_v3 = vunpack.c.l.bf16 %v351_v53  ;;  %v1772_v53 = vld [vmem:[%s1947_s11 + $0x68] ss:$16 sps:$4 sm:$0xff]  }
  0x33   : > { %1202 = vmatpush1.bf16.msra.mxu0 %v1698_v27  ;;  %v383_v57 = vld [vmem:[%s336_s14] sm:$0xf]  ;;  %v366_v61 = vrot.slane %v357_v56, %v365_v48  ;;  %v1732_v0 = vld [vmem:[%s1947_s11 + $0x384] ss:$16 sps:$4 sm:$0xff]   ;;  %v374_v1 = vrot.slane %v357_v56, %v373_v50  ;;  %v362_v9 = vrot.slane %v357_v56, %v361_v54  ;;  %v370_v10 = vrot.slane %v357_v56, %v369_v59  ;;  %v1783_v56 = vld [vmem:[%s1947_s11 + $0x28c] ss:$16 sps:$4 sm:$0xff]  }
  0x34   : > { %1243 = vmatpush1.bf16.msra.mxu1 %v1699_v28  ;;  %1203 = vmatprep.subr.bf16.mxu0 %v1700_v29  ;;  %v392_v62 = vrot.slane %v383_v57, %v365_v48  ;;  %v400_v2 = vrot.slane %v383_v57, %v373_v50  ;;  %v1734_v5 = vld [vmem:[%s1947_s11 + $0x180] ss:$16 sps:$4 sm:$0xff]   ;;  %v1736_v11 = vld [vmem:[%s1947_s11 + $0x1a4] ss:$16 sps:$4 sm:$0xff]   ;;  %v388_v16 = vrot.slane %v383_v57, %v361_v54  ;;  %v1771_v48 = vld [vmem:[%s1947_s11 + $0x24c] ss:$16 sps:$4 sm:$0xff]  }
  0x35   : > { %1244 = vmatprep.subr.bf16.mxu1 %v1702_v30  ;;  %v380_v4 = vmul.f32 %v366_v61, %v354_v55  ;;  %v1735_v6 = vld [vmem:[%s1947_s11 + $0x380] ss:$16 sps:$4 sm:$0xff]   ;;  %v382_v8 = vmul.f32 %v374_v1, %v356_v63  ;;  %v1738_v13 = vld [vmem:[%s1947_s11 + $0x3a4] ss:$16 sps:$4 sm:$0xff]   ;;  %v379_v19 = vmul.f32 %v362_v9, %v353_v3  ;;  %v381_v20 = vmul.f32 %v370_v10, %v355_v7  ;;  %v1769_v50 = vld [vmem:[%s1947_s11 + $0x248] ss:$16 sps:$4 sm:$0xff]  }
  0x36   : > { %v1740_v17 = vld [vmem:[%s1947_s11 + $0x1a0] ss:$16 sps:$4 sm:$0xff]   ;;  %v396_v21 = vrot.slane %v383_v57, %v369_v59  ;;  %v1742_v23 = vld [vmem:[%s1947_s11 + $0x1c4] ss:$16 sps:$4 sm:$0xff]   ;;  %v1775_v54 = vld [vmem:[%s1947_s11 + $0x268] ss:$16 sps:$4 sm:$0xff]  }
  0x37   : > { %1204 = vmatpush1.bf16.msra.mxu0 %v1704_v31  ;;  %v406_v12 = vadd.f32 %v392_v62, %v380_v4  ;;  %v408_v14 = vadd.f32 %v400_v2, %v382_v8  ;;  %v1741_v22 = vld [vmem:[%s1947_s11 + $0x3a0] ss:$16 sps:$4 sm:$0xff]   ;;  %v1744_v25 = vld [vmem:[%s1947_s11 + $0x3c4] ss:$16 sps:$4 sm:$0xff]   ;;  %v405_v29 = vadd.f32 %v388_v16, %v379_v19  ;;  %v1780_v55 = vld [vmem:[%s1947_s11 + $0x8c] ss:$16 sps:$4 sm:$0xff]  }
  0x38   : > { %1245 = vmatpush1.bf16.msra.mxu1 %v1705_v32  ;;  %1205 = vmatprep.subr.bf16.mxu0 %v1706_v33  ;;  %v1746_v27 = vld [vmem:[%s1947_s11 + $0x1c0] ss:$16 sps:$4 sm:$0xff]   ;;  %v407_v30 = vadd.f32 %v396_v21, %v381_v20  ;;  %v1748_v31 = vld [vmem:[%s1947_s11 + $0x1e4] ss:$16 sps:$4 sm:$0xff]   ;;  %v1778_v57 = vld [vmem:[%s1947_s11 + $0x88] ss:$16 sps:$4 sm:$0xff]  }
  0x39   : > { %1246 = vmatprep.subr.bf16.mxu1 %v1708_v34  ;;  %v410_v15 = vmax.f32 %v406_v12, 0.0  ;;  %v412_v18 = vmax.f32 %v408_v14, 0.0  ;;  %v1747_v28 = vld [vmem:[%s1947_s11 + $0x3c0] ss:$16 sps:$4 sm:$0xff]   ;;  %v1750_v32 = vld [vmem:[%s1947_s11 + $0x3e4] ss:$16 sps:$4 sm:$0xff]  }
  0x3a   : > { %v1752_v33 = vld [vmem:[%s1947_s11 + $0x1e0] ss:$16 sps:$4 sm:$0xff]   ;;  %v1786_v59 = vld [vmem:[%s1947_s11 + $0xac] ss:$16 sps:$4 sm:$0xff]   ;;  %v1784_v61 = vld [vmem:[%s1947_s11 + $0xa8] ss:$16 sps:$4 sm:$0xff]  }
  0x3b   : > { %1206 = vmatpush1.bf16.msra.mxu0 %v1710_v35  ;;  %v414_v24 = vpack.c.bf16 %v410_v15, %v410_v15  ;;  %v416_v26 = vpack.c.bf16 %v412_v18, %v412_v18  ;;  %v1753_v34 = vld [vmem:[%s1947_s11 + $0x3e0] ss:$16 sps:$4 sm:$0xff]   ;;  %v409_v35 = vmax.f32 %v405_v29, 0.0  ;;  %v1787_v62 = vld [vmem:[%s1947_s11 + $0x2a8] ss:$16 sps:$4 sm:$0xff]  }
  0x3c   : > { %1247 = vmatpush1.bf16.msra.mxu1 %v1711_v36  ;;  %1207 = vmatprep.subr.bf16.mxu0 %v1712_v37  ;;  %v411_v36 = vmax.f32 %v407_v30, 0.0  ;;  %v1756_v37 = vld [vmem:[%s1947_s11 + $0xc] ss:$16 sps:$4 sm:$0xff]   ;;  %v1790_v1 = vld [vmem:[%s1947_s11 + $0xc8] ss:$16 sps:$4 sm:$0xff]  }
  0x3d   : > { %1248 = vmatprep.subr.bf16.mxu1 %v1714_v39  ;;  %1221 = vmatprep.mubr.bf16.mxu0 %v414_v24  ;;  %v2032_v39 = vpack.c.bf16 %v409_v35, %v409_v35  ;;  %v1792_v63 = vld [vmem:[%s1947_s11 + $0xcc] ss:$16 sps:$4 sm:$0xff]   ;;  %v1793_v2 = vld [vmem:[%s1947_s11 + $0x2c8] ss:$16 sps:$4 sm:$0xff]  }
  0x3e   : > { %1262 = vmatprep.mubr.bf16.mxu1 %v416_v26  ;;  %v1798_v3 = vld [vmem:[%s1947_s11 + $0xec] ss:$16 sps:$4 sm:$0xff]   ;;  %v1802_v9 = vld [vmem:[%s1947_s11 + $0x108] ss:$16 sps:$4 sm:$0xff]  }
  0x3f   : > { %1208 = vmatpush1.bf16.msra.mxu0 %v1716_v40  ;;  %v2034_v40 = vpack.c.bf16 %v411_v36, %v411_v36  ;;  %v1801_v4 = vld [vmem:[%s1947_s11 + $0x2ec] ss:$16 sps:$4 sm:$0xff]   ;;  %v1805_v10 = vld [vmem:[%s1947_s11 + $0x308] ss:$16 sps:$4 sm:$0xff]  }
  0x40   : > { %1249 = vmatpush1.bf16.msra.mxu1 %v1717_v41  ;;  %1209 = vmatprep.subr.bf16.mxu0 %v1718_v42  ;;  %v1754_v41 = vld [vmem:[%s1947_s11 + $0x8] ss:$16 sps:$4 sm:$0xff]   ;;  %v1804_v7 = vld [vmem:[%s1947_s11 + $0x10c] ss:$16 sps:$4 sm:$0xff]  }
  0x41   : > { %1250 = vmatprep.subr.bf16.mxu1 %v1720_v44  ;;  %v1757_v42 = vld [vmem:[%s1947_s11 + $0x208] ss:$16 sps:$4 sm:$0xff]   ;;  %v1765_v44 = vld [vmem:[%s1947_s11 + $0x22c] ss:$16 sps:$4 sm:$0xff]  }
  0x42   : > { %v1807_v8 = vld [vmem:[%s1947_s11 + $0x30c] ss:$16 sps:$4 sm:$0xff]   ;;  %v1811_v14 = vld [vmem:[%s1947_s11 + $0x328] ss:$16 sps:$4 sm:$0xff]  }
  0x43   : > { %1210 = vmatpush1.bf16.msra.mxu0 %v1722_v45  ;;  %v1760_v45 = vld [vmem:[%s1947_s11 + $0x28] ss:$16 sps:$4 sm:$0xff]   ;;  %v1813_v12 = vld [vmem:[%s1947_s11 + $0x32c] ss:$16 sps:$4 sm:$0xff]  }
  0x44   : > { %1251 = vmatpush1.bf16.msra.mxu1 %v1723_v46  ;;  %1211 = vmatprep.subr.bf16.mxu0 %v1724_v47  ;;  %v1763_v46 = vld [vmem:[%s1947_s11 + $0x228] ss:$16 sps:$4 sm:$0xff]   ;;  %v1768_v47 = vld [vmem:[%s1947_s11 + $0x4c] ss:$16 sps:$4 sm:$0xff]  }
  0x45   : > { %1252 = vmatprep.subr.bf16.mxu1 %v1726_v49  ;;  %v1766_v49 = vld [vmem:[%s1947_s11 + $0x48] ss:$16 sps:$4 sm:$0xff]   ;;  %v1816_v15 = vld [vmem:[%s1947_s11 + $0x14c] ss:$16 sps:$4 sm:$0xff]  }
  0x46   : > { %v1819_v16 = vld [vmem:[%s1947_s11 + $0x34c] ss:$16 sps:$4 sm:$0xff]   ;;  %v1817_v18 = vld [vmem:[%s1947_s11 + $0x348] ss:$16 sps:$4 sm:$0xff]  }
  0x47   : > { %1212 = vmatpush1.bf16.msra.mxu0 %v1728_v51  ;;  %v1774_v51 = vld [vmem:[%s1947_s11 + $0x6c] ss:$16 sps:$4 sm:$0xff]   ;;  %v1820_v21 = vld [vmem:[%s1947_s11 + $0x168] ss:$16 sps:$4 sm:$0xff]  }
  0x48   : > { %1253 = vmatpush1.bf16.msra.mxu1 %v1729_v52  ;;  %1213 = vmatprep.subr.bf16.mxu0 %v1730_v60  ;;  %v1777_v52 = vld [vmem:[%s1947_s11 + $0x26c] ss:$16 sps:$4 sm:$0xff]   ;;  %v1832_v29 = vld [vmem:[%s1947_s11 + $0x1a8] ss:$16 sps:$4 sm:$0xff]  }
  0x49   : > { %1254 = vmatprep.subr.bf16.mxu1 %v1732_v0  ;;  %v1789_v60 = vld [vmem:[%s1947_s11 + $0x2ac] ss:$16 sps:$4 sm:$0xff]   ;;  %v1835_v30 = vld [vmem:[%s1947_s11 + $0x3a8] ss:$16 sps:$4 sm:$0xff]  }
  0x4a   : > { %v1795_v0 = vld [vmem:[%s1947_s11 + $0x2cc] ss:$16 sps:$4 sm:$0xff]  }
  0x4b   : > { %1214 = vmatpush1.bf16.msra.mxu0 %v1734_v5  ;;  %v1796_v5 = vld [vmem:[%s1947_s11 + $0xe8] ss:$16 sps:$4 sm:$0xff]   ;;  %v1822_v19 = vld [vmem:[%s1947_s11 + $0x16c] ss:$16 sps:$4 sm:$0xff]  }
  0x4c   : > { %1255 = vmatpush1.bf16.msra.mxu1 %v1735_v6  ;;  %1215 = vmatprep.subr.bf16.mxu0 %v1736_v11  ;;  %v1799_v6 = vld [vmem:[%s1947_s11 + $0x2e8] ss:$16 sps:$4 sm:$0xff]   ;;  %v1810_v11 = vld [vmem:[%s1947_s11 + $0x12c] ss:$16 sps:$4 sm:$0xff]  }
  0x4d   : > { %1256 = vmatprep.subr.bf16.mxu1 %v1738_v13  ;;  %v1808_v13 = vld [vmem:[%s1947_s11 + $0x128] ss:$16 sps:$4 sm:$0xff]   ;;  %v1825_v20 = vld [vmem:[%s1947_s11 + $0x36c] ss:$16 sps:$4 sm:$0xff]  }
  0x4e   : > { %v1846_v35 = vld [vmem:[%s1947_s11 + $0x1ec] ss:$16 sps:$4 sm:$0xff]  }
  0x4f   : > { %1216 = vmatpush1.bf16.msra.mxu0 %v1740_v17  ;;  %v1814_v17 = vld [vmem:[%s1947_s11 + $0x148] ss:$16 sps:$4 sm:$0xff]   ;;  %v1849_v36 = vld [vmem:[%s1947_s11 + $0x3ec] ss:$16 sps:$4 sm:$0xff]  }
  0x50   : > { %1257 = vmatpush1.bf16.msra.mxu1 %v1741_v22  ;;  %1217 = vmatprep.subr.bf16.mxu0 %v1742_v23  ;;  %v1823_v22 = vld [vmem:[%s1947_s11 + $0x368] ss:$16 sps:$4 sm:$0xff]   ;;  %v1828_v23 = vld [vmem:[%s1947_s11 + $0x18c] ss:$16 sps:$4 sm:$0xff]  }
  0x51   : > { %1258 = vmatprep.subr.bf16.mxu1 %v1744_v25  ;;  %v1826_v25 = vld [vmem:[%s1947_s11 + $0x188] ss:$16 sps:$4 sm:$0xff]  }
  0x53   : > { %1218 = vmatpush1.bf16.msra.mxu0 %v1746_v27  ;;  %v1834_v27 = vld [vmem:[%s1947_s11 + $0x1ac] ss:$16 sps:$4 sm:$0xff]  }
  0x54   : > { %1259 = vmatpush1.bf16.msra.mxu1 %v1747_v28  ;;  %1219 = vmatprep.subr.bf16.mxu0 %v1748_v31  ;;  %v1837_v28 = vld [vmem:[%s1947_s11 + $0x3ac] ss:$16 sps:$4 sm:$0xff]  }
  0x55   : > { %1260 = vmatprep.subr.bf16.mxu1 %v1750_v32  ;;  %v1840_v31 = vld [vmem:[%s1947_s11 + $0x1cc] ss:$16 sps:$4 sm:$0xff]  }
  0x56   : > { %v1843_v32 = vld [vmem:[%s1947_s11 + $0x3cc] ss:$16 sps:$4 sm:$0xff]  }
  0x57   : > { %1220 = vmatpush1.bf16.msra.mxu0 %v1752_v33  ;;  %v1838_v33 = vld [vmem:[%s1947_s11 + $0x1c8] ss:$16 sps:$4 sm:$0xff]  }
  0x58   : > { %1261 = vmatpush1.bf16.msra.mxu1 %v1753_v34  ;;  %1271 = vmatprep.subr.bf16.mxu0 %v1756_v37  ;;  %v1841_v34 = vld [vmem:[%s1947_s11 + $0x3c8] ss:$16 sps:$4 sm:$0xff]  }
  0x59   : > { %1312 = vmatprep.subr.bf16.mxu1 %v1759_v38  ;;  %v1844_v37 = vld [vmem:[%s1947_s11 + $0x1e8] ss:$16 sps:$4 sm:$0xff]  }
  0x5a   : > { %1222 = vmatmul.mubr.bf16.vlgmr.msra.gmra.mrb[0].mxu0 %v2032_v39  ;;  %v1847_v38 = vld [vmem:[%s1947_s11 + $0x3e8] ss:$16 sps:$4 sm:$0xff]  }
  0x5b   : > { %1263 = vmatmul.mubr.bf16.vlgmr.msra.gmra.mrb[0].mxu1 %v2034_v40  ;;  %1272 = vmatpush1.bf16.msra.mxu0 %v1754_v41 }
  0x5c   : > { %1313 = vmatpush1.bf16.msra.mxu1 %v1757_v42  ;;  %1273 = vmatprep.subr.bf16.mxu0 %v1762_v43  ;;  %v417_v42 = vld [vmem:[#allocation2] sm:$0xff] }
  0x5d   : > { %1314 = vmatprep.subr.bf16.mxu1 %v1765_v44  ;;  %1303 = vmatprep.mubr.bf16.mxu0 %v414_v24  ;;  %v1831_v24 = vld [vmem:[%s1947_s11 + $0x38c] ss:$16 sps:$4 sm:$0xff]  }
  0x5e   : > { %1344 = vmatprep.mubr.bf16.mxu1 %v416_v26  ;;  %v1829_v26 = vld [vmem:[%s1947_s11 + $0x388] ss:$16 sps:$4 sm:$0xff]  }
  0x5f   : > { %1274 = vmatpush1.bf16.msra.mxu0 %v1760_v45 }
  0x60   : > { %1315 = vmatpush1.bf16.msra.mxu1 %v1763_v46  ;;  %1275 = vmatprep.subr.bf16.mxu0 %v1768_v47  ;;  %v418_v46 = vld [vmem:[#allocation2 + $0x8] sm:$0xff] }
  0x61   : > { %1316 = vmatprep.subr.bf16.mxu1 %v1771_v48 }
  0x63   : > { %1276 = vmatpush1.bf16.msra.mxu0 %v1766_v49 }
  0x64   : > { %1317 = vmatpush1.bf16.msra.mxu1 %v1769_v50  ;;  %1277 = vmatprep.subr.bf16.mxu0 %v1774_v51 }
  0x65   : > { %1318 = vmatprep.subr.bf16.mxu1 %v1777_v52 }
  0x67   : > { %1278 = vmatpush1.bf16.msra.mxu0 %v1772_v53 }
  0x68   : > { %1319 = vmatpush1.bf16.msra.mxu1 %v1775_v54  ;;  %1279 = vmatprep.subr.bf16.mxu0 %v1780_v55 }
  0x69   : > { %1320 = vmatprep.subr.bf16.mxu1 %v1783_v56 }
  0x6b   : > { %1280 = vmatpush1.bf16.msra.mxu0 %v1778_v57 }
  0x6c   : > { %1321 = vmatpush1.bf16.msra.mxu1 %v1781_v58  ;;  %1281 = vmatprep.subr.bf16.mxu0 %v1786_v59  ;;  %v420_v58 = vld [vmem:[#allocation2 + $0x18] sm:$0xff] }
  0x6d   : > { %1322 = vmatprep.subr.bf16.mxu1 %v1789_v60 }
  0x6f   : > { %1282 = vmatpush1.bf16.msra.mxu0 %v1784_v61 }
  0x70   : > { %1323 = vmatpush1.bf16.msra.mxu1 %v1787_v62  ;;  %1283 = vmatprep.subr.bf16.mxu0 %v1792_v63 }
  0x71   : > { %1324 = vmatprep.subr.bf16.mxu1 %v1795_v0 }
  0x73   : > { %1284 = vmatpush1.bf16.msra.mxu0 %v1790_v1 }
  0x74   : > { %1325 = vmatpush1.bf16.msra.mxu1 %v1793_v2  ;;  %1285 = vmatprep.subr.bf16.mxu0 %v1798_v3 }
  0x75   : > { %1326 = vmatprep.subr.bf16.mxu1 %v1801_v4 }
  0x77   : > { %1286 = vmatpush1.bf16.msra.mxu0 %v1796_v5 }
  0x78   : > { %1327 = vmatpush1.bf16.msra.mxu1 %v1799_v6  ;;  %1287 = vmatprep.subr.bf16.mxu0 %v1804_v7 }
  0x79   : > { %1328 = vmatprep.subr.bf16.mxu1 %v1807_v8 }
  0x7b   : > { %1288 = vmatpush1.bf16.msra.mxu0 %v1802_v9 }
  0x7c   : > { %1329 = vmatpush1.bf16.msra.mxu1 %v1805_v10  ;;  %1289 = vmatprep.subr.bf16.mxu0 %v1810_v11 }
  0x7d   : > { %1330 = vmatprep.subr.bf16.mxu1 %v1813_v12 }
  0x7f   : > { %1290 = vmatpush1.bf16.msra.mxu0 %v1808_v13 }
  0x80   : > { %1331 = vmatpush1.bf16.msra.mxu1 %v1811_v14  ;;  %1291 = vmatprep.subr.bf16.mxu0 %v1816_v15 }
  0x81   : > { %1332 = vmatprep.subr.bf16.mxu1 %v1819_v16 }
  0x83   : > { %1292 = vmatpush1.bf16.msra.mxu0 %v1814_v17 }
  0x84   : > { %1333 = vmatpush1.bf16.msra.mxu1 %v1817_v18  ;;  %1293 = vmatprep.subr.bf16.mxu0 %v1822_v19 }
  0x85   : > { %1334 = vmatprep.subr.bf16.mxu1 %v1825_v20 }
  0x87   : > { %1294 = vmatpush1.bf16.msra.mxu0 %v1820_v21 }
  0x88   : > { %1335 = vmatpush1.bf16.msra.mxu1 %v1823_v22  ;;  %1295 = vmatprep.subr.bf16.mxu0 %v1828_v23 }
  0x89   : > { %1336 = vmatprep.subr.bf16.mxu1 %v1831_v24 }
  0x8b   : > { %1296 = vmatpush1.bf16.msra.mxu0 %v1826_v25 }
  0x8c   : > { %1337 = vmatpush1.bf16.msra.mxu1 %v1829_v26  ;;  %1297 = vmatprep.subr.bf16.mxu0 %v1834_v27 }
  0x8d   : > { %1338 = vmatprep.subr.bf16.mxu1 %v1837_v28 }
  0x8f   : > { %1298 = vmatpush1.bf16.msra.mxu0 %v1832_v29 }
  0x90   : > { %1339 = vmatpush1.bf16.msra.mxu1 %v1835_v30  ;;  %1299 = vmatprep.subr.bf16.mxu0 %v1840_v31 }
  0x91   : > { %1340 = vmatprep.subr.bf16.mxu1 %v1843_v32 }
  0x93   : > { %1300 = vmatpush1.bf16.msra.mxu0 %v1838_v33 }
  0x94   : > { %1341 = vmatpush1.bf16.msra.mxu1 %v1841_v34  ;;  %1301 = vmatprep.subr.bf16.mxu0 %v1846_v35 }
  0x95   : > { %1342 = vmatprep.subr.bf16.mxu1 %v1849_v36 }
  0x97   : > { %1302 = vmatpush1.bf16.msra.mxu0 %v1844_v37 }
  0x98   : > { %1343 = vmatpush1.bf16.msra.mxu1 %v1847_v38 }
  0x9a   : > { %1304 = vmatmul.mubr.bf16.vlgmr.msra.gmra.mrb[4].mxu0 %v2032_v39  ;;  %v419_v39 = vld [vmem:[#allocation2 + $0x10] sm:$0xff] }
  0x9b   : > { %1345 = vmatmul.mubr.bf16.vlgmr.msra.gmra.mrb[4].mxu1 %v2034_v40 }
 0x12d   : > { %v1223_v41 = vpop.f32.mrb[0].mxu0 }
 0x12e   : > { %v1264_v43 = vpop.f32.mrb[0].mxu1  ;;  %v1225_v45 = vpop.f32.mrb[1].mxu0 }
 0x12f   : > { %v1265_v44 = vadd.f32 %v1264_v43, %v1223_v41  ;;  %v1266_v47 = vpop.f32.mrb[1].mxu1  ;;  %v1227_v49 = vpop.f32.mrb[2].mxu0 }
 0x130   : > { %v1267_v48 = vadd.f32 %v1266_v47, %v1225_v45  ;;  %v1268_v50 = vpop.f32.mrb[2].mxu1  ;;  %v1228_v52 = vpop.f32.mrb[3].mxu0 }
 0x131   : > { %v1353_v51 = vadd.f32 %v1265_v44, %v417_v42  ;;  %v1269_v53 = vpop.f32.mrb[3].mxu1 }
 0x132   : > { %v1354_v54 = vadd.f32 %v1267_v48, %v418_v46 }
 0x133   : > { %1357 = vst [vmem:[#allocation2] sm:$0xff] %v1353_v51 }
 0x134   : > { %1358 = vst [vmem:[#allocation2 + $0x8] sm:$0xff] %v1354_v54 }
 0x13a   : > { %v1365_v3 = vld [vmem:[#allocation2] sm:$0xff] (!%p1624_p7) }
 0x13b   : > { %v1366_v4 = vld [vmem:[#allocation2 + $0x8] sm:$0xff] (!%p1624_p7) }
 0x13c   : > { %v1631_v6 = vpack.c.bf16 (!%p1624_p7), %v1366_v4, %v1365_v3 }
 0x13e   : > { %1385 = vst [vmem:[%s2124_s6] sm:$0xff] (!%p1624_p7), %v1631_v6 }
 0x16d   : > { %v1305_v55 = vpop.f32.mrb[4].mxu0 }
 0x16e   : > { %v1346_v56 = vpop.f32.mrb[4].mxu1  ;;  %v1307_v57 = vpop.f32.mrb[5].mxu0  ;;  %1364 = sbr.rel (%p1624_p7) target bundleno = 383 (0x17f), region = 52 }
 0x16f   : > { %v1347_v40 = vadd.f32 %v1346_v56, %v1305_v55  ;;  %v1348_v59 = vpop.f32.mrb[5].mxu1  ;;  %v1309_v61 = vpop.f32.mrb[6].mxu0 }
 0x170   : > { %v1349_v60 = vadd.f32 %v1348_v59, %v1307_v57  ;;  %v1350_v62 = vpop.f32.mrb[6].mxu1  ;;  %v1310_v0 = vpop.f32.mrb[7].mxu0 }
 0x171   : > { %v1355_v63 = vadd.f32 %v1347_v40, %v419_v39  ;;  %v1351_v1 = vpop.f32.mrb[7].mxu1 }
 0x172   : > { %v1356_v2 = vadd.f32 %v1349_v60, %v420_v58 }
 0x173   : > { %1359 = vst [vmem:[#allocation2 + $0x10] sm:$0xff] %v1355_v63 }
 0x174   : > { %1360 = vst [vmem:[#allocation2 + $0x18] sm:$0xff] %v1356_v2 }
 0x17a   : > { %v1367_v5 = vld [vmem:[#allocation2 + $0x10] sm:$0xff] }
 0x17b   : > { %v1368_v7 = vld [vmem:[#allocation2 + $0x18] sm:$0xff] }
 0x17c   : > { %v1632_v8 = vpack.c.bf16 %v1368_v7, %v1367_v5 }
 0x17e   : > { %1386 = vst [vmem:[%s2124_s6 + $0x8] sm:$0xff] %v1632_v8 }
 0x17f PF: > { %s16_s23 = sadd.s32 1, %s1872_s23   ;;  %s2125_s21 = smov %s1868_s22 }
 0x180   : > { %p13_p8 = scmp.ge.s32.totalorder %s16_s23, 4   ;;  %s2126_s22 = smov %s2128_s4 }
 0x182   :  { %15 = sbr.rel (!%p13_p8) target bundleno = 2 (0x2), region = 91 }

// kernel: densenet121_features.249
= control target key start
LH: loop header
LB: loop body
LE: loop exit
PB: predicated region body
PF: predicated region fallthrough
CT: control target
= control target key end

     0   :  { %v28_v0 = vlaneseq  ;;  %s200_s0 = inlined_call_operand.vmem [shape: bf16[8,1024], index: 0, kind: input, shape index: {}]   ;;  %s201_s1 = inlined_call_operand.vmem [shape: f32[1,1024], index: 1, kind: input, shape index: {}]   ;;  %s202_s2 = inlined_call_operand.vmem [shape: f32[1,1024], index: 2, kind: input, shape index: {}]   ;;  %s203_s3 = inlined_call_operand.vmem [shape: f32[8,1024], index: 3, kind: output, shape index: {}]  }
   0x1   :  { %v14_v1 = vld [vmem:[%s200_s0] sm:$0xff]  ;;  %v15_v5 = vld [vmem:[%s200_s0 + $0x8] sm:$0xff]  ;;  %v16_v6 = vld [vmem:[%s200_s0 + $0x10] sm:$0xff] }
   0x2   :  { %v18_v2 = vunpack.c.l.bf16 %v14_v1  ;;  %v29_v3 = vshrl.u32 %v28_v0, 7  ;;  %v19_v4 = vunpack.c.h.bf16 %v14_v1  ;;  %v17_v7 = vld [vmem:[%s200_s0 + $0x18] sm:$0xff]  ;;  %v26_v8 = vld [vmem:[%s201_s1] sm:$0xff]  ;;  %v20_v10 = vunpack.c.l.bf16 %v15_v5 }
   0x3   :  { %v76_v9 = vld [vmem:[%s202_s2] sm:$0xff]  ;;  %v21_v11 = vunpack.c.h.bf16 %v15_v5  ;;  %v22_v12 = vunpack.c.l.bf16 %v16_v6  ;;  %v23_v13 = vunpack.c.h.bf16 %v16_v6  ;;  %v24_v20 = vunpack.c.l.bf16 %v17_v7 }
   0x4   :  { %v30_v14 = vsub.s32 0, %v29_v3  ;;  %v34_v15 = vsub.s32 1, %v29_v3  ;;  %v38_v16 = vsub.s32 2, %v29_v3  ;;  %v42_v17 = vsub.s32 3, %v29_v3 }
   0x5   :  { %v46_v18 = vsub.s32 4, %v29_v3  ;;  %v50_v19 = vsub.s32 5, %v29_v3  ;;  %v54_v21 = vsub.s32 6, %v29_v3  ;;  %v25_v48 = vunpack.c.h.bf16 %v17_v7 }
   0x6   :  { %v31_v22 = vrot.slane %v26_v8, %v30_v14  ;;  %v81_v23 = vrot.slane %v76_v9, %v30_v14  ;;  %v35_v24 = vrot.slane %v26_v8, %v34_v15  ;;  %v85_v25 = vrot.slane %v76_v9, %v34_v15 }
   0x7   :  { %v39_v26 = vrot.slane %v26_v8, %v38_v16  ;;  %v89_v27 = vrot.slane %v76_v9, %v38_v16  ;;  %v43_v28 = vrot.slane %v26_v8, %v42_v17  ;;  %v93_v29 = vrot.slane %v76_v9, %v42_v17 }
   0x8   :  { %v68_v30 = vmul.f32 %v31_v22, %v18_v2  ;;  %v69_v31 = vmul.f32 %v35_v24, %v19_v4  ;;  %v47_v32 = vrot.slane %v26_v8, %v46_v18  ;;  %v97_v33 = vrot.slane %v76_v9, %v46_v18 }
   0x9   :  { %v70_v34 = vmul.f32 %v39_v26, %v20_v10  ;;  %v71_v35 = vmul.f32 %v43_v28, %v21_v11  ;;  %v51_v36 = vrot.slane %v26_v8, %v50_v19  ;;  %v101_v37 = vrot.slane %v76_v9, %v50_v19 }
   0xa   :  { %v118_v38 = vadd.f32 %v81_v23, %v68_v30  ;;  %v119_v39 = vadd.f32 %v85_v25, %v69_v31  ;;  %v72_v40 = vmul.f32 %v47_v32, %v22_v12  ;;  %v55_v41 = vrot.slane %v26_v8, %v54_v21 }
   0xb   :  { %v120_v42 = vadd.f32 %v89_v27, %v70_v34  ;;  %v121_v43 = vadd.f32 %v93_v29, %v71_v35  ;;  %v73_v44 = vmul.f32 %v51_v36, %v23_v13  ;;  %v105_v45 = vrot.slane %v76_v9, %v54_v21 }
   0xc   :  { %126 = vst [vmem:[%s203_s3] sm:$0xff] %v118_v38  ;;  %127 = vst [vmem:[%s203_s3 + $0x8] sm:$0xff] %v119_v39  ;;  %v122_v46 = vadd.f32 %v97_v33, %v72_v40  ;;  %v74_v47 = vmul.f32 %v55_v41, %v24_v20  ;;  %v58_v49 = vsub.s32 7, %v29_v3 }
   0xd   :  { %128 = vst [vmem:[%s203_s3 + $0x10] sm:$0xff] %v120_v42  ;;  %129 = vst [vmem:[%s203_s3 + $0x18] sm:$0xff] %v121_v43  ;;  %v123_v50 = vadd.f32 %v101_v37, %v73_v44 }
   0xe   :  { %130 = vst [vmem:[%s203_s3 + $0x20] sm:$0xff] %v122_v46  ;;  %v124_v51 = vadd.f32 %v105_v45, %v74_v47  ;;  %v59_v52 = vrot.slane %v26_v8, %v58_v49  ;;  %v109_v53 = vrot.slane %v76_v9, %v58_v49 }
   0xf   :  { %131 = vst [vmem:[%s203_s3 + $0x28] sm:$0xff] %v123_v50 }
  0x10   :  { %132 = vst [vmem:[%s203_s3 + $0x30] sm:$0xff] %v124_v51  ;;  %v75_v54 = vmul.f32 %v59_v52, %v25_v48 }
  0x12   :  { %v125_v55 = vadd.f32 %v109_v53, %v75_v54 }
  0x14   :  { %133 = vst [vmem:[%s203_s3 + $0x38] sm:$0xff] %v125_v55 }

</bundles_post_ra>
